<compile_context>
chip_gen: v5e
topology: v5e:2x2
jax: 0.10.0
libtpu: 0.0.40
codegen_flags: <defaults>
</compile_context>

<pallas_src>
import jax
import jax.numpy as jnp
from jax.experimental import pallas as pl
from jax.experimental.pallas import tpu as pltpu


_VMEM_LIMIT = 48 * 1024 * 1024  # > v5e's 16 MiB default scoped, < v7x's 64 MiB physical


def _compiler_params():
    return pltpu.CompilerParams(
        dimension_semantics=("parallel",),
        vmem_limit_bytes=_VMEM_LIMIT,
    )


def _round_up(x, m):
    return ((x + m - 1) // m) * m


# ---------------------------------------------------------------------------
# Kernels (all dots: bf16 x bf16 -> f32 accumulate on the MXU)
# ---------------------------------------------------------------------------

def transform_kernel(x_ref, w_ref, o_ref):
    """Z1 = X @ W1 for one row-stripe; W1 resident."""
    z = jnp.dot(x_ref[...], w_ref[...], preferred_element_type=jnp.float32)
    o_ref[...] = z.astype(o_ref.dtype)


def propagate_fused_kernel(a_ref, z_ref, b_ref, w2_ref, o_ref):
    """Z2 = relu(A @ Z1 + b1) @ W2 for one row-stripe; Z1/b1/W2 resident."""
    h = jnp.dot(a_ref[...], z_ref[...], preferred_element_type=jnp.float32)
    h = jnp.maximum(h + b_ref[...], 0.0)
    z2 = jnp.dot(h.astype(jnp.bfloat16), w2_ref[...],
                 preferred_element_type=jnp.float32)
    o_ref[...] = z2.astype(o_ref.dtype)


def propagate_out_kernel(a_ref, z_ref, b_ref, o_ref):
    """OUT = A @ Z2 + b2 for one row-stripe; Z2/b2 resident."""
    h = jnp.dot(a_ref[...], z_ref[...], preferred_element_type=jnp.float32)
    o_ref[...] = (h + b_ref[...]).astype(o_ref.dtype)


# ---------------------------------------------------------------------------
# pallas_call wrappers
# ---------------------------------------------------------------------------

def feature_transform(x_bf16, w_bf16, *, bm):
    m, k = x_bf16.shape
    n = w_bf16.shape[1]
    return pl.pallas_call(
        transform_kernel,
        out_shape=jax.ShapeDtypeStruct((m, n), jnp.bfloat16),
        grid_spec=pltpu.PrefetchScalarGridSpec(
            num_scalar_prefetch=0,
            grid=(m // bm,),
            in_specs=[
                pl.BlockSpec((bm, k), lambda i: (i, 0)),   # X row-stripe (bf16)
                pl.BlockSpec((k, n), lambda i: (0, 0)),    # W1 resident  (bf16)
            ],
            out_specs=pl.BlockSpec((bm, n), lambda i: (i, 0)),
        ),
        compiler_params=_compiler_params(),
    )(x_bf16, w_bf16)


def propagate_fused(a_bf16, z_bf16, b_f32, w2_bf16, *, bm):
    n_pad = a_bf16.shape[0]
    hid = z_bf16.shape[1]
    out = w2_bf16.shape[1]
    return pl.pallas_call(
        propagate_fused_kernel,
        out_shape=jax.ShapeDtypeStruct((n_pad, out), jnp.bfloat16),
        grid_spec=pltpu.PrefetchScalarGridSpec(
            num_scalar_prefetch=0,
            grid=(n_pad // bm,),
            in_specs=[
                pl.BlockSpec((bm, n_pad), lambda i: (i, 0)),   # A row-stripe (bf16)
                pl.BlockSpec((n_pad, hid), lambda i: (0, 0)),  # Z1 resident  (bf16)
                pl.BlockSpec((1, hid), lambda i: (0, 0)),      # b1 resident  (f32)
                pl.BlockSpec((hid, out), lambda i: (0, 0)),    # W2 resident  (bf16)
            ],
            out_specs=pl.BlockSpec((bm, out), lambda i: (i, 0)),
        ),
        compiler_params=_compiler_params(),
    )(a_bf16, z_bf16, b_f32, w2_bf16)


def propagate_out(a_bf16, z_bf16, b_f32, *, bm):
    n_pad = a_bf16.shape[0]
    out = z_bf16.shape[1]
    return pl.pallas_call(
        propagate_out_kernel,
        out_shape=jax.ShapeDtypeStruct((n_pad, out), jnp.float32),
        grid_spec=pltpu.PrefetchScalarGridSpec(
            num_scalar_prefetch=0,
            grid=(n_pad // bm,),
            in_specs=[
                pl.BlockSpec((bm, n_pad), lambda i: (i, 0)),   # A row-stripe (bf16)
                pl.BlockSpec((n_pad, out), lambda i: (0, 0)),  # Z2 resident  (bf16)
                pl.BlockSpec((1, out), lambda i: (0, 0)),      # b2 resident  (f32)
            ],
            out_specs=pl.BlockSpec((bm, out), lambda i: (i, 0)),
        ),
        compiler_params=_compiler_params(),
    )(a_bf16, z_bf16, b_f32)


# ---------------------------------------------------------------------------
# GCNEncoder forward
# ---------------------------------------------------------------------------

def gcn_encoder(a_hat, x, w1, b1, w2, b2, *, bm=512):
    """Forward pass.  a_hat: (N, N) f32 normalized adjacency; x: (N, F) features."""
    n, f_in = x.shape
    hidden = w1.shape[1]
    out_c = w2.shape[1]

    # Choose the row tile: big for HBM roofline, but keep the double-buffered bf16
    # A row-stripe (2 * bm * n_pad * 2 bytes) around <= 12 MB.
    n_pad128 = _round_up(n, 128)
    while bm > 128 and 2 * bm * n_pad128 * 2 > 12 * 1024 * 1024:
        bm //= 2
    bm = min(bm, n_pad128)
    n_pad = _round_up(n, bm)
    f_in_pad = _round_up(f_in, 128)
    hid_pad = _round_up(hidden, 128)
    out_pad = _round_up(out_c, 128)

    bf16 = jnp.bfloat16
    b1 = jnp.reshape(b1, (1, -1)).astype(jnp.float32)
    b2 = jnp.reshape(b2, (1, -1)).astype(jnp.float32)

    # Cast first, then pad -> no n_pad^2 f32 intermediate materialized in HBM.
    a_p = jnp.pad(a_hat.astype(bf16), ((0, n_pad - n), (0, n_pad - n)))
    x_p = jnp.pad(x.astype(bf16), ((0, n_pad - n), (0, f_in_pad - f_in)))
    w1_p = jnp.pad(w1.astype(bf16), ((0, f_in_pad - f_in), (0, hid_pad - hidden)))
    w2_p = jnp.pad(w2.astype(bf16), ((0, hid_pad - hidden), (0, out_pad - out_c)))
    b1_p = jnp.pad(b1, ((0, 0), (0, hid_pad - hidden)))
    b2_p = jnp.pad(b2, ((0, 0), (0, out_pad - out_c)))

    z1 = feature_transform(x_p, w1_p, bm=bm)            # bf16 (n_pad, hid_pad)
    z2 = propagate_fused(a_p, z1, b1_p, w2_p, bm=bm)    # bf16 (n_pad, out_pad)
    out = propagate_out(a_p, z2, b2_p, bm=bm)           # f32  (n_pad, out_pad)
    return out[:n, :out_c]


def normalized_adjacency(edge_index, num_nodes):
    """GCN symmetric normalization with self-loops (JAX glue, not the hot path).
    Note: duplicate edges collapse to weight 1 (PyG scatter-add would give multiplicity)."""
    src, dst = edge_index[0], edge_index[1]
    a = jnp.zeros((num_nodes, num_nodes), jnp.float32)
    a = a.at[dst, src].set(1.0)                  # message flows src -> dst (row = dst)
    a = a + jnp.eye(num_nodes, dtype=jnp.float32)
    deg = a.sum(axis=1)
    dinv = jnp.where(deg > 0, 1.0 / jnp.sqrt(deg), 0.0)
    return dinv[:, None] * a * dinv[None, :]


# ---------------------------------------------------------------------------
# Demo / correctness check
# ---------------------------------------------------------------------------

if __name__ == "__main__":
    # Small CiteSeer-like synthetic shapes: N nodes, IN_CHANNELS features,
    # out_channels = 2, hidden = 2 * out_channels = 4.  N and IN chosen so that
    # both row and feature padding paths are exercised.
    N = 600
    IN_CHANNELS = 300
    OUT_CHANNELS = 2
    HIDDEN = 2 * OUT_CHANNELS
    NUM_EDGES = 3000

    key = jax.random.PRNGKey(0)
    k_x, k_e1, k_e2, k_w1, k_b1, k_w2, k_b2 = jax.random.split(key, 7)

    # Node features (NormalizeFeatures-style: non-negative, rows sum to 1)
    x_raw = jax.random.uniform(k_x, (N, IN_CHANNELS), jnp.float32)
    x = x_raw / jnp.clip(x_raw.sum(axis=1, keepdims=True), 1e-12)

    # Random edge_index (2, E)
    src = jax.random.randint(k_e1, (NUM_EDGES,), 0, N)
    dst = jax.random.randint(k_e2, (NUM_EDGES,), 0, N)
    edge_index = jnp.stack([src, dst], axis=0)

    # Parameter init (glorot-style scale), shapes from __init__:
    s1 = jnp.sqrt(6.0 / (IN_CHANNELS + HIDDEN))
    s2 = jnp.sqrt(6.0 / (HIDDEN + OUT_CHANNELS))
    w1 = jax.random.uniform(k_w1, (IN_CHANNELS, HIDDEN), jnp.float32, -s1, s1)
    b1 = jax.random.uniform(k_b1, (1, HIDDEN), jnp.float32, -0.1, 0.1)
    w2 = jax.random.uniform(k_w2, (HIDDEN, OUT_CHANNELS), jnp.float32, -s2, s2)
    b2 = jax.random.uniform(k_b2, (1, OUT_CHANNELS), jnp.float32, -0.1, 0.1)

    a_hat = normalized_adjacency(edge_index, N)

    gcn = jax.jit(gcn_encoder)
    out = gcn(a_hat, x, w1, b1, w2, b2)
    out = jax.block_until_ready(out)

    # Pure-JAX reference mirroring the kernel's bf16 quantization points exactly.
    hp = jax.lax.Precision.HIGHEST
    f32 = jnp.float32
    bf = jnp.bfloat16
    a_q = a_hat.astype(bf).astype(f32)
    x_q = x.astype(bf).astype(f32)
    w1_q = w1.astype(bf).astype(f32)
    w2_q = w2.astype(bf).astype(f32)
    z1_ref = jnp.matmul(x_q, w1_q, precision=hp).astype(bf).astype(f32)
    h1_ref = jnp.maximum(jnp.matmul(a_q, z1_ref, precision=hp) + b1, 0.0)
    z2_ref = jnp.matmul(h1_ref.astype(bf).astype(f32), w2_q,
                        precision=hp).astype(bf).astype(f32)
    ref = jnp.matmul(a_q, z2_ref, precision=hp) + b2

    assert out.shape == (N, OUT_CHANNELS)
    assert jnp.allclose(out, ref, atol=1e-3, rtol=1e-3), (
        float(jnp.max(jnp.abs(out - ref))))

    print("KERNEL_OK")
</pallas_src>

<mosaic_0001>
module attributes {stable_mosaic.version = 11 : i64} {
  func.func @transform_kernel(%arg0: i32, %arg1: memref<512x384xbf16, #tpu.memory_space<vmem>>, %arg2: memref<384x128xbf16, #tpu.memory_space<vmem>>, %arg3: memref<512x128xbf16, #tpu.memory_space<vmem>>) attributes {dimension_semantics = [#tpu.dimension_semantics<parallel>], iteration_bounds = array<i64: 2>, scalar_prefetch = 0 : i64, scratch_operands = 0 : i64, tpu.core_type = #tpu.core_type<tc>, window_params = [{transform_indices = @transform_0, window_bounds = array<i64: 512, 384>}, {pipeline_mode = #tpu.pipeline_mode<synchronous>, transform_indices = @transform_1, window_bounds = array<i64: 384, 128>}, {transform_indices = @transform_2, window_bounds = array<i64: 512, 128>}]} {
    %c0 = arith.constant 0 : index
    %c0_0 = arith.constant 0 : index
    %0 = vector.load %arg1[%c0, %c0_0] : memref<512x384xbf16, #tpu.memory_space<vmem>>, vector<512x384xbf16>
    %c0_1 = arith.constant 0 : index
    %c0_2 = arith.constant 0 : index
    %1 = vector.load %arg2[%c0_1, %c0_2] : memref<384x128xbf16, #tpu.memory_space<vmem>>, vector<384x128xbf16>
    %cst = arith.constant dense<0.000000e+00> : vector<512x128xf32>
    %2 = tpu.matmul %0, %1, %cst {dimension_numbers = #tpu.dot_dimension_numbers<[1], [0], [0], [1], [0, 0, 1, 1], [], []>} : vector<512x384xbf16>, vector<384x128xbf16>, vector<512x128xf32> -> vector<512x128xf32>
    %3 = arith.truncf %2 : vector<512x128xf32> to vector<512x128xbf16>
    %c0_3 = arith.constant 0 : index
    %c0_4 = arith.constant 0 : index
    %4 = vector.load %arg3[%c0_3, %c0_4] : memref<512x128xbf16, #tpu.memory_space<vmem>>, vector<512x128xbf16>
    tpu.vector_store %arg3[%c0_3, %c0_4], %3 {strides = array<i32>} : memref<512x128xbf16, #tpu.memory_space<vmem>>, vector<512x128xbf16>,
    return
  }
  func.func @transform_0(%arg0: i32) -> (i32, i32) {
    %c0_i32 = arith.constant 0 : i32
    %c0_i32_0 = arith.constant 0 : i32
    return %arg0, %c0_i32 : i32, i32
  }
  func.func @transform_1(%arg0: i32) -> (i32, i32) {
    %c0_i32 = arith.constant 0 : i32
    %c0_i32_0 = arith.constant 0 : i32
    %c0_i32_1 = arith.constant 0 : i32
    return %c0_i32, %c0_i32_0 : i32, i32
  }
  func.func @transform_2(%arg0: i32) -> (i32, i32) {
    %c0_i32 = arith.constant 0 : i32
    %c0_i32_0 = arith.constant 0 : i32
    return %arg0, %c0_i32 : i32, i32
  }
}

module attributes {stable_mosaic.version = 11 : i64} {
  func.func @propagate_fused_kernel(%arg0: i32, %arg1: memref<512x1024xbf16, #tpu.memory_space<vmem>>, %arg2: memref<1024x128xbf16, #tpu.memory_space<vmem>>, %arg3: memref<1x128xf32, #tpu.memory_space<vmem>>, %arg4: memref<128x128xbf16, #tpu.memory_space<vmem>>, %arg5: memref<512x128xbf16, #tpu.memory_space<vmem>>) attributes {dimension_semantics = [#tpu.dimension_semantics<parallel>], iteration_bounds = array<i64: 2>, scalar_prefetch = 0 : i64, scratch_operands = 0 : i64, tpu.core_type = #tpu.core_type<tc>, window_params = [{transform_indices = @transform_0, window_bounds = array<i64: 512, 1024>}, {pipeline_mode = #tpu.pipeline_mode<synchronous>, transform_indices = @transform_1, window_bounds = array<i64: 1024, 128>}, {pipeline_mode = #tpu.pipeline_mode<synchronous>, transform_indices = @transform_2, window_bounds = array<i64: 1, 128>}, {pipeline_mode = #tpu.pipeline_mode<synchronous>, transform_indices = @transform_3, window_bounds = array<i64: 128, 128>}, {transform_indices = @transform_4, window_bounds = array<i64: 512, 128>}]} {
    %c0 = arith.constant 0 : index
    %c0_0 = arith.constant 0 : index
    %0 = vector.load %arg1[%c0, %c0_0] : memref<512x1024xbf16, #tpu.memory_space<vmem>>, vector<512x1024xbf16>
    %c0_1 = arith.constant 0 : index
    %c0_2 = arith.constant 0 : index
    %1 = vector.load %arg2[%c0_1, %c0_2] : memref<1024x128xbf16, #tpu.memory_space<vmem>>, vector<1024x128xbf16>
    %cst = arith.constant dense<0.000000e+00> : vector<512x128xf32>
    %2 = tpu.matmul %0, %1, %cst {dimension_numbers = #tpu.dot_dimension_numbers<[1], [0], [0], [1], [0, 0, 1, 1], [], []>} : vector<512x1024xbf16>, vector<1024x128xbf16>, vector<512x128xf32> -> vector<512x128xf32>
    %c0_3 = arith.constant 0 : index
    %c0_4 = arith.constant 0 : index
    %3 = vector.load %arg3[%c0_3, %c0_4] : memref<1x128xf32, #tpu.memory_space<vmem>>, vector<1x128xf32>
    %4 = vector.broadcast %3 : vector<1x128xf32> to vector<512x128xf32>
    %5 = arith.addf %2, %4 : vector<512x128xf32>
    %cst_5 = arith.constant 0.000000e+00 : f32
    %6 = vector.broadcast %cst_5 : f32 to vector<512x128xf32>
    %7 = arith.maximumf %5, %6 : vector<512x128xf32>
    %8 = arith.truncf %7 : vector<512x128xf32> to vector<512x128xbf16>
    %c0_6 = arith.constant 0 : index
    %c0_7 = arith.constant 0 : index
    %9 = vector.load %arg4[%c0_6, %c0_7] : memref<128x128xbf16, #tpu.memory_space<vmem>>, vector<128x128xbf16>
    %cst_8 = arith.constant dense<0.000000e+00> : vector<512x128xf32>
    %10 = tpu.matmul %8, %9, %cst_8 {dimension_numbers = #tpu.dot_dimension_numbers<[1], [0], [0], [1], [0, 0, 1, 1], [], []>} : vector<512x128xbf16>, vector<128x128xbf16>, vector<512x128xf32> -> vector<512x128xf32>
    %11 = arith.truncf %10 : vector<512x128xf32> to vector<512x128xbf16>
    %c0_9 = arith.constant 0 : index
    %c0_10 = arith.constant 0 : index
    %12 = vector.load %arg5[%c0_9, %c0_10] : memref<512x128xbf16, #tpu.memory_space<vmem>>, vector<512x128xbf16>
    tpu.vector_store %arg5[%c0_9, %c0_10], %11 {strides = array<i32>} : memref<512x128xbf16, #tpu.memory_space<vmem>>, vector<512x128xbf16>,
    return
  }
  func.func @transform_0(%arg0: i32) -> (i32, i32) {
    %c0_i32 = arith.constant 0 : i32
    %c0_i32_0 = arith.constant 0 : i32
    return %arg0, %c0_i32 : i32, i32
  }
  func.func @transform_1(%arg0: i32) -> (i32, i32) {
    %c0_i32 = arith.constant 0 : i32
    %c0_i32_0 = arith.constant 0 : i32
    %c0_i32_1 = arith.constant 0 : i32
    return %c0_i32, %c0_i32_0 : i32, i32
  }
  func.func @transform_2(%arg0: i32) -> (i32, i32) {
    %c0_i32 = arith.constant 0 : i32
    %c0_i32_0 = arith.constant 0 : i32
    %c0_i32_1 = arith.constant 0 : i32
    return %c0_i32, %c0_i32_0 : i32, i32
  }
  func.func @transform_3(%arg0: i32) -> (i32, i32) {
    %c0_i32 = arith.constant 0 : i32
    %c0_i32_0 = arith.constant 0 : i32
    %c0_i32_1 = arith.constant 0 : i32
    return %c0_i32, %c0_i32_0 : i32, i32
  }
  func.func @transform_4(%arg0: i32) -> (i32, i32) {
    %c0_i32 = arith.constant 0 : i32
    %c0_i32_0 = arith.constant 0 : i32
    return %arg0, %c0_i32 : i32, i32
  }
}

module attributes {stable_mosaic.version = 11 : i64} {
  func.func @propagate_out_kernel(%arg0: i32, %arg1: memref<512x1024xbf16, #tpu.memory_space<vmem>>, %arg2: memref<1024x128xbf16, #tpu.memory_space<vmem>>, %arg3: memref<1x128xf32, #tpu.memory_space<vmem>>, %arg4: memref<512x128xf32, #tpu.memory_space<vmem>>) attributes {dimension_semantics = [#tpu.dimension_semantics<parallel>], iteration_bounds = array<i64: 2>, scalar_prefetch = 0 : i64, scratch_operands = 0 : i64, tpu.core_type = #tpu.core_type<tc>, window_params = [{transform_indices = @transform_0, window_bounds = array<i64: 512, 1024>}, {pipeline_mode = #tpu.pipeline_mode<synchronous>, transform_indices = @transform_1, window_bounds = array<i64: 1024, 128>}, {pipeline_mode = #tpu.pipeline_mode<synchronous>, transform_indices = @transform_2, window_bounds = array<i64: 1, 128>}, {transform_indices = @transform_3, window_bounds = array<i64: 512, 128>}]} {
    %c0 = arith.constant 0 : index
    %c0_0 = arith.constant 0 : index
    %0 = vector.load %arg1[%c0, %c0_0] : memref<512x1024xbf16, #tpu.memory_space<vmem>>, vector<512x1024xbf16>
    %c0_1 = arith.constant 0 : index
    %c0_2 = arith.constant 0 : index
    %1 = vector.load %arg2[%c0_1, %c0_2] : memref<1024x128xbf16, #tpu.memory_space<vmem>>, vector<1024x128xbf16>
    %cst = arith.constant dense<0.000000e+00> : vector<512x128xf32>
    %2 = tpu.matmul %0, %1, %cst {dimension_numbers = #tpu.dot_dimension_numbers<[1], [0], [0], [1], [0, 0, 1, 1], [], []>} : vector<512x1024xbf16>, vector<1024x128xbf16>, vector<512x128xf32> -> vector<512x128xf32>
    %c0_3 = arith.constant 0 : index
    %c0_4 = arith.constant 0 : index
    %3 = vector.load %arg3[%c0_3, %c0_4] : memref<1x128xf32, #tpu.memory_space<vmem>>, vector<1x128xf32>
    %4 = vector.broadcast %3 : vector<1x128xf32> to vector<512x128xf32>
    %5 = arith.addf %2, %4 : vector<512x128xf32>
    %c0_5 = arith.constant 0 : index
    %c0_6 = arith.constant 0 : index
    %6 = vector.load %arg4[%c0_5, %c0_6] : memref<512x128xf32, #tpu.memory_space<vmem>>, vector<512x128xf32>
    tpu.vector_store %arg4[%c0_5, %c0_6], %5 {strides = array<i32>} : memref<512x128xf32, #tpu.memory_space<vmem>>, vector<512x128xf32>,
    return
  }
  func.func @transform_0(%arg0: i32) -> (i32, i32) {
    %c0_i32 = arith.constant 0 : i32
    %c0_i32_0 = arith.constant 0 : i32
    return %arg0, %c0_i32 : i32, i32
  }
  func.func @transform_1(%arg0: i32) -> (i32, i32) {
    %c0_i32 = arith.constant 0 : i32
    %c0_i32_0 = arith.constant 0 : i32
    %c0_i32_1 = arith.constant 0 : i32
    return %c0_i32, %c0_i32_0 : i32, i32
  }
  func.func @transform_2(%arg0: i32) -> (i32, i32) {
    %c0_i32 = arith.constant 0 : i32
    %c0_i32_0 = arith.constant 0 : i32
    %c0_i32_1 = arith.constant 0 : i32
    return %c0_i32, %c0_i32_0 : i32, i32
  }
  func.func @transform_3(%arg0: i32) -> (i32, i32) {
    %c0_i32 = arith.constant 0 : i32
    %c0_i32_0 = arith.constant 0 : i32
    return %arg0, %c0_i32 : i32, i32
  }
}

</mosaic_0001>

<bundles_post_ra>
// kernel: gcn_encoder.3
= control target key start
LH: loop header
LB: loop body
LE: loop exit
PB: predicated region body
PF: predicated region fallthrough
CT: control target
= control target key end

     0   :  { %s2531_s9 = smov 0   ;;  %s2996_s0 = inlined_call_operand.vmem [shape: bf16[1024,384], index: 0, kind: input, shape index: {}]   ;;  %s2997_s1 = inlined_call_operand.vmem [shape: bf16[384,128], index: 1, kind: input, shape index: {}]   ;;  %s2998_s2 = inlined_call_operand.vmem [shape: bf16[1024,128], index: 2, kind: output, shape index: {}]  }
   0x1 LB: > { %s1673_s10 = sadd.s32 4294967295, %s2514_s9   ;;  %p1677_p0 = scmp.ge.s32.totalorder %s2514_s9, 1  ;;  %s2514_s9 = sphi %s2531_s9, %s12_s9  }
   0x2   : > { %p114_p1 = scmp.lt.s32.totalorder %s2514_s9, 3 }
   0x4   : > { %p115_p2 = pnand %p1677_p0, %p114_p1 }
   0x5   : > { %s1678_s29 = sshll.u32 (!%p115_p2), %s1673_s10, 6 }
   0x6   : > { %118 = sbr.rel (%p115_p2) target bundleno = 558 (0x22e), region = 28  ;;  %p138_p3 = scmp.lt.s32.totalorder (!%p115_p2), %s1678_s29, 127 }
   0xb   : > { %v2267_v0 = vld [vmem:[%s2997_s1 + $0x38] sm:$0xff]  ;;  %v2266_v3 = vld [vmem:[%s2997_s1 + $0x30] sm:$0xff]  ;;  %v2265_v6 = vld [vmem:[%s2997_s1 + $0x28] sm:$0xff]  ;;  %s3000_s29 = smov (!%p138_p3, %s1678_s29), 127 }
   0xc   : > { %v2545_v1 = vld [vmem:[%s2997_s1 + $0x78] sm:$0xff]  ;;  %982 = vmatpush.bf16.msra.mxu0 %v2267_v0  ;;  %2475 = vmatpush.bf16.msra.mxu3 %v2267_v0  ;;  %v2560_v4 = vld [vmem:[%s2997_s1 + $0x70] sm:$0xff]  ;;  %v2575_v7 = vld [vmem:[%s2997_s1 + $0x68] sm:$0xff]  ;;  %s2499_s17 = smul.u32 12, %s3000_s29  ;;  %s1681_s11 = sshll.u32 %s3000_s29, 2 }
   0xd   : > { %v2550_v2 = vld [vmem:[%s2997_s1 + $0xb8] sm:$0xff]  ;;  %1151 = vmatpush.bf16.msra.mxu1 %v2545_v1  ;;  %v2565_v5 = vld [vmem:[%s2997_s1 + $0xb0] sm:$0xff]  ;;  %v2580_v8 = vld [vmem:[%s2997_s1 + $0xa8] sm:$0xff]  ;;  %s2755_s14 = scalar_lea.vmem %s2998_s2, %s1681_s11 }
   0xe   : > { %1320 = vmatpush.bf16.msra.mxu2 %v2550_v2  ;;  %v2264_v9 = vld [vmem:[%s2997_s1 + $0x20] sm:$0xff]  ;;  %v2263_v12 = vld [vmem:[%s2997_s1 + $0x18] sm:$0xff]  ;;  %v2262_v15 = vld [vmem:[%s2997_s1 + $0x10] sm:$0xff]  ;;  %s2631_s26 = scalar_lea.vmem %s2996_s0, %s2499_s17 }
   0xf   : > { %v2590_v10 = vld [vmem:[%s2997_s1 + $0x60] sm:$0xff]  ;;  %v2271_v13 = vld [vmem:[%s2997_s1 + $0x58] sm:$0xff]  ;;  %v2270_v16 = vld [vmem:[%s2997_s1 + $0x50] sm:$0xff] }
  0x10   : > { %983 = vmatpush.bf16.msra.mxu0 %v2266_v3  ;;  %2476 = vmatpush.bf16.msra.mxu3 %v2266_v3  ;;  %v2595_v11 = vld [vmem:[%s2997_s1 + $0xa0] sm:$0xff]  ;;  %v2610_v14 = vld [vmem:[%s2997_s1 + $0x98] sm:$0xff]  ;;  %v2623_v17 = vld [vmem:[%s2997_s1 + $0x90] sm:$0xff] }
  0x11   : > { %1152 = vmatpush.bf16.msra.mxu1 %v2560_v4  ;;  %v2261_v18 = vld [vmem:[%s2997_s1 + $0x8] sm:$0xff]  ;;  %v2260_v21 = vld [vmem:[%s2997_s1] sm:$0xff]  ;;  %v1686_v29 = vld [vmem:[%s2631_s26 + $0xc] sm:$0xf0] }
  0x12   : > { %1321 = vmatpush.bf16.msra.mxu2 %v2565_v5  ;;  %v2269_v19 = vld [vmem:[%s2997_s1 + $0x48] sm:$0xff]  ;;  %v2268_v22 = vld [vmem:[%s2997_s1 + $0x40] sm:$0xff]  ;;  %v2166_v31 = vld [vmem:[%s2631_s26 + $0x10] sm:$0xf0] }
  0x13   : > { %v2640_v20 = vld [vmem:[%s2997_s1 + $0x88] sm:$0xff]  ;;  %v2651_v23 = vld [vmem:[%s2997_s1 + $0x80] sm:$0xff]  ;;  %v1696_v36 = vld [vmem:[%s2631_s26 + $0x18] sm:$0xf] }
  0x14   : > { %984 = vmatpush.bf16.msra.mxu0 %v2265_v6  ;;  %2477 = vmatpush.bf16.msra.mxu3 %v2265_v6  ;;  %v1684_v24 = vld [vmem:[%s2631_s26] sm:$0xf]  ;;  %v2165_v25 = vld [vmem:[%s2631_s26 + $0x8] sm:$0xf0]  ;;  %v2164_v28 = vld [vmem:[%s2631_s26 + $0x4] sm:$0xf] }
  0x15   : > { %1153 = vmatpush.bf16.msra.mxu1 %v2575_v7  ;;  %v1972_v26 = vld [vmem:[%s2631_s26 + $0x240] sm:$0xf]  ;;  %v2237_v27 = vld [vmem:[%s2631_s26 + $0x248] sm:$0xf0]  ;;  %v1692_v30 = vld [vmem:[%s2631_s26 + $0x8] sm:$0xf]  ;;  %v1685_v32 = vor.u32 %v2165_v25, %v1684_v24  ;;  %v1689_v34 = vor.u32 %v2164_v28, %v1686_v29 }
  0x16   : > { %1322 = vmatpush.bf16.msra.mxu2 %v2580_v8  ;;  %v1973_v33 = vor.u32 %v2237_v27, %v1972_v26  ;;  %v1693_v35 = vor.u32 %v2166_v31, %v1692_v30  ;;  %v2168_v37 = vld [vmem:[%s2631_s26 + $0x20] sm:$0xf0]  ;;  %v1984_v38 = vld [vmem:[%s2631_s26 + $0x258] sm:$0xf]  ;;  %v2167_v40 = vld [vmem:[%s2631_s26 + $0x1c] sm:$0xf] }
  0x17   : > { %v2240_v39 = vld [vmem:[%s2631_s26 + $0x260] sm:$0xf0]  ;;  %v1698_v41 = vld [vmem:[%s2631_s26 + $0x24] sm:$0xf0]  ;;  %v1704_v42 = vld [vmem:[%s2631_s26 + $0x20] sm:$0xf]  ;;  %v1697_v44 = vor.u32 %v2168_v37, %v1696_v36 }
  0x18   : > { %985 = vmatpush.bf16.msra.mxu0 %v2264_v9  ;;  %2478 = vmatpush.bf16.msra.mxu3 %v2264_v9  ;;  %v2169_v43 = vld [vmem:[%s2631_s26 + $0x28] sm:$0xf0]  ;;  %v1985_v45 = vor.u32 %v2240_v39, %v1984_v38  ;;  %v1701_v46 = vor.u32 %v2167_v40, %v1698_v41  ;;  %v1708_v48 = vld [vmem:[%s2631_s26 + $0x30] sm:$0xf]  ;;  %v2171_v49 = vld [vmem:[%s2631_s26 + $0x38] sm:$0xf0] }
  0x19   : > { %1154 = vmatpush.bf16.msra.mxu1 %v2590_v10  ;;  %v1705_v47 = vor.u32 %v2169_v43, %v1704_v42  ;;  %v1996_v50 = vld [vmem:[%s2631_s26 + $0x270] sm:$0xf]  ;;  %v2243_v51 = vld [vmem:[%s2631_s26 + $0x278] sm:$0xf0]  ;;  %v2170_v52 = vld [vmem:[%s2631_s26 + $0x34] sm:$0xf]  ;;  %v1709_v56 = vor.u32 %v2171_v49, %v1708_v48 }
  0x1a   : > { %1323 = vmatpush.bf16.msra.mxu2 %v2595_v11  ;;  %v1710_v53 = vld [vmem:[%s2631_s26 + $0x3c] sm:$0xf0]  ;;  %v1716_v54 = vld [vmem:[%s2631_s26 + $0x38] sm:$0xf]  ;;  %v2172_v55 = vld [vmem:[%s2631_s26 + $0x40] sm:$0xf0]  ;;  %v1997_v57 = vor.u32 %v2243_v51, %v1996_v50 }
  0x1b   : > { %v1713_v58 = vor.u32 %v2170_v52, %v1710_v53  ;;  %v1717_v59 = vor.u32 %v2172_v55, %v1716_v54  ;;  %v1720_v60 = vld [vmem:[%s2631_s26 + $0x48] sm:$0xf]  ;;  %v2174_v61 = vld [vmem:[%s2631_s26 + $0x50] sm:$0xf0]  ;;  %v2173_v0 = vld [vmem:[%s2631_s26 + $0x4c] sm:$0xf] }
  0x1c   : > { %986 = vmatpush.bf16.msra.mxu0 %v2263_v12  ;;  %2479 = vmatpush.bf16.msra.mxu3 %v2263_v12  ;;  %v2008_v62 = vld [vmem:[%s2631_s26 + $0x288] sm:$0xf]  ;;  %v2246_v63 = vld [vmem:[%s2631_s26 + $0x290] sm:$0xf0]  ;;  %v2175_v3 = vld [vmem:[%s2631_s26 + $0x58] sm:$0xf0] }
  0x1d   : > { %1155 = vmatpush.bf16.msra.mxu1 %v2271_v13  ;;  %v2177_v9 = vld [vmem:[%s2631_s26 + $0x68] sm:$0xf0]  ;;  %v2176_v12 = vld [vmem:[%s2631_s26 + $0x64] sm:$0xf]  ;;  %v2179_v25 = vld [vmem:[%s2631_s26 + $0x7c] sm:$0xf] }
  0x1e   : > { %1324 = vmatpush.bf16.msra.mxu2 %v2610_v14  ;;  %v2252_v24 = vld [vmem:[%s2631_s26 + $0x2c0] sm:$0xf0]  ;;  %v1752_v26 = vld [vmem:[%s2631_s26 + $0x80] sm:$0xf]  ;;  %v2181_v27 = vld [vmem:[%s2631_s26 + $0x88] sm:$0xf0] }
  0x1f   : > { %v1753_v31 = vor.u32 %v2181_v27, %v1752_v26  ;;  %v2182_v36 = vld [vmem:[%s2631_s26 + $0x94] sm:$0xf]  ;;  %v1758_v37 = vld [vmem:[%s2631_s26 + $0x9c] sm:$0xf0]  ;;  %v1764_v38 = vld [vmem:[%s2631_s26 + $0x98] sm:$0xf] }
  0x20   : > { %987 = vmatpush.bf16.msra.mxu0 %v2262_v15  ;;  %2480 = vmatpush.bf16.msra.mxu3 %v2262_v15  ;;  %v2178_v15 = vld [vmem:[%s2631_s26 + $0x70] sm:$0xf0]  ;;  %v2184_v39 = vld [vmem:[%s2631_s26 + $0xa0] sm:$0xf0]  ;;  %v1761_v42 = vor.u32 %v2182_v36, %v1758_v37  ;;  %v2185_v48 = vld [vmem:[%s2631_s26 + $0xac] sm:$0xf] }
  0x21   : > { %1156 = vmatpush.bf16.msra.mxu1 %v2270_v16  ;;  %v1765_v43 = vor.u32 %v2184_v39, %v1764_v38  ;;  %v1770_v49 = vld [vmem:[%s2631_s26 + $0xb4] sm:$0xf0]  ;;  %v1776_v50 = vld [vmem:[%s2631_s26 + $0xb0] sm:$0xf]  ;;  %v2187_v51 = vld [vmem:[%s2631_s26 + $0xb8] sm:$0xf0] }
  0x22   : > { %1325 = vmatpush.bf16.msra.mxu2 %v2623_v17  ;;  %v1773_v54 = vor.u32 %v2185_v48, %v1770_v49  ;;  %v1777_v55 = vor.u32 %v2187_v51, %v1776_v50  ;;  %v2195_v36 = vld [vmem:[%s2631_s26 + $0xf8] sm:$0xf0]  ;;  %v2194_v38 = vld [vmem:[%s2631_s26 + $0xf4] sm:$0xf] }
  0x23   : > { %v2242_v39 = vld [vmem:[%s2631_s26 + $0x274] sm:$0xf] }
  0x24   : > { %988 = vmatpush.bf16.msra.mxu0 %v2261_v18  ;;  %2481 = vmatpush.bf16.msra.mxu3 %v2261_v18 }
  0x25   : > { %1157 = vmatpush.bf16.msra.mxu1 %v2269_v19 }
  0x26   : > { %1326 = vmatpush.bf16.msra.mxu2 %v2640_v20 }
  0x28   : > { %989 = vmatpush.bf16.msra.mxu0 %v2260_v21  ;;  %2482 = vmatpush.bf16.msra.mxu3 %v2260_v21  ;;  %v2180_v21 = vld [vmem:[%s2631_s26 + $0x80] sm:$0xf0] }
  0x29   : > { %1158 = vmatpush.bf16.msra.mxu1 %v2268_v22 }
  0x2a   : > { %1327 = vmatpush.bf16.msra.mxu2 %v2651_v23 }
  0x2b   : > { %990 = vmatmul.bf16.vlgmr.msra.gmra.mxu0 %v1685_v32  ;;  %1110 = vmatmul.bf16.vlgmr.msra.gmra.mxu3 %v1973_v33  ;;  %v1756_v32 = vld [vmem:[%s2631_s26 + $0x90] sm:$0xf]  ;;  %v2183_v33 = vld [vmem:[%s2631_s26 + $0x98] sm:$0xf0] }
  0x2c   : > { %2483 = vmatpush.bf16.msrb.mxu3 %v2545_v1  ;;  %1159 = vmatmul.bf16.vlgmr.msra.gmra.mxu1 %v1689_v34  ;;  %v1722_v1 = vld [vmem:[%s2631_s26 + $0x54] sm:$0xf0]  ;;  %v2044_v34 = vld [vmem:[%s2631_s26 + $0x2d0] sm:$0xf]  ;;  %v1757_v40 = vor.u32 %v2183_v33, %v1756_v32 }
  0x2d   : > { %1328 = vmatmul.bf16.vlgmr.msra.gmra.mxu2 %v1693_v35  ;;  %v1725_v6 = vor.u32 %v2173_v0, %v1722_v1  ;;  %v2255_v35 = vld [vmem:[%s2631_s26 + $0x2d8] sm:$0xf0] }
  0x2e   : > { %v2045_v41 = vor.u32 %v2255_v35, %v2044_v34  ;;  %v1804_v35 = vld [vmem:[%s2631_s26 + $0xf0] sm:$0xf] }
  0x30   : > { %2484 = vmatpush.bf16.msrb.mxu3 %v2560_v4  ;;  %v1721_v4 = vor.u32 %v2174_v61, %v1720_v60  ;;  %v1974_v60 = vld [vmem:[%s2631_s26 + $0x24c] sm:$0xf0] }
  0x31   : > { %v1782_v61 = vld [vmem:[%s2631_s26 + $0xcc] sm:$0xf0] }
  0x34   : > { %2485 = vmatpush.bf16.msrb.mxu3 %v2575_v7 }
  0x38   : > { %2486 = vmatpush.bf16.msrb.mxu3 %v2590_v10  ;;  %v2020_v10 = vld [vmem:[%s2631_s26 + $0x2a0] sm:$0xf] }
  0x3b   : > { %995 = vmatmul.bf16.gmra.mxu0 %v1697_v44  ;;  %1115 = vmatmul.bf16.gmra.mxu3 %v1985_v45  ;;  %v1768_v44 = vld [vmem:[%s2631_s26 + $0xa8] sm:$0xf]  ;;  %v2186_v45 = vld [vmem:[%s2631_s26 + $0xb0] sm:$0xf0] }
  0x3c   : > { %2487 = vmatpush.bf16.msrb.mxu3 %v2271_v13  ;;  %1164 = vmatmul.bf16.gmra.mxu1 %v1701_v46  ;;  %v1734_v13 = vld [vmem:[%s2631_s26 + $0x6c] sm:$0xf0]  ;;  %v2056_v46 = vld [vmem:[%s2631_s26 + $0x2e8] sm:$0xf]  ;;  %v1769_v52 = vor.u32 %v2186_v45, %v1768_v44 }
  0x3d   : > { %1333 = vmatmul.bf16.gmra.mxu2 %v1705_v47  ;;  %v1737_v18 = vor.u32 %v2176_v12, %v1734_v13  ;;  %v2258_v47 = vld [vmem:[%s2631_s26 + $0x2f0] sm:$0xf0]  ;;  %v2191_v13 = vld [vmem:[%s2631_s26 + $0xdc] sm:$0xf] }
  0x3e   : > { %v2057_v53 = vor.u32 %v2258_v47, %v2056_v46  ;;  %v1805_v47 = vor.u32 %v2195_v36, %v1804_v35 }
  0x40   : > { %2488 = vmatpush.bf16.msrb.mxu3 %v2270_v16 }
  0x44   : > { %2489 = vmatpush.bf16.msrb.mxu3 %v2269_v19 }
  0x48   : > { %2490 = vmatpush.bf16.msrb.mxu3 %v2268_v22  ;;  %v2032_v22 = vld [vmem:[%s2631_s26 + $0x2b8] sm:$0xf] }
  0x49   : > { %v2033_v29 = vor.u32 %v2252_v24, %v2032_v22 }
  0x4b   : > { %1000 = vmatmul.bf16.gmra.mxu0 %v1709_v56  ;;  %1120 = vmatmul.bf16.gmra.mxu3 %v1997_v57  ;;  %v1780_v56 = vld [vmem:[%s2631_s26 + $0xc0] sm:$0xf]  ;;  %v2189_v57 = vld [vmem:[%s2631_s26 + $0xc8] sm:$0xf0] }
  0x4c   : > { %2491 = vmatpush.bf16.msra.mxu3 %v2550_v2  ;;  %1169 = vmatmul.bf16.gmra.mxu1 %v1713_v58  ;;  %v1728_v2 = vld [vmem:[%s2631_s26 + $0x50] sm:$0xf]  ;;  %v2188_v58 = vld [vmem:[%s2631_s26 + $0xc4] sm:$0xf]  ;;  %v1781_v0 = vor.u32 %v2189_v57, %v1780_v56 }
  0x4d   : > { %1338 = vmatmul.bf16.gmra.mxu2 %v1717_v59  ;;  %v1729_v7 = vor.u32 %v2175_v3, %v1728_v2  ;;  %v2236_v59 = vld [vmem:[%s2631_s26 + $0x244] sm:$0xf]  ;;  %v1785_v3 = vor.u32 %v2188_v58, %v1782_v61  ;;  %v2198_v61 = vld [vmem:[%s2631_s26 + $0x110] sm:$0xf0] }
  0x4e   : > { %v1977_v1 = vor.u32 %v2236_v59, %v1974_v60  ;;  %v1816_v60 = vld [vmem:[%s2631_s26 + $0x108] sm:$0xf] }
  0x50   : > { %2492 = vmatpush.bf16.msra.mxu3 %v2565_v5  ;;  %v2009_v5 = vor.u32 %v2246_v63, %v2008_v62  ;;  %v1788_v62 = vld [vmem:[%s2631_s26 + $0xc8] sm:$0xf]  ;;  %v2190_v63 = vld [vmem:[%s2631_s26 + $0xd0] sm:$0xf0] }
  0x54   : > { %2493 = vmatpush.bf16.msra.mxu3 %v2580_v8  ;;  %v1732_v8 = vld [vmem:[%s2631_s26 + $0x60] sm:$0xf] }
  0x55   : > { %v1733_v16 = vor.u32 %v2177_v9, %v1732_v8 }
  0x58   : > { %2494 = vmatpush.bf16.msra.mxu3 %v2595_v11  ;;  %v2249_v11 = vld [vmem:[%s2631_s26 + $0x2a8] sm:$0xf0] }
  0x5b   : > { %1005 = vmatmul.bf16.gmra.mxu0 %v1721_v4  ;;  %1125 = vmatmul.bf16.gmra.mxu3 %v2009_v5  ;;  %v1789_v4 = vor.u32 %v2190_v63, %v1788_v62  ;;  %v2197_v63 = vld [vmem:[%s2631_s26 + $0x10c] sm:$0xf] }
  0x5c   : > { %2495 = vmatpush.bf16.msra.mxu3 %v2610_v14  ;;  %1174 = vmatmul.bf16.gmra.mxu1 %v1725_v6  ;;  %v1740_v14 = vld [vmem:[%s2631_s26 + $0x68] sm:$0xf] }
  0x5d   : > { %1343 = vmatmul.bf16.gmra.mxu2 %v1729_v7  ;;  %v1741_v19 = vor.u32 %v2178_v15, %v1740_v14  ;;  %v2239_v14 = vld [vmem:[%s2631_s26 + $0x25c] sm:$0xf]  ;;  %v1986_v15 = vld [vmem:[%s2631_s26 + $0x264] sm:$0xf0] }
  0x5e   : > { %v1989_v24 = vor.u32 %v2239_v14, %v1986_v15 }
  0x60   : > { %2496 = vmatpush.bf16.msra.mxu3 %v2623_v17  ;;  %v2021_v17 = vor.u32 %v2249_v11, %v2020_v10  ;;  %v1792_v10 = vld [vmem:[%s2631_s26 + $0xd8] sm:$0xf]  ;;  %v2192_v11 = vld [vmem:[%s2631_s26 + $0xe0] sm:$0xf0] }
  0x61   : > { %v1793_v22 = vor.u32 %v2192_v11, %v1792_v10 }
  0x64   : > { %2497 = vmatpush.bf16.msra.mxu3 %v2640_v20  ;;  %v1744_v20 = vld [vmem:[%s2631_s26 + $0x78] sm:$0xf] }
  0x65   : > { %v1745_v28 = vor.u32 %v2180_v21, %v1744_v20 }
  0x68   : > { %2498 = vmatpush.bf16.msra.mxu3 %v2651_v23  ;;  %v1746_v23 = vld [vmem:[%s2631_s26 + $0x84] sm:$0xf0] }
  0x69   : > { %v1749_v30 = vor.u32 %v2179_v25, %v1746_v23 }
  0x6b   : > { %1010 = vmatmul.bf16.gmra.mxu0 %v1733_v16  ;;  %1130 = vmatmul.bf16.gmra.mxu3 %v2021_v17  ;;  %v1794_v16 = vld [vmem:[%s2631_s26 + $0xe4] sm:$0xf0]  ;;  %v1800_v17 = vld [vmem:[%s2631_s26 + $0xe0] sm:$0xf] }
  0x6c   : > { %1179 = vmatmul.bf16.gmra.mxu1 %v1737_v18  ;;  %v2193_v18 = vld [vmem:[%s2631_s26 + $0xe8] sm:$0xf0]  ;;  %v1797_v27 = vor.u32 %v2191_v13, %v1794_v16 }
  0x6d   : > { %1348 = vmatmul.bf16.gmra.mxu2 %v1741_v19 }
  0x7b   : > { %1015 = vmatmul.bf16.gmra.mxu0 %v1745_v28  ;;  %1135 = vmatmul.bf16.gmra.mxu3 %v2033_v29  ;;  %v1801_v28 = vor.u32 %v2193_v18, %v1800_v17 }
  0x7c   : > { %1184 = vmatmul.bf16.gmra.mxu1 %v1749_v30 }
  0x7d   : > { %1353 = vmatmul.bf16.gmra.mxu2 %v1753_v31 }
  0x8b   : > { %1020 = vmatmul.bf16.gmra.mxu0 %v1757_v40  ;;  %1140 = vmatmul.bf16.gmra.mxu3 %v2045_v41  ;;  %v1998_v40 = vld [vmem:[%s2631_s26 + $0x27c] sm:$0xf0] }
  0x8c   : > { %1189 = vmatmul.bf16.gmra.mxu1 %v1761_v42  ;;  %v1806_v41 = vld [vmem:[%s2631_s26 + $0xfc] sm:$0xf0]  ;;  %v1812_v42 = vld [vmem:[%s2631_s26 + $0xf8] sm:$0xf]  ;;  %v2001_v48 = vor.u32 %v2242_v39, %v1998_v40 }
  0x8d   : > { %1358 = vmatmul.bf16.gmra.mxu2 %v1765_v43  ;;  %v2196_v43 = vld [vmem:[%s2631_s26 + $0x100] sm:$0xf0] }
  0x9b   : > { %1025 = vmatmul.bf16.gmra.mxu0 %v1769_v52  ;;  %1145 = vmatmul.bf16.gmra.mxu3 %v2057_v53  ;;  %v1809_v52 = vor.u32 %v2194_v38, %v1806_v41  ;;  %v1813_v53 = vor.u32 %v2196_v43, %v1812_v42 }
  0x9c   : > { %1194 = vmatmul.bf16.gmra.mxu1 %v1773_v54 }
  0x9d   : > { %1363 = vmatmul.bf16.gmra.mxu2 %v1777_v55 }
  0xa8   : > { %v991_v2 = vpop.f32.mrf.mxu0 }
  0xa9   : > { %v1160_v5 = vpop.f32.mrf.mxu1 }
  0xaa   : > { %v1161_v12 = vadd.f32 %v1160_v5, %v991_v2  ;;  %v1818_v2 = vld [vmem:[%s2631_s26 + $0x114] sm:$0xf0] }
  0xab   : > { %1030 = vmatmul.bf16.gmra.mxu0 %v1781_v0  ;;  %1279 = vmatmul.bf16.vlgmr.msrb.gmra.mxu3 %v1977_v1  ;;  %v2245_v0 = vld [vmem:[%s2631_s26 + $0x28c] sm:$0xf]  ;;  %v2010_v1 = vld [vmem:[%s2631_s26 + $0x294] sm:$0xf0]  ;;  %v1821_v14 = vor.u32 %v2197_v63, %v1818_v2 }
  0xac   : > { %1199 = vmatmul.bf16.gmra.mxu1 %v1785_v3  ;;  %v1824_v3 = vld [vmem:[%s2631_s26 + $0x110] sm:$0xf]  ;;  %v2013_v10 = vor.u32 %v2245_v0, %v2010_v1 }
  0xad   : > { %1368 = vmatmul.bf16.gmra.mxu2 %v1789_v4  ;;  %v2199_v4 = vld [vmem:[%s2631_s26 + $0x118] sm:$0xf0] }
  0xae   : > { %v2739_v6 = vpop.f32.mrf.mxu3  ;;  %v1825_v15 = vor.u32 %v2199_v4, %v1824_v3 }
  0xb0   : > { %v1329_v7 = vpop.f32.mrf.mxu2  ;;  %v993_v8 = vpop.f32.mrf.mxu0 }
  0xb1   : > { %v1162_v9 = vpop.f32.mrf.mxu1  ;;  %v1330_v25 = vadd.f32 %v1329_v7, %v1161_v12 }
  0xb2   : > { %v1163_v19 = vadd.f32 %v1162_v9, %v993_v8  ;;  %v1817_v9 = vor.u32 %v2198_v61, %v1816_v60 }
  0xb6   : > { %v2749_v20 = vpop.f32.mrf.mxu3 }
  0xb8   : > { %v1331_v21 = vpop.f32.mrf.mxu2  ;;  %v996_v26 = vpop.f32.mrf.mxu0 }
  0xb9   : > { %v1332_v23 = vadd.f32 %v1331_v21, %v1163_v19  ;;  %v1165_v29 = vpop.f32.mrf.mxu1 }
  0xba   : > { %v1166_v37 = vadd.f32 %v1165_v29, %v996_v26  ;;  %v2200_v26 = vld [vmem:[%s2631_s26 + $0x124] sm:$0xf]  ;;  %v1830_v29 = vld [vmem:[%s2631_s26 + $0x12c] sm:$0xf0] }
  0xbb   : > { %v2287_v30 = vpack.c.bf16 %v1332_v23, %v1330_v25  ;;  %1035 = vmatmul.bf16.gmra.mxu0 %v1793_v22  ;;  %1284 = vmatmul.bf16.gmra.mxu3 %v1989_v24  ;;  %v1828_v24 = vld [vmem:[%s2631_s26 + $0x120] sm:$0xf]  ;;  %v2201_v25 = vld [vmem:[%s2631_s26 + $0x128] sm:$0xf0]  ;;  %v1833_v41 = vor.u32 %v2200_v26, %v1830_v29 }
  0xbc   : > { %1204 = vmatmul.bf16.gmra.mxu1 %v1797_v27  ;;  %v2248_v27 = vld [vmem:[%s2631_s26 + $0x2a4] sm:$0xf]  ;;  %v1829_v36 = vor.u32 %v2201_v25, %v1828_v24  ;;  %v1860_v24 = vld [vmem:[%s2631_s26 + $0x158] sm:$0xf] }
  0xbd   : > { %2288 = vst [vmem:[%s2755_s14] sm:$0xff] %v2287_v30   ;;  %1373 = vmatmul.bf16.gmra.mxu2 %v1801_v28  ;;  %v2022_v28 = vld [vmem:[%s2631_s26 + $0x2ac] sm:$0xf0]  ;;  %v1836_v30 = vld [vmem:[%s2631_s26 + $0x128] sm:$0xf]  ;;  %v2208_v25 = vld [vmem:[%s2631_s26 + $0x160] sm:$0xf0] }
  0xbe   : > { %v2758_v31 = vpop.f32.mrf.mxu3 }
  0xc0   : > { %v1334_v32 = vpop.f32.mrf.mxu2  ;;  %v998_v33 = vpop.f32.mrf.mxu0 }
  0xc1   : > { %v1167_v34 = vpop.f32.mrf.mxu1  ;;  %v1335_v49 = vadd.f32 %v1334_v32, %v1166_v37  ;;  %v2202_v32 = vld [vmem:[%s2631_s26 + $0x130] sm:$0xf0]  ;;  %v2025_v37 = vor.u32 %v2248_v27, %v2022_v28 }
  0xc2   : > { %v1168_v44 = vadd.f32 %v1167_v34, %v998_v33  ;;  %v1837_v42 = vor.u32 %v2202_v32, %v1836_v30 }
  0xc6   : > { %v2768_v45 = vpop.f32.mrf.mxu3 }
  0xc8   : > { %v1336_v46 = vpop.f32.mrf.mxu2  ;;  %v1001_v51 = vpop.f32.mrf.mxu0 }
  0xc9   : > { %v1337_v50 = vadd.f32 %v1336_v46, %v1168_v44  ;;  %v1170_v54 = vpop.f32.mrf.mxu1 }
  0xca   : > { %v1171_v62 = vadd.f32 %v1170_v54, %v1001_v51  ;;  %v2204_v51 = vld [vmem:[%s2631_s26 + $0x140] sm:$0xf0]  ;;  %v2251_v54 = vld [vmem:[%s2631_s26 + $0x2bc] sm:$0xf] }
  0xcb   : > { %v2292_v55 = vpack.c.bf16 %v1337_v50, %v1335_v49  ;;  %1040 = vmatmul.bf16.gmra.mxu0 %v1805_v47  ;;  %1289 = vmatmul.bf16.gmra.mxu3 %v2001_v48  ;;  %v1840_v50 = vld [vmem:[%s2631_s26 + $0x138] sm:$0xf] }
  0xcc   : > { %1209 = vmatmul.bf16.gmra.mxu1 %v1809_v52  ;;  %v1841_v63 = vor.u32 %v2204_v51, %v1840_v50  ;;  %v2058_v50 = vld [vmem:[%s2631_s26 + $0x2f4] sm:$0xf0] }
  0xcd   : > { %2444 = vst [vmem:[%s2755_s14 + $0x8] sm:$0xff] %v2292_v55   ;;  %1378 = vmatmul.bf16.gmra.mxu2 %v1813_v53  ;;  %v2203_v53 = vld [vmem:[%s2631_s26 + $0x13c] sm:$0xf]  ;;  %v2034_v55 = vld [vmem:[%s2631_s26 + $0x2c4] sm:$0xf0] }
  0xce   : > { %v2771_v56 = vpop.f32.mrf.mxu3  ;;  %v2037_v0 = vor.u32 %v2251_v54, %v2034_v55  ;;  %v1866_v51 = vld [vmem:[%s2631_s26 + $0x174] sm:$0xf0] }
  0xd0   : > { %v1339_v57 = vpop.f32.mrf.mxu2  ;;  %v1003_v58 = vpop.f32.mrf.mxu0 }
  0xd1   : > { %v1172_v59 = vpop.f32.mrf.mxu1  ;;  %v1340_v11 = vadd.f32 %v1339_v57, %v1171_v62  ;;  %v1842_v57 = vld [vmem:[%s2631_s26 + $0x144] sm:$0xf0] }
  0xd2   : > { %v1173_v5 = vadd.f32 %v1172_v59, %v1003_v58  ;;  %v1848_v58 = vld [vmem:[%s2631_s26 + $0x140] sm:$0xf]  ;;  %v2205_v59 = vld [vmem:[%s2631_s26 + $0x148] sm:$0xf0]  ;;  %v1845_v4 = vor.u32 %v2203_v53, %v1842_v57  ;;  %v2211_v53 = vld [vmem:[%s2631_s26 + $0x178] sm:$0xf0] }
  0xd6   : > { %v2781_v7 = vpop.f32.mrf.mxu3 }
  0xd8   : > { %v1341_v8 = vpop.f32.mrf.mxu2  ;;  %v1006_v13 = vpop.f32.mrf.mxu0 }
  0xd9   : > { %v1342_v12 = vadd.f32 %v1341_v8, %v1173_v5  ;;  %v1175_v16 = vpop.f32.mrf.mxu1  ;;  %v1849_v5 = vor.u32 %v2205_v59, %v1848_v58 }
  0xda   : > { %v1176_v23 = vadd.f32 %v1175_v16, %v1006_v13 }
  0xdb   : > { %v2297_v17 = vpack.c.bf16 %v1342_v12, %v1340_v11  ;;  %1045 = vmatmul.bf16.gmra.mxu0 %v1817_v9  ;;  %1294 = vmatmul.bf16.gmra.mxu3 %v2013_v10 }
  0xdc   : > { %1214 = vmatmul.bf16.gmra.mxu1 %v1821_v14  ;;  %v1852_v14 = vld [vmem:[%s2631_s26 + $0x150] sm:$0xf] }
  0xdd   : > { %2445 = vst [vmem:[%s2755_s14 + $0x10] sm:$0xff] %v2297_v17   ;;  %1383 = vmatmul.bf16.gmra.mxu2 %v1825_v15  ;;  %v2207_v15 = vld [vmem:[%s2631_s26 + $0x158] sm:$0xf0]  ;;  %v2206_v17 = vld [vmem:[%s2631_s26 + $0x154] sm:$0xf] }
  0xde   : > { %v2784_v18 = vpop.f32.mrf.mxu3  ;;  %v1853_v28 = vor.u32 %v2207_v15, %v1852_v14  ;;  %v2212_v14 = vld [vmem:[%s2631_s26 + $0x184] sm:$0xf]  ;;  %v1980_v15 = vld [vmem:[%s2631_s26 + $0x248] sm:$0xf] }
  0xe0   : > { %v1344_v19 = vpop.f32.mrf.mxu2  ;;  %v1008_v21 = vpop.f32.mrf.mxu0 }
  0xe1   : > { %v1177_v22 = vpop.f32.mrf.mxu1  ;;  %v1345_v38 = vadd.f32 %v1344_v19, %v1176_v23  ;;  %v2254_v19 = vld [vmem:[%s2631_s26 + $0x2d4] sm:$0xf] }
  0xe2   : > { %v1178_v33 = vadd.f32 %v1177_v22, %v1008_v21  ;;  %v2046_v21 = vld [vmem:[%s2631_s26 + $0x2dc] sm:$0xf0] }
  0xe3   : > { %v1854_v22 = vld [vmem:[%s2631_s26 + $0x15c] sm:$0xf0]  ;;  %v2049_v29 = vor.u32 %v2254_v19, %v2046_v21  ;;  %v1884_v19 = vld [vmem:[%s2631_s26 + $0x188] sm:$0xf]  ;;  %v2214_v21 = vld [vmem:[%s2631_s26 + $0x190] sm:$0xf0] }
  0xe6   : > { %v2794_v34 = vpop.f32.mrf.mxu3 }
  0xe8   : > { %v1346_v35 = vpop.f32.mrf.mxu2  ;;  %v1011_v40 = vpop.f32.mrf.mxu0 }
  0xe9   : > { %v1347_v39 = vadd.f32 %v1346_v35, %v1178_v33  ;;  %v1180_v43 = vpop.f32.mrf.mxu1  ;;  %v1857_v35 = vor.u32 %v2206_v17, %v1854_v22  ;;  %v1878_v17 = vld [vmem:[%s2631_s26 + $0x18c] sm:$0xf0] }
  0xea   : > { %v1181_v52 = vadd.f32 %v1180_v43, %v1011_v40  ;;  %v1864_v43 = vld [vmem:[%s2631_s26 + $0x168] sm:$0xf] }
  0xeb   : > { %v2302_v44 = vpack.c.bf16 %v1347_v39, %v1345_v38  ;;  %1050 = vmatmul.bf16.gmra.mxu0 %v1829_v36  ;;  %1299 = vmatmul.bf16.gmra.mxu3 %v2025_v37  ;;  %v1861_v36 = vor.u32 %v2208_v25, %v1860_v24 }
  0xec   : > { %1219 = vmatmul.bf16.gmra.mxu1 %v1833_v41 }
  0xed   : > { %2446 = vst [vmem:[%s2755_s14 + $0x18] sm:$0xff] %v2302_v44   ;;  %1388 = vmatmul.bf16.gmra.mxu2 %v1837_v42  ;;  %v2210_v44 = vld [vmem:[%s2631_s26 + $0x170] sm:$0xf0] }
  0xee   : > { %v2797_v46 = vpop.f32.mrf.mxu3  ;;  %v1865_v58 = vor.u32 %v2210_v44, %v1864_v43  ;;  %v2216_v43 = vld [vmem:[%s2631_s26 + $0x1a0] sm:$0xf0] }
  0xf0   : > { %v1349_v47 = vpop.f32.mrf.mxu2  ;;  %v1013_v48 = vpop.f32.mrf.mxu0 }
  0xf1   : > { %v1182_v49 = vpop.f32.mrf.mxu1  ;;  %v1350_v1 = vadd.f32 %v1349_v47, %v1181_v52  ;;  %v1872_v52 = vld [vmem:[%s2631_s26 + $0x170] sm:$0xf] }
  0xf2   : > { %v1183_v60 = vadd.f32 %v1182_v49, %v1013_v48  ;;  %v2209_v48 = vld [vmem:[%s2631_s26 + $0x16c] sm:$0xf] }
  0xf3   : > { %v2257_v49 = vld [vmem:[%s2631_s26 + $0x2ec] sm:$0xf] }
  0xf4   : > { %v2061_v59 = vor.u32 %v2257_v49, %v2058_v50  ;;  %v2241_v49 = vld [vmem:[%s2631_s26 + $0x268] sm:$0xf0]  ;;  %v1890_v50 = vld [vmem:[%s2631_s26 + $0x1a4] sm:$0xf0] }
  0xf6   : > { %v2807_v61 = vpop.f32.mrf.mxu3 }
  0xf8   : > { %v1351_v62 = vpop.f32.mrf.mxu2  ;;  %v1016_v3 = vpop.f32.mrf.mxu0 }
  0xf9   : > { %v1352_v2 = vadd.f32 %v1351_v62, %v1183_v60  ;;  %v1185_v8 = vpop.f32.mrf.mxu1 }
  0xfa   : > { %v1186_v16 = vadd.f32 %v1185_v8, %v1016_v3 }
  0xfb   : > { %v2307_v9 = vpack.c.bf16 %v1352_v2, %v1350_v1  ;;  %1055 = vmatmul.bf16.gmra.mxu0 %v1841_v63  ;;  %1304 = vmatmul.bf16.gmra.mxu3 %v2037_v0  ;;  %v1869_v0 = vor.u32 %v2209_v48, %v1866_v51  ;;  %v1873_v1 = vor.u32 %v2211_v53, %v1872_v52  ;;  %v1992_v48 = vld [vmem:[%s2631_s26 + $0x260] sm:$0xf]  ;;  %v2217_v52 = vld [vmem:[%s2631_s26 + $0x1a8] sm:$0xf0] }
  0xfc   : > { %1224 = vmatmul.bf16.gmra.mxu1 %v1845_v4  ;;  %v1896_v51 = vld [vmem:[%s2631_s26 + $0x1a0] sm:$0xf] }
  0xfd   : > { %2447 = vst [vmem:[%s2755_s14 + $0x20] sm:$0xff] %v2307_v9   ;;  %1393 = vmatmul.bf16.gmra.mxu2 %v1849_v5 }
  0xfe   : > { %v2810_v10 = vpop.f32.mrf.mxu3 }
 0x100   : > { %v1354_v11 = vpop.f32.mrf.mxu2  ;;  %v1018_v12 = vpop.f32.mrf.mxu0 }
 0x101   : > { %v1187_v13 = vpop.f32.mrf.mxu1  ;;  %v1355_v30 = vadd.f32 %v1354_v11, %v1186_v16  ;;  %v1876_v11 = vld [vmem:[%s2631_s26 + $0x180] sm:$0xf]  ;;  %v2238_v16 = vld [vmem:[%s2631_s26 + $0x250] sm:$0xf0] }
 0x102   : > { %v1188_v23 = vadd.f32 %v1187_v13, %v1018_v12  ;;  %v2213_v12 = vld [vmem:[%s2631_s26 + $0x188] sm:$0xf0] }
 0x106   : > { %v2820_v26 = vpop.f32.mrf.mxu3 }
 0x108   : > { %v1356_v27 = vpop.f32.mrf.mxu2  ;;  %v1021_v33 = vpop.f32.mrf.mxu0 }
 0x109   : > { %v1357_v32 = vadd.f32 %v1356_v27, %v1188_v23  ;;  %v1190_v37 = vpop.f32.mrf.mxu1  ;;  %v1877_v23 = vor.u32 %v2213_v12, %v1876_v11  ;;  %v1981_v27 = vor.u32 %v2238_v16, %v1980_v15  ;;  %v1900_v12 = vld [vmem:[%s2631_s26 + $0x1b0] sm:$0xf]  ;;  %v2218_v15 = vld [vmem:[%s2631_s26 + $0x1b4] sm:$0xf]  ;;  %v2004_v16 = vld [vmem:[%s2631_s26 + $0x278] sm:$0xf] }
 0x10a   : > { %v1191_v47 = vadd.f32 %v1190_v37, %v1021_v33  ;;  %v1885_v33 = vor.u32 %v2214_v21, %v1884_v19  ;;  %v1902_v19 = vld [vmem:[%s2631_s26 + $0x1bc] sm:$0xf0]  ;;  %v1908_v21 = vld [vmem:[%s2631_s26 + $0x1b8] sm:$0xf] }
 0x10b   : > { %v2312_v38 = vpack.c.bf16 %v1357_v32, %v1355_v30  ;;  %1060 = vmatmul.bf16.gmra.mxu0 %v1853_v28  ;;  %1309 = vmatmul.bf16.gmra.mxu3 %v2049_v29  ;;  %v1881_v32 = vor.u32 %v2212_v14, %v1878_v17  ;;  %v2244_v17 = vld [vmem:[%s2631_s26 + $0x280] sm:$0xf0] }
 0x10c   : > { %1229 = vmatmul.bf16.gmra.mxu1 %v1857_v35 }
 0x10d   : > { %2448 = vst [vmem:[%s2755_s14 + $0x28] sm:$0xff] %v2312_v38   ;;  %1398 = vmatmul.bf16.gmra.mxu2 %v1861_v36 }
 0x10e   : > { %v2823_v39 = vpop.f32.mrf.mxu3 }
 0x110   : > { %v1359_v40 = vpop.f32.mrf.mxu2  ;;  %v1023_v41 = vpop.f32.mrf.mxu0 }
 0x111   : > { %v1192_v42 = vpop.f32.mrf.mxu1  ;;  %v1360_v60 = vadd.f32 %v1359_v40, %v1191_v47  ;;  %v2215_v47 = vld [vmem:[%s2631_s26 + $0x19c] sm:$0xf] }
 0x112   : > { %v1193_v54 = vadd.f32 %v1192_v42, %v1023_v41  ;;  %v1888_v42 = vld [vmem:[%s2631_s26 + $0x198] sm:$0xf] }
 0x116   : > { %v2833_v55 = vpop.f32.mrf.mxu3 }
 0x118   : > { %v1361_v57 = vpop.f32.mrf.mxu2  ;;  %v1026_v63 = vpop.f32.mrf.mxu0 }
 0x119   : > { %v1362_v62 = vadd.f32 %v1361_v57, %v1193_v54  ;;  %v1195_v2 = vpop.f32.mrf.mxu1 }
 0x11a   : > { %v1196_v13 = vadd.f32 %v1195_v2, %v1026_v63 }
 0x11b   : > { %v2317_v3 = vpack.c.bf16 %v1362_v62, %v1360_v60  ;;  %1065 = vmatmul.bf16.gmra.mxu0 %v1865_v58  ;;  %1314 = vmatmul.bf16.gmra.mxu3 %v2061_v59  ;;  %v1889_v58 = vor.u32 %v2216_v43, %v1888_v42  ;;  %v1993_v59 = vor.u32 %v2241_v49, %v1992_v48  ;;  %v2222_v48 = vld [vmem:[%s2631_s26 + $0x1d0] sm:$0xf0] }
 0x11c   : > { %1234 = vmatmul.bf16.gmra.mxu1 %v1869_v0  ;;  %v1893_v0 = vor.u32 %v2215_v47, %v1890_v50  ;;  %v1912_v47 = vld [vmem:[%s2631_s26 + $0x1c8] sm:$0xf]  ;;  %v2221_v50 = vld [vmem:[%s2631_s26 + $0x1cc] sm:$0xf] }
 0x11d   : > { %2449 = vst [vmem:[%s2755_s14 + $0x30] sm:$0xff] %v2317_v3   ;;  %1403 = vmatmul.bf16.gmra.mxu2 %v1873_v1  ;;  %v1897_v1 = vor.u32 %v2217_v52, %v1896_v51  ;;  %v2016_v51 = vld [vmem:[%s2631_s26 + $0x290] sm:$0xf]  ;;  %v2247_v52 = vld [vmem:[%s2631_s26 + $0x298] sm:$0xf0] }
 0x11e   : > { %v2836_v4 = vpop.f32.mrf.mxu3 }
 0x120   : > { %v1364_v5 = vpop.f32.mrf.mxu2  ;;  %v1028_v8 = vpop.f32.mrf.mxu0 }
 0x121   : > { %v1197_v9 = vpop.f32.mrf.mxu1  ;;  %v1365_v28 = vadd.f32 %v1364_v5, %v1196_v13  ;;  %v2219_v13 = vld [vmem:[%s2631_s26 + $0x1b8] sm:$0xf0] }
 0x122   : > { %v1198_v22 = vadd.f32 %v1197_v9, %v1028_v8 }
 0x126   : > { %v2846_v24 = vpop.f32.mrf.mxu3 }
 0x128   : > { %v1366_v25 = vpop.f32.mrf.mxu2  ;;  %v1031_v30 = vpop.f32.mrf.mxu0 }
 0x129   : > { %v1367_v29 = vadd.f32 %v1366_v25, %v1198_v22  ;;  %v1200_v35 = vpop.f32.mrf.mxu1  ;;  %v2220_v22 = vld [vmem:[%s2631_s26 + $0x1c0] sm:$0xf0] }
 0x12a   : > { %v1201_v44 = vadd.f32 %v1200_v35, %v1031_v30  ;;  %v1905_v35 = vor.u32 %v2218_v15, %v1902_v19  ;;  %v2225_v19 = vld [vmem:[%s2631_s26 + $0x1e8] sm:$0xf0] }
 0x12b   : > { %v2322_v36 = vpack.c.bf16 %v1367_v29, %v1365_v28  ;;  %1070 = vmatmul.bf16.gmra.mxu0 %v1877_v23  ;;  %1448 = vmatmul.bf16.vlgmr.msra.gmra.mxu3 %v1981_v27  ;;  %v1901_v28 = vor.u32 %v2219_v13, %v1900_v12  ;;  %v2005_v29 = vor.u32 %v2244_v17, %v2004_v16  ;;  %v1924_v17 = vld [vmem:[%s2631_s26 + $0x1e0] sm:$0xf] }
 0x12c   : > { %1239 = vmatmul.bf16.gmra.mxu1 %v1881_v32 }
 0x12d   : > { %2450 = vst [vmem:[%s2755_s14 + $0x38] sm:$0xff] %v2322_v36   ;;  %1408 = vmatmul.bf16.gmra.mxu2 %v1885_v33  ;;  %v1909_v36 = vor.u32 %v2220_v22, %v1908_v21  ;;  %v2224_v22 = vld [vmem:[%s2631_s26 + $0x1e4] sm:$0xf] }
 0x12e   : > { %v2849_v37 = vpop.f32.mrf.mxu3 }
 0x130   : > { %v1369_v38 = vpop.f32.mrf.mxu2  ;;  %v1033_v40 = vpop.f32.mrf.mxu0 }
 0x131   : > { %v1202_v41 = vpop.f32.mrf.mxu1  ;;  %v1370_v60 = vadd.f32 %v1369_v38, %v1201_v44 }
 0x132   : > { %v1203_v53 = vadd.f32 %v1202_v41, %v1033_v40 }
 0x136   : > { %v2859_v54 = vpop.f32.mrf.mxu3 }
 0x138   : > { %v1371_v57 = vpop.f32.mrf.mxu2  ;;  %v1036_v63 = vpop.f32.mrf.mxu0 }
 0x139   : > { %v1372_v62 = vadd.f32 %v1371_v57, %v1203_v53  ;;  %v1205_v2 = vpop.f32.mrf.mxu1  ;;  %v1914_v53 = vld [vmem:[%s2631_s26 + $0x1d4] sm:$0xf0]  ;;  %v1920_v57 = vld [vmem:[%s2631_s26 + $0x1d0] sm:$0xf] }
 0x13a   : > { %v1206_v14 = vadd.f32 %v1205_v2, %v1036_v63  ;;  %v1913_v63 = vor.u32 %v2222_v48, %v1912_v47 }
 0x13b   : > { %v2327_v3 = vpack.c.bf16 %v1372_v62, %v1370_v60  ;;  %1075 = vmatmul.bf16.gmra.mxu0 %v1889_v58  ;;  %1453 = vmatmul.bf16.gmra.mxu3 %v1993_v59  ;;  %v2223_v58 = vld [vmem:[%s2631_s26 + $0x1d8] sm:$0xf0] }
 0x13c   : > { %1244 = vmatmul.bf16.gmra.mxu1 %v1893_v0  ;;  %v2017_v0 = vor.u32 %v2247_v52, %v2016_v51 }
 0x13d   : > { %2451 = vst [vmem:[%s2755_s14 + $0x40] sm:$0xff] %v2327_v3   ;;  %1413 = vmatmul.bf16.gmra.mxu2 %v1897_v1 }
 0x13e   : > { %v2862_v5 = vpop.f32.mrf.mxu3 }
 0x140   : > { %v1374_v8 = vpop.f32.mrf.mxu2  ;;  %v1038_v9 = vpop.f32.mrf.mxu0 }
 0x141   : > { %v1207_v11 = vpop.f32.mrf.mxu1  ;;  %v1375_v30 = vadd.f32 %v1374_v8, %v1206_v14  ;;  %v1917_v8 = vor.u32 %v2221_v50, %v1914_v53 }
 0x142   : > { %v1208_v25 = vadd.f32 %v1207_v11, %v1038_v9  ;;  %v1921_v9 = vor.u32 %v2223_v58, %v1920_v57  ;;  %v1936_v57 = vld [vmem:[%s2631_s26 + $0x1f8] sm:$0xf]  ;;  %v2228_v58 = vld [vmem:[%s2631_s26 + $0x200] sm:$0xf0] }
 0x146   : > { %v2872_v23 = vpop.f32.mrf.mxu3 }
 0x148   : > { %v1376_v27 = vpop.f32.mrf.mxu2  ;;  %v1041_v33 = vpop.f32.mrf.mxu0 }
 0x149   : > { %v1377_v32 = vadd.f32 %v1376_v27, %v1208_v25  ;;  %v1210_v38 = vpop.f32.mrf.mxu1  ;;  %v2028_v25 = vld [vmem:[%s2631_s26 + $0x2a8] sm:$0xf]  ;;  %v2250_v27 = vld [vmem:[%s2631_s26 + $0x2b0] sm:$0xf0] }
 0x14a   : > { %v1211_v49 = vadd.f32 %v1210_v38, %v1041_v33  ;;  %v2029_v38 = vor.u32 %v2250_v27, %v2028_v25 }
 0x14b   : > { %v2332_v40 = vpack.c.bf16 %v1377_v32, %v1375_v30  ;;  %1080 = vmatmul.bf16.gmra.mxu0 %v1901_v28  ;;  %1458 = vmatmul.bf16.gmra.mxu3 %v2005_v29  ;;  %v1926_v28 = vld [vmem:[%s2631_s26 + $0x1ec] sm:$0xf0]  ;;  %v1932_v29 = vld [vmem:[%s2631_s26 + $0x1e8] sm:$0xf]  ;;  %v2226_v30 = vld [vmem:[%s2631_s26 + $0x1f0] sm:$0xf0] }
 0x14c   : > { %1249 = vmatmul.bf16.gmra.mxu1 %v1905_v35  ;;  %v1933_v47 = vor.u32 %v2226_v30, %v1932_v29 }
 0x14d   : > { %2452 = vst [vmem:[%s2755_s14 + $0x48] sm:$0xff] %v2332_v40   ;;  %1418 = vmatmul.bf16.gmra.mxu2 %v1909_v36  ;;  %v1925_v36 = vor.u32 %v2225_v19, %v1924_v17 }
 0x14e   : > { %v2875_v41 = vpop.f32.mrf.mxu3 }
 0x150   : > { %v1379_v42 = vpop.f32.mrf.mxu2  ;;  %v1043_v43 = vpop.f32.mrf.mxu0 }
 0x151   : > { %v1212_v44 = vpop.f32.mrf.mxu1  ;;  %v1380_v1 = vadd.f32 %v1379_v42, %v1211_v49 }
 0x152   : > { %v1213_v59 = vadd.f32 %v1212_v44, %v1043_v43  ;;  %v1929_v44 = vor.u32 %v2224_v22, %v1926_v28 }
 0x156   : > { %v2885_v60 = vpop.f32.mrf.mxu3 }
 0x158   : > { %v1381_v62 = vpop.f32.mrf.mxu2  ;;  %v1046_v3 = vpop.f32.mrf.mxu0 }
 0x159   : > { %v1382_v2 = vadd.f32 %v1381_v62, %v1213_v59  ;;  %v1215_v11 = vpop.f32.mrf.mxu1  ;;  %v2227_v62 = vld [vmem:[%s2631_s26 + $0x1fc] sm:$0xf] }
 0x15a   : > { %v1216_v21 = vadd.f32 %v1215_v11, %v1046_v3  ;;  %v2229_v3 = vld [vmem:[%s2631_s26 + $0x208] sm:$0xf0] }
 0x15b   : > { %v2337_v12 = vpack.c.bf16 %v1382_v2, %v1380_v1  ;;  %1085 = vmatmul.bf16.gmra.mxu0 %v1913_v63  ;;  %1463 = vmatmul.bf16.gmra.mxu3 %v2017_v0  ;;  %v2040_v63 = vld [vmem:[%s2631_s26 + $0x2c0] sm:$0xf]  ;;  %v2253_v0 = vld [vmem:[%s2631_s26 + $0x2c8] sm:$0xf0]  ;;  %v1938_v1 = vld [vmem:[%s2631_s26 + $0x204] sm:$0xf0] }
 0x15c   : > { %1254 = vmatmul.bf16.gmra.mxu1 %v1917_v8  ;;  %v1944_v2 = vld [vmem:[%s2631_s26 + $0x200] sm:$0xf]  ;;  %v1941_v19 = vor.u32 %v2227_v62, %v1938_v1 }
 0x15d   : > { %2453 = vst [vmem:[%s2755_s14 + $0x50] sm:$0xff] %v2337_v12   ;;  %1423 = vmatmul.bf16.gmra.mxu2 %v1921_v9  ;;  %v1937_v12 = vor.u32 %v2228_v58, %v1936_v57 }
 0x15e   : > { %v2888_v13 = vpop.f32.mrf.mxu3 }
 0x160   : > { %v1384_v14 = vpop.f32.mrf.mxu2  ;;  %v1048_v15 = vpop.f32.mrf.mxu0 }
 0x161   : > { %v1217_v16 = vpop.f32.mrf.mxu1  ;;  %v1385_v40 = vadd.f32 %v1384_v14, %v1216_v21  ;;  %v2041_v14 = vor.u32 %v2253_v0, %v2040_v63  ;;  %v1945_v21 = vor.u32 %v2229_v3, %v1944_v2 }
 0x162   : > { %v1218_v32 = vadd.f32 %v1217_v16, %v1048_v15 }
 0x166   : > { %v2898_v33 = vpop.f32.mrf.mxu3 }
 0x168   : > { %v1386_v35 = vpop.f32.mrf.mxu2  ;;  %v1051_v43 = vpop.f32.mrf.mxu0 }
 0x169   : > { %v1387_v42 = vadd.f32 %v1386_v35, %v1218_v32  ;;  %v1220_v48 = vpop.f32.mrf.mxu1  ;;  %v1948_v32 = vld [vmem:[%s2631_s26 + $0x210] sm:$0xf]  ;;  %v2231_v35 = vld [vmem:[%s2631_s26 + $0x218] sm:$0xf0] }
 0x16a   : > { %v1221_v59 = vadd.f32 %v1220_v48, %v1051_v43  ;;  %v1950_v43 = vld [vmem:[%s2631_s26 + $0x21c] sm:$0xf0] }
 0x16b   : > { %v2342_v49 = vpack.c.bf16 %v1387_v42, %v1385_v40  ;;  %1090 = vmatmul.bf16.gmra.mxu0 %v1925_v36  ;;  %1468 = vmatmul.bf16.gmra.mxu3 %v2029_v38  ;;  %v2230_v38 = vld [vmem:[%s2631_s26 + $0x214] sm:$0xf]  ;;  %v2052_v40 = vld [vmem:[%s2631_s26 + $0x2d8] sm:$0xf]  ;;  %v2256_v42 = vld [vmem:[%s2631_s26 + $0x2e0] sm:$0xf0] }
 0x16c   : > { %1259 = vmatmul.bf16.gmra.mxu1 %v1929_v44  ;;  %v1956_v44 = vld [vmem:[%s2631_s26 + $0x218] sm:$0xf]  ;;  %v1953_v62 = vor.u32 %v2230_v38, %v1950_v43 }
 0x16d   : > { %2454 = vst [vmem:[%s2755_s14 + $0x58] sm:$0xff] %v2342_v49   ;;  %1428 = vmatmul.bf16.gmra.mxu2 %v1933_v47  ;;  %v2232_v47 = vld [vmem:[%s2631_s26 + $0x220] sm:$0xf0] }
 0x16e   : > { %v2901_v50 = vpop.f32.mrf.mxu3  ;;  %v1957_v63 = vor.u32 %v2232_v47, %v1956_v44 }
 0x170   : > { %v1389_v51 = vpop.f32.mrf.mxu2  ;;  %v1053_v52 = vpop.f32.mrf.mxu0 }
 0x171   : > { %v1222_v53 = vpop.f32.mrf.mxu1  ;;  %v1390_v15 = vadd.f32 %v1389_v51, %v1221_v59 }
 0x172   : > { %v1223_v8 = vadd.f32 %v1222_v53, %v1053_v52  ;;  %v1949_v52 = vor.u32 %v2231_v35, %v1948_v32  ;;  %v2053_v53 = vor.u32 %v2256_v42, %v2052_v40 }
 0x176   : > { %v2911_v9 = vpop.f32.mrf.mxu3 }
 0x178   : > { %v1391_v11 = vpop.f32.mrf.mxu2  ;;  %v1056_v17 = vpop.f32.mrf.mxu0 }
 0x179   : > { %v1392_v16 = vadd.f32 %v1391_v11, %v1223_v8  ;;  %v1225_v22 = vpop.f32.mrf.mxu1 }
 0x17a   : > { %v1226_v36 = vadd.f32 %v1225_v22, %v1056_v17  ;;  %v2064_v17 = vld [vmem:[%s2631_s26 + $0x2f0] sm:$0xf] }
 0x17b   : > { %v2347_v25 = vpack.c.bf16 %v1392_v16, %v1390_v15  ;;  %1095 = vmatmul.bf16.gmra.mxu0 %v1937_v12  ;;  %1473 = vmatmul.bf16.gmra.mxu3 %v2041_v14  ;;  %v1960_v12 = vld [vmem:[%s2631_s26 + $0x228] sm:$0xf]  ;;  %v2234_v14 = vld [vmem:[%s2631_s26 + $0x230] sm:$0xf0]  ;;  %v2233_v16 = vld [vmem:[%s2631_s26 + $0x22c] sm:$0xf] }
 0x17c   : > { %1264 = vmatmul.bf16.gmra.mxu1 %v1941_v19  ;;  %v2259_v19 = vld [vmem:[%s2631_s26 + $0x2f8] sm:$0xf0]  ;;  %v1968_v22 = vld [vmem:[%s2631_s26 + $0x230] sm:$0xf]  ;;  %v1961_v32 = vor.u32 %v2234_v14, %v1960_v12 }
 0x17d   : > { %2455 = vst [vmem:[%s2755_s14 + $0x60] sm:$0xff] %v2347_v25   ;;  %1433 = vmatmul.bf16.gmra.mxu2 %v1945_v21  ;;  %v1962_v21 = vld [vmem:[%s2631_s26 + $0x234] sm:$0xf0]  ;;  %v2235_v25 = vld [vmem:[%s2631_s26 + $0x238] sm:$0xf0]  ;;  %v2065_v35 = vor.u32 %v2259_v19, %v2064_v17  ;;  %v1281_v17 = vadd.f32 %v2849_v37, %v2739_v6  ;;  %v1283_v19 = vadd.f32 %v2859_v54, %v2749_v20 }
 0x17e   : > { %v2914_v27 = vpop.f32.mrf.mxu3  ;;  %v1965_v42 = vor.u32 %v2233_v16, %v1962_v21  ;;  %v1969_v43 = vor.u32 %v2235_v25, %v1968_v22  ;;  %v1286_v37 = vadd.f32 %v2862_v5, %v2758_v31  ;;  %v1288_v54 = vadd.f32 %v2872_v23, %v2768_v45 }
 0x17f   : > { %v1291_v5 = vadd.f32 %v2875_v41, %v2771_v56  ;;  %v1293_v23 = vadd.f32 %v2885_v60, %v2781_v7  ;;  %v1296_v41 = vadd.f32 %v2888_v13, %v2784_v18  ;;  %v1298_v60 = vadd.f32 %v2898_v33, %v2794_v34 }
 0x180   : > { %v1394_v28 = vpop.f32.mrf.mxu2  ;;  %v1058_v29 = vpop.f32.mrf.mxu0  ;;  %v1301_v13 = vadd.f32 %v2901_v50, %v2797_v46  ;;  %v1303_v33 = vadd.f32 %v2911_v9, %v2807_v61  ;;  %v1306_v50 = vadd.f32 %v2914_v27, %v2810_v10 }
 0x181   : > { %v1227_v30 = vpop.f32.mrf.mxu1  ;;  %v1395_v57 = vadd.f32 %v1394_v28, %v1226_v36 }
 0x182   : > { %v1228_v48 = vadd.f32 %v1227_v30, %v1058_v29 }
 0x186   : > { %v2924_v49 = vpop.f32.mrf.mxu3 }
 0x187   : > { %v1308_v9 = vadd.f32 %v2924_v49, %v2820_v26 }
 0x188   : > { %v1396_v51 = vpop.f32.mrf.mxu2  ;;  %v1061_v59 = vpop.f32.mrf.mxu0 }
 0x189   : > { %v1397_v58 = vadd.f32 %v1396_v51, %v1228_v48  ;;  %v1230_v0 = vpop.f32.mrf.mxu1 }
 0x18a   : > { %v1231_v15 = vadd.f32 %v1230_v0, %v1061_v59 }
 0x18b   : > { %v2352_v1 = vpack.c.bf16 %v1397_v58, %v1395_v57  ;;  %1100 = vmatmul.bf16.gmra.mxu0 %v1949_v52  ;;  %1478 = vmatmul.bf16.gmra.mxu3 %v2053_v53 }
 0x18c   : > { %1269 = vmatmul.bf16.gmra.mxu1 %v1953_v62 }
 0x18d   : > { %2456 = vst [vmem:[%s2755_s14 + $0x68] sm:$0xff] %v2352_v1   ;;  %1438 = vmatmul.bf16.gmra.mxu2 %v1957_v63 }
 0x18e   : > { %v2927_v2 = vpop.f32.mrf.mxu3 }
 0x18f   : > { %v1311_v27 = vadd.f32 %v2927_v2, %v2823_v39 }
 0x190   : > { %v1399_v3 = vpop.f32.mrf.mxu2  ;;  %v1063_v8 = vpop.f32.mrf.mxu0 }
 0x191   : > { %v1232_v11 = vpop.f32.mrf.mxu1  ;;  %v1400_v36 = vadd.f32 %v1399_v3, %v1231_v15 }
 0x192   : > { %v1233_v28 = vadd.f32 %v1232_v11, %v1063_v8 }
 0x196   : > { %v2937_v29 = vpop.f32.mrf.mxu3 }
 0x197   : > { %v1313_v49 = vadd.f32 %v2937_v29, %v2833_v55 }
 0x198   : > { %v1401_v30 = vpop.f32.mrf.mxu2  ;;  %v1066_v40 = vpop.f32.mrf.mxu0 }
 0x199   : > { %v1402_v38 = vadd.f32 %v1401_v30, %v1233_v28  ;;  %v1235_v44 = vpop.f32.mrf.mxu1 }
 0x19a   : > { %v1236_v57 = vadd.f32 %v1235_v44, %v1066_v40 }
 0x19b   : > { %v2357_v47 = vpack.c.bf16 %v1402_v38, %v1400_v36  ;;  %1105 = vmatmul.bf16.gmra.mxu0 %v1961_v32  ;;  %1483 = vmatmul.bf16.gmra.mxu3 %v2065_v35 }
 0x19c   : > { %1274 = vmatmul.bf16.gmra.mxu1 %v1965_v42 }
 0x19d   : > { %2457 = vst [vmem:[%s2755_s14 + $0x70] sm:$0xff] %v2357_v47   ;;  %1443 = vmatmul.bf16.gmra.mxu2 %v1969_v43 }
 0x19e   : > { %v2940_v48 = vpop.f32.mrf.mxu3 }
 0x19f   : > { %v1316_v29 = vadd.f32 %v2940_v48, %v2836_v4 }
 0x1a0   : > { %v1404_v51 = vpop.f32.mrf.mxu2  ;;  %v1068_v52 = vpop.f32.mrf.mxu0 }
 0x1a1   : > { %v1237_v53 = vpop.f32.mrf.mxu1  ;;  %v1405_v63 = vadd.f32 %v1404_v51, %v1236_v57 }
 0x1a2   : > { %v1238_v58 = vadd.f32 %v1237_v53, %v1068_v52 }
 0x1a6   : > { %v2942_v59 = vpop.f32.mrf.mxu3 }
 0x1a8   : > { %v1406_v62 = vpop.f32.mrf.mxu2  ;;  %v1071_v1 = vpop.f32.mrf.mxu0 }
 0x1a9   : > { %v1407_v0 = vadd.f32 %v1406_v62, %v1238_v58  ;;  %v1240_v3 = vpop.f32.mrf.mxu1 }
 0x1aa   : > { %v1241_v16 = vadd.f32 %v1240_v3, %v1071_v1 }
 0x1ab   : > { %v2362_v8 = vpack.c.bf16 %v1407_v0, %v1405_v63 }
 0x1ad   : > { %2458 = vst [vmem:[%s2755_s14 + $0x78] sm:$0xff] %v2362_v8  }
 0x1ae   : > { %v1449_v11 = vpop.f32.mrf.mxu3 }
 0x1af   : > { %v1450_v25 = vadd.f32 %v1449_v11, %v1281_v17 }
 0x1b0   : > { %v1409_v12 = vpop.f32.mrf.mxu2  ;;  %v1073_v14 = vpop.f32.mrf.mxu0 }
 0x1b1   : > { %v1242_v15 = vpop.f32.mrf.mxu1  ;;  %v1410_v32 = vadd.f32 %v1409_v12, %v1241_v16 }
 0x1b2   : > { %v1243_v21 = vadd.f32 %v1242_v15, %v1073_v14 }
 0x1b6   : > { %v1451_v22 = vpop.f32.mrf.mxu3 }
 0x1b7   : > { %v1452_v30 = vadd.f32 %v1451_v22, %v1283_v19 }
 0x1b8   : > { %v1411_v28 = vpop.f32.mrf.mxu2  ;;  %v1076_v36 = vpop.f32.mrf.mxu0 }
 0x1b9   : > { %v1412_v35 = vadd.f32 %v1411_v28, %v1243_v21  ;;  %v2407_v38 = vpack.c.bf16 %v1452_v30, %v1450_v25  ;;  %v1245_v40 = vpop.f32.mrf.mxu1 }
 0x1ba   : > { %v1246_v20 = vadd.f32 %v1245_v40, %v1076_v36 }
 0x1bb   : > { %v2367_v42 = vpack.c.bf16 %v1412_v35, %v1410_v32  ;;  %2467 = vst [vmem:[%s2755_s14 + $0xc0] sm:$0xff] %v2407_v38  }
 0x1bd   : > { %2459 = vst [vmem:[%s2755_s14 + $0x80] sm:$0xff] %v2367_v42  }
 0x1be   : > { %v1454_v43 = vpop.f32.mrf.mxu3 }
 0x1bf   : > { %v1455_v53 = vadd.f32 %v1454_v43, %v1286_v37 }
 0x1c0   : > { %v1414_v44 = vpop.f32.mrf.mxu2  ;;  %v1078_v47 = vpop.f32.mrf.mxu0 }
 0x1c1   : > { %v1247_v6 = vpop.f32.mrf.mxu1  ;;  %v1415_v62 = vadd.f32 %v1414_v44, %v1246_v20 }
 0x1c2   : > { %v1248_v51 = vadd.f32 %v1247_v6, %v1078_v47 }
 0x1c6   : > { %v1456_v52 = vpop.f32.mrf.mxu3 }
 0x1c7   : > { %v1457_v58 = vadd.f32 %v1456_v52, %v1288_v54 }
 0x1c8   : > { %v1416_v57 = vpop.f32.mrf.mxu2  ;;  %v1081_v0 = vpop.f32.mrf.mxu0 }
 0x1c9   : > { %v1417_v63 = vadd.f32 %v1416_v57, %v1248_v51  ;;  %v2412_v1 = vpack.c.bf16 %v1457_v58, %v1455_v53  ;;  %v1250_v3 = vpop.f32.mrf.mxu1 }
 0x1ca   : > { %v1251_v45 = vadd.f32 %v1250_v3, %v1081_v0 }
 0x1cb   : > { %v2372_v8 = vpack.c.bf16 %v1417_v63, %v1415_v62  ;;  %2468 = vst [vmem:[%s2755_s14 + $0xc8] sm:$0xff] %v2412_v1  }
 0x1cd   : > { %2460 = vst [vmem:[%s2755_s14 + $0x88] sm:$0xff] %v2372_v8  }
 0x1ce   : > { %v1459_v11 = vpop.f32.mrf.mxu3 }
 0x1cf   : > { %v1460_v17 = vadd.f32 %v1459_v11, %v1291_v5 }
 0x1d0   : > { %v1419_v12 = vpop.f32.mrf.mxu2  ;;  %v1083_v14 = vpop.f32.mrf.mxu0 }
 0x1d1   : > { %v1252_v31 = vpop.f32.mrf.mxu1  ;;  %v1420_v22 = vadd.f32 %v1419_v12, %v1251_v45 }
 0x1d2   : > { %v1253_v15 = vadd.f32 %v1252_v31, %v1083_v14 }
 0x1d6   : > { %v1461_v16 = vpop.f32.mrf.mxu3 }
 0x1d7   : > { %v1462_v21 = vadd.f32 %v1461_v16, %v1293_v23 }
 0x1d8   : > { %v1421_v19 = vpop.f32.mrf.mxu2  ;;  %v1086_v28 = vpop.f32.mrf.mxu0 }
 0x1d9   : > { %v1422_v25 = vadd.f32 %v1421_v19, %v1253_v15  ;;  %v2417_v30 = vpack.c.bf16 %v1462_v21, %v1460_v17  ;;  %v1255_v32 = vpop.f32.mrf.mxu1 }
 0x1da   : > { %v1256_v7 = vadd.f32 %v1255_v32, %v1086_v28 }
 0x1db   : > { %v2377_v35 = vpack.c.bf16 %v1422_v25, %v1420_v22  ;;  %2469 = vst [vmem:[%s2755_s14 + $0xd0] sm:$0xff] %v2417_v30  }
 0x1dd   : > { %2461 = vst [vmem:[%s2755_s14 + $0x90] sm:$0xff] %v2377_v35  }
 0x1de   : > { %v1464_v36 = vpop.f32.mrf.mxu3 }
 0x1df   : > { %v1465_v44 = vadd.f32 %v1464_v36, %v1296_v41 }
 0x1e0   : > { %v1424_v38 = vpop.f32.mrf.mxu2  ;;  %v1088_v40 = vpop.f32.mrf.mxu0 }
 0x1e1   : > { %v1257_v56 = vpop.f32.mrf.mxu1  ;;  %v1425_v20 = vadd.f32 %v1424_v38, %v1256_v7 }
 0x1e2   : > { %v1258_v42 = vadd.f32 %v1257_v56, %v1088_v40 }
 0x1e6   : > { %v1466_v43 = vpop.f32.mrf.mxu3 }
 0x1e7   : > { %v1467_v6 = vadd.f32 %v1466_v43, %v1298_v60 }
 0x1e8   : > { %v1426_v47 = vpop.f32.mrf.mxu2  ;;  %v1091_v54 = vpop.f32.mrf.mxu0 }
 0x1e9   : > { %v1427_v37 = vadd.f32 %v1426_v47, %v1258_v42  ;;  %v2422_v51 = vpack.c.bf16 %v1467_v6, %v1465_v44  ;;  %v1260_v52 = vpop.f32.mrf.mxu1 }
 0x1ea   : > { %v1261_v34 = vadd.f32 %v1260_v52, %v1091_v54 }
 0x1eb   : > { %v2382_v53 = vpack.c.bf16 %v1427_v37, %v1425_v20  ;;  %2470 = vst [vmem:[%s2755_s14 + $0xd8] sm:$0xff] %v2422_v51  }
 0x1ed   : > { %2462 = vst [vmem:[%s2755_s14 + $0x98] sm:$0xff] %v2382_v53  }
 0x1ee   : > { %v1469_v57 = vpop.f32.mrf.mxu3 }
 0x1ef   : > { %v1470_v1 = vadd.f32 %v1469_v57, %v1301_v13  ;;  %v1318_v57 = vadd.f32 %v2942_v59, %v2846_v24 }
 0x1f0   : > { %v1429_v58 = vpop.f32.mrf.mxu2  ;;  %v1093_v62 = vpop.f32.mrf.mxu0 }
 0x1f1   : > { %v1262_v18 = vpop.f32.mrf.mxu1  ;;  %v1430_v11 = vadd.f32 %v1429_v58, %v1261_v34 }
 0x1f2   : > { %v1263_v63 = vadd.f32 %v1262_v18, %v1093_v62 }
 0x1f6   : > { %v1471_v0 = vpop.f32.mrf.mxu3 }
 0x1f7   : > { %v1472_v8 = vadd.f32 %v1471_v0, %v1303_v33 }
 0x1f8   : > { %v1431_v3 = vpop.f32.mrf.mxu2  ;;  %v1096_v14 = vpop.f32.mrf.mxu0 }
 0x1f9   : > { %v1432_v12 = vadd.f32 %v1431_v3, %v1263_v63  ;;  %v2427_v31 = vpack.c.bf16 %v1472_v8, %v1470_v1  ;;  %v1265_v45 = vpop.f32.mrf.mxu1 }
 0x1fa   : > { %v1266_v61 = vadd.f32 %v1265_v45, %v1096_v14 }
 0x1fb   : > { %v2387_v5 = vpack.c.bf16 %v1432_v12, %v1430_v11  ;;  %2471 = vst [vmem:[%s2755_s14 + $0xe0] sm:$0xff] %v2427_v31  }
 0x1fd   : > { %2463 = vst [vmem:[%s2755_s14 + $0xa0] sm:$0xff] %v2387_v5  }
 0x1fe   : > { %v1474_v23 = vpop.f32.mrf.mxu3 }
 0x1ff   : > { %v1475_v21 = vadd.f32 %v1474_v23, %v1306_v50 }
 0x200   : > { %v1434_v15 = vpop.f32.mrf.mxu2  ;;  %v1098_v16 = vpop.f32.mrf.mxu0 }
 0x201   : > { %v1267_v46 = vpop.f32.mrf.mxu1  ;;  %v1435_v28 = vadd.f32 %v1434_v15, %v1266_v61 }
 0x202   : > { %v1268_v17 = vadd.f32 %v1267_v46, %v1098_v16 }
 0x206   : > { %v1476_v19 = vpop.f32.mrf.mxu3 }
 0x207   : > { %v1477_v25 = vadd.f32 %v1476_v19, %v1308_v9 }
 0x208   : > { %v1436_v22 = vpop.f32.mrf.mxu2  ;;  %v1101_v32 = vpop.f32.mrf.mxu0 }
 0x209   : > { %v1437_v30 = vadd.f32 %v1436_v22, %v1268_v17  ;;  %v2432_v35 = vpack.c.bf16 %v1477_v25, %v1475_v21  ;;  %v1270_v36 = vpop.f32.mrf.mxu1 }
 0x20a   : > { %v1271_v26 = vadd.f32 %v1270_v36, %v1101_v32 }
 0x20b   : > { %v2392_v38 = vpack.c.bf16 %v1437_v30, %v1435_v28  ;;  %2472 = vst [vmem:[%s2755_s14 + $0xe8] sm:$0xff] %v2432_v35  }
 0x20d   : > { %2464 = vst [vmem:[%s2755_s14 + $0xa8] sm:$0xff] %v2392_v38  }
 0x20e   : > { %v1479_v40 = vpop.f32.mrf.mxu3 }
 0x20f   : > { %v1480_v42 = vadd.f32 %v1479_v40, %v1311_v27 }
 0x210   : > { %v1439_v56 = vpop.f32.mrf.mxu2  ;;  %v1103_v7 = vpop.f32.mrf.mxu0 }
 0x211   : > { %v1272_v10 = vpop.f32.mrf.mxu1  ;;  %v1440_v47 = vadd.f32 %v1439_v56, %v1271_v26 }
 0x212   : > { %v1273_v41 = vadd.f32 %v1272_v10, %v1103_v7 }
 0x216   : > { %v1481_v60 = vpop.f32.mrf.mxu3 }
 0x217   : > { %v1482_v44 = vadd.f32 %v1481_v60, %v1313_v49 }
 0x218   : > { %v1441_v43 = vpop.f32.mrf.mxu2  ;;  %v1106_v37 = vpop.f32.mrf.mxu0 }
 0x219   : > { %v1442_v6 = vadd.f32 %v1441_v43, %v1273_v41  ;;  %v2437_v20 = vpack.c.bf16 %v1482_v44, %v1480_v42  ;;  %v1275_v54 = vpop.f32.mrf.mxu1 }
 0x21a   : > { %v1276_v55 = vadd.f32 %v1275_v54, %v1106_v37 }
 0x21b   : > { %v2397_v51 = vpack.c.bf16 %v1442_v6, %v1440_v47  ;;  %2473 = vst [vmem:[%s2755_s14 + $0xf0] sm:$0xff] %v2437_v20  }
 0x21d   : > { %2465 = vst [vmem:[%s2755_s14 + $0xb0] sm:$0xff] %v2397_v51  }
 0x21e   : > { %v1484_v52 = vpop.f32.mrf.mxu3 }
 0x21f   : > { %v1485_v18 = vadd.f32 %v1484_v52, %v1316_v29 }
 0x220   : > { %v1444_v53 = vpop.f32.mrf.mxu2  ;;  %v1108_v39 = vpop.f32.mrf.mxu0 }
 0x221   : > { %v1277_v2 = vpop.f32.mrf.mxu1  ;;  %v1445_v33 = vadd.f32 %v1444_v53, %v1276_v55 }
 0x222   : > { %v1278_v58 = vadd.f32 %v1277_v2, %v1108_v39 }
 0x226   : > { %v1486_v62 = vpop.f32.mrf.mxu3 }
 0x227   : > { %v1487_v13 = vadd.f32 %v1486_v62, %v1318_v57 }
 0x228   : > { %v1446_v34 = vpop.f32.mrf.mxu2 }
 0x229   : > { %v1447_v63 = vadd.f32 %v1446_v34, %v1278_v58  ;;  %v2442_v0 = vpack.c.bf16 %v1487_v13, %v1485_v18 }
 0x22b   : > { %v2402_v1 = vpack.c.bf16 %v1447_v63, %v1445_v33  ;;  %2474 = vst [vmem:[%s2755_s14 + $0xf8] sm:$0xff] %v2442_v0  }
 0x22d   : > { %2466 = vst [vmem:[%s2755_s14 + $0xb8] sm:$0xff] %v2402_v1  }
 0x22e PF: > { %s12_s9 = sadd.s32 1, %s2514_s9  }
 0x22f   : > { %p9_p4 = scmp.ge.s32.totalorder %s12_s9, 4  }
 0x231   :  { %11 = sbr.rel (!%p9_p4) target bundleno = 1 (0x1), region = 58 }

// kernel: gcn_encoder.4
= control target key start
LH: loop header
LB: loop body
LE: loop exit
PB: predicated region body
PF: predicated region fallthrough
CT: control target
= control target key end

     0   :  { %s6033_s15 = smov 0   ;;  %s7312_s0 = inlined_call_operand.vmem [shape: bf16[1024,1024], index: 0, kind: input, shape index: {}]   ;;  %s7313_s1 = inlined_call_operand.vmem [shape: bf16[1024,128], index: 1, kind: input, shape index: {}]   ;;  %s7314_s2 = inlined_call_operand.vmem [shape: f32[1,128], index: 2, kind: input, shape index: {}]   ;;  %s7315_s3 = inlined_call_operand.vmem [shape: bf16[128,128], index: 3, kind: input, shape index: {}]   ;;  %s7316_s4 = inlined_call_operand.vmem [shape: bf16[1024,128], index: 4, kind: output, shape index: {}]  }
   0x1 LB: > { %s4121_s16 = sadd.s32 4294967295, %s6006_s15   ;;  %p4125_p0 = scmp.ge.s32.totalorder %s6006_s15, 1  ;;  %s6006_s15 = sphi %s6033_s15, %s14_s15  }
   0x2   : > { %p164_p1 = scmp.lt.s32.totalorder %s6006_s15, 3 }
   0x4   : > { %p165_p2 = pnand %p4125_p0, %p164_p1 }
   0x6   : > { %168 = sbr.rel (%p165_p2) target bundleno = 1465 (0x5b9), region = 36 }
   0xb   : > { %v5709_v0 = vld [vmem:[%s7313_s1 + $0x38] sm:$0xff]  ;;  %v5708_v1 = vld [vmem:[%s7313_s1 + $0x30] sm:$0xff]  ;;  %v5707_v2 = vld [vmem:[%s7313_s1 + $0x28] sm:$0xff]  ;;  %s4126_s23 = sshll.u32 %s4121_s16, 6 }
   0xc   : > { %5965 = vmatpush.bf16.msra.mxu1 %v5709_v0  ;;  %5966 = vmatpush.bf16.msra.mxu2 %v5709_v0  ;;  %v5706_v3 = vld [vmem:[%s7313_s1 + $0x20] sm:$0xff]  ;;  %p192_p3 = scmp.lt.s32.totalorder %s4126_s23, 127  ;;  %v5705_v4 = vld [vmem:[%s7313_s1 + $0x18] sm:$0xff]  ;;  %v5704_v5 = vld [vmem:[%s7313_s1 + $0x10] sm:$0xff] }
   0xd   : > { %5967 = vmatpush.bf16.msra.mxu3 %v5709_v0  ;;  %2256 = vmatpush.bf16.msra.mxu0 %v5709_v0  ;;  %v5703_v6 = vld [vmem:[%s7313_s1 + $0x8] sm:$0xff]  ;;  %v5702_v7 = vld [vmem:[%s7313_s1] sm:$0xff]  ;;  %v5725_v14 = vld [vmem:[%s7313_s1 + $0xb8] sm:$0xff] }
   0xe   : > { %s7424_s23 = smov (!%p192_p3, %s4126_s23), 127  ;;  %v5733_v15 = vld [vmem:[%s7313_s1 + $0xf8] sm:$0xff]  ;;  %v5724_v22 = vld [vmem:[%s7313_s1 + $0xb0] sm:$0xff]  ;;  %v5723_v26 = vld [vmem:[%s7313_s1 + $0xa8] sm:$0xff] }
   0xf   : > { %s5445_s30 = sshll.u32 %s7424_s23, 5  ;;  %v5717_v16 = vld [vmem:[%s7313_s1 + $0x78] sm:$0xff]  ;;  %v5732_v23 = vld [vmem:[%s7313_s1 + $0xf0] sm:$0xff]  ;;  %v5731_v27 = vld [vmem:[%s7313_s1 + $0xe8] sm:$0xff]  ;;  %s4130_s7 = sshll.u32 %s7424_s23, 2 }
  0x10   : > { %5968 = vmatpush.bf16.msra.mxu1 %v5708_v1  ;;  %5969 = vmatpush.bf16.msra.mxu2 %v5708_v1  ;;  %s6068_s9 = scalar_lea.vmem %s7312_s0, %s5445_s30  ;;  %v5716_v24 = vld [vmem:[%s7313_s1 + $0x70] sm:$0xff]  ;;  %v5715_v28 = vld [vmem:[%s7313_s1 + $0x68] sm:$0xff]  ;;  %v5722_v41 = vld [vmem:[%s7313_s1 + $0xa0] sm:$0xff]  ;;  %s7135_s11 = scalar_lea.vmem %s7316_s4, %s4130_s7 }
  0x11   : > { %5970 = vmatpush.bf16.msra.mxu3 %v5708_v1  ;;  %2257 = vmatpush.bf16.msra.mxu0 %v5708_v1  ;;  %v4389_v8 = vld [vmem:[%s6068_s9 + $0x200] sm:$0xf]  ;;  %v5721_v56 = vld [vmem:[%s7313_s1 + $0x98] sm:$0xff] }
  0x12   : > { %v5514_v9 = vld [vmem:[%s6068_s9 + $0x21c] sm:$0xf0]  ;;  %v5729_v57 = vld [vmem:[%s7313_s1 + $0xd8] sm:$0xff] }
  0x13   : > { %v4645_v10 = vld [vmem:[%s6068_s9 + $0x400] sm:$0xf]  ;;  %v4390_v17 = vor.u32 %v5514_v9, %v4389_v8  ;;  %v5713_v58 = vld [vmem:[%s7313_s1 + $0x58] sm:$0xff]  ;;  %v5728_v8 = vld [vmem:[%s7313_s1 + $0xd0] sm:$0xff] }
  0x14   : > { %5971 = vmatpush.bf16.msra.mxu1 %v5707_v2  ;;  %5972 = vmatpush.bf16.msra.mxu2 %v5707_v2  ;;  %v5578_v11 = vld [vmem:[%s6068_s9 + $0x41c] sm:$0xf0]  ;;  %v5712_v9 = vld [vmem:[%s7313_s1 + $0x50] sm:$0xff] }
  0x15   : > { %5973 = vmatpush.bf16.msra.mxu3 %v5707_v2  ;;  %2258 = vmatpush.bf16.msra.mxu0 %v5707_v2  ;;  %v4901_v12 = vld [vmem:[%s6068_s9 + $0x600] sm:$0xf]  ;;  %v4646_v18 = vor.u32 %v5578_v11, %v4645_v10 }
  0x16   : > { %v5642_v13 = vld [vmem:[%s6068_s9 + $0x61c] sm:$0xf0] }
  0x17   : > { %v4902_v19 = vor.u32 %v5642_v13, %v4901_v12  ;;  %v4133_v20 = vld [vmem:[%s6068_s9] sm:$0xf] }
  0x18   : > { %5974 = vmatpush.bf16.msra.mxu1 %v5706_v3  ;;  %5975 = vmatpush.bf16.msra.mxu2 %v5706_v3  ;;  %v5450_v21 = vld [vmem:[%s6068_s9 + $0x1c] sm:$0xf0] }
  0x19   : > { %5976 = vmatpush.bf16.msra.mxu3 %v5706_v3  ;;  %2259 = vmatpush.bf16.msra.mxu0 %v5706_v3  ;;  %v4134_v25 = vor.u32 %v5450_v21, %v4133_v20  ;;  %v4421_v29 = vld [vmem:[%s6068_s9 + $0x240] sm:$0xf] }
  0x1a   : > { %v5522_v30 = vld [vmem:[%s6068_s9 + $0x25c] sm:$0xf0] }
  0x1b   : > { %v4677_v31 = vld [vmem:[%s6068_s9 + $0x440] sm:$0xf]  ;;  %v4422_v35 = vor.u32 %v5522_v30, %v4421_v29 }
  0x1c   : > { %5977 = vmatpush.bf16.msra.mxu1 %v5705_v4  ;;  %5978 = vmatpush.bf16.msra.mxu2 %v5705_v4  ;;  %v5586_v32 = vld [vmem:[%s6068_s9 + $0x45c] sm:$0xf0] }
  0x1d   : > { %5979 = vmatpush.bf16.msra.mxu3 %v5705_v4  ;;  %2260 = vmatpush.bf16.msra.mxu0 %v5705_v4  ;;  %v4933_v33 = vld [vmem:[%s6068_s9 + $0x640] sm:$0xf]  ;;  %v4678_v36 = vor.u32 %v5586_v32, %v4677_v31 }
  0x1e   : > { %v5650_v34 = vld [vmem:[%s6068_s9 + $0x65c] sm:$0xf0] }
  0x1f   : > { %v4934_v37 = vor.u32 %v5650_v34, %v4933_v33  ;;  %v4165_v38 = vld [vmem:[%s6068_s9 + $0x40] sm:$0xf] }
  0x20   : > { %5980 = vmatpush.bf16.msra.mxu1 %v5704_v5  ;;  %5981 = vmatpush.bf16.msra.mxu2 %v5704_v5  ;;  %v5458_v39 = vld [vmem:[%s6068_s9 + $0x5c] sm:$0xf0] }
  0x21   : > { %5982 = vmatpush.bf16.msra.mxu3 %v5704_v5  ;;  %2261 = vmatpush.bf16.msra.mxu0 %v5704_v5  ;;  %v4166_v40 = vor.u32 %v5458_v39, %v4165_v38  ;;  %v5730_v42 = vld [vmem:[%s7313_s1 + $0xe0] sm:$0xff] }
  0x22   : > { %v5714_v43 = vld [vmem:[%s7313_s1 + $0x60] sm:$0xff] }
  0x23   : > { %v4453_v44 = vld [vmem:[%s6068_s9 + $0x280] sm:$0xf] }
  0x24   : > { %5983 = vmatpush.bf16.msra.mxu1 %v5703_v6  ;;  %5984 = vmatpush.bf16.msra.mxu2 %v5703_v6  ;;  %v5530_v45 = vld [vmem:[%s6068_s9 + $0x29c] sm:$0xf0] }
  0x25   : > { %5985 = vmatpush.bf16.msra.mxu3 %v5703_v6  ;;  %2262 = vmatpush.bf16.msra.mxu0 %v5703_v6  ;;  %v4709_v46 = vld [vmem:[%s6068_s9 + $0x480] sm:$0xf]  ;;  %v4454_v50 = vor.u32 %v5530_v45, %v4453_v44 }
  0x26   : > { %v5594_v47 = vld [vmem:[%s6068_s9 + $0x49c] sm:$0xf0] }
  0x27   : > { %v4965_v48 = vld [vmem:[%s6068_s9 + $0x680] sm:$0xf]  ;;  %v4710_v51 = vor.u32 %v5594_v47, %v4709_v46 }
  0x28   : > { %5986 = vmatpush.bf16.msra.mxu1 %v5702_v7  ;;  %5987 = vmatpush.bf16.msra.mxu2 %v5702_v7  ;;  %v5658_v49 = vld [vmem:[%s6068_s9 + $0x69c] sm:$0xf0] }
  0x29   : > { %5988 = vmatpush.bf16.msra.mxu3 %v5702_v7  ;;  %2263 = vmatpush.bf16.msra.mxu0 %v5702_v7  ;;  %v4966_v52 = vor.u32 %v5658_v49, %v4965_v48  ;;  %v4197_v53 = vld [vmem:[%s6068_s9 + $0x80] sm:$0xf]  ;;  %v5720_v7 = vld [vmem:[%s7313_s1 + $0x90] sm:$0xff]  ;;  %v5737_v48 = vld [vmem:[%s7313_s1 + $0x118] sm:$0xff] }
  0x2a   : > { %v5466_v54 = vld [vmem:[%s6068_s9 + $0x9c] sm:$0xf0] }
  0x2b   : > { %2304 = vmatmul.bf16.vlgmr.msra.gmra.mxu1 %v4390_v17  ;;  %2344 = vmatmul.bf16.vlgmr.msra.gmra.mxu2 %v4646_v18  ;;  %v4198_v55 = vor.u32 %v5466_v54, %v4197_v53  ;;  %v4485_v59 = vld [vmem:[%s6068_s9 + $0x2c0] sm:$0xf] }
  0x2c   : > { %2594 = vmatpush.bf16.msrb.mxu2 %v5725_v14  ;;  %2425 = vmatpush.bf16.msrb.mxu1 %v5717_v16  ;;  %v5538_v60 = vld [vmem:[%s6068_s9 + $0x2dc] sm:$0xf0] }
  0x2d   : > { %2763 = vmatpush.bf16.msrb.mxu3 %v5733_v15  ;;  %2264 = vmatmul.bf16.vlgmr.msra.gmra.mxu0 %v4134_v25  ;;  %v4741_v61 = vld [vmem:[%s6068_s9 + $0x4c0] sm:$0xf]  ;;  %v4486_v1 = vor.u32 %v5538_v60, %v4485_v59  ;;  %v5741_v25 = vld [vmem:[%s7313_s1 + $0x138] sm:$0xff]  ;;  %v5735_v60 = vld [vmem:[%s7313_s1 + $0x108] sm:$0xff] }
  0x2e   : > { %2384 = vmatmul.bf16.vlgmr.msra.gmra.mxu3 %v4902_v19  ;;  %v5602_v62 = vld [vmem:[%s6068_s9 + $0x4dc] sm:$0xf0]  ;;  %2932 = vmatpush.bf16.msrb.mxu0 %v5741_v25  ;;  %v5765_v59 = vld [vmem:[%s7313_s1 + $0x1f8] sm:$0xff] }
  0x2f   : > { %v4997_v63 = vld [vmem:[%s6068_s9 + $0x6c0] sm:$0xf]  ;;  %v4742_v2 = vor.u32 %v5602_v62, %v4741_v61  ;;  %v5749_v61 = vld [vmem:[%s7313_s1 + $0x178] sm:$0xff] }
  0x30   : > { %2595 = vmatpush.bf16.msrb.mxu2 %v5724_v22  ;;  %2426 = vmatpush.bf16.msrb.mxu1 %v5716_v24  ;;  %v5666_v0 = vld [vmem:[%s6068_s9 + $0x6dc] sm:$0xf0]  ;;  %v5719_v22 = vld [vmem:[%s7313_s1 + $0x88] sm:$0xff] }
  0x31   : > { %2764 = vmatpush.bf16.msrb.mxu3 %v5732_v23  ;;  %v4998_v3 = vor.u32 %v5666_v0, %v4997_v63  ;;  %v4229_v4 = vld [vmem:[%s6068_s9 + $0xc0] sm:$0xf]  ;;  %v5727_v23 = vld [vmem:[%s7313_s1 + $0xc8] sm:$0xff] }
  0x32   : > { %v5474_v5 = vld [vmem:[%s6068_s9 + $0xdc] sm:$0xf0]  ;;  %v5711_v24 = vld [vmem:[%s7313_s1 + $0x48] sm:$0xff] }
  0x33   : > { %v4230_v6 = vor.u32 %v5474_v5, %v4229_v4  ;;  %v4517_v10 = vld [vmem:[%s6068_s9 + $0x300] sm:$0xf] }
  0x34   : > { %2596 = vmatpush.bf16.msrb.mxu2 %v5723_v26  ;;  %2427 = vmatpush.bf16.msrb.mxu1 %v5715_v28  ;;  %v5546_v11 = vld [vmem:[%s6068_s9 + $0x31c] sm:$0xf0]  ;;  %v5740_v26 = vld [vmem:[%s7313_s1 + $0x130] sm:$0xff] }
  0x35   : > { %2765 = vmatpush.bf16.msrb.mxu3 %v5731_v27  ;;  %v4773_v12 = vld [vmem:[%s6068_s9 + $0x500] sm:$0xf]  ;;  %v4518_v16 = vor.u32 %v5546_v11, %v4517_v10  ;;  %2933 = vmatpush.bf16.msrb.mxu0 %v5740_v26  ;;  %v5446_v11 = vld [vmem:[%s6068_s9 + $0x4] sm:$0xf] }
  0x36   : > { %v5610_v13 = vld [vmem:[%s6068_s9 + $0x51c] sm:$0xf0] }
  0x37   : > { %v5029_v14 = vld [vmem:[%s6068_s9 + $0x700] sm:$0xf]  ;;  %v4774_v17 = vor.u32 %v5610_v13, %v4773_v12  ;;  %v4135_v12 = vld [vmem:[%s6068_s9 + $0x20] sm:$0xf0]  ;;  %v4141_v13 = vld [vmem:[%s6068_s9 + $0x8] sm:$0xf] }
  0x38   : > { %2597 = vmatpush.bf16.msrb.mxu2 %v5722_v41  ;;  %2428 = vmatpush.bf16.msrb.mxu1 %v5714_v43  ;;  %v5674_v15 = vld [vmem:[%s6068_s9 + $0x71c] sm:$0xf0]  ;;  %v5739_v41 = vld [vmem:[%s7313_s1 + $0x128] sm:$0xff] }
  0x39   : > { %2766 = vmatpush.bf16.msrb.mxu3 %v5730_v42  ;;  %v5030_v18 = vor.u32 %v5674_v15, %v5029_v14  ;;  %v4261_v19 = vld [vmem:[%s6068_s9 + $0x100] sm:$0xf]  ;;  %2934 = vmatpush.bf16.msrb.mxu0 %v5739_v41  ;;  %v5451_v14 = vld [vmem:[%s6068_s9 + $0x24] sm:$0xf0]  ;;  %v5447_v15 = vld [vmem:[%s6068_s9 + $0xc] sm:$0xf] }
  0x3a   : > { %v5482_v20 = vld [vmem:[%s6068_s9 + $0x11c] sm:$0xf0]  ;;  %v4181_v41 = vld [vmem:[%s6068_s9 + $0x50] sm:$0xf] }
  0x3b   : > { %2309 = vmatmul.bf16.gmra.mxu1 %v4422_v35  ;;  %2349 = vmatmul.bf16.gmra.mxu2 %v4678_v36  ;;  %v4262_v21 = vor.u32 %v5482_v20, %v4261_v19  ;;  %v4549_v27 = vld [vmem:[%s6068_s9 + $0x340] sm:$0xf] }
  0x3c   : > { %2598 = vmatpush.bf16.msrb.mxu2 %v5721_v56  ;;  %2429 = vmatpush.bf16.msrb.mxu1 %v5713_v58  ;;  %v5554_v28 = vld [vmem:[%s6068_s9 + $0x35c] sm:$0xf0]  ;;  %v5736_v56 = vld [vmem:[%s7313_s1 + $0x110] sm:$0xff]  ;;  %v5757_v58 = vld [vmem:[%s7313_s1 + $0x1b8] sm:$0xff] }
  0x3d   : > { %2269 = vmatmul.bf16.gmra.mxu0 %v4166_v40  ;;  %2767 = vmatpush.bf16.msrb.mxu3 %v5729_v57  ;;  %v4805_v29 = vld [vmem:[%s6068_s9 + $0x540] sm:$0xf]  ;;  %v4550_v33 = vor.u32 %v5554_v28, %v4549_v27  ;;  %v5454_v28 = vld [vmem:[%s6068_s9 + $0x44] sm:$0xf] }
  0x3e   : > { %2389 = vmatmul.bf16.gmra.mxu3 %v4934_v37  ;;  %v5618_v30 = vld [vmem:[%s6068_s9 + $0x55c] sm:$0xf0] }
  0x3f   : > { %v5061_v31 = vld [vmem:[%s6068_s9 + $0x740] sm:$0xf]  ;;  %v4806_v34 = vor.u32 %v5618_v30, %v4805_v29  ;;  %v4167_v30 = vld [vmem:[%s6068_s9 + $0x60] sm:$0xf0] }
  0x40   : > { %2599 = vmatpush.bf16.msrb.mxu2 %v5720_v7  ;;  %2430 = vmatpush.bf16.msrb.mxu1 %v5712_v9  ;;  %v5682_v32 = vld [vmem:[%s6068_s9 + $0x75c] sm:$0xf0] }
  0x41   : > { %2768 = vmatpush.bf16.msrb.mxu3 %v5728_v8  ;;  %v5062_v35 = vor.u32 %v5682_v32, %v5061_v31  ;;  %v4293_v36 = vld [vmem:[%s6068_s9 + $0x140] sm:$0xf]  ;;  %v4173_v31 = vld [vmem:[%s6068_s9 + $0x48] sm:$0xf] }
  0x42   : > { %v5490_v37 = vld [vmem:[%s6068_s9 + $0x15c] sm:$0xf0]  ;;  %v5459_v32 = vld [vmem:[%s6068_s9 + $0x64] sm:$0xf0] }
  0x43   : > { %v4294_v38 = vor.u32 %v5490_v37, %v4293_v36  ;;  %v5718_v39 = vld [vmem:[%s7313_s1 + $0x80] sm:$0xff]  ;;  %v4170_v37 = vor.u32 %v5454_v28, %v4167_v30 }
  0x44   : > { %2600 = vmatpush.bf16.msrb.mxu2 %v5719_v22  ;;  %2431 = vmatpush.bf16.msrb.mxu1 %v5711_v24  ;;  %v5726_v40 = vld [vmem:[%s7313_s1 + $0xc0] sm:$0xff]  ;;  %v5452_v22 = vld [vmem:[%s6068_s9 + $0x2c] sm:$0xf0] }
  0x45   : > { %2769 = vmatpush.bf16.msrb.mxu3 %v5727_v23  ;;  %v5710_v42 = vld [vmem:[%s7313_s1 + $0x40] sm:$0xff] }
  0x46   : > { %v5738_v43 = vld [vmem:[%s7313_s1 + $0x120] sm:$0xff] }
  0x47   : > { %v4581_v44 = vld [vmem:[%s6068_s9 + $0x380] sm:$0xf]  ;;  %2935 = vmatpush.bf16.msrb.mxu0 %v5738_v43 }
  0x48   : > { %2601 = vmatpush.bf16.msrb.mxu2 %v5718_v39  ;;  %2432 = vmatpush.bf16.msrb.mxu1 %v5710_v42  ;;  %v5562_v45 = vld [vmem:[%s6068_s9 + $0x39c] sm:$0xf0]  ;;  %v5460_v42 = vld [vmem:[%s6068_s9 + $0x6c] sm:$0xf0] }
  0x49   : > { %2770 = vmatpush.bf16.msrb.mxu3 %v5726_v40  ;;  %v4837_v46 = vld [vmem:[%s6068_s9 + $0x580] sm:$0xf]  ;;  %v4182_v43 = vor.u32 %v5460_v42, %v4181_v41  ;;  %v5479_v41 = vld [vmem:[%s6068_s9 + $0x10c] sm:$0xf] }
  0x4a   : > { %v5626_v47 = vld [vmem:[%s6068_s9 + $0x59c] sm:$0xf0]  ;;  %v4271_v42 = vld [vmem:[%s6068_s9 + $0x128] sm:$0xf0] }
  0x4b   : > { %2314 = vmatmul.bf16.gmra.mxu1 %v4454_v50  ;;  %2354 = vmatmul.bf16.gmra.mxu2 %v4710_v51  ;;  %v5093_v49 = vld [vmem:[%s6068_s9 + $0x780] sm:$0xf]  ;;  %v4582_v51 = vor.u32 %v5562_v45, %v4581_v44 }
  0x4c   : > { %v5690_v50 = vld [vmem:[%s6068_s9 + $0x79c] sm:$0xf0]  ;;  %2936 = vmatpush.bf16.msrb.mxu0 %v5737_v48  ;;  %3270 = vmatpush.bf16.msra.mxu2 %v5757_v58  ;;  %v5462_v48 = vld [vmem:[%s6068_s9 + $0x84] sm:$0xf] }
  0x4d   : > { %2274 = vmatmul.bf16.gmra.mxu0 %v4198_v55  ;;  %v5094_v53 = vor.u32 %v5690_v50, %v5093_v49  ;;  %v4325_v54 = vld [vmem:[%s6068_s9 + $0x180] sm:$0xf]  ;;  %3439 = vmatpush.bf16.msra.mxu3 %v5765_v59  ;;  %v4199_v50 = vld [vmem:[%s6068_s9 + $0xa0] sm:$0xf0] }
  0x4e   : > { %2394 = vmatmul.bf16.gmra.mxu3 %v4966_v52  ;;  %v4838_v52 = vor.u32 %v5626_v47, %v4837_v46  ;;  %v5498_v55 = vld [vmem:[%s6068_s9 + $0x19c] sm:$0xf0]  ;;  %3101 = vmatpush.bf16.msra.mxu1 %v5749_v61  ;;  %v4213_v61 = vld [vmem:[%s6068_s9 + $0x90] sm:$0xf] }
  0x4f   : > { %v4326_v57 = vor.u32 %v5498_v55, %v4325_v54  ;;  %v5734_v62 = vld [vmem:[%s7313_s1 + $0x100] sm:$0xff]  ;;  %v4207_v54 = vld [vmem:[%s6068_s9 + $0xa8] sm:$0xf0] }
  0x50   : > { %2937 = vmatpush.bf16.msrb.mxu0 %v5736_v56  ;;  %v4613_v63 = vld [vmem:[%s6068_s9 + $0x3c0] sm:$0xf] }
  0x51   : > { %v5570_v0 = vld [vmem:[%s6068_s9 + $0x3dc] sm:$0xf0] }
  0x52   : > { %v5698_v4 = vld [vmem:[%s6068_s9 + $0x7dc] sm:$0xf0]  ;;  %v4614_v5 = vor.u32 %v5570_v0, %v4613_v63 }
  0x53   : > { %v4357_v8 = vld [vmem:[%s6068_s9 + $0x1c0] sm:$0xf] }
  0x54   : > { %2938 = vmatpush.bf16.msrb.mxu0 %v5735_v60  ;;  %v5506_v9 = vld [vmem:[%s6068_s9 + $0x1dc] sm:$0xf0] }
  0x55   : > { %v4358_v10 = vor.u32 %v5506_v9, %v4357_v8  ;;  %v4231_v9 = vld [vmem:[%s6068_s9 + $0xe0] sm:$0xf0] }
  0x58   : > { %2939 = vmatpush.bf16.msrb.mxu0 %v5734_v62  ;;  %v5468_v62 = vld [vmem:[%s6068_s9 + $0xac] sm:$0xf0] }
  0x59   : > { %v4214_v63 = vor.u32 %v5468_v62, %v4213_v61 }
  0x5b   : > { %2319 = vmatmul.bf16.gmra.mxu1 %v4486_v1  ;;  %2359 = vmatmul.bf16.gmra.mxu2 %v4742_v2  ;;  %v4869_v1 = vld [vmem:[%s6068_s9 + $0x5c0] sm:$0xf] }
  0x5c   : > { %v5634_v2 = vld [vmem:[%s6068_s9 + $0x5dc] sm:$0xf0] }
  0x5d   : > { %2279 = vmatmul.bf16.gmra.mxu0 %v4230_v6  ;;  %v4870_v6 = vor.u32 %v5634_v2, %v4869_v1  ;;  %v5756_v1 = vld [vmem:[%s7313_s1 + $0x1b0] sm:$0xff] }
  0x5e   : > { %2399 = vmatmul.bf16.gmra.mxu3 %v4998_v3  ;;  %v5125_v3 = vld [vmem:[%s6068_s9 + $0x7c0] sm:$0xf]  ;;  %v5764_v2 = vld [vmem:[%s7313_s1 + $0x1f0] sm:$0xff]  ;;  %3271 = vmatpush.bf16.msra.mxu2 %v5756_v1  ;;  %v5486_v1 = vld [vmem:[%s6068_s9 + $0x144] sm:$0xf] }
  0x5f   : > { %v5126_v7 = vor.u32 %v5698_v4, %v5125_v3  ;;  %3440 = vmatpush.bf16.msra.mxu3 %v5764_v2 }
  0x6b   : > { %2324 = vmatmul.bf16.gmra.mxu1 %v4518_v16  ;;  %2364 = vmatmul.bf16.gmra.mxu2 %v4774_v17  ;;  %v4143_v16 = vld [vmem:[%s6068_s9 + $0x28] sm:$0xf0]  ;;  %v4138_v17 = vor.u32 %v5446_v11, %v4135_v12  ;;  %v5475_v11 = vld [vmem:[%s6068_s9 + $0xe4] sm:$0xf0] }
  0x6c   : > { %v4146_v20 = vor.u32 %v5447_v15, %v4143_v16  ;;  %v5471_v12 = vld [vmem:[%s6068_s9 + $0xcc] sm:$0xf] }
  0x6d   : > { %2284 = vmatmul.bf16.gmra.mxu0 %v4262_v21  ;;  %v4149_v21 = vld [vmem:[%s6068_s9 + $0x10] sm:$0xf] }
  0x6e   : > { %2404 = vmatmul.bf16.gmra.mxu3 %v5030_v18  ;;  %v4142_v18 = vor.u32 %v5451_v14, %v4141_v13  ;;  %v4150_v23 = vor.u32 %v5452_v22, %v4149_v21  ;;  %v4239_v13 = vld [vmem:[%s6068_s9 + $0xe8] sm:$0xf0]  ;;  %v4245_v21 = vld [vmem:[%s6068_s9 + $0xd0] sm:$0xf] }
  0x6f   : > { %v5476_v22 = vld [vmem:[%s6068_s9 + $0xec] sm:$0xf0] }
  0x7b   : > { %2329 = vmatmul.bf16.gmra.mxu1 %v4550_v33  ;;  %2369 = vmatmul.bf16.gmra.mxu2 %v4806_v34  ;;  %v5455_v33 = vld [vmem:[%s6068_s9 + $0x4c] sm:$0xf] }
  0x7c   : > { %v4175_v34 = vld [vmem:[%s6068_s9 + $0x68] sm:$0xf0] }
  0x7d   : > { %2289 = vmatmul.bf16.gmra.mxu0 %v4294_v38  ;;  %v4174_v38 = vor.u32 %v5459_v32, %v4173_v31  ;;  %v4178_v40 = vor.u32 %v5455_v33, %v4175_v34  ;;  %v5478_v33 = vld [vmem:[%s6068_s9 + $0x104] sm:$0xf] }
  0x7e   : > { %2409 = vmatmul.bf16.gmra.mxu3 %v5062_v35 }
  0x8b   : > { %2334 = vmatmul.bf16.gmra.mxu1 %v4582_v51  ;;  %2374 = vmatmul.bf16.gmra.mxu2 %v4838_v52  ;;  %v4205_v51 = vld [vmem:[%s6068_s9 + $0x88] sm:$0xf] }
  0x8c   : > { %v5467_v52 = vld [vmem:[%s6068_s9 + $0xa4] sm:$0xf0] }
  0x8d   : > { %2294 = vmatmul.bf16.gmra.mxu0 %v4326_v57  ;;  %v4202_v57 = vor.u32 %v5462_v48, %v4199_v50  ;;  %v4206_v58 = vor.u32 %v5467_v52, %v4205_v51 }
  0x8e   : > { %2414 = vmatmul.bf16.gmra.mxu3 %v5094_v53  ;;  %v5463_v53 = vld [vmem:[%s6068_s9 + $0x8c] sm:$0xf] }
  0x8f   : > { %v4210_v60 = vor.u32 %v5463_v53, %v4207_v54  ;;  %v4274_v53 = vor.u32 %v5479_v41, %v4271_v42  ;;  %v4277_v54 = vld [vmem:[%s6068_s9 + $0x110] sm:$0xf]  ;;  %v5494_v42 = vld [vmem:[%s6068_s9 + $0x184] sm:$0xf] }
  0x9b   : > { %2339 = vmatmul.bf16.gmra.mxu1 %v4614_v5  ;;  %2379 = vmatmul.bf16.gmra.mxu2 %v4870_v6  ;;  %v5748_v6 = vld [vmem:[%s7313_s1 + $0x170] sm:$0xff] }
  0x9c   : > { %3102 = vmatpush.bf16.msra.mxu1 %v5748_v6  ;;  %v4295_v6 = vld [vmem:[%s6068_s9 + $0x160] sm:$0xf0] }
  0x9d   : > { %2299 = vmatmul.bf16.gmra.mxu0 %v4358_v10  ;;  %v4237_v10 = vld [vmem:[%s6068_s9 + $0xc8] sm:$0xf] }
  0x9e   : > { %2419 = vmatmul.bf16.gmra.mxu3 %v5126_v7  ;;  %v5470_v7 = vld [vmem:[%s6068_s9 + $0xc4] sm:$0xf] }
  0x9f   : > { %v4234_v16 = vor.u32 %v5470_v7, %v4231_v9  ;;  %v4301_v7 = vld [vmem:[%s6068_s9 + $0x148] sm:$0xf] }
  0xa0   : > { %v5491_v9 = vld [vmem:[%s6068_s9 + $0x164] sm:$0xf0] }
  0xa8   : > { %v6248_v19 = vpop.f32.mrf.mxu1 }
  0xaa   : > { %v6252_v24 = vpop.f32.mrf.mxu0 }
  0xab   : > { %2433 = vmatmul.bf16.vlgmr.msrb.gmra.mxu1 %v4138_v17  ;;  %2602 = vmatmul.bf16.vlgmr.msrb.gmra.mxu2 %v4142_v18  ;;  %v4238_v17 = vor.u32 %v5475_v11, %v4237_v10  ;;  %v5487_v10 = vld [vmem:[%s6068_s9 + $0x14c] sm:$0xf] }
  0xac   : > { %v4303_v11 = vld [vmem:[%s6068_s9 + $0x168] sm:$0xf0] }
  0xad   : > { %2940 = vmatmul.bf16.vlgmr.msrb.gmra.mxu0 %v4150_v23  ;;  %v4246_v23 = vor.u32 %v5476_v22, %v4245_v21  ;;  %v4306_v21 = vor.u32 %v5487_v10, %v4303_v11  ;;  %v4309_v22 = vld [vmem:[%s6068_s9 + $0x150] sm:$0xf] }
  0xae   : > { %2771 = vmatmul.bf16.vlgmr.msrb.gmra.mxu3 %v4146_v20  ;;  %v6254_v25 = vpop.f32.mrf.mxu2  ;;  %v4242_v20 = vor.u32 %v5471_v12, %v4239_v13 }
  0xb0   : > { %v6258_v27 = vpop.f32.mrf.mxu1 }
  0xb1   : > { %v6256_v26 = vpop.f32.mrf.mxu3 }
  0xb2   : > { %7317 = vst [vmem:[#allocation2_spill] sm:$0xff] %v6256_v26  ;;  %v6261_v29 = vpop.f32.mrf.mxu0 }
  0xb6   : > { %v6268_v35 = vpop.f32.mrf.mxu2 }
  0xb8   : > { %v6272_v39 = vpop.f32.mrf.mxu1 }
  0xb9   : > { %v6270_v36 = vpop.f32.mrf.mxu3 }
  0xba   : > { %7318 = vst [vmem:[#allocation3_spill] sm:$0xff] %v6270_v36  ;;  %v6276_v44 = vpop.f32.mrf.mxu0  ;;  %v4405_v36 = vld [vmem:[%s6068_s9 + $0x210] sm:$0xf] }
  0xbb   : > { %2438 = vmatmul.bf16.gmra.mxu1 %v4170_v37  ;;  %2607 = vmatmul.bf16.gmra.mxu2 %v4174_v38  ;;  %v4263_v37 = vld [vmem:[%s6068_s9 + $0x120] sm:$0xf0]  ;;  %v4269_v38 = vld [vmem:[%s6068_s9 + $0x108] sm:$0xf] }
  0xbc   : > { %v4266_v50 = vor.u32 %v5478_v33, %v4263_v37 }
  0xbd   : > { %2945 = vmatmul.bf16.gmra.mxu0 %v4182_v43 }
  0xbe   : > { %2776 = vmatmul.bf16.gmra.mxu3 %v4178_v40  ;;  %v6278_v45 = vpop.f32.mrf.mxu2  ;;  %v5483_v40 = vld [vmem:[%s6068_s9 + $0x124] sm:$0xf0] }
  0xbf   : > { %v4270_v51 = vor.u32 %v5483_v40, %v4269_v38 }
  0xc0   : > { %v6282_v47 = vpop.f32.mrf.mxu1 }
  0xc1   : > { %v6280_v46 = vpop.f32.mrf.mxu3 }
  0xc2   : > { %7319 = vst [vmem:[#allocation4_spill] sm:$0xff] %v6280_v46  ;;  %v6285_v49 = vpop.f32.mrf.mxu0 }
  0xc6   : > { %v6292_v55 = vpop.f32.mrf.mxu2 }
  0xc8   : > { %v6296_v59 = vpop.f32.mrf.mxu1 }
  0xc9   : > { %v6294_v56 = vpop.f32.mrf.mxu3 }
  0xca   : > { %7320 = vst [vmem:[#allocation5_spill] sm:$0xff] %v6294_v56  ;;  %v6300_v0 = vpop.f32.mrf.mxu0 }
  0xcb   : > { %2443 = vmatmul.bf16.gmra.mxu1 %v4202_v57  ;;  %2612 = vmatmul.bf16.gmra.mxu2 %v4206_v58  ;;  %v5484_v57 = vld [vmem:[%s6068_s9 + $0x12c] sm:$0xf0] }
  0xcc   : > { %v4278_v58 = vor.u32 %v5484_v57, %v4277_v54  ;;  %v5499_v54 = vld [vmem:[%s6068_s9 + $0x1a4] sm:$0xf0]  ;;  %v5495_v57 = vld [vmem:[%s6068_s9 + $0x18c] sm:$0xf] }
  0xcd   : > { %2950 = vmatmul.bf16.gmra.mxu0 %v4214_v63 }
  0xce   : > { %2781 = vmatmul.bf16.gmra.mxu3 %v4210_v60  ;;  %v6308_v3 = vpop.f32.mrf.mxu2 }
  0xd0   : > { %v6312_v5 = vpop.f32.mrf.mxu1 }
  0xd1   : > { %v6310_v4 = vpop.f32.mrf.mxu3 }
  0xd2   : > { %7321 = vst [vmem:[#allocation6_spill] sm:$0xff] %v6310_v4  ;;  %v6318_v8 = vpop.f32.mrf.mxu0 }
  0xd6   : > { %v6325_v14 = vpop.f32.mrf.mxu2 }
  0xd8   : > { %v6329_v18 = vpop.f32.mrf.mxu1 }
  0xd9   : > { %v6327_v15 = vpop.f32.mrf.mxu3 }
  0xda   : > { %7322 = vst [vmem:[#allocation7_spill] sm:$0xff] %v6327_v15  ;;  %v6333_v28 = vpop.f32.mrf.mxu0 }
  0xdb   : > { %2448 = vmatmul.bf16.gmra.mxu1 %v4234_v16  ;;  %2617 = vmatmul.bf16.gmra.mxu2 %v4238_v17  ;;  %v4298_v16 = vor.u32 %v5486_v1, %v4295_v6  ;;  %v4302_v17 = vor.u32 %v5491_v9, %v4301_v7 }
  0xdd   : > { %2955 = vmatmul.bf16.gmra.mxu0 %v4246_v23  ;;  %v5492_v23 = vld [vmem:[%s6068_s9 + $0x16c] sm:$0xf0] }
  0xde   : > { %2786 = vmatmul.bf16.gmra.mxu3 %v4242_v20  ;;  %v6335_v30 = vpop.f32.mrf.mxu2  ;;  %v4310_v33 = vor.u32 %v5492_v23, %v4309_v22  ;;  %v5755_v23 = vld [vmem:[%s7313_s1 + $0x1a8] sm:$0xff] }
  0xdf   : > { %3272 = vmatpush.bf16.msra.mxu2 %v5755_v23 }
  0xe0   : > { %v6339_v32 = vpop.f32.mrf.mxu1 }
  0xe1   : > { %v6337_v31 = vpop.f32.mrf.mxu3 }
  0xe2   : > { %7323 = vst [vmem:[#allocation8_spill] sm:$0xff] %v6337_v31  ;;  %v6342_v34 = vpop.f32.mrf.mxu0 }
  0xe6   : > { %v6349_v43 = vpop.f32.mrf.mxu2 }
  0xe8   : > { %v6353_v52 = vpop.f32.mrf.mxu1 }
  0xe9   : > { %v6351_v48 = vpop.f32.mrf.mxu3 }
  0xea   : > { %7324 = vst [vmem:[#allocation9_spill] sm:$0xff] %v6351_v48  ;;  %v6357_v60 = vpop.f32.mrf.mxu0 }
  0xeb   : > { %2453 = vmatmul.bf16.gmra.mxu1 %v4266_v50  ;;  %2622 = vmatmul.bf16.gmra.mxu2 %v4270_v51  ;;  %v4327_v51 = vld [vmem:[%s6068_s9 + $0x1a0] sm:$0xf0] }
  0xec   : > { %v4330_v7 = vor.u32 %v5494_v42, %v4327_v51 }
  0xed   : > { %2960 = vmatmul.bf16.gmra.mxu0 %v4278_v58  ;;  %v4335_v58 = vld [vmem:[%s6068_s9 + $0x1a8] sm:$0xf0] }
  0xee   : > { %2791 = vmatmul.bf16.gmra.mxu3 %v4274_v53  ;;  %v6359_v61 = vpop.f32.mrf.mxu2  ;;  %v4333_v53 = vld [vmem:[%s6068_s9 + $0x188] sm:$0xf]  ;;  %v4338_v11 = vor.u32 %v5495_v57, %v4335_v58  ;;  %v5502_v57 = vld [vmem:[%s6068_s9 + $0x1c4] sm:$0xf] }
  0xef   : > { %v4334_v9 = vor.u32 %v5499_v54, %v4333_v53  ;;  %v5747_v54 = vld [vmem:[%s7313_s1 + $0x168] sm:$0xff] }
  0xf0   : > { %v6363_v63 = vpop.f32.mrf.mxu1  ;;  %3103 = vmatpush.bf16.msra.mxu1 %v5747_v54  ;;  %v5508_v54 = vld [vmem:[%s6068_s9 + $0x1ec] sm:$0xf0] }
  0xf1   : > { %v6361_v62 = vpop.f32.mrf.mxu3 }
  0xf2   : > { %7325 = vst [vmem:[#allocation10_spill] sm:$0xff] %v6361_v62  ;;  %v6366_v2 = vpop.f32.mrf.mxu0 }
  0xf6   : > { %v6373_v12 = vpop.f32.mrf.mxu2 }
  0xf8   : > { %v6377_v20 = vpop.f32.mrf.mxu1 }
  0xf9   : > { %v6375_v13 = vpop.f32.mrf.mxu3 }
  0xfa   : > { %7326 = vst [vmem:[#allocation11_spill] sm:$0xff] %v6375_v13  ;;  %v6381_v37 = vpop.f32.mrf.mxu0  ;;  %v4373_v13 = vld [vmem:[%s6068_s9 + $0x1d0] sm:$0xf] }
  0xfb   : > { %2458 = vmatmul.bf16.gmra.mxu1 %v4298_v16  ;;  %2627 = vmatmul.bf16.gmra.mxu2 %v4302_v17  ;;  %v4341_v16 = vld [vmem:[%s6068_s9 + $0x190] sm:$0xf]  ;;  %v4374_v62 = vor.u32 %v5508_v54, %v4373_v13  ;;  %v6452_v13 = vld [vmem:[%s7314_s2] ss:$0 sm:$0xff]  ;;  %v4399_v54 = vld [vmem:[%s6068_s9 + $0x228] sm:$0xf0] }
  0xfc   : > { %v5500_v17 = vld [vmem:[%s6068_s9 + $0x1ac] sm:$0xf0] }
  0xfd   : > { %2965 = vmatmul.bf16.gmra.mxu0 %v4310_v33  ;;  %v5763_v33 = vld [vmem:[%s7313_s1 + $0x1e8] sm:$0xff] }
  0xfe   : > { %2796 = vmatmul.bf16.gmra.mxu3 %v4306_v21  ;;  %v6383_v38 = vpop.f32.mrf.mxu2  ;;  %v4342_v21 = vor.u32 %v5500_v17, %v4341_v16  ;;  %v5503_v16 = vld [vmem:[%s6068_s9 + $0x1cc] sm:$0xf] }
  0xff   : > { %3441 = vmatpush.bf16.msra.mxu3 %v5763_v33  ;;  %v4367_v17 = vld [vmem:[%s6068_s9 + $0x1e8] sm:$0xf0] }
 0x100   : > { %v6387_v41 = vpop.f32.mrf.mxu1 }
 0x101   : > { %v6385_v40 = vpop.f32.mrf.mxu3 }
 0x102   : > { %7327 = vst [vmem:[#allocation12_spill] sm:$0xff] %v6385_v40  ;;  %v6390_v50 = vpop.f32.mrf.mxu0  ;;  %v4370_v40 = vor.u32 %v5503_v16, %v4367_v17  ;;  %v4397_v16 = vld [vmem:[%s6068_s9 + $0x208] sm:$0xf]  ;;  %v2266_v17 = vadd.f32 %v6452_v13, %v6252_v24 }
 0x106   : > { %v6397_v1 = vpop.f32.mrf.mxu2 }
 0x108   : > { %v6401_v10 = vpop.f32.mrf.mxu1 }
 0x109   : > { %v6399_v6 = vpop.f32.mrf.mxu3 }
 0x10a   : > { %7328 = vst [vmem:[#allocation13_spill] sm:$0xff] %v6399_v6  ;;  %v6405_v22 = vpop.f32.mrf.mxu0 }
 0x10b   : > { %2463 = vmatmul.bf16.gmra.mxu1 %v4330_v7  ;;  %2632 = vmatmul.bf16.gmra.mxu2 %v4334_v9  ;;  %v4359_v7 = vld [vmem:[%s6068_s9 + $0x1e0] sm:$0xf0]  ;;  %v4365_v9 = vld [vmem:[%s6068_s9 + $0x1c8] sm:$0xf] }
 0x10c   : > { %v4362_v33 = vor.u32 %v5502_v57, %v4359_v7 }
 0x10d   : > { %2970 = vmatmul.bf16.gmra.mxu0 %v4342_v21 }
 0x10e   : > { %2801 = vmatmul.bf16.gmra.mxu3 %v4338_v11  ;;  %v6413_v42 = vpop.f32.mrf.mxu2  ;;  %v5507_v11 = vld [vmem:[%s6068_s9 + $0x1e4] sm:$0xf0] }
 0x10f   : > { %7329 = vst [vmem:[#allocation14_spill] sm:$0xff] %v6413_v42 }
 0x110   : > { %v6417_v53 = vpop.f32.mrf.mxu1 }
 0x111   : > { %v6415_v51 = vpop.f32.mrf.mxu3 }
 0x112   : > { %7330 = vst [vmem:[#allocation15_spill] sm:$0xff] %v6415_v51  ;;  %v6423_v58 = vpop.f32.mrf.mxu0  ;;  %v4366_v51 = vor.u32 %v5507_v11, %v4365_v9  ;;  %v5773_v9 = vld [vmem:[%s7315_s3 + $0x38] sm:$0xff]  ;;  %v4391_v11 = vld [vmem:[%s6068_s9 + $0x220] sm:$0xf0] }
 0x113   : > { %3768 = vmatpush.bf16.msra.mxu0 %v5773_v9  ;;  %v5516_v9 = vld [vmem:[%s6068_s9 + $0x22c] sm:$0xf0] }
 0x116   : > { %v6430_v23 = vpop.f32.mrf.mxu2 }
 0x117   : > { %7331 = vst [vmem:[#allocation16_spill] sm:$0xff] %v6430_v23 }
 0x118   : > { %v6434_v6 = vpop.f32.mrf.mxu1 }
 0x119   : > { %v6432_v21 = vpop.f32.mrf.mxu3 }
 0x11a   : > { %7332 = vst [vmem:[#allocation17_spill] sm:$0xff] %v6432_v21  ;;  %v6438_v48 = vpop.f32.mrf.mxu0 }
 0x11b   : > { %2468 = vmatmul.bf16.gmra.mxu1 %v4362_v33  ;;  %2637 = vmatmul.bf16.gmra.mxu2 %v4366_v51  ;;  %v5511_v33 = vld [vmem:[%s6068_s9 + $0x20c] sm:$0xf] }
 0x11c   : > { %v4402_v46 = vor.u32 %v5511_v33, %v4399_v54  ;;  %v5523_v54 = vld [vmem:[%s6068_s9 + $0x264] sm:$0xf0] }
 0x11d   : > { %2975 = vmatmul.bf16.gmra.mxu0 %v4374_v62  ;;  %v5515_v62 = vld [vmem:[%s6068_s9 + $0x224] sm:$0xf0] }
 0x11e   : > { %2806 = vmatmul.bf16.gmra.mxu3 %v4370_v40  ;;  %v6440_v21 = vpop.f32.mrf.mxu2  ;;  %v5510_v40 = vld [vmem:[%s6068_s9 + $0x204] sm:$0xf]  ;;  %v4398_v4 = vor.u32 %v5515_v62, %v4397_v16 }
 0x11f   : > { %7333 = vst [vmem:[#allocation18_spill] sm:$0xff] %v6440_v21  ;;  %v4394_v15 = vor.u32 %v5510_v40, %v4391_v11  ;;  %v4406_v21 = vor.u32 %v5516_v9, %v4405_v36  ;;  %v5519_v9 = vld [vmem:[%s6068_s9 + $0x24c] sm:$0xf] }
 0x120   : > { %v6444_v7 = vpop.f32.mrf.mxu1 }
 0x121   : > { %v6442_v57 = vpop.f32.mrf.mxu3 }
 0x122   : > { %7334 = vst [vmem:[#allocation19_spill] sm:$0xff] %v6442_v57  ;;  %v6455_v51 = vpop.f32.mrf.mxu0 }
 0x126   : > { %v6464_v57 = vpop.f32.mrf.mxu2 }
 0x127   : > { %7335 = vst [vmem:[#allocation20_spill] sm:$0xff] %v6464_v57  ;;  %v4431_v57 = vld [vmem:[%s6068_s9 + $0x268] sm:$0xf0] }
 0x128   : > { %v2434_v56 = vpop.f32.mrf.mxu1 }
 0x129   : > { %v6466_v31 = vpop.f32.mrf.mxu3  ;;  %v2435_v26 = vadd.f32 %v2434_v56, %v2266_v17  ;;  %v4429_v17 = vld [vmem:[%s6068_s9 + $0x248] sm:$0xf] }
 0x12a   : > { %7336 = vst [vmem:[#allocation21_spill] sm:$0xff] %v6466_v31  ;;  %v2941_v24 = vpop.f32.mrf.mxu0  ;;  %v2268_v31 = vadd.f32 %v6452_v13, %v6261_v29  ;;  %v2271_v29 = vadd.f32 %v6452_v13, %v6276_v44 }
 0x12b   : > { %2473 = vmatmul.bf16.gmra.mxu1 %v4394_v15  ;;  %2642 = vmatmul.bf16.gmra.mxu2 %v4398_v4  ;;  %v5518_v4 = vld [vmem:[%s6068_s9 + $0x244] sm:$0xf] }
 0x12d   : > { %2980 = vmatmul.bf16.gmra.mxu0 %v4406_v21 }
 0x12e   : > { %2811 = vmatmul.bf16.gmra.mxu3 %v4402_v46  ;;  %v2603_v40 = vpop.f32.mrf.mxu2  ;;  %v4423_v46 = vld [vmem:[%s6068_s9 + $0x260] sm:$0xf0] }
 0x12f   : > { %v2604_v11 = vadd.f32 %v2603_v40, %v2435_v26  ;;  %v4426_v23 = vor.u32 %v5518_v4, %v4423_v46  ;;  %v2273_v4 = vadd.f32 %v6452_v13, %v6285_v49  ;;  %v2276_v49 = vadd.f32 %v6452_v13, %v6300_v0 }
 0x130   : > { %v2436_v62 = vpop.f32.mrf.mxu1 }
 0x131   : > { %v2772_v16 = vpop.f32.mrf.mxu3  ;;  %v2437_v56 = vadd.f32 %v2436_v62, %v2268_v31  ;;  %v5524_v62 = vld [vmem:[%s6068_s9 + $0x26c] sm:$0xf0] }
 0x132   : > { %v2773_v33 = vadd.f32 %v2772_v16, %v2604_v11  ;;  %v2943_v36 = vpop.f32.mrf.mxu0  ;;  %v4430_v11 = vor.u32 %v5523_v54, %v4429_v17  ;;  %v4437_v16 = vld [vmem:[%s6068_s9 + $0x250] sm:$0xf] }
 0x133   : > { %v4438_v44 = vor.u32 %v5524_v62, %v4437_v16 }
 0x134   : > { %v6472_v15 = vadd.f32 %v2941_v24, %v2773_v33  ;;  %v4434_v24 = vor.u32 %v5519_v9, %v4431_v57  ;;  %v5526_v9 = vld [vmem:[%s6068_s9 + $0x284] sm:$0xf] }
 0x136   : > { %7337 = vst [vmem:[#allocation22_spill] sm:$0xff] %v6472_v15  ;;  %v2605_v26 = vpop.f32.mrf.mxu2 }
 0x137   : > { %v2606_v40 = vadd.f32 %v2605_v26, %v2437_v56 }
 0x138   : > { %v2439_v31 = vpop.f32.mrf.mxu1 }
 0x139   : > { %v2774_v21 = vpop.f32.mrf.mxu3  ;;  %v2440_v15 = vadd.f32 %v2439_v31, %v2271_v29  ;;  %v5527_v31 = vld [vmem:[%s6068_s9 + $0x28c] sm:$0xf] }
 0x13a   : > { %v2775_v33 = vadd.f32 %v2774_v21, %v2606_v40  ;;  %v2946_v56 = vpop.f32.mrf.mxu0  ;;  %v4455_v40 = vld [vmem:[%s6068_s9 + $0x2a0] sm:$0xf0]  ;;  %v4461_v21 = vld [vmem:[%s6068_s9 + $0x288] sm:$0xf] }
 0x13b   : > { %2478 = vmatmul.bf16.gmra.mxu1 %v4426_v23  ;;  %2647 = vmatmul.bf16.gmra.mxu2 %v4430_v11  ;;  %v5531_v11 = vld [vmem:[%s6068_s9 + $0x2a4] sm:$0xf0] }
 0x13c   : > { %v6484_v42 = vadd.f32 %v2943_v36, %v2775_v33  ;;  %v4458_v33 = vor.u32 %v5526_v9, %v4455_v40  ;;  %v5762_v9 = vld [vmem:[%s7313_s1 + $0x1e0] sm:$0xff]  ;;  %v2278_v40 = vadd.f32 %v6452_v13, %v6318_v8 }
 0x13d   : > { %2985 = vmatmul.bf16.gmra.mxu0 %v4438_v44  ;;  %v4462_v44 = vor.u32 %v5531_v11, %v4461_v21  ;;  %3442 = vmatpush.bf16.msra.mxu3 %v5762_v9  ;;  %v5534_v8 = vld [vmem:[%s6068_s9 + $0x2c4] sm:$0xf] }
 0x13e   : > { %2816 = vmatmul.bf16.gmra.mxu3 %v4434_v24  ;;  %v2608_v57 = vpop.f32.mrf.mxu2  ;;  %v4463_v24 = vld [vmem:[%s6068_s9 + $0x2a8] sm:$0xf0] }
 0x13f   : > { %v2609_v46 = vadd.f32 %v2608_v57, %v2440_v15  ;;  %v4469_v57 = vld [vmem:[%s6068_s9 + $0x290] sm:$0xf] }
 0x140   : > { %v2441_v54 = vpop.f32.mrf.mxu1 }
 0x141   : > { %v2777_v17 = vpop.f32.mrf.mxu3  ;;  %v2442_v29 = vadd.f32 %v2441_v54, %v2273_v4 }
 0x142   : > { %v2778_v36 = vadd.f32 %v2777_v17, %v2609_v46  ;;  %v2948_v26 = vpop.f32.mrf.mxu0  ;;  %v5532_v46 = vld [vmem:[%s6068_s9 + $0x2ac] sm:$0xf0] }
 0x144   : > { %v6488_v23 = vadd.f32 %v2946_v56, %v2778_v36  ;;  %v4466_v56 = vor.u32 %v5527_v31, %v4463_v24 }
 0x146   : > { %7338 = vst [vmem:[#allocation23_spill] sm:$0xff] %v6488_v23  ;;  %v2610_v15 = vpop.f32.mrf.mxu2  ;;  %v4470_v23 = vor.u32 %v5532_v46, %v4469_v57  ;;  %v4495_v57 = vld [vmem:[%s6068_s9 + $0x2e8] sm:$0xf0] }
 0x147   : > { %v2611_v16 = vadd.f32 %v2610_v15, %v2442_v29  ;;  %v5754_v29 = vld [vmem:[%s7313_s1 + $0x1a0] sm:$0xff] }
 0x148   : > { %v2444_v4 = vpop.f32.mrf.mxu1  ;;  %3273 = vmatpush.bf16.msra.mxu2 %v5754_v29  ;;  %v5746_v15 = vld [vmem:[%s7313_s1 + $0x160] sm:$0xff] }
 0x149   : > { %v2779_v62 = vpop.f32.mrf.mxu3  ;;  %v2445_v54 = vadd.f32 %v2444_v4, %v2276_v49  ;;  %3104 = vmatpush.bf16.msra.mxu1 %v5746_v15  ;;  %v5539_v4 = vld [vmem:[%s6068_s9 + $0x2e4] sm:$0xf0] }
 0x14a   : > { %v2780_v17 = vadd.f32 %v2779_v62, %v2611_v16  ;;  %v2951_v0 = vpop.f32.mrf.mxu0 }
 0x14b   : > { %2483 = vmatmul.bf16.gmra.mxu1 %v4458_v33  ;;  %2652 = vmatmul.bf16.gmra.mxu2 %v4462_v44  ;;  %v4487_v33 = vld [vmem:[%s6068_s9 + $0x2e0] sm:$0xf0]  ;;  %v4493_v44 = vld [vmem:[%s6068_s9 + $0x2c8] sm:$0xf] }
 0x14c   : > { %v6500_v36 = vadd.f32 %v2948_v26, %v2780_v17  ;;  %v4490_v29 = vor.u32 %v5534_v8, %v4487_v33  ;;  %v4494_v9 = vor.u32 %v5539_v4, %v4493_v44 }
 0x14d   : > { %2990 = vmatmul.bf16.gmra.mxu0 %v4470_v23  ;;  %v2281_v23 = vadd.f32 %v6452_v13, %v6333_v28 }
 0x14e   : > { %2821 = vmatmul.bf16.gmra.mxu3 %v4466_v56  ;;  %v2613_v26 = vpop.f32.mrf.mxu2  ;;  %v5535_v56 = vld [vmem:[%s6068_s9 + $0x2cc] sm:$0xf] }
 0x14f   : > { %v2614_v21 = vadd.f32 %v2613_v26, %v2445_v54  ;;  %v4501_v26 = vld [vmem:[%s6068_s9 + $0x2d0] sm:$0xf] }
 0x150   : > { %v2446_v49 = vpop.f32.mrf.mxu1 }
 0x151   : > { %v2782_v11 = vpop.f32.mrf.mxu3  ;;  %v2447_v24 = vadd.f32 %v2446_v49, %v2278_v40  ;;  %v4498_v40 = vor.u32 %v5535_v56, %v4495_v57  ;;  %v5772_v56 = vld [vmem:[%s7315_s3 + $0x30] sm:$0xff] }
 0x152   : > { %v2783_v31 = vadd.f32 %v2782_v11, %v2614_v21  ;;  %v2953_v62 = vpop.f32.mrf.mxu0  ;;  %v5540_v21 = vld [vmem:[%s6068_s9 + $0x2ec] sm:$0xf0]  ;;  %3769 = vmatpush.bf16.msra.mxu0 %v5772_v56  ;;  %v2288_v56 = vadd.f32 %v6452_v13, %v6366_v2  ;;  %v2291_v2 = vadd.f32 %v6452_v13, %v6381_v37 }
 0x153   : > { %v4502_v15 = vor.u32 %v5540_v21, %v4501_v26 }
 0x154   : > { %v6513_v16 = vadd.f32 %v2951_v0, %v2783_v31 }
 0x156   : > { %v2615_v46 = vpop.f32.mrf.mxu2 }
 0x157   : > { %v2616_v17 = vadd.f32 %v2615_v46, %v2447_v24  ;;  %v2283_v24 = vadd.f32 %v6452_v13, %v6342_v34  ;;  %v5542_v46 = vld [vmem:[%s6068_s9 + $0x304] sm:$0xf] }
 0x158   : > { %v2449_v0 = vpop.f32.mrf.mxu1 }
 0x159   : > { %v2784_v54 = vpop.f32.mrf.mxu3  ;;  %v2450_v49 = vadd.f32 %v2449_v0, %v2281_v23  ;;  %v5543_v0 = vld [vmem:[%s6068_s9 + $0x30c] sm:$0xf] }
 0x15a   : > { %v2785_v11 = vadd.f32 %v2784_v54, %v2616_v17  ;;  %v2956_v28 = vpop.f32.mrf.mxu0  ;;  %v4519_v17 = vld [vmem:[%s6068_s9 + $0x320] sm:$0xf0]  ;;  %v4525_v54 = vld [vmem:[%s6068_s9 + $0x308] sm:$0xf] }
 0x15b   : > { %2488 = vmatmul.bf16.gmra.mxu1 %v4490_v29  ;;  %2657 = vmatmul.bf16.gmra.mxu2 %v4494_v9  ;;  %v5547_v29 = vld [vmem:[%s6068_s9 + $0x324] sm:$0xf0]  ;;  %v2286_v9 = vadd.f32 %v6452_v13, %v6357_v60 }
 0x15c   : > { %v6525_v31 = vadd.f32 %v2953_v62, %v2785_v11 }
 0x15d   : > { %2995 = vmatmul.bf16.gmra.mxu0 %v4502_v15  ;;  %v4526_v15 = vor.u32 %v5547_v29, %v4525_v54 }
 0x15e   : > { %2826 = vmatmul.bf16.gmra.mxu3 %v4498_v40  ;;  %v2618_v8 = vpop.f32.mrf.mxu2  ;;  %v4527_v40 = vld [vmem:[%s6068_s9 + $0x328] sm:$0xf0] }
 0x15f   : > { %v2619_v33 = vadd.f32 %v2618_v8, %v2450_v49  ;;  %v4522_v49 = vor.u32 %v5542_v46, %v4519_v17  ;;  %v4533_v8 = vld [vmem:[%s6068_s9 + $0x310] sm:$0xf] }
 0x160   : > { %v2451_v62 = vpop.f32.mrf.mxu1 }
 0x161   : > { %v2787_v44 = vpop.f32.mrf.mxu3  ;;  %v2452_v23 = vadd.f32 %v2451_v62, %v2283_v24  ;;  %v4530_v24 = vor.u32 %v5543_v0, %v4527_v40  ;;  %v5550_v40 = vld [vmem:[%s6068_s9 + $0x344] sm:$0xf] }
 0x162   : > { %v2788_v4 = vadd.f32 %v2787_v44, %v2619_v33  ;;  %v2958_v34 = vpop.f32.mrf.mxu0  ;;  %v5548_v33 = vld [vmem:[%s6068_s9 + $0x32c] sm:$0xf0] }
 0x163   : > { %v4534_v60 = vor.u32 %v5548_v33, %v4533_v8 }
 0x164   : > { %v6532_v57 = vadd.f32 %v2956_v28, %v2788_v4 }
 0x166   : > { %v2620_v26 = vpop.f32.mrf.mxu2 }
 0x167   : > { %v2621_v21 = vadd.f32 %v2620_v26, %v2452_v23 }
 0x168   : > { %v2454_v28 = vpop.f32.mrf.mxu1 }
 0x169   : > { %v2789_v11 = vpop.f32.mrf.mxu3  ;;  %v2455_v62 = vadd.f32 %v2454_v28, %v2286_v9  ;;  %v4559_v28 = vld [vmem:[%s6068_s9 + $0x368] sm:$0xf0] }
 0x16a   : > { %v2790_v44 = vadd.f32 %v2789_v11, %v2621_v21  ;;  %v2961_v23 = vpop.f32.mrf.mxu0  ;;  %v4551_v21 = vld [vmem:[%s6068_s9 + $0x360] sm:$0xf0]  ;;  %v4557_v11 = vld [vmem:[%s6068_s9 + $0x348] sm:$0xf] }
 0x16b   : > { %2493 = vmatmul.bf16.gmra.mxu1 %v4522_v49  ;;  %2662 = vmatmul.bf16.gmra.mxu2 %v4526_v15  ;;  %v5555_v49 = vld [vmem:[%s6068_s9 + $0x364] sm:$0xf0]  ;;  %v5551_v15 = vld [vmem:[%s6068_s9 + $0x34c] sm:$0xf] }
 0x16c   : > { %v6544_v4 = vadd.f32 %v2958_v34, %v2790_v44  ;;  %v4554_v44 = vor.u32 %v5550_v40, %v4551_v21 }
 0x16d   : > { %3000 = vmatmul.bf16.gmra.mxu0 %v4534_v60 }
 0x16e   : > { %2831 = vmatmul.bf16.gmra.mxu3 %v4530_v24  ;;  %v2623_v46 = vpop.f32.mrf.mxu2 }
 0x16f   : > { %v2624_v17 = vadd.f32 %v2623_v46, %v2455_v62  ;;  %v4558_v62 = vor.u32 %v5555_v49, %v4557_v11  ;;  %v5556_v46 = vld [vmem:[%s6068_s9 + $0x36c] sm:$0xf0] }
 0x170   : > { %v2456_v29 = vpop.f32.mrf.mxu1 }
 0x171   : > { %v2792_v54 = vpop.f32.mrf.mxu3  ;;  %v2457_v9 = vadd.f32 %v2456_v29, %v2288_v56  ;;  %v4565_v56 = vld [vmem:[%s6068_s9 + $0x350] sm:$0xf] }
 0x172   : > { %v2793_v34 = vadd.f32 %v2792_v54, %v2624_v17  ;;  %v2963_v26 = vpop.f32.mrf.mxu0  ;;  %v4566_v37 = vor.u32 %v5556_v46, %v4565_v56 }
 0x174   : > { %v6548_v0 = vadd.f32 %v2961_v23, %v2793_v34  ;;  %v4562_v23 = vor.u32 %v5551_v15, %v4559_v28  ;;  %v5558_v28 = vld [vmem:[%s6068_s9 + $0x384] sm:$0xf] }
 0x176   : > { %v2625_v24 = vpop.f32.mrf.mxu2 }
 0x177   : > { %v2626_v8 = vadd.f32 %v2625_v24, %v2457_v9  ;;  %v2293_v9 = vadd.f32 %v6452_v13, %v6390_v50  ;;  %v2296_v50 = vadd.f32 %v6452_v13, %v6405_v22 }
 0x178   : > { %v2459_v60 = vpop.f32.mrf.mxu1 }
 0x179   : > { %v2794_v33 = vpop.f32.mrf.mxu3  ;;  %v2460_v54 = vadd.f32 %v2459_v60, %v2291_v2  ;;  %v4591_v60 = vld [vmem:[%s6068_s9 + $0x3a8] sm:$0xf0] }
 0x17a   : > { %v2795_v17 = vadd.f32 %v2794_v33, %v2626_v8  ;;  %v2966_v34 = vpop.f32.mrf.mxu0  ;;  %v4583_v8 = vld [vmem:[%s6068_s9 + $0x3a0] sm:$0xf0]  ;;  %v4589_v33 = vld [vmem:[%s6068_s9 + $0x388] sm:$0xf] }
 0x17b   : > { %2498 = vmatmul.bf16.gmra.mxu1 %v4554_v44  ;;  %2667 = vmatmul.bf16.gmra.mxu2 %v4558_v62  ;;  %v5563_v44 = vld [vmem:[%s6068_s9 + $0x3a4] sm:$0xf0]  ;;  %v5559_v62 = vld [vmem:[%s6068_s9 + $0x38c] sm:$0xf] }
 0x17c   : > { %v6560_v29 = vadd.f32 %v2963_v26, %v2795_v17  ;;  %v4586_v17 = vor.u32 %v5558_v28, %v4583_v8  ;;  %v5761_v28 = vld [vmem:[%s7313_s1 + $0x1d8] sm:$0xff]  ;;  %v2298_v8 = vadd.f32 %v6452_v13, %v6423_v58  ;;  %v5566_v58 = vld [vmem:[%s6068_s9 + $0x3c4] sm:$0xf] }
 0x17d   : > { %3005 = vmatmul.bf16.gmra.mxu0 %v4566_v37  ;;  %3443 = vmatpush.bf16.msra.mxu3 %v5761_v28 }
 0x17e   : > { %2836 = vmatmul.bf16.gmra.mxu3 %v4562_v23  ;;  %v2628_v40 = vpop.f32.mrf.mxu2 }
 0x17f   : > { %v2629_v21 = vadd.f32 %v2628_v40, %v2460_v54  ;;  %v4590_v54 = vor.u32 %v5563_v44, %v4589_v33  ;;  %v5564_v40 = vld [vmem:[%s6068_s9 + $0x3ac] sm:$0xf0] }
 0x180   : > { %v2461_v49 = vpop.f32.mrf.mxu1 }
 0x181   : > { %v2797_v11 = vpop.f32.mrf.mxu3  ;;  %v2462_v2 = vadd.f32 %v2461_v49, %v2293_v9  ;;  %v4597_v9 = vld [vmem:[%s6068_s9 + $0x390] sm:$0xf] }
 0x182   : > { %v2798_v26 = vadd.f32 %v2797_v11, %v2629_v21  ;;  %v2968_v24 = vpop.f32.mrf.mxu0 }
 0x184   : > { %v6564_v15 = vadd.f32 %v2966_v34, %v2798_v26  ;;  %v4594_v34 = vor.u32 %v5559_v62, %v4591_v60  ;;  %v4598_v26 = vor.u32 %v5564_v40, %v4597_v9  ;;  %v5567_v9 = vld [vmem:[%s6068_s9 + $0x3cc] sm:$0xf] }
 0x185   : > { %v4623_v40 = vld [vmem:[%s6068_s9 + $0x3e8] sm:$0xf0] }
 0x186   : > { %v2630_v23 = vpop.f32.mrf.mxu2 }
 0x187   : > { %v2631_v56 = vadd.f32 %v2630_v23, %v2462_v2  ;;  %v5753_v2 = vld [vmem:[%s7313_s1 + $0x198] sm:$0xff] }
 0x188   : > { %v2464_v37 = vpop.f32.mrf.mxu1  ;;  %3274 = vmatpush.bf16.msra.mxu2 %v5753_v2  ;;  %v5745_v23 = vld [vmem:[%s7313_s1 + $0x158] sm:$0xff] }
 0x189   : > { %v2799_v46 = vpop.f32.mrf.mxu3  ;;  %v2465_v11 = vadd.f32 %v2464_v37, %v2296_v50  ;;  %3105 = vmatpush.bf16.msra.mxu1 %v5745_v23  ;;  %v5571_v37 = vld [vmem:[%s6068_s9 + $0x3e4] sm:$0xf0] }
 0x18a   : > { %v2800_v21 = vadd.f32 %v2799_v46, %v2631_v56  ;;  %v2971_v22 = vpop.f32.mrf.mxu0 }
 0x18b   : > { %2503 = vmatmul.bf16.gmra.mxu1 %v4586_v17  ;;  %2672 = vmatmul.bf16.gmra.mxu2 %v4590_v54  ;;  %v4615_v17 = vld [vmem:[%s6068_s9 + $0x3e0] sm:$0xf0]  ;;  %v4621_v54 = vld [vmem:[%s6068_s9 + $0x3c8] sm:$0xf] }
 0x18c   : > { %v6576_v49 = vadd.f32 %v2968_v24, %v2800_v21  ;;  %v4618_v2 = vor.u32 %v5566_v58, %v4615_v17  ;;  %v4622_v28 = vor.u32 %v5571_v37, %v4621_v54 }
 0x18d   : > { %3010 = vmatmul.bf16.gmra.mxu0 %v4598_v26 }
 0x18e   : > { %2841 = vmatmul.bf16.gmra.mxu3 %v4594_v34  ;;  %v2633_v24 = vpop.f32.mrf.mxu2  ;;  %v2301_v34 = vadd.f32 %v6452_v13, %v6438_v48 }
 0x18f   : > { %v2634_v33 = vadd.f32 %v2633_v24, %v2465_v11  ;;  %v4629_v24 = vld [vmem:[%s6068_s9 + $0x3d0] sm:$0xf] }
 0x190   : > { %v2466_v50 = vpop.f32.mrf.mxu1 }
 0x191   : > { %v2802_v44 = vpop.f32.mrf.mxu3  ;;  %v2467_v60 = vadd.f32 %v2466_v50, %v2298_v8  ;;  %v4626_v8 = vor.u32 %v5567_v9, %v4623_v40  ;;  %v5771_v9 = vld [vmem:[%s7315_s3 + $0x28] sm:$0xff] }
 0x192   : > { %v2803_v62 = vadd.f32 %v2802_v44, %v2634_v33  ;;  %v2973_v46 = vpop.f32.mrf.mxu0  ;;  %v5572_v33 = vld [vmem:[%s6068_s9 + $0x3ec] sm:$0xf0]  ;;  %3770 = vmatpush.bf16.msra.mxu0 %v5771_v9 }
 0x193   : > { %v4630_v23 = vor.u32 %v5572_v33, %v4629_v24  ;;  %v2306_v24 = vadd.f32 %v6452_v13, %v6248_v19 }
 0x194   : > { %v6589_v56 = vadd.f32 %v2971_v22, %v2803_v62 }
 0x196   : > { %v2635_v21 = vpop.f32.mrf.mxu2 }
 0x197   : > { %v2636_v11 = vadd.f32 %v2635_v21, %v2467_v60  ;;  %v2303_v60 = vadd.f32 %v6452_v13, %v6455_v51  ;;  %v5574_v21 = vld [vmem:[%s6068_s9 + $0x404] sm:$0xf] }
 0x198   : > { %v2469_v22 = vpop.f32.mrf.mxu1 }
 0x199   : > { %v2804_v26 = vpop.f32.mrf.mxu3  ;;  %v2470_v50 = vadd.f32 %v2469_v22, %v2301_v34  ;;  %v4655_v22 = vld [vmem:[%s6068_s9 + $0x428] sm:$0xf0] }
 0x19a   : > { %v2805_v44 = vadd.f32 %v2804_v26, %v2636_v11  ;;  %v2976_v48 = vpop.f32.mrf.mxu0  ;;  %v4647_v11 = vld [vmem:[%s6068_s9 + $0x420] sm:$0xf0]  ;;  %v4653_v26 = vld [vmem:[%s6068_s9 + $0x408] sm:$0xf] }
 0x19b   : > { %2508 = vmatmul.bf16.gmra.mxu1 %v4618_v2  ;;  %2677 = vmatmul.bf16.gmra.mxu2 %v4622_v28  ;;  %v5579_v2 = vld [vmem:[%s6068_s9 + $0x424] sm:$0xf0]  ;;  %v5575_v28 = vld [vmem:[%s6068_s9 + $0x40c] sm:$0xf] }
 0x19c   : > { %v6601_v62 = vadd.f32 %v2973_v46, %v2805_v44 }
 0x19d   : > { %3015 = vmatmul.bf16.gmra.mxu0 %v4630_v23  ;;  %v4654_v23 = vor.u32 %v5579_v2, %v4653_v26 }
 0x19e   : > { %2846 = vmatmul.bf16.gmra.mxu3 %v4626_v8  ;;  %v2638_v58 = vpop.f32.mrf.mxu2 }
 0x19f   : > { %v2639_v17 = vadd.f32 %v2638_v58, %v2470_v50  ;;  %v4650_v50 = vor.u32 %v5574_v21, %v4647_v11  ;;  %v4661_v58 = vld [vmem:[%s6068_s9 + $0x410] sm:$0xf]  ;;  %v2308_v21 = vadd.f32 %v6452_v13, %v6258_v27  ;;  %v2311_v27 = vadd.f32 %v6452_v13, %v6272_v39 }
 0x1a0   : > { %v2471_v46 = vpop.f32.mrf.mxu1 }
 0x1a1   : > { %v2807_v54 = vpop.f32.mrf.mxu3  ;;  %v2472_v34 = vadd.f32 %v2471_v46, %v2303_v60  ;;  %v4658_v60 = vor.u32 %v5575_v28, %v4655_v22 }
 0x1a2   : > { %v2808_v37 = vadd.f32 %v2807_v54, %v2639_v17  ;;  %v2978_v51 = vpop.f32.mrf.mxu0  ;;  %v5580_v17 = vld [vmem:[%s6068_s9 + $0x42c] sm:$0xf0] }
 0x1a3   : > { %v4662_v9 = vor.u32 %v5580_v17, %v4661_v58 }
 0x1a4   : > { %v6608_v40 = vadd.f32 %v2976_v48, %v2808_v37 }
 0x1a6   : > { %v2640_v8 = vpop.f32.mrf.mxu2 }
 0x1a7   : > { %v2641_v33 = vadd.f32 %v2640_v8, %v2472_v34  ;;  %v5582_v8 = vld [vmem:[%s6068_s9 + $0x444] sm:$0xf] }
 0x1a8   : > { %v2474_v48 = vpop.f32.mrf.mxu1 }
 0x1a9   : > { %v2809_v44 = vpop.f32.mrf.mxu3  ;;  %v2475_v46 = vadd.f32 %v2474_v48, %v2306_v24  ;;  %v4687_v48 = vld [vmem:[%s6068_s9 + $0x468] sm:$0xf0] }
 0x1aa   : > { %v2810_v54 = vadd.f32 %v2809_v44, %v2641_v33  ;;  %v2981_v19 = vpop.f32.mrf.mxu0  ;;  %v4679_v33 = vld [vmem:[%s6068_s9 + $0x460] sm:$0xf0]  ;;  %v4685_v44 = vld [vmem:[%s6068_s9 + $0x448] sm:$0xf] }
 0x1ab   : > { %2513 = vmatmul.bf16.gmra.mxu1 %v4650_v50  ;;  %2682 = vmatmul.bf16.gmra.mxu2 %v4654_v23  ;;  %v5587_v50 = vld [vmem:[%s6068_s9 + $0x464] sm:$0xf0]  ;;  %v5583_v23 = vld [vmem:[%s6068_s9 + $0x44c] sm:$0xf] }
 0x1ac   : > { %v6620_v37 = vadd.f32 %v2978_v51, %v2810_v54  ;;  %v4682_v54 = vor.u32 %v5582_v8, %v4679_v33  ;;  %v2313_v8 = vadd.f32 %v6452_v13, %v6282_v47  ;;  %v2316_v47 = vadd.f32 %v6452_v13, %v6296_v59  ;;  %v5752_v59 = vld [vmem:[%s7313_s1 + $0x190] sm:$0xff] }
 0x1ad   : > { %3020 = vmatmul.bf16.gmra.mxu0 %v4662_v9  ;;  %3275 = vmatpush.bf16.msra.mxu2 %v5752_v59 }
 0x1ae   : > { %2851 = vmatmul.bf16.gmra.mxu3 %v4658_v60  ;;  %v2643_v34 = vpop.f32.mrf.mxu2 }
 0x1af   : > { %v2644_v11 = vadd.f32 %v2643_v34, %v2475_v46  ;;  %v4686_v46 = vor.u32 %v5587_v50, %v4685_v44  ;;  %v4693_v34 = vld [vmem:[%s6068_s9 + $0x450] sm:$0xf] }
 0x1b0   : > { %v2476_v2 = vpop.f32.mrf.mxu1 }
 0x1b1   : > { %v2812_v26 = vpop.f32.mrf.mxu3  ;;  %v2477_v28 = vadd.f32 %v2476_v2, %v2308_v21  ;;  %v5588_v21 = vld [vmem:[%s6068_s9 + $0x46c] sm:$0xf0] }
 0x1b2   : > { %v2813_v51 = vadd.f32 %v2812_v26, %v2644_v11  ;;  %v2983_v24 = vpop.f32.mrf.mxu0 }
 0x1b4   : > { %v6624_v22 = vadd.f32 %v2981_v19, %v2813_v51  ;;  %v4690_v19 = vor.u32 %v5583_v23, %v4687_v48  ;;  %v4694_v51 = vor.u32 %v5588_v21, %v4693_v34 }
 0x1b6   : > { %v2645_v60 = vpop.f32.mrf.mxu2 }
 0x1b7   : > { %v2646_v58 = vadd.f32 %v2645_v60, %v2477_v28  ;;  %v5590_v60 = vld [vmem:[%s6068_s9 + $0x484] sm:$0xf] }
 0x1b8   : > { %v2479_v9 = vpop.f32.mrf.mxu1 }
 0x1b9   : > { %v2814_v17 = vpop.f32.mrf.mxu3  ;;  %v2480_v26 = vadd.f32 %v2479_v9, %v2311_v27  ;;  %v4719_v9 = vld [vmem:[%s6068_s9 + $0x4a8] sm:$0xf0] }
 0x1ba   : > { %v2815_v11 = vadd.f32 %v2814_v17, %v2646_v58  ;;  %v2986_v39 = vpop.f32.mrf.mxu0  ;;  %v4711_v58 = vld [vmem:[%s6068_s9 + $0x4a0] sm:$0xf0]  ;;  %v4717_v17 = vld [vmem:[%s6068_s9 + $0x488] sm:$0xf] }
 0x1bb   : > { %2518 = vmatmul.bf16.gmra.mxu1 %v4682_v54  ;;  %2687 = vmatmul.bf16.gmra.mxu2 %v4686_v46  ;;  %v5595_v54 = vld [vmem:[%s6068_s9 + $0x4a4] sm:$0xf0]  ;;  %v5591_v46 = vld [vmem:[%s6068_s9 + $0x48c] sm:$0xf] }
 0x1bc   : > { %v6636_v2 = vadd.f32 %v2983_v24, %v2815_v11  ;;  %v4714_v11 = vor.u32 %v5590_v60, %v4711_v58 }
 0x1bd   : > { %3025 = vmatmul.bf16.gmra.mxu0 %v4694_v51 }
 0x1be   : > { %2856 = vmatmul.bf16.gmra.mxu3 %v4690_v19  ;;  %v2648_v28 = vpop.f32.mrf.mxu2 }
 0x1bf   : > { %v2649_v33 = vadd.f32 %v2648_v28, %v2480_v26  ;;  %v4718_v26 = vor.u32 %v5595_v54, %v4717_v17  ;;  %v4725_v28 = vld [vmem:[%s6068_s9 + $0x490] sm:$0xf] }
 0x1c0   : > { %v2481_v50 = vpop.f32.mrf.mxu1 }
 0x1c1   : > { %v2817_v44 = vpop.f32.mrf.mxu3  ;;  %v2482_v23 = vadd.f32 %v2481_v50, %v2313_v8  ;;  %v5596_v8 = vld [vmem:[%s6068_s9 + $0x4ac] sm:$0xf0] }
 0x1c2   : > { %v2818_v24 = vadd.f32 %v2817_v44, %v2649_v33  ;;  %v2988_v27 = vpop.f32.mrf.mxu0 }
 0x1c4   : > { %v6640_v48 = vadd.f32 %v2986_v39, %v2818_v24  ;;  %v4722_v39 = vor.u32 %v5591_v46, %v4719_v9  ;;  %v4726_v24 = vor.u32 %v5596_v8, %v4725_v28  ;;  %v2321_v8 = vadd.f32 %v6452_v13, %v6329_v18 }
 0x1c6   : > { %7339 = vst [vmem:[#allocation24_spill] sm:$0xff] %v6640_v48  ;;  %v2650_v19 = vpop.f32.mrf.mxu2 }
 0x1c7   : > { %v2651_v34 = vadd.f32 %v2650_v19, %v2482_v23  ;;  %v5760_v23 = vld [vmem:[%s7313_s1 + $0x1d0] sm:$0xff] }
 0x1c8   : > { %v2484_v51 = vpop.f32.mrf.mxu1  ;;  %3444 = vmatpush.bf16.msra.mxu3 %v5760_v23  ;;  %v5744_v19 = vld [vmem:[%s7313_s1 + $0x150] sm:$0xff] }
 0x1c9   : > { %v2819_v21 = vpop.f32.mrf.mxu3  ;;  %v2485_v44 = vadd.f32 %v2484_v51, %v2316_v47  ;;  %3106 = vmatpush.bf16.msra.mxu1 %v5744_v19  ;;  %v5599_v51 = vld [vmem:[%s6068_s9 + $0x4cc] sm:$0xf]  ;;  %v2323_v19 = vadd.f32 %v6452_v13, %v6339_v32  ;;  %v4781_v32 = vld [vmem:[%s6068_s9 + $0x508] sm:$0xf] }
 0x1ca   : > { %v2820_v33 = vadd.f32 %v2819_v21, %v2651_v34  ;;  %v2991_v48 = vpop.f32.mrf.mxu0  ;;  %v5598_v34 = vld [vmem:[%s6068_s9 + $0x4c4] sm:$0xf] }
 0x1cb   : > { %2523 = vmatmul.bf16.gmra.mxu1 %v4714_v11  ;;  %2692 = vmatmul.bf16.gmra.mxu2 %v4718_v26  ;;  %v4743_v11 = vld [vmem:[%s6068_s9 + $0x4e0] sm:$0xf0]  ;;  %v5603_v26 = vld [vmem:[%s6068_s9 + $0x4e4] sm:$0xf0] }
 0x1cc   : > { %v6652_v50 = vadd.f32 %v2988_v27, %v2820_v33  ;;  %v2318_v27 = vadd.f32 %v6452_v13, %v6312_v5  ;;  %v4749_v5 = vld [vmem:[%s6068_s9 + $0x4c8] sm:$0xf] }
 0x1cd   : > { %3030 = vmatmul.bf16.gmra.mxu0 %v4726_v24  ;;  %v4746_v24 = vor.u32 %v5598_v34, %v4743_v11  ;;  %v4750_v59 = vor.u32 %v5603_v26, %v4749_v5 }
 0x1ce   : > { %2861 = vmatmul.bf16.gmra.mxu3 %v4722_v39  ;;  %v2653_v60 = vpop.f32.mrf.mxu2  ;;  %v4751_v39 = vld [vmem:[%s6068_s9 + $0x4e8] sm:$0xf0] }
 0x1cf   : > { %v2654_v58 = vadd.f32 %v2653_v60, %v2485_v44  ;;  %v4754_v23 = vor.u32 %v5599_v51, %v4751_v39  ;;  %v4757_v60 = vld [vmem:[%s6068_s9 + $0x4d0] sm:$0xf]  ;;  %v5770_v51 = vld [vmem:[%s7315_s3 + $0x20] sm:$0xff] }
 0x1d0   : > { %v2486_v54 = vpop.f32.mrf.mxu1  ;;  %3771 = vmatpush.bf16.msra.mxu0 %v5770_v51  ;;  %v2328_v51 = vadd.f32 %v6452_v13, %v6363_v63  ;;  %v2331_v63 = vadd.f32 %v6452_v13, %v6377_v20 }
 0x1d1   : > { %v2822_v17 = vpop.f32.mrf.mxu3  ;;  %v2487_v9 = vadd.f32 %v2486_v54, %v2318_v27  ;;  %v5604_v27 = vld [vmem:[%s6068_s9 + $0x4ec] sm:$0xf0] }
 0x1d2   : > { %v2823_v46 = vadd.f32 %v2822_v17, %v2654_v58  ;;  %v2993_v21 = vpop.f32.mrf.mxu0 }
 0x1d4   : > { %v6665_v47 = vadd.f32 %v2991_v48, %v2823_v46  ;;  %v4758_v46 = vor.u32 %v5604_v27, %v4757_v60 }
 0x1d6   : > { %v2655_v28 = vpop.f32.mrf.mxu2 }
 0x1d7   : > { %v2656_v33 = vadd.f32 %v2655_v28, %v2487_v9  ;;  %v5606_v28 = vld [vmem:[%s6068_s9 + $0x504] sm:$0xf] }
 0x1d8   : > { %v2489_v48 = vpop.f32.mrf.mxu1 }
 0x1d9   : > { %v2824_v44 = vpop.f32.mrf.mxu3  ;;  %v2490_v17 = vadd.f32 %v2489_v48, %v2321_v8 }
 0x1da   : > { %v2825_v58 = vadd.f32 %v2824_v44, %v2656_v33  ;;  %v2996_v18 = vpop.f32.mrf.mxu0  ;;  %v4775_v33 = vld [vmem:[%s6068_s9 + $0x520] sm:$0xf0]  ;;  %v5611_v44 = vld [vmem:[%s6068_s9 + $0x524] sm:$0xf0] }
 0x1db   : > { %2528 = vmatmul.bf16.gmra.mxu1 %v4746_v24  ;;  %2697 = vmatmul.bf16.gmra.mxu2 %v4750_v59  ;;  %v5607_v24 = vld [vmem:[%s6068_s9 + $0x50c] sm:$0xf] }
 0x1dc   : > { %v6677_v54 = vadd.f32 %v2993_v21, %v2825_v58  ;;  %v4783_v59 = vld [vmem:[%s6068_s9 + $0x528] sm:$0xf0]  ;;  %v4778_v58 = vor.u32 %v5606_v28, %v4775_v33 }
 0x1dd   : > { %3035 = vmatmul.bf16.gmra.mxu0 %v4758_v46 }
 0x1de   : > { %2866 = vmatmul.bf16.gmra.mxu3 %v4754_v23  ;;  %v2658_v9 = vpop.f32.mrf.mxu2  ;;  %v2326_v23 = vadd.f32 %v6452_v13, %v6353_v52 }
 0x1df   : > { %v2659_v34 = vadd.f32 %v2658_v9, %v2490_v17  ;;  %v4782_v17 = vor.u32 %v5611_v44, %v4781_v32  ;;  %v4789_v9 = vld [vmem:[%s6068_s9 + $0x510] sm:$0xf] }
 0x1e0   : > { %v2491_v21 = vpop.f32.mrf.mxu1 }
 0x1e1   : > { %v2827_v11 = vpop.f32.mrf.mxu3  ;;  %v2492_v26 = vadd.f32 %v2491_v21, %v2323_v19  ;;  %v5612_v19 = vld [vmem:[%s6068_s9 + $0x52c] sm:$0xf0] }
 0x1e2   : > { %v2828_v5 = vadd.f32 %v2827_v11, %v2659_v34  ;;  %v2998_v8 = vpop.f32.mrf.mxu0 }
 0x1e4   : > { %v6684_v39 = vadd.f32 %v2996_v18, %v2828_v5  ;;  %v4786_v18 = vor.u32 %v5607_v24, %v4783_v59  ;;  %v4790_v5 = vor.u32 %v5612_v19, %v4789_v9  ;;  %v5614_v59 = vld [vmem:[%s6068_s9 + $0x544] sm:$0xf] }
 0x1e6   : > { %v2660_v48 = vpop.f32.mrf.mxu2 }
 0x1e7   : > { %v2661_v60 = vadd.f32 %v2660_v48, %v2492_v26 }
 0x1e8   : > { %v2494_v46 = vpop.f32.mrf.mxu1 }
 0x1e9   : > { %v2829_v27 = vpop.f32.mrf.mxu3  ;;  %v2495_v11 = vadd.f32 %v2494_v46, %v2326_v23  ;;  %v4807_v23 = vld [vmem:[%s6068_s9 + $0x560] sm:$0xf0] }
 0x1ea   : > { %v2830_v34 = vadd.f32 %v2829_v27, %v2661_v60  ;;  %v3001_v52 = vpop.f32.mrf.mxu0  ;;  %v4813_v60 = vld [vmem:[%s6068_s9 + $0x548] sm:$0xf]  ;;  %v4810_v19 = vor.u32 %v5614_v59, %v4807_v23 }
 0x1eb   : > { %2533 = vmatmul.bf16.gmra.mxu1 %v4778_v58  ;;  %2702 = vmatmul.bf16.gmra.mxu2 %v4782_v17  ;;  %v5619_v27 = vld [vmem:[%s6068_s9 + $0x564] sm:$0xf0]  ;;  %v5615_v58 = vld [vmem:[%s6068_s9 + $0x54c] sm:$0xf] }
 0x1ec   : > { %v6696_v21 = vadd.f32 %v2998_v8, %v2830_v34  ;;  %v4815_v17 = vld [vmem:[%s6068_s9 + $0x568] sm:$0xf0]  ;;  %v4814_v34 = vor.u32 %v5619_v27, %v4813_v60 }
 0x1ed   : > { %3040 = vmatmul.bf16.gmra.mxu0 %v4790_v5  ;;  %v4818_v5 = vor.u32 %v5615_v58, %v4815_v17  ;;  %v5622_v17 = vld [vmem:[%s6068_s9 + $0x584] sm:$0xf] }
 0x1ee   : > { %2871 = vmatmul.bf16.gmra.mxu3 %v4786_v18  ;;  %v2663_v26 = vpop.f32.mrf.mxu2 }
 0x1ef   : > { %v2664_v28 = vadd.f32 %v2663_v26, %v2495_v11  ;;  %v5620_v26 = vld [vmem:[%s6068_s9 + $0x56c] sm:$0xf0] }
 0x1f0   : > { %v2496_v32 = vpop.f32.mrf.mxu1 }
 0x1f1   : > { %v2832_v33 = vpop.f32.mrf.mxu3  ;;  %v2497_v44 = vadd.f32 %v2496_v32, %v2328_v51 }
 0x1f2   : > { %v2833_v8 = vadd.f32 %v2832_v33, %v2664_v28  ;;  %v3003_v48 = vpop.f32.mrf.mxu0 }
 0x1f4   : > { %v6700_v24 = vadd.f32 %v3001_v52, %v2833_v8  ;;  %v4821_v52 = vld [vmem:[%s6068_s9 + $0x550] sm:$0xf] }
 0x1f5   : > { %v4822_v32 = vor.u32 %v5620_v26, %v4821_v52 }
 0x1f6   : > { %v2665_v46 = vpop.f32.mrf.mxu2 }
 0x1f7   : > { %v2666_v18 = vadd.f32 %v2665_v46, %v2497_v44  ;;  %v2333_v44 = vadd.f32 %v6452_v13, %v6387_v41  ;;  %v2336_v41 = vadd.f32 %v6452_v13, %v6401_v10  ;;  %v5751_v10 = vld [vmem:[%s7313_s1 + $0x188] sm:$0xff] }
 0x1f8   : > { %v2499_v11 = vpop.f32.mrf.mxu1  ;;  %v5759_v13 = vld [vmem:[%s7313_s1 + $0x1c8] sm:$0xff]  ;;  %3276 = vmatpush.bf16.msra.mxu2 %v5751_v10 }
 0x1f9   : > { %v2834_v9 = vpop.f32.mrf.mxu3  ;;  %v2500_v28 = vadd.f32 %v2499_v11, %v2331_v63  ;;  %v4839_v63 = vld [vmem:[%s6068_s9 + $0x5a0] sm:$0xf0]  ;;  %3445 = vmatpush.bf16.msra.mxu3 %v5759_v13 }
 0x1fa   : > { %v2835_v51 = vadd.f32 %v2834_v9, %v2666_v18  ;;  %v3006_v20 = vpop.f32.mrf.mxu0  ;;  %v4845_v18 = vld [vmem:[%s6068_s9 + $0x588] sm:$0xf]  ;;  %v4842_v26 = vor.u32 %v5622_v17, %v4839_v63  ;;  %v6739_v17 = vld [vmem:[%s7314_s2] ss:$0 sm:$0xff] }
 0x1fb   : > { %2538 = vmatmul.bf16.gmra.mxu1 %v4810_v19  ;;  %2707 = vmatmul.bf16.gmra.mxu2 %v4814_v34  ;;  %v5627_v9 = vld [vmem:[%s6068_s9 + $0x5a4] sm:$0xf0]  ;;  %v5623_v19 = vld [vmem:[%s6068_s9 + $0x58c] sm:$0xf] }
 0x1fc   : > { %v6712_v33 = vadd.f32 %v3003_v48, %v2835_v51  ;;  %v4847_v34 = vld [vmem:[%s6068_s9 + $0x5a8] sm:$0xf0]  ;;  %v4846_v51 = vor.u32 %v5627_v9, %v4845_v18 }
 0x1fd   : > { %3045 = vmatmul.bf16.gmra.mxu0 %v4822_v32  ;;  %v4850_v32 = vor.u32 %v5623_v19, %v4847_v34 }
 0x1fe   : > { %2876 = vmatmul.bf16.gmra.mxu3 %v4818_v5  ;;  %v2668_v8 = vpop.f32.mrf.mxu2 }
 0x1ff   : > { %v2669_v59 = vadd.f32 %v2668_v8, %v2500_v28  ;;  %v5628_v8 = vld [vmem:[%s6068_s9 + $0x5ac] sm:$0xf0] }
 0x200   : > { %v2501_v60 = vpop.f32.mrf.mxu1 }
 0x201   : > { %v2837_v23 = vpop.f32.mrf.mxu3  ;;  %v2502_v27 = vadd.f32 %v2501_v60, %v2333_v44 }
 0x202   : > { %v2838_v48 = vadd.f32 %v2837_v23, %v2669_v59  ;;  %v3008_v46 = vpop.f32.mrf.mxu0 }
 0x204   : > { %v6716_v58 = vadd.f32 %v3006_v20, %v2838_v48  ;;  %v4853_v20 = vld [vmem:[%s6068_s9 + $0x590] sm:$0xf] }
 0x205   : > { %v4854_v60 = vor.u32 %v5628_v8, %v4853_v20  ;;  %v2341_v8 = vadd.f32 %v6739_v17, %v6434_v6 }
 0x206   : > { %v2670_v11 = vpop.f32.mrf.mxu2 }
 0x207   : > { %v2671_v5 = vadd.f32 %v2670_v11, %v2502_v27  ;;  %v5743_v11 = vld [vmem:[%s7313_s1 + $0x148] sm:$0xff] }
 0x208   : > { %v2504_v28 = vpop.f32.mrf.mxu1  ;;  %3107 = vmatpush.bf16.msra.mxu1 %v5743_v11  ;;  %v2343_v11 = vadd.f32 %v6739_v17, %v6444_v7  ;;  %v4909_v7 = vld [vmem:[%s6068_s9 + $0x608] sm:$0xf] }
 0x209   : > { %v2839_v52 = vpop.f32.mrf.mxu3  ;;  %v2505_v59 = vadd.f32 %v2504_v28, %v2336_v41  ;;  %v5631_v28 = vld [vmem:[%s6068_s9 + $0x5cc] sm:$0xf] }
 0x20a   : > { %v2840_v44 = vadd.f32 %v2839_v52, %v2671_v5  ;;  %v3011_v48 = vpop.f32.mrf.mxu0  ;;  %v5630_v5 = vld [vmem:[%s6068_s9 + $0x5c4] sm:$0xf] }
 0x20b   : > { %2543 = vmatmul.bf16.gmra.mxu1 %v4842_v26  ;;  %2712 = vmatmul.bf16.gmra.mxu2 %v4846_v51  ;;  %v4871_v26 = vld [vmem:[%s6068_s9 + $0x5e0] sm:$0xf0]  ;;  %v5635_v51 = vld [vmem:[%s6068_s9 + $0x5e4] sm:$0xf0] }
 0x20c   : > { %v6728_v23 = vadd.f32 %v3008_v46, %v2840_v44  ;;  %v2338_v46 = vadd.f32 %v6739_v17, %v6417_v53  ;;  %v4877_v53 = vld [vmem:[%s6068_s9 + $0x5c8] sm:$0xf] }
 0x20d   : > { %3050 = vmatmul.bf16.gmra.mxu0 %v4854_v60  ;;  %v4874_v60 = vor.u32 %v5630_v5, %v4871_v26  ;;  %v4878_v10 = vor.u32 %v5635_v51, %v4877_v53 }
 0x20e   : > { %2881 = vmatmul.bf16.gmra.mxu3 %v4850_v32  ;;  %v2673_v27 = vpop.f32.mrf.mxu2  ;;  %v4879_v32 = vld [vmem:[%s6068_s9 + $0x5e8] sm:$0xf0] }
 0x20f   : > { %v2674_v63 = vadd.f32 %v2673_v27, %v2505_v59  ;;  %v4882_v13 = vor.u32 %v5631_v28, %v4879_v32  ;;  %v4885_v27 = vld [vmem:[%s6068_s9 + $0x5d0] sm:$0xf]  ;;  %v5769_v28 = vld [vmem:[%s7315_s3 + $0x18] sm:$0xff] }
 0x210   : > { %v2506_v9 = vpop.f32.mrf.mxu1  ;;  %3772 = vmatpush.bf16.msra.mxu0 %v5769_v28  ;;  %v2348_v28 = vadd.f32 %v6739_v17, %v6268_v35  ;;  %v2351_v35 = vadd.f32 %v6739_v17, %v6278_v45 }
 0x211   : > { %v2842_v18 = vpop.f32.mrf.mxu3  ;;  %v2507_v34 = vadd.f32 %v2506_v9, %v2338_v46  ;;  %v5636_v46 = vld [vmem:[%s6068_s9 + $0x5ec] sm:$0xf0] }
 0x212   : > { %v2843_v19 = vadd.f32 %v2842_v18, %v2674_v63  ;;  %v3013_v52 = vpop.f32.mrf.mxu0 }
 0x214   : > { %v6746_v41 = vadd.f32 %v3011_v48, %v2843_v19  ;;  %v4886_v19 = vor.u32 %v5636_v46, %v4885_v27 }
 0x216   : > { %v2675_v20 = vpop.f32.mrf.mxu2 }
 0x217   : > { %v2676_v44 = vadd.f32 %v2675_v20, %v2507_v34  ;;  %v5638_v20 = vld [vmem:[%s6068_s9 + $0x604] sm:$0xf] }
 0x218   : > { %v2509_v48 = vpop.f32.mrf.mxu1 }
 0x219   : > { %v2844_v59 = vpop.f32.mrf.mxu3  ;;  %v2510_v18 = vadd.f32 %v2509_v48, %v2341_v8 }
 0x21a   : > { %v2845_v63 = vadd.f32 %v2844_v59, %v2676_v44  ;;  %v3016_v6 = vpop.f32.mrf.mxu0  ;;  %v4903_v44 = vld [vmem:[%s6068_s9 + $0x620] sm:$0xf0]  ;;  %v5643_v59 = vld [vmem:[%s6068_s9 + $0x624] sm:$0xf0] }
 0x21b   : > { %2548 = vmatmul.bf16.gmra.mxu1 %v4874_v60  ;;  %2717 = vmatmul.bf16.gmra.mxu2 %v4878_v10  ;;  %v5639_v60 = vld [vmem:[%s6068_s9 + $0x60c] sm:$0xf] }
 0x21c   : > { %v6758_v9 = vadd.f32 %v3013_v52, %v2845_v63  ;;  %v4911_v10 = vld [vmem:[%s6068_s9 + $0x628] sm:$0xf0]  ;;  %v4906_v63 = vor.u32 %v5638_v20, %v4903_v44 }
 0x21d   : > { %3055 = vmatmul.bf16.gmra.mxu0 %v4886_v19 }
 0x21e   : > { %2886 = vmatmul.bf16.gmra.mxu3 %v4882_v13  ;;  %v2678_v34 = vpop.f32.mrf.mxu2  ;;  %v2346_v13 = vadd.f32 %v6739_v17, %v6254_v25 }
 0x21f   : > { %v2679_v5 = vadd.f32 %v2678_v34, %v2510_v18  ;;  %v4910_v18 = vor.u32 %v5643_v59, %v4909_v7  ;;  %v4917_v34 = vld [vmem:[%s6068_s9 + $0x610] sm:$0xf] }
 0x220   : > { %v2511_v52 = vpop.f32.mrf.mxu1 }
 0x221   : > { %v2847_v26 = vpop.f32.mrf.mxu3  ;;  %v2512_v51 = vadd.f32 %v2511_v52, %v2343_v11  ;;  %v5644_v11 = vld [vmem:[%s6068_s9 + $0x62c] sm:$0xf0] }
 0x222   : > { %v2848_v53 = vadd.f32 %v2847_v26, %v2679_v5  ;;  %v3018_v8 = vpop.f32.mrf.mxu0 }
 0x224   : > { %v6765_v32 = vadd.f32 %v3016_v6, %v2848_v53  ;;  %v4914_v6 = vor.u32 %v5639_v60, %v4911_v10  ;;  %v4918_v53 = vor.u32 %v5644_v11, %v4917_v34  ;;  %v5646_v10 = vld [vmem:[%s6068_s9 + $0x644] sm:$0xf] }
 0x226   : > { %v2680_v48 = vpop.f32.mrf.mxu2 }
 0x227   : > { %v2681_v27 = vadd.f32 %v2680_v48, %v2512_v51 }
 0x228   : > { %v2514_v19 = vpop.f32.mrf.mxu1 }
 0x229   : > { %v2849_v46 = vpop.f32.mrf.mxu3  ;;  %v2515_v26 = vadd.f32 %v2514_v19, %v2346_v13  ;;  %v4935_v13 = vld [vmem:[%s6068_s9 + $0x660] sm:$0xf0] }
 0x22a   : > { %v2850_v5 = vadd.f32 %v2849_v46, %v2681_v27  ;;  %v3021_v25 = vpop.f32.mrf.mxu0  ;;  %v4941_v27 = vld [vmem:[%s6068_s9 + $0x648] sm:$0xf]  ;;  %v4938_v11 = vor.u32 %v5646_v10, %v4935_v13 }
 0x22b   : > { %2553 = vmatmul.bf16.gmra.mxu1 %v4906_v63  ;;  %2722 = vmatmul.bf16.gmra.mxu2 %v4910_v18  ;;  %v5651_v46 = vld [vmem:[%s6068_s9 + $0x664] sm:$0xf0]  ;;  %v5647_v63 = vld [vmem:[%s6068_s9 + $0x64c] sm:$0xf] }
 0x22c   : > { %v6777_v52 = vadd.f32 %v3018_v8, %v2850_v5  ;;  %v4943_v18 = vld [vmem:[%s6068_s9 + $0x668] sm:$0xf0]  ;;  %v4942_v5 = vor.u32 %v5651_v46, %v4941_v27 }
 0x22d   : > { %3060 = vmatmul.bf16.gmra.mxu0 %v4918_v53  ;;  %v4946_v53 = vor.u32 %v5647_v63, %v4943_v18  ;;  %v5654_v18 = vld [vmem:[%s6068_s9 + $0x684] sm:$0xf] }
 0x22e   : > { %2891 = vmatmul.bf16.gmra.mxu3 %v4914_v6  ;;  %v2683_v51 = vpop.f32.mrf.mxu2 }
 0x22f   : > { %v2684_v20 = vadd.f32 %v2683_v51, %v2515_v26  ;;  %v5652_v51 = vld [vmem:[%s6068_s9 + $0x66c] sm:$0xf0] }
 0x230   : > { %v2516_v7 = vpop.f32.mrf.mxu1 }
 0x231   : > { %v2852_v44 = vpop.f32.mrf.mxu3  ;;  %v2517_v59 = vadd.f32 %v2516_v7, %v2348_v28 }
 0x232   : > { %v2853_v8 = vadd.f32 %v2852_v44, %v2684_v20  ;;  %v3023_v48 = vpop.f32.mrf.mxu0 }
 0x234   : > { %v6781_v60 = vadd.f32 %v3021_v25, %v2853_v8  ;;  %v4949_v25 = vld [vmem:[%s6068_s9 + $0x650] sm:$0xf] }
 0x235   : > { %v4950_v7 = vor.u32 %v5652_v51, %v4949_v25 }
 0x236   : > { %v2685_v19 = vpop.f32.mrf.mxu2 }
 0x237   : > { %v2686_v6 = vadd.f32 %v2685_v19, %v2517_v59  ;;  %v2353_v59 = vadd.f32 %v6739_v17, %v6292_v55  ;;  %v2356_v55 = vadd.f32 %v6739_v17, %v6308_v3  ;;  %v5750_v3 = vld [vmem:[%s7313_s1 + $0x180] sm:$0xff] }
 0x238   : > { %v2519_v26 = vpop.f32.mrf.mxu1  ;;  %3277 = vmatpush.bf16.msra.mxu2 %v5750_v3 }
 0x239   : > { %v2854_v34 = vpop.f32.mrf.mxu3  ;;  %v2520_v20 = vadd.f32 %v2519_v26, %v2351_v35  ;;  %v4967_v35 = vld [vmem:[%s6068_s9 + $0x6a0] sm:$0xf0] }
 0x23a   : > { %v2855_v28 = vadd.f32 %v2854_v34, %v2686_v6  ;;  %v3026_v45 = vpop.f32.mrf.mxu0  ;;  %v4973_v6 = vld [vmem:[%s6068_s9 + $0x688] sm:$0xf]  ;;  %v4970_v51 = vor.u32 %v5654_v18, %v4967_v35 }
 0x23b   : > { %2558 = vmatmul.bf16.gmra.mxu1 %v4938_v11  ;;  %2727 = vmatmul.bf16.gmra.mxu2 %v4942_v5  ;;  %v5659_v34 = vld [vmem:[%s6068_s9 + $0x6a4] sm:$0xf0]  ;;  %v5655_v11 = vld [vmem:[%s6068_s9 + $0x68c] sm:$0xf] }
 0x23c   : > { %v6793_v44 = vadd.f32 %v3023_v48, %v2855_v28  ;;  %v4975_v5 = vld [vmem:[%s6068_s9 + $0x6a8] sm:$0xf0]  ;;  %v4974_v28 = vor.u32 %v5659_v34, %v4973_v6 }
 0x23d   : > { %3065 = vmatmul.bf16.gmra.mxu0 %v4950_v7  ;;  %v4978_v7 = vor.u32 %v5655_v11, %v4975_v5 }
 0x23e   : > { %2896 = vmatmul.bf16.gmra.mxu3 %v4946_v53  ;;  %v2688_v8 = vpop.f32.mrf.mxu2 }
 0x23f   : > { %v2689_v10 = vadd.f32 %v2688_v8, %v2520_v20  ;;  %v5660_v8 = vld [vmem:[%s6068_s9 + $0x6ac] sm:$0xf0] }
 0x240   : > { %v2521_v27 = vpop.f32.mrf.mxu1 }
 0x241   : > { %v2857_v13 = vpop.f32.mrf.mxu3  ;;  %v2522_v46 = vadd.f32 %v2521_v27, %v2353_v59 }
 0x242   : > { %v2858_v48 = vadd.f32 %v2857_v13, %v2689_v10  ;;  %v3028_v19 = vpop.f32.mrf.mxu0 }
 0x244   : > { %v6797_v63 = vadd.f32 %v3026_v45, %v2858_v48  ;;  %v4981_v45 = vld [vmem:[%s6068_s9 + $0x690] sm:$0xf] }
 0x245   : > { %v4982_v27 = vor.u32 %v5660_v8, %v4981_v45  ;;  %v2361_v8 = vadd.f32 %v6739_v17, %v6335_v30 }
 0x246   : > { %v2690_v26 = vpop.f32.mrf.mxu2 }
 0x247   : > { %v2691_v53 = vadd.f32 %v2690_v26, %v2522_v46  ;;  %v5758_v46 = vld [vmem:[%s7313_s1 + $0x1c0] sm:$0xff] }
 0x248   : > { %v2524_v20 = vpop.f32.mrf.mxu1  ;;  %3446 = vmatpush.bf16.msra.mxu3 %v5758_v46  ;;  %v5742_v26 = vld [vmem:[%s7313_s1 + $0x140] sm:$0xff] }
 0x249   : > { %v2859_v25 = vpop.f32.mrf.mxu3  ;;  %v2525_v10 = vadd.f32 %v2524_v20, %v2356_v55  ;;  %3108 = vmatpush.bf16.msra.mxu1 %v5742_v26  ;;  %v5663_v20 = vld [vmem:[%s6068_s9 + $0x6cc] sm:$0xf]  ;;  %v2363_v26 = vadd.f32 %v6739_v17, %v6349_v43  ;;  %v5037_v43 = vld [vmem:[%s6068_s9 + $0x708] sm:$0xf] }
 0x24a   : > { %v2860_v59 = vadd.f32 %v2859_v25, %v2691_v53  ;;  %v3031_v48 = vpop.f32.mrf.mxu0  ;;  %v5662_v53 = vld [vmem:[%s6068_s9 + $0x6c4] sm:$0xf] }
 0x24b   : > { %2563 = vmatmul.bf16.gmra.mxu1 %v4970_v51  ;;  %2732 = vmatmul.bf16.gmra.mxu2 %v4974_v28  ;;  %v4999_v51 = vld [vmem:[%s6068_s9 + $0x6e0] sm:$0xf0]  ;;  %v5667_v28 = vld [vmem:[%s6068_s9 + $0x6e4] sm:$0xf0] }
 0x24c   : > { %v6809_v13 = vadd.f32 %v3028_v19, %v2860_v59  ;;  %v2358_v19 = vadd.f32 %v6739_v17, %v6325_v14  ;;  %v5005_v14 = vld [vmem:[%s6068_s9 + $0x6c8] sm:$0xf] }
 0x24d   : > { %3070 = vmatmul.bf16.gmra.mxu0 %v4982_v27  ;;  %v5002_v27 = vor.u32 %v5662_v53, %v4999_v51  ;;  %v5006_v3 = vor.u32 %v5667_v28, %v5005_v14 }
 0x24e   : > { %2901 = vmatmul.bf16.gmra.mxu3 %v4978_v7  ;;  %v2693_v18 = vpop.f32.mrf.mxu2  ;;  %v5007_v7 = vld [vmem:[%s6068_s9 + $0x6e8] sm:$0xf0] }
 0x24f   : > { %v2694_v35 = vadd.f32 %v2693_v18, %v2525_v10  ;;  %v5010_v46 = vor.u32 %v5663_v20, %v5007_v7  ;;  %v5013_v18 = vld [vmem:[%s6068_s9 + $0x6d0] sm:$0xf] }
 0x250   : > { %v2526_v34 = vpop.f32.mrf.mxu1  ;;  %v5768_v20 = vld [vmem:[%s7315_s3 + $0x10] sm:$0xff] }
 0x251   : > { %v2862_v6 = vpop.f32.mrf.mxu3  ;;  %v2527_v5 = vadd.f32 %v2526_v34, %v2358_v19  ;;  %v5668_v19 = vld [vmem:[%s6068_s9 + $0x6ec] sm:$0xf0]  ;;  %3773 = vmatpush.bf16.msra.mxu0 %v5768_v20  ;;  %v2368_v20 = vadd.f32 %v6739_v17, %v6373_v12  ;;  %v2371_v12 = vadd.f32 %v6739_v17, %v6383_v38 }
 0x252   : > { %v2863_v11 = vadd.f32 %v2862_v6, %v2694_v35  ;;  %v3033_v25 = vpop.f32.mrf.mxu0 }
 0x254   : > { %v6822_v55 = vadd.f32 %v3031_v48, %v2863_v11  ;;  %v5014_v11 = vor.u32 %v5668_v19, %v5013_v18 }
 0x256   : > { %v2695_v45 = vpop.f32.mrf.mxu2 }
 0x257   : > { %v2696_v59 = vadd.f32 %v2695_v45, %v2527_v5  ;;  %v5670_v45 = vld [vmem:[%s6068_s9 + $0x704] sm:$0xf] }
 0x258   : > { %v2529_v48 = vpop.f32.mrf.mxu1 }
 0x259   : > { %v2864_v10 = vpop.f32.mrf.mxu3  ;;  %v2530_v6 = vadd.f32 %v2529_v48, %v2361_v8 }
 0x25a   : > { %v2865_v35 = vadd.f32 %v2864_v10, %v2696_v59  ;;  %v3036_v30 = vpop.f32.mrf.mxu0  ;;  %v5031_v59 = vld [vmem:[%s6068_s9 + $0x720] sm:$0xf0]  ;;  %v5675_v10 = vld [vmem:[%s6068_s9 + $0x724] sm:$0xf0] }
 0x25b   : > { %2568 = vmatmul.bf16.gmra.mxu1 %v5002_v27  ;;  %2737 = vmatmul.bf16.gmra.mxu2 %v5006_v3  ;;  %v5671_v27 = vld [vmem:[%s6068_s9 + $0x70c] sm:$0xf] }
 0x25c   : > { %v6834_v34 = vadd.f32 %v3033_v25, %v2865_v35  ;;  %v5039_v3 = vld [vmem:[%s6068_s9 + $0x728] sm:$0xf0]  ;;  %v5034_v35 = vor.u32 %v5670_v45, %v5031_v59 }
 0x25d   : > { %3075 = vmatmul.bf16.gmra.mxu0 %v5014_v11 }
 0x25e   : > { %2906 = vmatmul.bf16.gmra.mxu3 %v5010_v46  ;;  %v2698_v5 = vpop.f32.mrf.mxu2  ;;  %v2366_v46 = vadd.f32 %v6739_v17, %v6359_v61 }
 0x25f   : > { %v2699_v53 = vadd.f32 %v2698_v5, %v2530_v6  ;;  %v5038_v6 = vor.u32 %v5675_v10, %v5037_v43  ;;  %v5045_v5 = vld [vmem:[%s6068_s9 + $0x710] sm:$0xf] }
 0x260   : > { %v2531_v25 = vpop.f32.mrf.mxu1 }
 0x261   : > { %v2867_v51 = vpop.f32.mrf.mxu3  ;;  %v2532_v28 = vadd.f32 %v2531_v25, %v2363_v26  ;;  %v5676_v26 = vld [vmem:[%s6068_s9 + $0x72c] sm:$0xf0] }
 0x262   : > { %v2868_v14 = vadd.f32 %v2867_v51, %v2699_v53  ;;  %v3038_v8 = vpop.f32.mrf.mxu0 }
 0x264   : > { %v6841_v7 = vadd.f32 %v3036_v30, %v2868_v14  ;;  %v5042_v30 = vor.u32 %v5671_v27, %v5039_v3  ;;  %v5046_v14 = vor.u32 %v5676_v26, %v5045_v5  ;;  %v5678_v3 = vld [vmem:[%s6068_s9 + $0x744] sm:$0xf] }
 0x266   : > { %v2700_v48 = vpop.f32.mrf.mxu2 }
 0x267   : > { %v2701_v18 = vadd.f32 %v2700_v48, %v2532_v28 }
 0x268   : > { %v2534_v11 = vpop.f32.mrf.mxu1 }
 0x269   : > { %v2869_v19 = vpop.f32.mrf.mxu3  ;;  %v2535_v51 = vadd.f32 %v2534_v11, %v2366_v46  ;;  %v5063_v46 = vld [vmem:[%s6068_s9 + $0x760] sm:$0xf0] }
 0x26a   : > { %v2870_v53 = vadd.f32 %v2869_v19, %v2701_v18  ;;  %v3041_v61 = vpop.f32.mrf.mxu0  ;;  %v5069_v18 = vld [vmem:[%s6068_s9 + $0x748] sm:$0xf]  ;;  %v5066_v26 = vor.u32 %v5678_v3, %v5063_v46 }
 0x26b   : > { %2573 = vmatmul.bf16.gmra.mxu1 %v5034_v35  ;;  %2742 = vmatmul.bf16.gmra.mxu2 %v5038_v6  ;;  %v5683_v19 = vld [vmem:[%s6068_s9 + $0x764] sm:$0xf0]  ;;  %v5679_v35 = vld [vmem:[%s6068_s9 + $0x74c] sm:$0xf] }
 0x26c   : > { %v6853_v25 = vadd.f32 %v3038_v8, %v2870_v53  ;;  %v5071_v6 = vld [vmem:[%s6068_s9 + $0x768] sm:$0xf0]  ;;  %v5070_v53 = vor.u32 %v5683_v19, %v5069_v18 }
 0x26d   : > { %3080 = vmatmul.bf16.gmra.mxu0 %v5046_v14  ;;  %v5074_v14 = vor.u32 %v5679_v35, %v5071_v6  ;;  %v5686_v6 = vld [vmem:[%s6068_s9 + $0x784] sm:$0xf] }
 0x26e   : > { %2911 = vmatmul.bf16.gmra.mxu3 %v5042_v30  ;;  %v2703_v28 = vpop.f32.mrf.mxu2 }
 0x26f   : > { %v2704_v45 = vadd.f32 %v2703_v28, %v2535_v51  ;;  %v5684_v28 = vld [vmem:[%s6068_s9 + $0x76c] sm:$0xf0] }
 0x270   : > { %v2536_v43 = vpop.f32.mrf.mxu1 }
 0x271   : > { %v2872_v59 = vpop.f32.mrf.mxu3  ;;  %v2537_v10 = vadd.f32 %v2536_v43, %v2368_v20 }
 0x272   : > { %v2873_v8 = vadd.f32 %v2872_v59, %v2704_v45  ;;  %v6860_v48 = vpop.f32.mrf.mxu0 }
 0x274   : > { %v6857_v27 = vadd.f32 %v3041_v61, %v2873_v8  ;;  %v5077_v61 = vld [vmem:[%s6068_s9 + $0x750] sm:$0xf]  ;;  %v2373_v8 = vadd.f32 %v6739_v17, %v6397_v1  ;;  %v7342_v1 = vld [vmem:[#allocation14_spill] sm:$0xff] }
 0x275   : > { %v5078_v59 = vor.u32 %v5684_v28, %v5077_v61 }
 0x276   : > { %v2705_v11 = vpop.f32.mrf.mxu2 }
 0x277   : > { %v2706_v30 = vadd.f32 %v2705_v11, %v2537_v10 }
 0x278   : > { %v2539_v51 = vpop.f32.mrf.mxu1 }
 0x279   : > { %v2874_v5 = vpop.f32.mrf.mxu3  ;;  %v2540_v45 = vadd.f32 %v2539_v51, %v2371_v12  ;;  %v5095_v12 = vld [vmem:[%s6068_s9 + $0x7a0] sm:$0xf0] }
 0x27a   : > { %v6871_v20 = vadd.f32 %v2874_v5, %v2706_v30  ;;  %v3046_v38 = vpop.f32.mrf.mxu0  ;;  %v5101_v30 = vld [vmem:[%s6068_s9 + $0x788] sm:$0xf] }
 0x27b   : > { %2578 = vmatmul.bf16.gmra.mxu1 %v5066_v26  ;;  %2747 = vmatmul.bf16.gmra.mxu2 %v5070_v53  ;;  %v5691_v5 = vld [vmem:[%s6068_s9 + $0x7a4] sm:$0xf0]  ;;  %v5687_v26 = vld [vmem:[%s6068_s9 + $0x78c] sm:$0xf] }
 0x27c   : > { %v5103_v53 = vld [vmem:[%s6068_s9 + $0x7a8] sm:$0xf0] }
 0x27d   : > { %3085 = vmatmul.bf16.gmra.mxu0 %v5078_v59  ;;  %v5102_v59 = vor.u32 %v5691_v5, %v5101_v30 }
 0x27e   : > { %2916 = vmatmul.bf16.gmra.mxu3 %v5074_v14  ;;  %v2708_v43 = vpop.f32.mrf.mxu2  ;;  %v2376_v14 = vadd.f32 %v6739_v17, %v7342_v1 }
 0x27f   : > { %v2709_v10 = vadd.f32 %v2708_v43, %v2540_v45  ;;  %v5098_v45 = vor.u32 %v5686_v6, %v5095_v12  ;;  %v5106_v43 = vor.u32 %v5687_v26, %v5103_v53  ;;  %v7344_v12 = vld [vmem:[#allocation16_spill] sm:$0xff] }
 0x280   : > { %v2541_v46 = vpop.f32.mrf.mxu1  ;;  %v2378_v30 = vadd.f32 %v6739_v17, %v7344_v12  ;;  %v7347_v12 = vld [vmem:[#allocation18_spill] sm:$0xff] }
 0x281   : > { %v2877_v3 = vpop.f32.mrf.mxu3  ;;  %v2542_v19 = vadd.f32 %v2541_v46, %v2373_v8  ;;  %v5109_v8 = vld [vmem:[%s6068_s9 + $0x790] sm:$0xf] }
 0x282   : > { %v2878_v18 = vadd.f32 %v2877_v3, %v2709_v10  ;;  %v6878_v11 = vpop.f32.mrf.mxu0  ;;  %v5692_v10 = vld [vmem:[%s6068_s9 + $0x7ac] sm:$0xf0] }
 0x283   : > { %7341 = vst [vmem:[#allocation26_spill] sm:$0xff] %v6878_v11 }
 0x284   : > { %v6875_v35 = vadd.f32 %v3046_v38, %v2878_v18  ;;  %v5110_v18 = vor.u32 %v5692_v10, %v5109_v8  ;;  %v5135_v8 = vld [vmem:[%s6068_s9 + $0x7e8] sm:$0xf0] }
 0x286   : > { %7340 = vst [vmem:[#allocation25_spill] sm:$0xff] %v6875_v35  ;;  %v2710_v51 = vpop.f32.mrf.mxu2 }
 0x287   : > { %v2711_v61 = vadd.f32 %v2710_v51, %v2542_v19 }
 0x288   : > { %v2544_v38 = vpop.f32.mrf.mxu1 }
 0x289   : > { %v2879_v28 = vpop.f32.mrf.mxu3  ;;  %v2545_v46 = vadd.f32 %v2544_v38, %v2376_v14  ;;  %v5699_v38 = vld [vmem:[%s6068_s9 + $0x7e4] sm:$0xf0] }
 0x28a   : > { %v6889_v3 = vadd.f32 %v2879_v28, %v2711_v61  ;;  %v3051_v19 = vpop.f32.mrf.mxu0  ;;  %v5694_v61 = vld [vmem:[%s6068_s9 + $0x7c4] sm:$0xf] }
 0x28b   : > { %2583 = vmatmul.bf16.gmra.mxu1 %v5098_v45  ;;  %2752 = vmatmul.bf16.gmra.mxu2 %v5102_v59  ;;  %v5127_v45 = vld [vmem:[%s6068_s9 + $0x7e0] sm:$0xf0]  ;;  %v5133_v59 = vld [vmem:[%s6068_s9 + $0x7c8] sm:$0xf] }
 0x28c   : > { %7343 = vst [vmem:[#allocation14_spill] sm:$0xff] %v6889_v3 }
 0x28d   : > { %3090 = vmatmul.bf16.gmra.mxu0 %v5110_v18 }
 0x28e   : > { %2921 = vmatmul.bf16.gmra.mxu3 %v5106_v43  ;;  %v2713_v6 = vpop.f32.mrf.mxu2  ;;  %v5695_v43 = vld [vmem:[%s6068_s9 + $0x7cc] sm:$0xf] }
 0x28f   : > { %v2714_v5 = vadd.f32 %v2713_v6, %v2545_v46  ;;  %v2381_v46 = vadd.f32 %v6739_v17, %v7347_v12  ;;  %v5767_v12 = vld [vmem:[%s7315_s3 + $0x8] sm:$0xff] }
 0x290   : > { %v2546_v53 = vpop.f32.mrf.mxu1  ;;  %3774 = vmatpush.bf16.msra.mxu0 %v5767_v12 }
 0x291   : > { %v2882_v26 = vpop.f32.mrf.mxu3  ;;  %v2547_v1 = vadd.f32 %v2546_v53, %v2378_v30  ;;  %v5134_v30 = vor.u32 %v5699_v38, %v5133_v59  ;;  %v5141_v53 = vld [vmem:[%s6068_s9 + $0x7d0] sm:$0xf] }
 0x292   : > { %v2883_v51 = vadd.f32 %v2882_v26, %v2714_v5  ;;  %v6896_v28 = vpop.f32.mrf.mxu0  ;;  %v5130_v5 = vor.u32 %v5694_v61, %v5127_v45  ;;  %v5138_v26 = vor.u32 %v5695_v43, %v5135_v8 }
 0x293   : > { %7346 = vst [vmem:[#allocation27_spill] sm:$0xff] %v6896_v28 }
 0x294   : > { %v6893_v14 = vadd.f32 %v3051_v19, %v2883_v51  ;;  %v5700_v51 = vld [vmem:[%s6068_s9 + $0x7ec] sm:$0xf0] }
 0x295   : > { %v5142_v11 = vor.u32 %v5700_v51, %v5141_v53 }
 0x296   : > { %7345 = vst [vmem:[#allocation16_spill] sm:$0xff] %v6893_v14  ;;  %v2715_v10 = vpop.f32.mrf.mxu2 }
 0x297   : > { %v2716_v18 = vadd.f32 %v2715_v10, %v2547_v1  ;;  %v7349_v10 = vld [vmem:[#allocation20_spill] sm:$0xff] }
 0x298   : > { %v2549_v19 = vpop.f32.mrf.mxu1  ;;  %v2383_v61 = vadd.f32 %v6739_v17, %v7349_v10 }
 0x299   : > { %v2884_v6 = vpop.f32.mrf.mxu3  ;;  %v2550_v28 = vadd.f32 %v2549_v19, %v2381_v46  ;;  %v5453_v19 = vld [vmem:[%s6068_s9 + $0x34] sm:$0xf0] }
 0x29a   : > { %v6907_v14 = vadd.f32 %v2884_v6, %v2716_v18  ;;  %v3056_v3 = vpop.f32.mrf.mxu0  ;;  %v5448_v18 = vld [vmem:[%s6068_s9 + $0x14] sm:$0xf] }
 0x29b   : > { %2588 = vmatmul.bf16.gmra.mxu1 %v5130_v5  ;;  %2757 = vmatmul.bf16.gmra.mxu2 %v5134_v30  ;;  %v4151_v5 = vld [vmem:[%s6068_s9 + $0x30] sm:$0xf0]  ;;  %v4157_v30 = vld [vmem:[%s6068_s9 + $0x18] sm:$0xf] }
 0x29c   : > { %7348 = vst [vmem:[#allocation18_spill] sm:$0xff] %v6907_v14 }
 0x29d   : > { %3095 = vmatmul.bf16.gmra.mxu0 %v5142_v11  ;;  %v7352_v11 = vld [vmem:[#allocation2_spill] sm:$0xff] }
 0x29e   : > { %2926 = vmatmul.bf16.gmra.mxu3 %v5138_v26  ;;  %v2718_v1 = vpop.f32.mrf.mxu2  ;;  %v5449_v26 = vld [vmem:[%s6068_s9 + $0x1c] sm:$0xf]  ;;  %v2386_v51 = vadd.f32 %v6739_v17, %v7352_v11 }
 0x29f   : > { %v2719_v45 = vadd.f32 %v2718_v1, %v2550_v28  ;;  %v4159_v28 = vld [vmem:[%s6068_s9 + $0x38] sm:$0xf0] }
 0x2a0   : > { %v2551_v38 = vpop.f32.mrf.mxu1 }
 0x2a1   : > { %v2887_v59 = vpop.f32.mrf.mxu3  ;;  %v2552_v8 = vadd.f32 %v2551_v38, %v2383_v61  ;;  %v4154_v61 = vor.u32 %v5448_v18, %v4151_v5 }
 0x2a2   : > { %v2888_v43 = vadd.f32 %v2887_v59, %v2719_v45  ;;  %v6917_v6 = vpop.f32.mrf.mxu0  ;;  %v4158_v45 = vor.u32 %v5453_v19, %v4157_v30 }
 0x2a3   : > { %7351 = vst [vmem:[#allocation28_spill] sm:$0xff] %v6917_v6 }
 0x2a4   : > { %v6914_v46 = vadd.f32 %v3056_v3, %v2888_v43  ;;  %v4162_v3 = vor.u32 %v5449_v26, %v4159_v28 }
 0x2a6   : > { %7350 = vst [vmem:[#allocation20_spill] sm:$0xff] %v6914_v46  ;;  %v2720_v53 = vpop.f32.mrf.mxu2 }
 0x2a7   : > { %v2721_v1 = vadd.f32 %v2720_v53, %v2552_v8  ;;  %v7354_v8 = vld [vmem:[#allocation3_spill] sm:$0xff] }
 0x2a8   : > { %v2554_v59 = vpop.f32.mrf.mxu1  ;;  %v2388_v18 = vadd.f32 %v6739_v17, %v7354_v8 }
 0x2a9   : > { %v2889_v10 = vpop.f32.mrf.mxu3  ;;  %v2555_v43 = vadd.f32 %v2554_v59, %v2386_v51  ;;  %v5456_v51 = vld [vmem:[%s6068_s9 + $0x54] sm:$0xf]  ;;  %v5457_v59 = vld [vmem:[%s6068_s9 + $0x5c] sm:$0xf] }
 0x2aa   : > { %v6926_v38 = vadd.f32 %v2889_v10, %v2721_v1  ;;  %v3061_v12 = vpop.f32.mrf.mxu0  ;;  %v4183_v10 = vld [vmem:[%s6068_s9 + $0x70] sm:$0xf0] }
 0x2ab   : > { %3109 = vmatmul.bf16.vlgmr.msra.gmra.mxu1 %v4154_v61  ;;  %3278 = vmatmul.bf16.vlgmr.msra.gmra.mxu2 %v4158_v45  ;;  %v4189_v61 = vld [vmem:[%s6068_s9 + $0x58] sm:$0xf] }
 0x2ac   : > { %7353 = vst [vmem:[#allocation2_spill] sm:$0xff] %v6926_v38  ;;  %v5461_v45 = vld [vmem:[%s6068_s9 + $0x74] sm:$0xf0]  ;;  %v7357_v38 = vld [vmem:[#allocation4_spill] sm:$0xff] }
 0x2ad   : > { %v2391_v46 = vadd.f32 %v6739_v17, %v7357_v38  ;;  %v4190_v14 = vor.u32 %v5461_v45, %v4189_v61 }
 0x2ae   : > { %3447 = vmatmul.bf16.vlgmr.msra.gmra.mxu3 %v4162_v3  ;;  %v2723_v11 = vpop.f32.mrf.mxu2  ;;  %v4191_v3 = vld [vmem:[%s6068_s9 + $0x78] sm:$0xf0] }
 0x2af   : > { %v2724_v5 = vadd.f32 %v2723_v11, %v2555_v43  ;;  %v4186_v11 = vor.u32 %v5456_v51, %v4183_v10 }
 0x2b0   : > { %v2556_v19 = vpop.f32.mrf.mxu1 }
 0x2b1   : > { %v2892_v30 = vpop.f32.mrf.mxu3  ;;  %v2557_v28 = vadd.f32 %v2556_v19, %v2388_v18 }
 0x2b2   : > { %v2893_v26 = vadd.f32 %v2892_v30, %v2724_v5  ;;  %v6933_v1 = vpop.f32.mrf.mxu0 }
 0x2b3   : > { %7356 = vst [vmem:[#allocation29_spill] sm:$0xff] %v6933_v1  ;;  %v7362_v1 = vld [vmem:[#allocation6_spill] sm:$0xff] }
 0x2b4   : > { %v6930_v53 = vadd.f32 %v3061_v12, %v2893_v26  ;;  %v4194_v12 = vor.u32 %v5457_v59, %v4191_v3 }
 0x2b6   : > { %7355 = vst [vmem:[#allocation3_spill] sm:$0xff] %v6930_v53  ;;  %v2725_v6 = vpop.f32.mrf.mxu2 }
 0x2b7   : > { %v2726_v8 = vadd.f32 %v2725_v6, %v2557_v28  ;;  %v7359_v6 = vld [vmem:[#allocation5_spill] sm:$0xff] }
 0x2b8   : > { %v2559_v5 = vpop.f32.mrf.mxu1  ;;  %v2393_v26 = vadd.f32 %v6739_v17, %v7359_v6 }
 0x2b9   : > { %v2894_v43 = vpop.f32.mrf.mxu3  ;;  %v2560_v30 = vadd.f32 %v2559_v5, %v2391_v46  ;;  %v5464_v46 = vld [vmem:[%s6068_s9 + $0x94] sm:$0xf]  ;;  %v4223_v5 = vld [vmem:[%s6068_s9 + $0xb8] sm:$0xf0] }
 0x2ba   : > { %v6942_v18 = vadd.f32 %v2894_v43, %v2726_v8  ;;  %v3066_v19 = vpop.f32.mrf.mxu0  ;;  %v4215_v8 = vld [vmem:[%s6068_s9 + $0xb0] sm:$0xf0]  ;;  %v5469_v43 = vld [vmem:[%s6068_s9 + $0xb4] sm:$0xf0] }
 0x2bb   : > { %3114 = vmatmul.bf16.gmra.mxu1 %v4186_v11  ;;  %3283 = vmatmul.bf16.gmra.mxu2 %v4190_v14  ;;  %v4221_v14 = vld [vmem:[%s6068_s9 + $0x98] sm:$0xf]  ;;  %v5465_v11 = vld [vmem:[%s6068_s9 + $0x9c] sm:$0xf] }
 0x2bc   : > { %7358 = vst [vmem:[#allocation4_spill] sm:$0xff] %v6942_v18  ;;  %v2396_v18 = vadd.f32 %v6739_v17, %v7362_v1  ;;  %v4222_v53 = vor.u32 %v5469_v43, %v4221_v14 }
 0x2be   : > { %3452 = vmatmul.bf16.gmra.mxu3 %v4194_v12  ;;  %v2728_v38 = vpop.f32.mrf.mxu2 }
 0x2bf   : > { %v2729_v28 = vadd.f32 %v2728_v38, %v2560_v30  ;;  %v4218_v38 = vor.u32 %v5464_v46, %v4215_v8 }
 0x2c0   : > { %v2561_v10 = vpop.f32.mrf.mxu1 }
 0x2c1   : > { %v2897_v51 = vpop.f32.mrf.mxu3  ;;  %v2562_v45 = vadd.f32 %v2561_v10, %v2393_v26 }
 0x2c2   : > { %v2898_v61 = vadd.f32 %v2897_v51, %v2729_v28  ;;  %v6949_v3 = vpop.f32.mrf.mxu0 }
 0x2c3   : > { %7361 = vst [vmem:[#allocation30_spill] sm:$0xff] %v6949_v3  ;;  %v7367_v3 = vld [vmem:[#allocation8_spill] sm:$0xff] }
 0x2c4   : > { %v6946_v59 = vadd.f32 %v3066_v19, %v2898_v61  ;;  %v4226_v19 = vor.u32 %v5465_v11, %v4223_v5  ;;  %v7364_v61 = vld [vmem:[#allocation7_spill] sm:$0xff] }
 0x2c6   : > { %7360 = vst [vmem:[#allocation5_spill] sm:$0xff] %v6946_v59  ;;  %v2730_v12 = vpop.f32.mrf.mxu2 }
 0x2c7   : > { %v2731_v6 = vadd.f32 %v2730_v12, %v2562_v45  ;;  %v2398_v45 = vadd.f32 %v6739_v17, %v7364_v61 }
 0x2c8   : > { %v2564_v28 = vpop.f32.mrf.mxu1 }
 0x2c9   : > { %v2899_v30 = vpop.f32.mrf.mxu3  ;;  %v2565_v51 = vadd.f32 %v2564_v28, %v2396_v18  ;;  %v5472_v18 = vld [vmem:[%s6068_s9 + $0xd4] sm:$0xf]  ;;  %v4255_v28 = vld [vmem:[%s6068_s9 + $0xf8] sm:$0xf0] }
 0x2ca   : > { %v6958_v26 = vadd.f32 %v2899_v30, %v2731_v6  ;;  %v3071_v10 = vpop.f32.mrf.mxu0  ;;  %v4247_v6 = vld [vmem:[%s6068_s9 + $0xf0] sm:$0xf0]  ;;  %v5477_v30 = vld [vmem:[%s6068_s9 + $0xf4] sm:$0xf0] }
 0x2cb   : > { %3119 = vmatmul.bf16.gmra.mxu1 %v4218_v38  ;;  %3288 = vmatmul.bf16.gmra.mxu2 %v4222_v53  ;;  %v4253_v53 = vld [vmem:[%s6068_s9 + $0xd8] sm:$0xf]  ;;  %v5473_v38 = vld [vmem:[%s6068_s9 + $0xdc] sm:$0xf] }
 0x2cc   : > { %7363 = vst [vmem:[#allocation6_spill] sm:$0xff] %v6958_v26  ;;  %v2401_v26 = vadd.f32 %v6739_v17, %v7367_v3  ;;  %v4254_v59 = vor.u32 %v5477_v30, %v4253_v53  ;;  %v7369_v3 = vld [vmem:[#allocation9_spill] sm:$0xff] }
 0x2ce   : > { %3457 = vmatmul.bf16.gmra.mxu3 %v4226_v19  ;;  %v2733_v1 = vpop.f32.mrf.mxu2 }
 0x2cf   : > { %v2734_v46 = vadd.f32 %v2733_v1, %v2565_v51  ;;  %v4250_v1 = vor.u32 %v5472_v18, %v4247_v6 }
 0x2d0   : > { %v2566_v14 = vpop.f32.mrf.mxu1 }
 0x2d1   : > { %v2902_v8 = vpop.f32.mrf.mxu3  ;;  %v2567_v11 = vadd.f32 %v2566_v14, %v2398_v45  ;;  %v4258_v45 = vor.u32 %v5473_v38, %v4255_v28  ;;  %v5480_v28 = vld [vmem:[%s6068_s9 + $0x114] sm:$0xf] }
 0x2d2   : > { %v2903_v43 = vadd.f32 %v2902_v8, %v2734_v46  ;;  %v6965_v12 = vpop.f32.mrf.mxu0 }
 0x2d3   : > { %7366 = vst [vmem:[#allocation31_spill] sm:$0xff] %v6965_v12 }
 0x2d4   : > { %v6962_v5 = vadd.f32 %v3071_v10, %v2903_v43 }
 0x2d6   : > { %7365 = vst [vmem:[#allocation7_spill] sm:$0xff] %v6962_v5  ;;  %v2735_v19 = vpop.f32.mrf.mxu2 }
 0x2d7   : > { %v2736_v61 = vadd.f32 %v2735_v19, %v2567_v11  ;;  %v2403_v11 = vadd.f32 %v6739_v17, %v7369_v3 }
 0x2d8   : > { %v2569_v46 = vpop.f32.mrf.mxu1 }
 0x2d9   : > { %v2904_v51 = vpop.f32.mrf.mxu3  ;;  %v2570_v8 = vadd.f32 %v2569_v46, %v2401_v26  ;;  %v5766_v26 = vld [vmem:[%s7315_s3] sm:$0xff]  ;;  %v5481_v46 = vld [vmem:[%s6068_s9 + $0x11c] sm:$0xf] }
 0x2da   : > { %v6974_v10 = vadd.f32 %v2904_v51, %v2736_v61  ;;  %v3076_v14 = vpop.f32.mrf.mxu0  ;;  %3775 = vmatpush.bf16.msra.mxu0 %v5766_v26  ;;  %v4279_v61 = vld [vmem:[%s6068_s9 + $0x130] sm:$0xf0]  ;;  %v4285_v51 = vld [vmem:[%s6068_s9 + $0x118] sm:$0xf] }
 0x2db   : > { %3124 = vmatmul.bf16.gmra.mxu1 %v4250_v1  ;;  %3293 = vmatmul.bf16.gmra.mxu2 %v4254_v59  ;;  %v5485_v1 = vld [vmem:[%s6068_s9 + $0x134] sm:$0xf0] }
 0x2dc   : > { %7368 = vst [vmem:[#allocation8_spill] sm:$0xff] %v6974_v10 }
 0x2de   : > { %3462 = vmatmul.bf16.gmra.mxu3 %v4258_v45  ;;  %v2738_v43 = vpop.f32.mrf.mxu2  ;;  %v4287_v45 = vld [vmem:[%s6068_s9 + $0x138] sm:$0xf0] }
 0x2df   : > { %v2739_v18 = vadd.f32 %v2738_v43, %v2570_v8  ;;  %v7372_v43 = vld [vmem:[#allocation10_spill] sm:$0xff] }
 0x2e0   : > { %v2571_v53 = vpop.f32.mrf.mxu1  ;;  %v2406_v3 = vadd.f32 %v6739_v17, %v7372_v43 }
 0x2e1   : > { %v2907_v6 = vpop.f32.mrf.mxu3  ;;  %v2572_v38 = vadd.f32 %v2571_v53, %v2403_v11  ;;  %v4286_v53 = vor.u32 %v5485_v1, %v4285_v51 }
 0x2e2   : > { %v2908_v30 = vadd.f32 %v2907_v6, %v2739_v18  ;;  %v6984_v19 = vpop.f32.mrf.mxu0  ;;  %v4282_v6 = vor.u32 %v5480_v28, %v4279_v61 }
 0x2e3   : > { %7371 = vst [vmem:[#allocation32_spill] sm:$0xff] %v6984_v19 }
 0x2e4   : > { %v6981_v59 = vadd.f32 %v3076_v14, %v2908_v30  ;;  %v4290_v14 = vor.u32 %v5481_v46, %v4287_v45 }
 0x2e6   : > { %7370 = vst [vmem:[#allocation9_spill] sm:$0xff] %v6981_v59  ;;  %v2740_v8 = vpop.f32.mrf.mxu2  ;;  %v7377_v59 = vld [vmem:[#allocation12_spill] sm:$0xff] }
 0x2e7   : > { %v2741_v11 = vadd.f32 %v2740_v8, %v2572_v38  ;;  %v7374_v38 = vld [vmem:[#allocation11_spill] sm:$0xff]  ;;  %v2411_v10 = vadd.f32 %v6739_v17, %v7377_v59 }
 0x2e8   : > { %v2574_v12 = vpop.f32.mrf.mxu1  ;;  %v2408_v28 = vadd.f32 %v6739_v17, %v7374_v38 }
 0x2e9   : > { %v2909_v18 = vpop.f32.mrf.mxu3  ;;  %v2575_v26 = vadd.f32 %v2574_v12, %v2406_v3  ;;  %v5488_v12 = vld [vmem:[%s6068_s9 + $0x154] sm:$0xf] }
 0x2ea   : > { %v6993_v30 = vadd.f32 %v2909_v18, %v2741_v11  ;;  %v3081_v19 = vpop.f32.mrf.mxu0  ;;  %v4311_v11 = vld [vmem:[%s6068_s9 + $0x170] sm:$0xf0]  ;;  %v4317_v18 = vld [vmem:[%s6068_s9 + $0x158] sm:$0xf] }
 0x2eb   : > { %3129 = vmatmul.bf16.gmra.mxu1 %v4282_v6  ;;  %3298 = vmatmul.bf16.gmra.mxu2 %v4286_v53  ;;  %v5493_v6 = vld [vmem:[%s6068_s9 + $0x174] sm:$0xf0]  ;;  %v5489_v53 = vld [vmem:[%s6068_s9 + $0x15c] sm:$0xf] }
 0x2ec   : > { %7373 = vst [vmem:[#allocation10_spill] sm:$0xff] %v6993_v30  ;;  %v4318_v5 = vor.u32 %v5493_v6, %v4317_v18 }
 0x2ee   : > { %3467 = vmatmul.bf16.gmra.mxu3 %v4290_v14  ;;  %v2743_v43 = vpop.f32.mrf.mxu2  ;;  %v4319_v14 = vld [vmem:[%s6068_s9 + $0x178] sm:$0xf0] }
 0x2ef   : > { %v2744_v61 = vadd.f32 %v2743_v43, %v2575_v26  ;;  %v4314_v43 = vor.u32 %v5488_v12, %v4311_v11 }
 0x2f0   : > { %v2576_v1 = vpop.f32.mrf.mxu1 }
 0x2f1   : > { %v2912_v51 = vpop.f32.mrf.mxu3  ;;  %v2577_v45 = vadd.f32 %v2576_v1, %v2408_v28 }
 0x2f2   : > { %v2913_v46 = vadd.f32 %v2912_v51, %v2744_v61  ;;  %v7000_v3 = vpop.f32.mrf.mxu0 }
 0x2f3   : > { %7376 = vst [vmem:[#allocation33_spill] sm:$0xff] %v7000_v3  ;;  %v7382_v3 = vld [vmem:[#allocation15_spill] sm:$0xff] }
 0x2f4   : > { %v6997_v8 = vadd.f32 %v3081_v19, %v2913_v46  ;;  %v4322_v19 = vor.u32 %v5489_v53, %v4319_v14 }
 0x2f6   : > { %7375 = vst [vmem:[#allocation11_spill] sm:$0xff] %v6997_v8  ;;  %v2745_v30 = vpop.f32.mrf.mxu2 }
 0x2f7   : > { %v2746_v38 = vadd.f32 %v2745_v30, %v2577_v45  ;;  %v7379_v30 = vld [vmem:[#allocation13_spill] sm:$0xff] }
 0x2f8   : > { %v2579_v61 = vpop.f32.mrf.mxu1  ;;  %v2413_v46 = vadd.f32 %v6739_v17, %v7379_v30 }
 0x2f9   : > { %v2914_v26 = vpop.f32.mrf.mxu3  ;;  %v2580_v51 = vadd.f32 %v2579_v61, %v2411_v10  ;;  %v5496_v10 = vld [vmem:[%s6068_s9 + $0x194] sm:$0xf]  ;;  %v4351_v61 = vld [vmem:[%s6068_s9 + $0x1b8] sm:$0xf0] }
 0x2fa   : > { %v7009_v28 = vadd.f32 %v2914_v26, %v2746_v38  ;;  %v3086_v1 = vpop.f32.mrf.mxu0  ;;  %v4343_v38 = vld [vmem:[%s6068_s9 + $0x1b0] sm:$0xf0]  ;;  %v5501_v26 = vld [vmem:[%s6068_s9 + $0x1b4] sm:$0xf0] }
 0x2fb   : > { %3134 = vmatmul.bf16.gmra.mxu1 %v4314_v43  ;;  %3303 = vmatmul.bf16.gmra.mxu2 %v4318_v5  ;;  %v4349_v5 = vld [vmem:[%s6068_s9 + $0x198] sm:$0xf]  ;;  %v5497_v43 = vld [vmem:[%s6068_s9 + $0x19c] sm:$0xf] }
 0x2fc   : > { %7378 = vst [vmem:[#allocation12_spill] sm:$0xff] %v7009_v28  ;;  %v2416_v28 = vadd.f32 %v6739_v17, %v7382_v3  ;;  %v4350_v8 = vor.u32 %v5501_v26, %v4349_v5  ;;  %v5999_v3 = vld [vmem:[%s7314_s2] ss:$0 sm:$0xff] }
 0x2fe   : > { %3472 = vmatmul.bf16.gmra.mxu3 %v4322_v19  ;;  %v2748_v59 = vpop.f32.mrf.mxu2 }
 0x2ff   : > { %v2749_v45 = vadd.f32 %v2748_v59, %v2580_v51  ;;  %v4346_v59 = vor.u32 %v5496_v10, %v4343_v38 }
 0x300   : > { %v2581_v11 = vpop.f32.mrf.mxu1 }
 0x301   : > { %v2917_v12 = vpop.f32.mrf.mxu3  ;;  %v2582_v6 = vadd.f32 %v2581_v11, %v2413_v46  ;;  %v4354_v46 = vor.u32 %v5497_v43, %v4351_v61  ;;  %v5504_v61 = vld [vmem:[%s6068_s9 + $0x1d4] sm:$0xf] }
 0x302   : > { %v2918_v18 = vadd.f32 %v2917_v12, %v2749_v45  ;;  %v7016_v14 = vpop.f32.mrf.mxu0 }
 0x303   : > { %7381 = vst [vmem:[#allocation34_spill] sm:$0xff] %v7016_v14  ;;  %v7386_v14 = vld [vmem:[#allocation19_spill] sm:$0xff] }
 0x304   : > { %v7013_v53 = vadd.f32 %v3086_v1, %v2918_v18  ;;  %v7384_v18 = vld [vmem:[#allocation17_spill] sm:$0xff] }
 0x306   : > { %7380 = vst [vmem:[#allocation13_spill] sm:$0xff] %v7013_v53  ;;  %v2750_v19 = vpop.f32.mrf.mxu2 }
 0x307   : > { %v2751_v30 = vadd.f32 %v2750_v19, %v2582_v6  ;;  %v2418_v6 = vadd.f32 %v5999_v3, %v7384_v18  ;;  %v4381_v19 = vld [vmem:[%s6068_s9 + $0x1d8] sm:$0xf] }
 0x308   : > { %v2584_v45 = vpop.f32.mrf.mxu1 }
 0x309   : > { %v2919_v51 = vpop.f32.mrf.mxu3  ;;  %v2585_v12 = vadd.f32 %v2584_v45, %v2416_v28 }
 0x30a   : > { %v7025_v1 = vadd.f32 %v2919_v51, %v2751_v30  ;;  %v3091_v11 = vpop.f32.mrf.mxu0  ;;  %v5509_v30 = vld [vmem:[%s6068_s9 + $0x1f4] sm:$0xf0]  ;;  %v5505_v51 = vld [vmem:[%s6068_s9 + $0x1dc] sm:$0xf] }
 0x30b   : > { %3139 = vmatmul.bf16.gmra.mxu1 %v4346_v59  ;;  %3308 = vmatmul.bf16.gmra.mxu2 %v4350_v8  ;;  %v4375_v8 = vld [vmem:[%s6068_s9 + $0x1f0] sm:$0xf0]  ;;  %v4383_v59 = vld [vmem:[%s6068_s9 + $0x1f8] sm:$0xf0] }
 0x30c   : > { %7383 = vst [vmem:[#allocation15_spill] sm:$0xff] %v7025_v1  ;;  %v2421_v1 = vadd.f32 %v5999_v3, %v7386_v14  ;;  %v7387_v14 = vld [vmem:[#allocation21_spill] sm:$0xff] }
 0x30e   : > { %3477 = vmatmul.bf16.gmra.mxu3 %v4354_v46  ;;  %v2753_v17 = vpop.f32.mrf.mxu2 }
 0x30f   : > { %v2754_v10 = vadd.f32 %v2753_v17, %v2585_v12  ;;  %v4378_v12 = vor.u32 %v5504_v61, %v4375_v8  ;;  %v4382_v17 = vor.u32 %v5509_v30, %v4381_v19 }
 0x310   : > { %v2586_v5 = vpop.f32.mrf.mxu1 }
 0x311   : > { %v2922_v38 = vpop.f32.mrf.mxu3  ;;  %v2587_v28 = vadd.f32 %v2586_v5, %v2418_v6  ;;  %v4386_v6 = vor.u32 %v5505_v51, %v4383_v59  ;;  %v2423_v5 = vadd.f32 %v5999_v3, %v7387_v14  ;;  %v4407_v59 = vld [vmem:[%s6068_s9 + $0x230] sm:$0xf0] }
 0x312   : > { %v2923_v26 = vadd.f32 %v2922_v38, %v2754_v10  ;;  %v7039_v46 = vpop.f32.mrf.mxu0 }
 0x313   : > { %7385 = vst [vmem:[#allocation17_spill] sm:$0xff] %v7039_v46 }
 0x314   : > { %v7031_v43 = vadd.f32 %v3091_v11, %v2923_v26 }
 0x316   : > { %v2755_v45 = vpop.f32.mrf.mxu2 }
 0x317   : > { %v2756_v53 = vadd.f32 %v2755_v45, %v2587_v28  ;;  %v5513_v45 = vld [vmem:[%s6068_s9 + $0x21c] sm:$0xf] }
 0x318   : > { %v2589_v35 = vpop.f32.mrf.mxu1 }
 0x319   : > { %v2924_v18 = vpop.f32.mrf.mxu3  ;;  %v2590_v10 = vadd.f32 %v2589_v35, %v2421_v1  ;;  %v4413_v35 = vld [vmem:[%s6068_s9 + $0x218] sm:$0xf] }
 0x31a   : > { %v7042_v11 = vadd.f32 %v2924_v18, %v2756_v53  ;;  %v3096_v8 = vpop.f32.mrf.mxu0  ;;  %v5512_v53 = vld [vmem:[%s6068_s9 + $0x214] sm:$0xf]  ;;  %v5517_v1 = vld [vmem:[%s6068_s9 + $0x234] sm:$0xf0]  ;;  %v4415_v18 = vld [vmem:[%s6068_s9 + $0x238] sm:$0xf0] }
 0x31b   : > { %3144 = vmatmul.bf16.gmra.mxu1 %v4378_v12  ;;  %3313 = vmatmul.bf16.gmra.mxu2 %v4382_v17  ;;  %v4410_v3 = vor.u32 %v5512_v53, %v4407_v59  ;;  %v4418_v14 = vor.u32 %v5513_v45, %v4415_v18  ;;  %v4445_v53 = vld [vmem:[%s6068_s9 + $0x258] sm:$0xf]  ;;  %v4447_v45 = vld [vmem:[%s6068_s9 + $0x278] sm:$0xf0] }
 0x31c   : > { %v5525_v59 = vld [vmem:[%s6068_s9 + $0x274] sm:$0xf0] }
 0x31e   : > { %3482 = vmatmul.bf16.gmra.mxu3 %v4386_v6  ;;  %v2758_v38 = vpop.f32.mrf.mxu2 }
 0x31f   : > { %v2759_v26 = vadd.f32 %v2758_v38, %v2590_v10  ;;  %v4414_v10 = vor.u32 %v5517_v1, %v4413_v35  ;;  %v5521_v1 = vld [vmem:[%s6068_s9 + $0x25c] sm:$0xf] }
 0x320   : > { %v2591_v61 = vpop.f32.mrf.mxu1  ;;  %v4450_v46 = vor.u32 %v5521_v1, %v4447_v45  ;;  %v5533_v1 = vld [vmem:[%s6068_s9 + $0x2b4] sm:$0xf0] }
 0x321   : > { %v2927_v28 = vpop.f32.mrf.mxu3  ;;  %v2592_v30 = vadd.f32 %v2591_v61, %v2423_v5 }
 0x322   : > { %v2928_v19 = vadd.f32 %v2927_v28, %v2759_v26 }
 0x324   : > { %v7045_v51 = vadd.f32 %v3096_v8, %v2928_v19  ;;  %v7390_v8 = vld [vmem:[#allocation22_spill] sm:$0xff] }
 0x326   : > { %7388 = vst [vmem:[#allocation19_spill] sm:$0xff] %v7045_v51  ;;  %v2760_v12 = vpop.f32.mrf.mxu2  ;;  %v4439_v51 = vld [vmem:[%s6068_s9 + $0x270] sm:$0xf0] }
 0x327   : > { %v2761_v17 = vadd.f32 %v2760_v12, %v2592_v30  ;;  %v5520_v12 = vld [vmem:[%s6068_s9 + $0x254] sm:$0xf] }
 0x328   : > { %v3110_v38 = vpop.f32.mrf.mxu1 }
 0x329   : > { %v2929_v6 = vpop.f32.mrf.mxu3  ;;  %v3111_v19 = vadd.f32 %v3110_v38, %v7390_v8 }
 0x32a   : > { %v7053_v5 = vadd.f32 %v2929_v6, %v2761_v17 }
 0x32b   : > { %3149 = vmatmul.bf16.gmra.mxu1 %v4410_v3  ;;  %3318 = vmatmul.bf16.gmra.mxu2 %v4414_v10  ;;  %v4442_v10 = vor.u32 %v5520_v12, %v4439_v51 }
 0x32c   : > { %7389 = vst [vmem:[#allocation21_spill] sm:$0xff] %v7053_v5 }
 0x32e   : > { %3487 = vmatmul.bf16.gmra.mxu3 %v4418_v14  ;;  %v3279_v26 = vpop.f32.mrf.mxu2  ;;  %v4446_v14 = vor.u32 %v5525_v59, %v4445_v53  ;;  %v5528_v53 = vld [vmem:[%s6068_s9 + $0x294] sm:$0xf] }
 0x32f   : > { %v3280_v30 = vadd.f32 %v3279_v26, %v3111_v19  ;;  %v7391_v19 = vld [vmem:[#allocation23_spill] sm:$0xff]  ;;  %v4471_v59 = vld [vmem:[%s6068_s9 + $0x2b0] sm:$0xf0] }
 0x330   : > { %v3112_v61 = vpop.f32.mrf.mxu1 }
 0x331   : > { %v3448_v28 = vpop.f32.mrf.mxu3  ;;  %v3113_v35 = vadd.f32 %v3112_v61, %v6484_v42 }
 0x332   : > { %v3449_v17 = vadd.f32 %v3448_v28, %v3280_v30 }
 0x334   : > { %v3608_v26 = vmax.f32 %v3449_v17, 0.0  ;;  %v4479_v17 = vld [vmem:[%s6068_s9 + $0x2b8] sm:$0xf0] }
 0x336   : > { %v3281_v18 = vpop.f32.mrf.mxu2 }
 0x337   : > { %v3282_v6 = vadd.f32 %v3281_v18, %v3113_v35  ;;  %v4477_v35 = vld [vmem:[%s6068_s9 + $0x298] sm:$0xf]  ;;  %v5529_v18 = vld [vmem:[%s6068_s9 + $0x29c] sm:$0xf] }
 0x338   : > { %v3115_v5 = vpop.f32.mrf.mxu1 }
 0x339   : > { %v3450_v3 = vpop.f32.mrf.mxu3  ;;  %v3116_v30 = vadd.f32 %v3115_v5, %v7391_v19 }
 0x33a   : > { %v3451_v38 = vadd.f32 %v3450_v3, %v3282_v6 }
 0x33b   : > { %3154 = vmatmul.bf16.gmra.mxu1 %v4442_v10  ;;  %3323 = vmatmul.bf16.gmra.mxu2 %v4446_v14  ;;  %v4474_v14 = vor.u32 %v5528_v53, %v4471_v59  ;;  %v5536_v53 = vld [vmem:[%s6068_s9 + $0x2d4] sm:$0xf] }
 0x33c   : > { %v3609_v8 = vmax.f32 %v3451_v38, 0.0  ;;  %v4478_v38 = vor.u32 %v5533_v1, %v4477_v35  ;;  %v4503_v59 = vld [vmem:[%s6068_s9 + $0x2f0] sm:$0xf0]  ;;  %v4509_v35 = vld [vmem:[%s6068_s9 + $0x2d8] sm:$0xf] }
 0x33d   : > { %v5541_v1 = vld [vmem:[%s6068_s9 + $0x2f4] sm:$0xf0] }
 0x33e   : > { %3492 = vmatmul.bf16.gmra.mxu3 %v4450_v46  ;;  %v3672_v42 = vpack.c.bf16 %v3609_v8, %v3608_v26  ;;  %v3284_v28 = vpop.f32.mrf.mxu2  ;;  %v4482_v8 = vor.u32 %v5529_v18, %v4479_v17  ;;  %v5537_v18 = vld [vmem:[%s6068_s9 + $0x2dc] sm:$0xf] }
 0x33f   : > { %v3285_v12 = vadd.f32 %v3284_v28, %v3116_v30  ;;  %v4511_v17 = vld [vmem:[%s6068_s9 + $0x2f8] sm:$0xf0] }
 0x340   : > { %3776 = vmatmul.bf16.vlgmr.msra.gmra.mxu0 %v3672_v42  ;;  %v3117_v51 = vpop.f32.mrf.mxu1 }
 0x341   : > { %v3453_v61 = vpop.f32.mrf.mxu3  ;;  %v3118_v45 = vadd.f32 %v3117_v51, %v6500_v36 }
 0x342   : > { %v3454_v3 = vadd.f32 %v3453_v61, %v3285_v12 }
 0x344   : > { %v3610_v42 = vmax.f32 %v3454_v3, 0.0 }
 0x346   : > { %v3286_v6 = vpop.f32.mrf.mxu2 }
 0x347   : > { %v3287_v10 = vadd.f32 %v3286_v6, %v3118_v45 }
 0x348   : > { %v3120_v26 = vpop.f32.mrf.mxu1 }
 0x349   : > { %v3455_v46 = vpop.f32.mrf.mxu3  ;;  %v3121_v30 = vadd.f32 %v3120_v26, %v6513_v16 }
 0x34a   : > { %v3456_v5 = vadd.f32 %v3455_v46, %v3287_v10 }
 0x34b   : > { %3159 = vmatmul.bf16.gmra.mxu1 %v4474_v14  ;;  %3328 = vmatmul.bf16.gmra.mxu2 %v4478_v38  ;;  %v4506_v14 = vor.u32 %v5536_v53, %v4503_v59  ;;  %v4510_v38 = vor.u32 %v5541_v1, %v4509_v35  ;;  %v4541_v53 = vld [vmem:[%s6068_s9 + $0x318] sm:$0xf]  ;;  %v5545_v1 = vld [vmem:[%s6068_s9 + $0x31c] sm:$0xf] }
 0x34c   : > { %v3611_v28 = vmax.f32 %v3456_v5, 0.0  ;;  %v4514_v5 = vor.u32 %v5537_v18, %v4511_v17  ;;  %v5549_v59 = vld [vmem:[%s6068_s9 + $0x334] sm:$0xf0] }
 0x34e   : > { %3497 = vmatmul.bf16.gmra.mxu3 %v4482_v8  ;;  %v3673_v36 = vpack.c.bf16 %v3611_v28, %v3610_v42  ;;  %v3289_v61 = vpop.f32.mrf.mxu2 }
 0x34f   : > { %v3290_v12 = vadd.f32 %v3289_v61, %v3121_v30  ;;  %v5544_v30 = vld [vmem:[%s6068_s9 + $0x314] sm:$0xf] }
 0x350   : > { %3781 = vmatmul.bf16.gmra.mxu0 %v3673_v36  ;;  %v3122_v19 = vpop.f32.mrf.mxu1 }
 0x351   : > { %v3458_v51 = vpop.f32.mrf.mxu3  ;;  %v3123_v45 = vadd.f32 %v3122_v19, %v6525_v31 }
 0x352   : > { %v3459_v3 = vadd.f32 %v3458_v51, %v3290_v12  ;;  %v4535_v12 = vld [vmem:[%s6068_s9 + $0x330] sm:$0xf0] }
 0x354   : > { %v3612_v26 = vmax.f32 %v3459_v3, 0.0 }
 0x356   : > { %v3291_v6 = vpop.f32.mrf.mxu2 }
 0x357   : > { %v3292_v10 = vadd.f32 %v3291_v6, %v3123_v45  ;;  %v4543_v45 = vld [vmem:[%s6068_s9 + $0x338] sm:$0xf0] }
 0x358   : > { %v3125_v8 = vpop.f32.mrf.mxu1 }
 0x359   : > { %v3460_v46 = vpop.f32.mrf.mxu3  ;;  %v3126_v51 = vadd.f32 %v3125_v8, %v6532_v57 }
 0x35a   : > { %v3461_v16 = vadd.f32 %v3460_v46, %v3292_v10  ;;  %v4538_v10 = vor.u32 %v5544_v30, %v4535_v12  ;;  %v4542_v46 = vor.u32 %v5549_v59, %v4541_v53  ;;  %v5553_v12 = vld [vmem:[%s6068_s9 + $0x35c] sm:$0xf] }
 0x35b   : > { %3164 = vmatmul.bf16.gmra.mxu1 %v4506_v14  ;;  %3333 = vmatmul.bf16.gmra.mxu2 %v4510_v38  ;;  %v4546_v38 = vor.u32 %v5545_v1, %v4543_v45  ;;  %v4575_v53 = vld [vmem:[%s6068_s9 + $0x378] sm:$0xf0] }
 0x35c   : > { %v3613_v42 = vmax.f32 %v3461_v16, 0.0 }
 0x35e   : > { %3502 = vmatmul.bf16.gmra.mxu3 %v4514_v5  ;;  %v3674_v31 = vpack.c.bf16 %v3613_v42, %v3612_v26  ;;  %v3294_v28 = vpop.f32.mrf.mxu2 }
 0x35f   : > { %v3295_v19 = vadd.f32 %v3294_v28, %v3126_v51  ;;  %v4573_v51 = vld [vmem:[%s6068_s9 + $0x358] sm:$0xf] }
 0x360   : > { %3786 = vmatmul.bf16.gmra.mxu0 %v3674_v31  ;;  %v3127_v61 = vpop.f32.mrf.mxu1 }
 0x361   : > { %v3463_v36 = vpop.f32.mrf.mxu3  ;;  %v3128_v35 = vadd.f32 %v3127_v61, %v6544_v4  ;;  %v4567_v61 = vld [vmem:[%s6068_s9 + $0x370] sm:$0xf0] }
 0x362   : > { %v3464_v17 = vadd.f32 %v3463_v36, %v3295_v19  ;;  %v5552_v36 = vld [vmem:[%s6068_s9 + $0x354] sm:$0xf]  ;;  %v5557_v19 = vld [vmem:[%s6068_s9 + $0x374] sm:$0xf0] }
 0x364   : > { %v3614_v8 = vmax.f32 %v3464_v17, 0.0  ;;  %v4574_v17 = vor.u32 %v5557_v19, %v4573_v51 }
 0x366   : > { %v3296_v18 = vpop.f32.mrf.mxu2 }
 0x367   : > { %v3297_v6 = vadd.f32 %v3296_v18, %v3128_v35  ;;  %v4570_v18 = vor.u32 %v5552_v36, %v4567_v61  ;;  %v4607_v36 = vld [vmem:[%s6068_s9 + $0x3b8] sm:$0xf0] }
 0x368   : > { %v3130_v14 = vpop.f32.mrf.mxu1 }
 0x369   : > { %v3465_v3 = vpop.f32.mrf.mxu3  ;;  %v3131_v31 = vadd.f32 %v3130_v14, %v6548_v0 }
 0x36a   : > { %v3466_v57 = vadd.f32 %v3465_v3, %v3297_v6  ;;  %v4578_v3 = vor.u32 %v5553_v12, %v4575_v53 }
 0x36b   : > { %3169 = vmatmul.bf16.gmra.mxu1 %v4538_v10  ;;  %3338 = vmatmul.bf16.gmra.mxu2 %v4542_v46 }
 0x36c   : > { %v3615_v5 = vmax.f32 %v3466_v57, 0.0 }
 0x36e   : > { %3507 = vmatmul.bf16.gmra.mxu3 %v4546_v38  ;;  %v3675_v4 = vpack.c.bf16 %v3615_v5, %v3614_v8  ;;  %v3299_v16 = vpop.f32.mrf.mxu2 }
 0x36f   : > { %v3300_v28 = vadd.f32 %v3299_v16, %v3131_v31  ;;  %v4599_v16 = vld [vmem:[%s6068_s9 + $0x3b0] sm:$0xf0] }
 0x370   : > { %3791 = vmatmul.bf16.gmra.mxu0 %v3675_v4  ;;  %v3132_v42 = vpop.f32.mrf.mxu1  ;;  %v5560_v4 = vld [vmem:[%s6068_s9 + $0x394] sm:$0xf] }
 0x371   : > { %v3468_v26 = vpop.f32.mrf.mxu3  ;;  %v3133_v30 = vadd.f32 %v3132_v42, %v6560_v29  ;;  %v5565_v42 = vld [vmem:[%s6068_s9 + $0x3b4] sm:$0xf0]  ;;  %v4602_v12 = vor.u32 %v5560_v4, %v4599_v16 }
 0x372   : > { %v3469_v35 = vadd.f32 %v3468_v26, %v3300_v28  ;;  %v4605_v26 = vld [vmem:[%s6068_s9 + $0x398] sm:$0xf]  ;;  %v5561_v28 = vld [vmem:[%s6068_s9 + $0x39c] sm:$0xf] }
 0x373   : > { %v4606_v53 = vor.u32 %v5565_v42, %v4605_v26 }
 0x374   : > { %v3616_v10 = vmax.f32 %v3469_v35, 0.0  ;;  %v4610_v35 = vor.u32 %v5561_v28, %v4607_v36 }
 0x376   : > { %v3301_v59 = vpop.f32.mrf.mxu2 }
 0x377   : > { %v3302_v1 = vadd.f32 %v3301_v59, %v3133_v30 }
 0x378   : > { %v3135_v6 = vpop.f32.mrf.mxu1 }
 0x379   : > { %v3470_v45 = vpop.f32.mrf.mxu3  ;;  %v3136_v8 = vadd.f32 %v3135_v6, %v6564_v15 }
 0x37a   : > { %v3471_v0 = vadd.f32 %v3470_v45, %v3302_v1 }
 0x37b   : > { %3174 = vmatmul.bf16.gmra.mxu1 %v4570_v18  ;;  %3343 = vmatmul.bf16.gmra.mxu2 %v4574_v17 }
 0x37c   : > { %v3617_v46 = vmax.f32 %v3471_v0, 0.0 }
 0x37e   : > { %3512 = vmatmul.bf16.gmra.mxu3 %v4578_v3  ;;  %v3676_v29 = vpack.c.bf16 %v3617_v46, %v3616_v10  ;;  %v3304_v14 = vpop.f32.mrf.mxu2  ;;  %v5568_v10 = vld [vmem:[%s6068_s9 + $0x3d4] sm:$0xf] }
 0x37f   : > { %v3305_v5 = vadd.f32 %v3304_v14, %v3136_v8  ;;  %v4631_v46 = vld [vmem:[%s6068_s9 + $0x3f0] sm:$0xf0]  ;;  %v5573_v14 = vld [vmem:[%s6068_s9 + $0x3f4] sm:$0xf0]  ;;  %v4639_v8 = vld [vmem:[%s6068_s9 + $0x3f8] sm:$0xf0] }
 0x380   : > { %3796 = vmatmul.bf16.gmra.mxu0 %v3676_v29  ;;  %v3137_v57 = vpop.f32.mrf.mxu1  ;;  %v4637_v29 = vld [vmem:[%s6068_s9 + $0x3d8] sm:$0xf]  ;;  %v4634_v42 = vor.u32 %v5568_v10, %v4631_v46 }
 0x381   : > { %v3473_v38 = vpop.f32.mrf.mxu3  ;;  %v3138_v31 = vadd.f32 %v3137_v57, %v6576_v49  ;;  %v5569_v57 = vld [vmem:[%s6068_s9 + $0x3dc] sm:$0xf] }
 0x382   : > { %v3474_v51 = vadd.f32 %v3473_v38, %v3305_v5  ;;  %v4642_v36 = vor.u32 %v5569_v57, %v4639_v8 }
 0x384   : > { %v3618_v1 = vmax.f32 %v3474_v51, 0.0 }
 0x386   : > { %v3306_v61 = vpop.f32.mrf.mxu2 }
 0x387   : > { %v3307_v19 = vadd.f32 %v3306_v61, %v3138_v31  ;;  %v4638_v31 = vor.u32 %v5573_v14, %v4637_v29 }
 0x388   : > { %v3140_v59 = vpop.f32.mrf.mxu1 }
 0x389   : > { %v3475_v30 = vpop.f32.mrf.mxu3  ;;  %v3141_v3 = vadd.f32 %v3140_v59, %v6589_v56 }
 0x38a   : > { %v3476_v15 = vadd.f32 %v3475_v30, %v3307_v19 }
 0x38b   : > { %3179 = vmatmul.bf16.gmra.mxu1 %v4602_v12  ;;  %3348 = vmatmul.bf16.gmra.mxu2 %v4606_v53 }
 0x38c   : > { %v3619_v45 = vmax.f32 %v3476_v15, 0.0  ;;  %v4663_v15 = vld [vmem:[%s6068_s9 + $0x430] sm:$0xf0] }
 0x38e   : > { %3517 = vmatmul.bf16.gmra.mxu3 %v4610_v35  ;;  %v3677_v49 = vpack.c.bf16 %v3619_v45, %v3618_v1  ;;  %v3309_v18 = vpop.f32.mrf.mxu2  ;;  %v5576_v35 = vld [vmem:[%s6068_s9 + $0x414] sm:$0xf]  ;;  %v4669_v1 = vld [vmem:[%s6068_s9 + $0x418] sm:$0xf] }
 0x38f   : > { %v3310_v0 = vadd.f32 %v3309_v18, %v3141_v3  ;;  %v5581_v45 = vld [vmem:[%s6068_s9 + $0x434] sm:$0xf0]  ;;  %v5577_v18 = vld [vmem:[%s6068_s9 + $0x41c] sm:$0xf]  ;;  %v4666_v46 = vor.u32 %v5576_v35, %v4663_v15 }
 0x390   : > { %3801 = vmatmul.bf16.gmra.mxu0 %v3677_v49  ;;  %v3142_v6 = vpop.f32.mrf.mxu1  ;;  %v4670_v29 = vor.u32 %v5581_v45, %v4669_v1 }
 0x391   : > { %v3478_v17 = vpop.f32.mrf.mxu3  ;;  %v3143_v38 = vadd.f32 %v3142_v6, %v6601_v62 }
 0x392   : > { %v3479_v4 = vadd.f32 %v3478_v17, %v3310_v0  ;;  %v4671_v17 = vld [vmem:[%s6068_s9 + $0x438] sm:$0xf0] }
 0x394   : > { %v3620_v61 = vmax.f32 %v3479_v4, 0.0 }
 0x396   : > { %v3311_v5 = vpop.f32.mrf.mxu2 }
 0x397   : > { %v3312_v16 = vadd.f32 %v3311_v5, %v3143_v38  ;;  %v4674_v38 = vor.u32 %v5577_v18, %v4671_v17 }
 0x398   : > { %v3145_v28 = vpop.f32.mrf.mxu1 }
 0x399   : > { %v3480_v26 = vpop.f32.mrf.mxu3  ;;  %v3146_v53 = vadd.f32 %v3145_v28, %v6608_v40  ;;  %v7121_v28 = vpop.f32.mrf.mxu0 }
 0x39a   : > { %v3481_v56 = vadd.f32 %v3480_v26, %v3312_v16 }
 0x39b   : > { %3184 = vmatmul.bf16.gmra.mxu1 %v4634_v42  ;;  %3353 = vmatmul.bf16.gmra.mxu2 %v4638_v31  ;;  %v5584_v31 = vld [vmem:[%s6068_s9 + $0x454] sm:$0xf] }
 0x39c   : > { %v3621_v51 = vmax.f32 %v3481_v56, 0.0  ;;  %v4701_v56 = vld [vmem:[%s6068_s9 + $0x458] sm:$0xf] }
 0x39e   : > { %3522 = vmatmul.bf16.gmra.mxu3 %v4642_v36  ;;  %v3678_v62 = vpack.c.bf16 %v3621_v51, %v3620_v61  ;;  %v3314_v19 = vpop.f32.mrf.mxu2  ;;  %v4695_v36 = vld [vmem:[%s6068_s9 + $0x470] sm:$0xf0]  ;;  %v5589_v61 = vld [vmem:[%s6068_s9 + $0x474] sm:$0xf0] }
 0x39f   : > { %v3315_v59 = vadd.f32 %v3314_v19, %v3146_v53  ;;  %v4703_v19 = vld [vmem:[%s6068_s9 + $0x478] sm:$0xf0]  ;;  %v4698_v35 = vor.u32 %v5584_v31, %v4695_v36  ;;  %v4702_v15 = vor.u32 %v5589_v61, %v4701_v56 }
 0x3a0   : > { %3806 = vmatmul.bf16.gmra.mxu0 %v3678_v62  ;;  %v3147_v12 = vpop.f32.mrf.mxu1  ;;  %v5585_v62 = vld [vmem:[%s6068_s9 + $0x45c] sm:$0xf] }
 0x3a1   : > { %v3483_v30 = vpop.f32.mrf.mxu3  ;;  %v3148_v49 = vadd.f32 %v3147_v12, %v6620_v37 }
 0x3a2   : > { %v3484_v3 = vadd.f32 %v3483_v30, %v3315_v59 }
 0x3a4   : > { %v3622_v57 = vmax.f32 %v3484_v3, 0.0 }
 0x3a6   : > { %v3316_v6 = vpop.f32.mrf.mxu2 }
 0x3a7   : > { %v3317_v0 = vadd.f32 %v3316_v6, %v3148_v49 }
 0x3a8   : > { %v3150_v14 = vpop.f32.mrf.mxu1 }
 0x3a9   : > { %v3485_v10 = vpop.f32.mrf.mxu3  ;;  %v3151_v26 = vadd.f32 %v3150_v14, %v6624_v22  ;;  %v4706_v22 = vor.u32 %v5585_v62, %v4703_v19  ;;  %v5592_v14 = vld [vmem:[%s6068_s9 + $0x494] sm:$0xf] }
 0x3aa   : > { %v3486_v40 = vadd.f32 %v3485_v10, %v3317_v0  ;;  %v7392_v10 = vld [vmem:[#allocation24_spill] sm:$0xff] }
 0x3ab   : > { %3189 = vmatmul.bf16.gmra.mxu1 %v4666_v46  ;;  %3358 = vmatmul.bf16.gmra.mxu2 %v4670_v29 }
 0x3ac   : > { %v3623_v8 = vmax.f32 %v3486_v40, 0.0  ;;  %v4727_v40 = vld [vmem:[%s6068_s9 + $0x4b0] sm:$0xf0] }
 0x3ad   : > { %v4730_v56 = vor.u32 %v5592_v14, %v4727_v40 }
 0x3ae   : > { %3527 = vmatmul.bf16.gmra.mxu3 %v4674_v38  ;;  %v3679_v37 = vpack.c.bf16 %v3623_v8, %v3622_v57  ;;  %v3319_v5 = vpop.f32.mrf.mxu2  ;;  %v4733_v57 = vld [vmem:[%s6068_s9 + $0x498] sm:$0xf] }
 0x3af   : > { %v3320_v42 = vadd.f32 %v3319_v5, %v3151_v26  ;;  %v5597_v8 = vld [vmem:[%s6068_s9 + $0x4b4] sm:$0xf0] }
 0x3b0   : > { %3811 = vmatmul.bf16.gmra.mxu0 %v3679_v37  ;;  %v3152_v16 = vpop.f32.mrf.mxu1  ;;  %v4734_v61 = vor.u32 %v5597_v8, %v4733_v57 }
 0x3b1   : > { %v3488_v4 = vpop.f32.mrf.mxu3  ;;  %v3153_v51 = vadd.f32 %v3152_v16, %v6636_v2  ;;  %v4735_v16 = vld [vmem:[%s6068_s9 + $0x4b8] sm:$0xf0] }
 0x3b2   : > { %v3489_v12 = vadd.f32 %v3488_v4, %v3320_v42  ;;  %v5593_v4 = vld [vmem:[%s6068_s9 + $0x49c] sm:$0xf] }
 0x3b3   : > { %v4738_v62 = vor.u32 %v5593_v4, %v4735_v16 }
 0x3b4   : > { %v3624_v49 = vmax.f32 %v3489_v12, 0.0 }
 0x3b6   : > { %v3321_v30 = vpop.f32.mrf.mxu2 }
 0x3b7   : > { %v3322_v53 = vadd.f32 %v3321_v30, %v3153_v51 }
 0x3b8   : > { %v3155_v1 = vpop.f32.mrf.mxu1 }
 0x3b9   : > { %v3490_v59 = vpop.f32.mrf.mxu3  ;;  %v3156_v46 = vadd.f32 %v3155_v1, %v7392_v10  ;;  %v4767_v10 = vld [vmem:[%s6068_s9 + $0x4f8] sm:$0xf0] }
 0x3ba   : > { %v3491_v45 = vadd.f32 %v3490_v59, %v3322_v53 }
 0x3bb   : > { %3194 = vmatmul.bf16.gmra.mxu1 %v4698_v35  ;;  %3363 = vmatmul.bf16.gmra.mxu2 %v4702_v15 }
 0x3bc   : > { %v3625_v18 = vmax.f32 %v3491_v45, 0.0  ;;  %v5600_v45 = vld [vmem:[%s6068_s9 + $0x4d4] sm:$0xf] }
 0x3bd   : > { %v3777_v2 = vpop.f32.mrf.mxu0 }
 0x3be   : > { %3532 = vmatmul.bf16.gmra.mxu3 %v4706_v22  ;;  %v3680_v17 = vpack.c.bf16 %v3625_v18, %v3624_v49  ;;  %v3324_v6 = vpop.f32.mrf.mxu2  ;;  %v4759_v18 = vld [vmem:[%s6068_s9 + $0x4f0] sm:$0xf0] }
 0x3bf   : > { %v3325_v29 = vadd.f32 %v3324_v6, %v3156_v46  ;;  %v4762_v40 = vor.u32 %v5600_v45, %v4759_v18 }
 0x3c0   : > { %3816 = vmatmul.bf16.gmra.mxu0 %v3680_v17  ;;  %v3157_v0 = vpop.f32.mrf.mxu1  ;;  %v5605_v17 = vld [vmem:[%s6068_s9 + $0x4f4] sm:$0xf0] }
 0x3c1   : > { %v3493_v3 = vpop.f32.mrf.mxu3  ;;  %v3158_v37 = vadd.f32 %v3157_v0, %v6652_v50  ;;  %v5601_v0 = vld [vmem:[%s6068_s9 + $0x4dc] sm:$0xf] }
 0x3c2   : > { %v3494_v42 = vadd.f32 %v3493_v3, %v3325_v29 }
 0x3c4   : > { %v3626_v30 = vmax.f32 %v3494_v42, 0.0 }
 0x3c5   : > { %v3779_v38 = vpop.f32.mrf.mxu0 }
 0x3c6   : > { %v5777_v5 = vpack.c.bf16 %v3779_v38, %v3777_v2  ;;  %v3326_v26 = vpop.f32.mrf.mxu2  ;;  %v4765_v2 = vld [vmem:[%s6068_s9 + $0x4d8] sm:$0xf] }
 0x3c7   : > { %v3327_v31 = vadd.f32 %v3326_v26, %v3158_v37  ;;  %v4766_v57 = vor.u32 %v5605_v17, %v4765_v2 }
 0x3c8   : > { %5778 = vst [vmem:[%s7135_s11] sm:$0xff] %v5777_v5   ;;  %v3160_v51 = vpop.f32.mrf.mxu1 }
 0x3c9   : > { %v3495_v36 = vpop.f32.mrf.mxu3  ;;  %v3161_v1 = vadd.f32 %v3160_v51, %v6665_v47  ;;  %v4770_v47 = vor.u32 %v5601_v0, %v4767_v10 }
 0x3ca   : > { %v3496_v19 = vadd.f32 %v3495_v36, %v3327_v31 }
 0x3cb   : > { %3199 = vmatmul.bf16.gmra.mxu1 %v4730_v56  ;;  %3368 = vmatmul.bf16.gmra.mxu2 %v4734_v61  ;;  %v5608_v61 = vld [vmem:[%s6068_s9 + $0x514] sm:$0xf] }
 0x3cc   : > { %v3627_v12 = vmax.f32 %v3496_v19, 0.0  ;;  %v4797_v19 = vld [vmem:[%s6068_s9 + $0x518] sm:$0xf] }
 0x3cd   : > { %v3782_v50 = vpop.f32.mrf.mxu0 }
 0x3ce   : > { %3537 = vmatmul.bf16.gmra.mxu3 %v4738_v62  ;;  %v3681_v53 = vpack.c.bf16 %v3627_v12, %v3626_v30  ;;  %v3329_v59 = vpop.f32.mrf.mxu2  ;;  %v4791_v62 = vld [vmem:[%s6068_s9 + $0x530] sm:$0xf0]  ;;  %v5613_v30 = vld [vmem:[%s6068_s9 + $0x534] sm:$0xf0] }
 0x3cf   : > { %v3330_v22 = vadd.f32 %v3329_v59, %v3161_v1  ;;  %v4799_v59 = vld [vmem:[%s6068_s9 + $0x538] sm:$0xf0]  ;;  %v4794_v45 = vor.u32 %v5608_v61, %v4791_v62 }
 0x3d0   : > { %3821 = vmatmul.bf16.gmra.mxu0 %v3681_v53  ;;  %v3162_v15 = vpop.f32.mrf.mxu1  ;;  %v5609_v53 = vld [vmem:[%s6068_s9 + $0x51c] sm:$0xf] }
 0x3d1   : > { %v3498_v35 = vpop.f32.mrf.mxu3  ;;  %v3163_v6 = vadd.f32 %v3162_v15, %v6677_v54 }
 0x3d2   : > { %v3499_v29 = vadd.f32 %v3498_v35, %v3330_v22 }
 0x3d4   : > { %v3628_v5 = vmax.f32 %v3499_v29, 0.0 }
 0x3d5   : > { %v3784_v49 = vpop.f32.mrf.mxu0 }
 0x3d6   : > { %v5782_v3 = vpack.c.bf16 %v3784_v49, %v3782_v50  ;;  %v3331_v46 = vpop.f32.mrf.mxu2  ;;  %v4798_v49 = vor.u32 %v5613_v30, %v4797_v19 }
 0x3d7   : > { %v3332_v14 = vadd.f32 %v3331_v46, %v3163_v6 }
 0x3d8   : > { %5934 = vst [vmem:[%s7135_s11 + $0x8] sm:$0xff] %v5782_v3   ;;  %v3165_v8 = vpop.f32.mrf.mxu1 }
 0x3d9   : > { %v3500_v38 = vpop.f32.mrf.mxu3  ;;  %v3166_v36 = vadd.f32 %v3165_v8, %v6684_v39  ;;  %v4802_v39 = vor.u32 %v5609_v53, %v4799_v59  ;;  %v4829_v8 = vld [vmem:[%s6068_s9 + $0x558] sm:$0xf] }
 0x3da   : > { %v3501_v37 = vadd.f32 %v3500_v38, %v3332_v14  ;;  %v5616_v38 = vld [vmem:[%s6068_s9 + $0x554] sm:$0xf] }
 0x3db   : > { %3204 = vmatmul.bf16.gmra.mxu1 %v4762_v40  ;;  %3373 = vmatmul.bf16.gmra.mxu2 %v4766_v57  ;;  %v4823_v57 = vld [vmem:[%s6068_s9 + $0x570] sm:$0xf0] }
 0x3dc   : > { %v3629_v4 = vmax.f32 %v3501_v37, 0.0 }
 0x3dd   : > { %v3787_v54 = vpop.f32.mrf.mxu0 }
 0x3de   : > { %3542 = vmatmul.bf16.gmra.mxu3 %v4770_v47  ;;  %v3682_v16 = vpack.c.bf16 %v3629_v4, %v3628_v5  ;;  %v3334_v26 = vpop.f32.mrf.mxu2  ;;  %v5621_v47 = vld [vmem:[%s6068_s9 + $0x574] sm:$0xf0]  ;;  %v5617_v4 = vld [vmem:[%s6068_s9 + $0x55c] sm:$0xf] }
 0x3df   : > { %v3335_v56 = vadd.f32 %v3334_v26, %v3166_v36  ;;  %v4826_v36 = vor.u32 %v5616_v38, %v4823_v57 }
 0x3e0   : > { %3826 = vmatmul.bf16.gmra.mxu0 %v3682_v16  ;;  %v3167_v31 = vpop.f32.mrf.mxu1 }
 0x3e1   : > { %v3503_v42 = vpop.f32.mrf.mxu3  ;;  %v3168_v12 = vadd.f32 %v3167_v31, %v6696_v21 }
 0x3e2   : > { %v3504_v15 = vadd.f32 %v3503_v42, %v3335_v56  ;;  %v4830_v56 = vor.u32 %v5621_v47, %v4829_v8 }
 0x3e4   : > { %v3630_v17 = vmax.f32 %v3504_v15, 0.0  ;;  %v5624_v15 = vld [vmem:[%s6068_s9 + $0x594] sm:$0xf] }
 0x3e5   : > { %v3789_v51 = vpop.f32.mrf.mxu0 }
 0x3e6   : > { %v5787_v50 = vpack.c.bf16 %v3789_v51, %v3787_v54  ;;  %v3336_v35 = vpop.f32.mrf.mxu2  ;;  %v4831_v54 = vld [vmem:[%s6068_s9 + $0x578] sm:$0xf0] }
 0x3e7   : > { %v3337_v1 = vadd.f32 %v3336_v35, %v3168_v12 }
 0x3e8   : > { %5935 = vst [vmem:[%s7135_s11 + $0x10] sm:$0xff] %v5787_v50   ;;  %v3170_v18 = vpop.f32.mrf.mxu1 }
 0x3e9   : > { %v3505_v22 = vpop.f32.mrf.mxu3  ;;  %v3171_v29 = vadd.f32 %v3170_v18, %v6700_v24  ;;  %v4834_v24 = vor.u32 %v5617_v4, %v4831_v54  ;;  %v5632_v54 = vld [vmem:[%s6068_s9 + $0x5d4] sm:$0xf] }
 0x3ea   : > { %v3506_v2 = vadd.f32 %v3505_v22, %v3337_v1  ;;  %v4855_v22 = vld [vmem:[%s6068_s9 + $0x5b0] sm:$0xf0] }
 0x3eb   : > { %3209 = vmatmul.bf16.gmra.mxu1 %v4794_v45  ;;  %3378 = vmatmul.bf16.gmra.mxu2 %v4798_v49  ;;  %v4861_v45 = vld [vmem:[%s6068_s9 + $0x598] sm:$0xf] }
 0x3ec   : > { %v3631_v6 = vmax.f32 %v3506_v2, 0.0  ;;  %v5629_v49 = vld [vmem:[%s6068_s9 + $0x5b4] sm:$0xf0]  ;;  %v5625_v2 = vld [vmem:[%s6068_s9 + $0x59c] sm:$0xf] }
 0x3ed   : > { %v3792_v21 = vpop.f32.mrf.mxu0 }
 0x3ee   : > { %3547 = vmatmul.bf16.gmra.mxu3 %v4802_v39  ;;  %v3683_v3 = vpack.c.bf16 %v3631_v6, %v3630_v17  ;;  %v3339_v0 = vpop.f32.mrf.mxu2  ;;  %v4863_v17 = vld [vmem:[%s6068_s9 + $0x5b8] sm:$0xf0] }
 0x3ef   : > { %v3340_v14 = vadd.f32 %v3339_v0, %v3171_v29 }
 0x3f0   : > { %3831 = vmatmul.bf16.gmra.mxu0 %v3683_v3  ;;  %v3172_v46 = vpop.f32.mrf.mxu1 }
 0x3f1   : > { %v3508_v10 = vpop.f32.mrf.mxu3  ;;  %v3173_v37 = vadd.f32 %v3172_v46, %v6712_v33  ;;  %v4862_v46 = vor.u32 %v5629_v49, %v4861_v45 }
 0x3f2   : > { %v3509_v26 = vadd.f32 %v3508_v10, %v3340_v14  ;;  %v4858_v10 = vor.u32 %v5624_v15, %v4855_v22 }
 0x3f4   : > { %v3632_v62 = vmax.f32 %v3509_v26, 0.0  ;;  %v4887_v26 = vld [vmem:[%s6068_s9 + $0x5f0] sm:$0xf0] }
 0x3f5   : > { %v3794_v40 = vpop.f32.mrf.mxu0 }
 0x3f6   : > { %v5792_v5 = vpack.c.bf16 %v3794_v40, %v3792_v21  ;;  %v3341_v16 = vpop.f32.mrf.mxu2 }
 0x3f7   : > { %v3342_v42 = vadd.f32 %v3341_v16, %v3173_v37 }
 0x3f8   : > { %5936 = vst [vmem:[%s7135_s11 + $0x18] sm:$0xff] %v5792_v5   ;;  %v3175_v61 = vpop.f32.mrf.mxu1 }
 0x3f9   : > { %v3510_v31 = vpop.f32.mrf.mxu3  ;;  %v3176_v59 = vadd.f32 %v3175_v61, %v6716_v58  ;;  %v4866_v58 = vor.u32 %v5625_v2, %v4863_v17  ;;  %v5633_v61 = vld [vmem:[%s6068_s9 + $0x5dc] sm:$0xf]  ;;  %v4919_v17 = vld [vmem:[%s6068_s9 + $0x630] sm:$0xf0] }
 0x3fa   : > { %v3511_v51 = vadd.f32 %v3510_v31, %v3342_v42  ;;  %v4893_v42 = vld [vmem:[%s6068_s9 + $0x5d8] sm:$0xf] }
 0x3fb   : > { %3214 = vmatmul.bf16.gmra.mxu1 %v4826_v36  ;;  %3383 = vmatmul.bf16.gmra.mxu2 %v4830_v56  ;;  %v5637_v31 = vld [vmem:[%s6068_s9 + $0x5f4] sm:$0xf0] }
 0x3fc   : > { %v3633_v19 = vmax.f32 %v3511_v51, 0.0 }
 0x3fd   : > { %v3797_v33 = vpop.f32.mrf.mxu0 }
 0x3fe   : > { %3552 = vmatmul.bf16.gmra.mxu3 %v4834_v24  ;;  %v3684_v30 = vpack.c.bf16 %v3633_v19, %v3632_v62  ;;  %v3344_v12 = vpop.f32.mrf.mxu2  ;;  %v4895_v24 = vld [vmem:[%s6068_s9 + $0x5f8] sm:$0xf0] }
 0x3ff   : > { %v3345_v35 = vadd.f32 %v3344_v12, %v3176_v59  ;;  %v4894_v12 = vor.u32 %v5637_v31, %v4893_v42  ;;  %v5648_v31 = vld [vmem:[%s6068_s9 + $0x654] sm:$0xf] }
 0x400   : > { %3836 = vmatmul.bf16.gmra.mxu0 %v3684_v30  ;;  %v3177_v53 = vpop.f32.mrf.mxu1  ;;  %v4890_v30 = vor.u32 %v5632_v54, %v4887_v26 }
 0x401   : > { %v3513_v50 = vpop.f32.mrf.mxu3  ;;  %v3178_v18 = vadd.f32 %v3177_v53, %v6728_v23 }
 0x402   : > { %v3514_v21 = vadd.f32 %v3513_v50, %v3345_v35 }
 0x404   : > { %v3634_v38 = vmax.f32 %v3514_v21, 0.0  ;;  %v5645_v21 = vld [vmem:[%s6068_s9 + $0x634] sm:$0xf0] }
 0x405   : > { %v3799_v1 = vpop.f32.mrf.mxu0 }
 0x406   : > { %v5797_v39 = vpack.c.bf16 %v3799_v1, %v3797_v33  ;;  %v3346_v6 = vpop.f32.mrf.mxu2 }
 0x407   : > { %v3347_v3 = vadd.f32 %v3346_v6, %v3178_v18  ;;  %v4925_v6 = vld [vmem:[%s6068_s9 + $0x618] sm:$0xf] }
 0x408   : > { %5937 = vst [vmem:[%s7135_s11 + $0x20] sm:$0xff] %v5797_v39   ;;  %v3180_v29 = vpop.f32.mrf.mxu1  ;;  %v5640_v39 = vld [vmem:[%s6068_s9 + $0x614] sm:$0xf] }
 0x409   : > { %v3515_v0 = vpop.f32.mrf.mxu3  ;;  %v3181_v5 = vadd.f32 %v3180_v29, %v6746_v41  ;;  %v4898_v41 = vor.u32 %v5633_v61, %v4895_v24  ;;  %v4957_v61 = vld [vmem:[%s6068_s9 + $0x658] sm:$0xf] }
 0x40a   : > { %v3516_v14 = vadd.f32 %v3515_v0, %v3347_v3  ;;  %v5653_v24 = vld [vmem:[%s6068_s9 + $0x674] sm:$0xf0] }
 0x40b   : > { %3219 = vmatmul.bf16.gmra.mxu1 %v4858_v10  ;;  %3388 = vmatmul.bf16.gmra.mxu2 %v4862_v46  ;;  %v5641_v10 = vld [vmem:[%s6068_s9 + $0x61c] sm:$0xf] }
 0x40c   : > { %v3635_v40 = vmax.f32 %v3516_v14, 0.0  ;;  %v4927_v46 = vld [vmem:[%s6068_s9 + $0x638] sm:$0xf0] }
 0x40d   : > { %v3802_v23 = vpop.f32.mrf.mxu0 }
 0x40e   : > { %3557 = vmatmul.bf16.gmra.mxu3 %v4866_v58  ;;  %v3685_v57 = vpack.c.bf16 %v3635_v40, %v3634_v38  ;;  %v3349_v8 = vpop.f32.mrf.mxu2  ;;  %v4922_v40 = vor.u32 %v5640_v39, %v4919_v17  ;;  %v5656_v17 = vld [vmem:[%s6068_s9 + $0x694] sm:$0xf] }
 0x40f   : > { %v3350_v4 = vadd.f32 %v3349_v8, %v3181_v5 }
 0x410   : > { %3841 = vmatmul.bf16.gmra.mxu0 %v3685_v57  ;;  %v3182_v37 = vpop.f32.mrf.mxu1 }
 0x411   : > { %v3518_v47 = vpop.f32.mrf.mxu3  ;;  %v3183_v36 = vadd.f32 %v3182_v37, %v6758_v9 }
 0x412   : > { %v3519_v62 = vadd.f32 %v3518_v47, %v3350_v4 }
 0x414   : > { %v3636_v59 = vmax.f32 %v3519_v62, 0.0 }
 0x415   : > { %v3804_v16 = vpop.f32.mrf.mxu0 }
 0x416   : > { %v5802_v56 = vpack.c.bf16 %v3804_v16, %v3802_v23  ;;  %v3351_v51 = vpop.f32.mrf.mxu2  ;;  %v4926_v23 = vor.u32 %v5645_v21, %v4925_v6  ;;  %v4983_v21 = vld [vmem:[%s6068_s9 + $0x6b0] sm:$0xf0] }
 0x417   : > { %v3352_v19 = vadd.f32 %v3351_v51, %v3183_v36 }
 0x418   : > { %5938 = vst [vmem:[%s7135_s11 + $0x28] sm:$0xff] %v5802_v56   ;;  %v3185_v50 = vpop.f32.mrf.mxu1  ;;  %v4951_v56 = vld [vmem:[%s6068_s9 + $0x670] sm:$0xf0] }
 0x419   : > { %v3520_v33 = vpop.f32.mrf.mxu3  ;;  %v3186_v49 = vadd.f32 %v3185_v50, %v6765_v32  ;;  %v4930_v32 = vor.u32 %v5641_v10, %v4927_v46 }
 0x41a   : > { %v3521_v53 = vadd.f32 %v3520_v33, %v3352_v19  ;;  %v5649_v19 = vld [vmem:[%s6068_s9 + $0x65c] sm:$0xf] }
 0x41b   : > { %3224 = vmatmul.bf16.gmra.mxu1 %v4890_v30  ;;  %3393 = vmatmul.bf16.gmra.mxu2 %v4894_v12  ;;  %v4959_v33 = vld [vmem:[%s6068_s9 + $0x678] sm:$0xf0] }
 0x41c   : > { %v3637_v35 = vmax.f32 %v3521_v53, 0.0  ;;  %v4954_v53 = vor.u32 %v5648_v31, %v4951_v56  ;;  %v5664_v31 = vld [vmem:[%s6068_s9 + $0x6d4] sm:$0xf] }
 0x41d   : > { %v3807_v9 = vpop.f32.mrf.mxu0  ;;  %v5015_v56 = vld [vmem:[%s6068_s9 + $0x6f0] sm:$0xf0] }
 0x41e   : > { %3562 = vmatmul.bf16.gmra.mxu3 %v4898_v41  ;;  %v3686_v15 = vpack.c.bf16 %v3637_v35, %v3636_v59  ;;  %v3354_v1 = vpop.f32.mrf.mxu2  ;;  %v4958_v59 = vor.u32 %v5653_v24, %v4957_v61  ;;  %v5021_v61 = vld [vmem:[%s6068_s9 + $0x6d8] sm:$0xf] }
 0x41f   : > { %v3355_v18 = vadd.f32 %v3354_v1, %v3186_v49  ;;  %v5669_v24 = vld [vmem:[%s6068_s9 + $0x6f4] sm:$0xf0] }
 0x420   : > { %3846 = vmatmul.bf16.gmra.mxu0 %v3686_v15  ;;  %v3187_v45 = vpop.f32.mrf.mxu1 }
 0x421   : > { %v3523_v22 = vpop.f32.mrf.mxu3  ;;  %v3188_v3 = vadd.f32 %v3187_v45, %v6777_v52 }
 0x422   : > { %v3524_v58 = vadd.f32 %v3523_v22, %v3355_v18 }
 0x424   : > { %v3638_v47 = vmax.f32 %v3524_v58, 0.0  ;;  %v4991_v58 = vld [vmem:[%s6068_s9 + $0x6b8] sm:$0xf0] }
 0x425   : > { %v3809_v2 = vpop.f32.mrf.mxu0 }
 0x426   : > { %v5807_v0 = vpack.c.bf16 %v3809_v2, %v3807_v9  ;;  %v3356_v29 = vpop.f32.mrf.mxu2 }
 0x427   : > { %v3357_v14 = vadd.f32 %v3356_v29, %v3188_v3  ;;  %v4989_v3 = vld [vmem:[%s6068_s9 + $0x698] sm:$0xf]  ;;  %v5657_v29 = vld [vmem:[%s6068_s9 + $0x69c] sm:$0xf] }
 0x428   : > { %5939 = vst [vmem:[%s7135_s11 + $0x30] sm:$0xff] %v5807_v0   ;;  %v3190_v57 = vpop.f32.mrf.mxu1  ;;  %v5661_v0 = vld [vmem:[%s6068_s9 + $0x6b4] sm:$0xf0] }
 0x429   : > { %v3525_v38 = vpop.f32.mrf.mxu3  ;;  %v3191_v26 = vadd.f32 %v3190_v57, %v6781_v60  ;;  %v4962_v60 = vor.u32 %v5649_v19, %v4959_v33  ;;  %v4986_v57 = vor.u32 %v5656_v17, %v4983_v21  ;;  %v5665_v19 = vld [vmem:[%s6068_s9 + $0x6dc] sm:$0xf]  ;;  %v5047_v17 = vld [vmem:[%s6068_s9 + $0x730] sm:$0xf0]  ;;  %v5677_v21 = vld [vmem:[%s6068_s9 + $0x734] sm:$0xf0] }
 0x42a   : > { %v3526_v8 = vadd.f32 %v3525_v38, %v3357_v14  ;;  %v5023_v33 = vld [vmem:[%s6068_s9 + $0x6f8] sm:$0xf0] }
 0x42b   : > { %3229 = vmatmul.bf16.gmra.mxu1 %v4922_v40  ;;  %3398 = vmatmul.bf16.gmra.mxu2 %v4926_v23 }
 0x42c   : > { %v3639_v37 = vmax.f32 %v3526_v8, 0.0 }
 0x42d   : > { %v3812_v52 = vpop.f32.mrf.mxu0 }
 0x42e   : > { %3567 = vmatmul.bf16.gmra.mxu3 %v4930_v32  ;;  %v3687_v5 = vpack.c.bf16 %v3639_v37, %v3638_v47  ;;  %v3359_v4 = vpop.f32.mrf.mxu2  ;;  %v4990_v32 = vor.u32 %v5661_v0, %v4989_v3 }
 0x42f   : > { %v3360_v42 = vadd.f32 %v3359_v4, %v3191_v26 }
 0x430   : > { %3851 = vmatmul.bf16.gmra.mxu0 %v3687_v5  ;;  %v3192_v16 = vpop.f32.mrf.mxu1 }
 0x431   : > { %v3528_v54 = vpop.f32.mrf.mxu3  ;;  %v3193_v51 = vadd.f32 %v3192_v16, %v6793_v44 }
 0x432   : > { %v3529_v12 = vadd.f32 %v3528_v54, %v3360_v42 }
 0x434   : > { %v3640_v15 = vmax.f32 %v3529_v12, 0.0 }
 0x435   : > { %v3814_v36 = vpop.f32.mrf.mxu0 }
 0x436   : > { %v5812_v62 = vpack.c.bf16 %v3814_v36, %v3812_v52  ;;  %v3361_v30 = vpop.f32.mrf.mxu2 }
 0x437   : > { %v3362_v50 = vadd.f32 %v3361_v30, %v3193_v51 }
 0x438   : > { %5940 = vst [vmem:[%s7135_s11 + $0x38] sm:$0xff] %v5812_v62   ;;  %v3195_v35 = vpop.f32.mrf.mxu1 }
 0x439   : > { %v3530_v41 = vpop.f32.mrf.mxu3  ;;  %v3196_v39 = vadd.f32 %v3195_v35, %v6797_v63  ;;  %v4994_v63 = vor.u32 %v5657_v29, %v4991_v58 }
 0x43a   : > { %v3531_v9 = vadd.f32 %v3530_v41, %v3362_v50 }
 0x43b   : > { %3234 = vmatmul.bf16.gmra.mxu1 %v4954_v53  ;;  %3403 = vmatmul.bf16.gmra.mxu2 %v4958_v59  ;;  %v5018_v53 = vor.u32 %v5664_v31, %v5015_v56  ;;  %v5022_v59 = vor.u32 %v5669_v24, %v5021_v61  ;;  %v5085_v31 = vld [vmem:[%s6068_s9 + $0x758] sm:$0xf]  ;;  %v5681_v24 = vld [vmem:[%s6068_s9 + $0x75c] sm:$0xf] }
 0x43c   : > { %v3641_v1 = vmax.f32 %v3531_v9, 0.0 }
 0x43d   : > { %v3817_v44 = vpop.f32.mrf.mxu0 }
 0x43e   : > { %3572 = vmatmul.bf16.gmra.mxu3 %v4962_v60  ;;  %v3688_v22 = vpack.c.bf16 %v3641_v1, %v3640_v15  ;;  %v3364_v45 = vpop.f32.mrf.mxu2 }
 0x43f   : > { %v3365_v2 = vadd.f32 %v3364_v45, %v3196_v39  ;;  %v5672_v39 = vld [vmem:[%s6068_s9 + $0x714] sm:$0xf] }
 0x440   : > { %3856 = vmatmul.bf16.gmra.mxu0 %v3688_v22  ;;  %v3197_v18 = vpop.f32.mrf.mxu1 }
 0x441   : > { %v3533_v49 = vpop.f32.mrf.mxu3  ;;  %v3198_v10 = vadd.f32 %v3197_v18, %v6809_v13 }
 0x442   : > { %v3534_v38 = vadd.f32 %v3533_v49, %v3365_v2 }
 0x444   : > { %v3642_v37 = vmax.f32 %v3534_v38, 0.0 }
 0x445   : > { %v3819_v6 = vpop.f32.mrf.mxu0 }
 0x446   : > { %v5817_v46 = vpack.c.bf16 %v3819_v6, %v3817_v44  ;;  %v3366_v14 = vpop.f32.mrf.mxu2  ;;  %v5053_v6 = vld [vmem:[%s6068_s9 + $0x718] sm:$0xf] }
 0x447   : > { %v3367_v40 = vadd.f32 %v3366_v14, %v3198_v10  ;;  %v5673_v10 = vld [vmem:[%s6068_s9 + $0x71c] sm:$0xf] }
 0x448   : > { %5941 = vst [vmem:[%s7135_s11 + $0x40] sm:$0xff] %v5817_v46   ;;  %v3200_v8 = vpop.f32.mrf.mxu1  ;;  %v5055_v46 = vld [vmem:[%s6068_s9 + $0x738] sm:$0xf0] }
 0x449   : > { %v3535_v23 = vpop.f32.mrf.mxu3  ;;  %v3201_v26 = vadd.f32 %v3200_v8, %v6822_v55  ;;  %v5026_v55 = vor.u32 %v5665_v19, %v5023_v33 }
 0x44a   : > { %v3536_v47 = vadd.f32 %v3535_v23, %v3367_v40  ;;  %v5050_v40 = vor.u32 %v5672_v39, %v5047_v17  ;;  %v5054_v23 = vor.u32 %v5677_v21, %v5053_v6  ;;  %v5111_v39 = vld [vmem:[%s6068_s9 + $0x7b0] sm:$0xf0]  ;;  %v5693_v17 = vld [vmem:[%s6068_s9 + $0x7b4] sm:$0xf0] }
 0x44b   : > { %3239 = vmatmul.bf16.gmra.mxu1 %v4986_v57  ;;  %3408 = vmatmul.bf16.gmra.mxu2 %v4990_v32 }
 0x44c   : > { %v3643_v52 = vmax.f32 %v3536_v47, 0.0 }
 0x44d   : > { %v3822_v13 = vpop.f32.mrf.mxu0 }
 0x44e   : > { %3577 = vmatmul.bf16.gmra.mxu3 %v4994_v63  ;;  %v3689_v5 = vpack.c.bf16 %v3643_v52, %v3642_v37  ;;  %v3369_v4 = vpop.f32.mrf.mxu2 }
 0x44f   : > { %v3370_v42 = vadd.f32 %v3369_v4, %v3201_v26  ;;  %v3044_v4 = vadd.f32 %v6860_v48, %v6871_v20 }
 0x450   : > { %3861 = vmatmul.bf16.gmra.mxu0 %v3689_v5  ;;  %v3202_v16 = vpop.f32.mrf.mxu1 }
 0x451   : > { %v3538_v54 = vpop.f32.mrf.mxu3  ;;  %v3203_v51 = vadd.f32 %v3202_v16, %v6834_v34  ;;  %v5680_v16 = vld [vmem:[%s6068_s9 + $0x754] sm:$0xf] }
 0x452   : > { %v3539_v12 = vadd.f32 %v3538_v54, %v3370_v42  ;;  %v5079_v42 = vld [vmem:[%s6068_s9 + $0x770] sm:$0xf0] }
 0x454   : > { %v3644_v9 = vmax.f32 %v3539_v12, 0.0  ;;  %v5082_v12 = vor.u32 %v5680_v16, %v5079_v42 }
 0x455   : > { %v3824_v36 = vpop.f32.mrf.mxu0 }
 0x456   : > { %v5822_v62 = vpack.c.bf16 %v3824_v36, %v3822_v13  ;;  %v3371_v30 = vpop.f32.mrf.mxu2  ;;  %v5685_v36 = vld [vmem:[%s6068_s9 + $0x774] sm:$0xf0] }
 0x457   : > { %v3372_v50 = vadd.f32 %v3371_v30, %v3203_v51  ;;  %v5087_v51 = vld [vmem:[%s6068_s9 + $0x778] sm:$0xf0] }
 0x458   : > { %5942 = vst [vmem:[%s7135_s11 + $0x48] sm:$0xff] %v5822_v62   ;;  %v3205_v35 = vpop.f32.mrf.mxu1 }
 0x459   : > { %v3540_v41 = vpop.f32.mrf.mxu3  ;;  %v3206_v49 = vadd.f32 %v3205_v35, %v6841_v7  ;;  %v5058_v7 = vor.u32 %v5673_v10, %v5055_v46 }
 0x45a   : > { %v3541_v60 = vadd.f32 %v3540_v41, %v3372_v50  ;;  %v5090_v41 = vor.u32 %v5681_v24, %v5087_v51  ;;  %v5697_v51 = vld [vmem:[%s6068_s9 + $0x7dc] sm:$0xf] }
 0x45b   : > { %3244 = vmatmul.bf16.gmra.mxu1 %v5018_v53  ;;  %3413 = vmatmul.bf16.gmra.mxu2 %v5022_v59 }
 0x45c   : > { %v3645_v15 = vmax.f32 %v3541_v60, 0.0 }
 0x45d   : > { %v3827_v34 = vpop.f32.mrf.mxu0 }
 0x45e   : > { %3582 = vmatmul.bf16.gmra.mxu3 %v5026_v55  ;;  %v3690_v1 = vpack.c.bf16 %v3645_v15, %v3644_v9  ;;  %v3374_v44 = vpop.f32.mrf.mxu2  ;;  %v7393_v15 = vld [vmem:[#allocation25_spill] sm:$0xff] }
 0x45f   : > { %v3375_v18 = vadd.f32 %v3374_v44, %v3206_v49  ;;  %v7395_v44 = vld [vmem:[#allocation26_spill] sm:$0xff]  ;;  %v5688_v49 = vld [vmem:[%s6068_s9 + $0x794] sm:$0xf] }
 0x460   : > { %3866 = vmatmul.bf16.gmra.mxu0 %v3690_v1  ;;  %v3207_v45 = vpop.f32.mrf.mxu1  ;;  %v7394_v1 = vld [vmem:[#allocation14_spill] sm:$0xff] }
 0x461   : > { %v3543_v22 = vpop.f32.mrf.mxu3  ;;  %v3208_v3 = vadd.f32 %v3207_v45, %v6853_v25 }
 0x462   : > { %v3544_v58 = vadd.f32 %v3543_v22, %v3375_v18  ;;  %v3049_v22 = vadd.f32 %v7395_v44, %v7394_v1  ;;  %v7400_v44 = vld [vmem:[#allocation2_spill] sm:$0xff] }
 0x464   : > { %v3646_v8 = vmax.f32 %v3544_v58, 0.0 }
 0x465   : > { %v3829_v2 = vpop.f32.mrf.mxu0 }
 0x466   : > { %v5827_v0 = vpack.c.bf16 %v3829_v2, %v3827_v34  ;;  %v3376_v29 = vpop.f32.mrf.mxu2  ;;  %v5117_v2 = vld [vmem:[%s6068_s9 + $0x798] sm:$0xf] }
 0x467   : > { %v3377_v14 = vadd.f32 %v3376_v29, %v3208_v3  ;;  %v5689_v3 = vld [vmem:[%s6068_s9 + $0x79c] sm:$0xf] }
 0x468   : > { %5943 = vst [vmem:[%s7135_s11 + $0x50] sm:$0xff] %v5827_v0   ;;  %v3210_v57 = vpop.f32.mrf.mxu1  ;;  %v5119_v0 = vld [vmem:[%s6068_s9 + $0x7b8] sm:$0xf0] }
 0x469   : > { %v3545_v38 = vpop.f32.mrf.mxu3  ;;  %v3211_v5 = vadd.f32 %v3210_v57, %v6857_v27  ;;  %v5086_v27 = vor.u32 %v5685_v36, %v5085_v31  ;;  %v5143_v31 = vld [vmem:[%s6068_s9 + $0x7f0] sm:$0xf0]  ;;  %v5149_v36 = vld [vmem:[%s6068_s9 + $0x7d8] sm:$0xf] }
 0x46a   : > { %v3546_v32 = vadd.f32 %v3545_v38, %v3377_v14  ;;  %v5114_v14 = vor.u32 %v5688_v49, %v5111_v39  ;;  %v5118_v38 = vor.u32 %v5693_v17, %v5117_v2 }
 0x46b   : > { %3249 = vmatmul.bf16.gmra.mxu1 %v5050_v40  ;;  %3418 = vmatmul.bf16.gmra.mxu2 %v5054_v23  ;;  %v5122_v23 = vor.u32 %v5689_v3, %v5119_v0 }
 0x46c   : > { %v3647_v63 = vmax.f32 %v3546_v32, 0.0 }
 0x46d   : > { %v3832_v25 = vpop.f32.mrf.mxu0 }
 0x46e   : > { %3587 = vmatmul.bf16.gmra.mxu3 %v5058_v7  ;;  %v3691_v47 = vpack.c.bf16 %v3647_v63, %v3646_v8  ;;  %v3379_v37 = vpop.f32.mrf.mxu2 }
 0x46f   : > { %v3380_v54 = vadd.f32 %v3379_v37, %v3211_v5  ;;  %v7397_v5 = vld [vmem:[#allocation18_spill] sm:$0xff] }
 0x470   : > { %3871 = vmatmul.bf16.gmra.mxu0 %v3691_v47  ;;  %v3212_v13 = vpop.f32.mrf.mxu1 }
 0x471   : > { %v3548_v52 = vpop.f32.mrf.mxu3  ;;  %v3213_v56 = vadd.f32 %v3212_v13, %v3044_v4  ;;  %v7398_v4 = vld [vmem:[#allocation27_spill] sm:$0xff] }
 0x472   : > { %v3549_v19 = vadd.f32 %v3548_v52, %v3380_v54  ;;  %v7396_v52 = vld [vmem:[#allocation16_spill] sm:$0xff]  ;;  %v3054_v54 = vadd.f32 %v7398_v4, %v7397_v5 }
 0x474   : > { %v3648_v20 = vmax.f32 %v3549_v19, 0.0 }
 0x475   : > { %v3834_v26 = vpop.f32.mrf.mxu0 }
 0x476   : > { %v5832_v61 = vpack.c.bf16 %v3834_v26, %v3832_v25  ;;  %v3381_v62 = vpop.f32.mrf.mxu2  ;;  %v5696_v26 = vld [vmem:[%s6068_s9 + $0x7d4] sm:$0xf] }
 0x477   : > { %v3382_v33 = vadd.f32 %v3381_v62, %v3213_v56  ;;  %v5701_v56 = vld [vmem:[%s6068_s9 + $0x7f4] sm:$0xf0]  ;;  %v5151_v62 = vld [vmem:[%s6068_s9 + $0x7f8] sm:$0xf0] }
 0x478   : > { %5944 = vst [vmem:[%s7135_s11 + $0x58] sm:$0xff] %v5832_v61   ;;  %v3215_v50 = vpop.f32.mrf.mxu1 }
 0x479   : > { %v3550_v30 = vpop.f32.mrf.mxu3  ;;  %v3216_v34 = vadd.f32 %v3215_v50, %v7393_v15  ;;  %v5150_v50 = vor.u32 %v5701_v56, %v5149_v36 }
 0x47a   : > { %v3551_v48 = vadd.f32 %v3550_v30, %v3382_v33 }
 0x47b   : > { %3254 = vmatmul.bf16.gmra.mxu1 %v5082_v12  ;;  %3423 = vmatmul.bf16.gmra.mxu2 %v5086_v27  ;;  %v5146_v27 = vor.u32 %v5696_v26, %v5143_v31 }
 0x47c   : > { %v3649_v53 = vmax.f32 %v3551_v48, 0.0  ;;  %v5154_v48 = vor.u32 %v5697_v51, %v5151_v62  ;;  %v7405_v62 = vld [vmem:[#allocation5_spill] sm:$0xff] }
 0x47d   : > { %v3837_v59 = vpop.f32.mrf.mxu0 }
 0x47e   : > { %3592 = vmatmul.bf16.gmra.mxu3 %v5090_v41  ;;  %v3692_v35 = vpack.c.bf16 %v3649_v53, %v3648_v20  ;;  %v3384_v55 = vpop.f32.mrf.mxu2 }
 0x47f   : > { %v3385_v45 = vadd.f32 %v3384_v55, %v3216_v34  ;;  %v7399_v34 = vld [vmem:[#allocation20_spill] sm:$0xff] }
 0x480   : > { %3876 = vmatmul.bf16.gmra.mxu0 %v3692_v35  ;;  %v3217_v9 = vpop.f32.mrf.mxu1 }
 0x481   : > { %v3553_v60 = vpop.f32.mrf.mxu3  ;;  %v3218_v6 = vadd.f32 %v3217_v9, %v3049_v22  ;;  %v7401_v22 = vld [vmem:[#allocation28_spill] sm:$0xff] }
 0x482   : > { %v3554_v46 = vadd.f32 %v3553_v60, %v3385_v45  ;;  %v3059_v45 = vadd.f32 %v7401_v22, %v7400_v44 }
 0x484   : > { %v3650_v7 = vmax.f32 %v3554_v46, 0.0 }
 0x485   : > { %v3839_v18 = vpop.f32.mrf.mxu0 }
 0x486   : > { %v5837_v21 = vpack.c.bf16 %v3839_v18, %v3837_v59  ;;  %v3386_v10 = vpop.f32.mrf.mxu2 }
 0x487   : > { %v3387_v29 = vadd.f32 %v3386_v10, %v3218_v6 }
 0x488   : > { %5945 = vst [vmem:[%s7135_s11 + $0x60] sm:$0xff] %v5837_v21   ;;  %v3220_v40 = vpop.f32.mrf.mxu1 }
 0x489   : > { %v3555_v58 = vpop.f32.mrf.mxu3  ;;  %v3221_v13 = vadd.f32 %v3220_v40, %v7396_v52 }
 0x48a   : > { %v3556_v57 = vadd.f32 %v3555_v58, %v3387_v29 }
 0x48b   : > { %3259 = vmatmul.bf16.gmra.mxu1 %v5114_v14  ;;  %3428 = vmatmul.bf16.gmra.mxu2 %v5118_v38 }
 0x48c   : > { %v3651_v32 = vmax.f32 %v3556_v57, 0.0  ;;  %v7402_v57 = vld [vmem:[#allocation3_spill] sm:$0xff] }
 0x48d   : > { %v3842_v8 = vpop.f32.mrf.mxu0 }
 0x48e   : > { %3597 = vmatmul.bf16.gmra.mxu3 %v5122_v23  ;;  %v3693_v63 = vpack.c.bf16 %v3651_v32, %v3650_v7  ;;  %v3389_v25 = vpop.f32.mrf.mxu2  ;;  %v7403_v32 = vld [vmem:[#allocation4_spill] sm:$0xff] }
 0x48f   : > { %v3390_v16 = vadd.f32 %v3389_v25, %v3221_v13 }
 0x490   : > { %3881 = vmatmul.bf16.gmra.mxu0 %v3693_v63  ;;  %v3222_v37 = vpop.f32.mrf.mxu1 }
 0x491   : > { %v3558_v47 = vpop.f32.mrf.mxu3  ;;  %v3223_v61 = vadd.f32 %v3222_v37, %v3054_v54 }
 0x492   : > { %v3559_v33 = vadd.f32 %v3558_v47, %v3390_v16 }
 0x494   : > { %v3652_v53 = vmax.f32 %v3559_v33, 0.0  ;;  %v7406_v33 = vld [vmem:[#allocation6_spill] sm:$0xff] }
 0x495   : > { %v3844_v42 = vpop.f32.mrf.mxu0 }
 0x496   : > { %v5842_v24 = vpack.c.bf16 %v3844_v42, %v3842_v8  ;;  %v3391_v19 = vpop.f32.mrf.mxu2  ;;  %v7404_v8 = vld [vmem:[#allocation29_spill] sm:$0xff] }
 0x497   : > { %v3392_v30 = vadd.f32 %v3391_v19, %v3223_v61  ;;  %v3064_v63 = vadd.f32 %v7404_v8, %v7403_v32 }
 0x498   : > { %5946 = vst [vmem:[%s7135_s11 + $0x68] sm:$0xff] %v5842_v24   ;;  %v3225_v41 = vpop.f32.mrf.mxu1 }
 0x499   : > { %v3560_v12 = vpop.f32.mrf.mxu3  ;;  %v3226_v1 = vadd.f32 %v3225_v41, %v7399_v34 }
 0x49a   : > { %v3561_v20 = vadd.f32 %v3560_v12, %v3392_v30  ;;  %v7407_v30 = vld [vmem:[#allocation30_spill] sm:$0xff] }
 0x49b   : > { %3264 = vmatmul.bf16.gmra.mxu1 %v5146_v27  ;;  %3433 = vmatmul.bf16.gmra.mxu2 %v5150_v50  ;;  %v3069_v12 = vadd.f32 %v7407_v30, %v7406_v33 }
 0x49c   : > { %v3653_v59 = vmax.f32 %v3561_v20, 0.0 }
 0x49d   : > { %v3847_v35 = vpop.f32.mrf.mxu0 }
 0x49e   : > { %3602 = vmatmul.bf16.gmra.mxu3 %v5154_v48  ;;  %v3694_v55 = vpack.c.bf16 %v3653_v59, %v3652_v53  ;;  %v3394_v60 = vpop.f32.mrf.mxu2 }
 0x49f   : > { %v3395_v49 = vadd.f32 %v3394_v60, %v3226_v1 }
 0x4a0   : > { %3886 = vmatmul.bf16.gmra.mxu0 %v3694_v55  ;;  %v3227_v15 = vpop.f32.mrf.mxu1 }
 0x4a1   : > { %v3563_v9 = vpop.f32.mrf.mxu3  ;;  %v3228_v39 = vadd.f32 %v3227_v15, %v3059_v45 }
 0x4a2   : > { %v3564_v6 = vadd.f32 %v3563_v9, %v3395_v49  ;;  %v7408_v49 = vld [vmem:[#allocation7_spill] sm:$0xff] }
 0x4a4   : > { %v3654_v46 = vmax.f32 %v3564_v6, 0.0 }
 0x4a5   : > { %v3849_v18 = vpop.f32.mrf.mxu0 }
 0x4a6   : > { %v5847_v2 = vpack.c.bf16 %v3849_v18, %v3847_v35  ;;  %v3396_v17 = vpop.f32.mrf.mxu2 }
 0x4a7   : > { %v3397_v21 = vadd.f32 %v3396_v17, %v3228_v39  ;;  %v7409_v39 = vld [vmem:[#allocation8_spill] sm:$0xff] }
 0x4a8   : > { %5947 = vst [vmem:[%s7135_s11 + $0x70] sm:$0xff] %v5847_v2   ;;  %v3230_v0 = vpop.f32.mrf.mxu1  ;;  %v7410_v2 = vld [vmem:[#allocation31_spill] sm:$0xff] }
 0x4a9   : > { %v3565_v3 = vpop.f32.mrf.mxu3  ;;  %v3231_v7 = vadd.f32 %v3230_v0, %v7402_v57  ;;  %v3074_v17 = vadd.f32 %v7410_v2, %v7409_v39 }
 0x4aa   : > { %v3566_v10 = vadd.f32 %v3565_v3, %v3397_v21 }
 0x4ac   : > { %v3655_v29 = vmax.f32 %v3566_v10, 0.0 }
 0x4ad   : > { %v3852_v58 = vpop.f32.mrf.mxu0 }
 0x4ae   : > { %v3695_v14 = vpack.c.bf16 %v3655_v29, %v3654_v46  ;;  %v3399_v38 = vpop.f32.mrf.mxu2 }
 0x4af   : > { %v3400_v25 = vadd.f32 %v3399_v38, %v3231_v7 }
 0x4b0   : > { %3891 = vmatmul.bf16.gmra.mxu0 %v3695_v14  ;;  %v3232_v23 = vpop.f32.mrf.mxu1 }
 0x4b1   : > { %v3568_v40 = vpop.f32.mrf.mxu3  ;;  %v3233_v37 = vadd.f32 %v3232_v23, %v3064_v63 }
 0x4b2   : > { %v3569_v5 = vadd.f32 %v3568_v40, %v3400_v25  ;;  %v7411_v25 = vld [vmem:[#allocation9_spill] sm:$0xff] }
 0x4b4   : > { %v3656_v42 = vmax.f32 %v3569_v5, 0.0 }
 0x4b5   : > { %v3854_v47 = vpop.f32.mrf.mxu0 }
 0x4b6   : > { %v5852_v52 = vpack.c.bf16 %v3854_v47, %v3852_v58  ;;  %v3401_v13 = vpop.f32.mrf.mxu2 }
 0x4b7   : > { %v3402_v4 = vadd.f32 %v3401_v13, %v3233_v37  ;;  %v7412_v37 = vld [vmem:[#allocation10_spill] sm:$0xff] }
 0x4b8   : > { %5948 = vst [vmem:[%s7135_s11 + $0x78] sm:$0xff] %v5852_v52   ;;  %v3235_v16 = vpop.f32.mrf.mxu1  ;;  %v7413_v52 = vld [vmem:[#allocation32_spill] sm:$0xff] }
 0x4b9   : > { %v3570_v54 = vpop.f32.mrf.mxu3  ;;  %v3236_v19 = vadd.f32 %v3235_v16, %v7405_v62  ;;  %v3079_v13 = vadd.f32 %v7413_v52, %v7412_v37 }
 0x4ba   : > { %v3571_v26 = vadd.f32 %v3570_v54, %v3402_v4 }
 0x4bc   : > { %v3657_v31 = vmax.f32 %v3571_v26, 0.0 }
 0x4bd   : > { %v3857_v36 = vpop.f32.mrf.mxu0 }
 0x4be   : > { %v3696_v56 = vpack.c.bf16 %v3657_v31, %v3656_v42  ;;  %v3404_v61 = vpop.f32.mrf.mxu2 }
 0x4bf   : > { %v3405_v27 = vadd.f32 %v3404_v61, %v3236_v19 }
 0x4c0   : > { %3896 = vmatmul.bf16.gmra.mxu0 %v3696_v56  ;;  %v3237_v51 = vpop.f32.mrf.mxu1 }
 0x4c1   : > { %v3573_v24 = vpop.f32.mrf.mxu3  ;;  %v3238_v41 = vadd.f32 %v3237_v51, %v3069_v12 }
 0x4c2   : > { %v3574_v53 = vadd.f32 %v3573_v24, %v3405_v27  ;;  %v7414_v27 = vld [vmem:[#allocation11_spill] sm:$0xff] }
 0x4c4   : > { %v3658_v9 = vmax.f32 %v3574_v53, 0.0 }
 0x4c5   : > { %v3859_v50 = vpop.f32.mrf.mxu0 }
 0x4c6   : > { %v5857_v48 = vpack.c.bf16 %v3859_v50, %v3857_v36  ;;  %v3406_v20 = vpop.f32.mrf.mxu2 }
 0x4c7   : > { %v3407_v59 = vadd.f32 %v3406_v20, %v3238_v41  ;;  %v7415_v41 = vld [vmem:[#allocation12_spill] sm:$0xff] }
 0x4c8   : > { %5949 = vst [vmem:[%s7135_s11 + $0x80] sm:$0xff] %v5857_v48   ;;  %v3240_v55 = vpop.f32.mrf.mxu1  ;;  %v7416_v48 = vld [vmem:[#allocation33_spill] sm:$0xff] }
 0x4c9   : > { %v3575_v35 = vpop.f32.mrf.mxu3  ;;  %v3241_v18 = vadd.f32 %v3240_v55, %v7408_v49  ;;  %v3084_v20 = vadd.f32 %v7416_v48, %v7415_v41  ;;  %v7422_v48 = vld [vmem:[#allocation21_spill] sm:$0xff] }
 0x4ca   : > { %v3576_v60 = vadd.f32 %v3575_v35, %v3407_v59 }
 0x4cc   : > { %v3659_v15 = vmax.f32 %v3576_v60, 0.0 }
 0x4cd   : > { %v3862_v34 = vpop.f32.mrf.mxu0 }
 0x4ce   : > { %v3697_v1 = vpack.c.bf16 %v3659_v15, %v3658_v9  ;;  %v3409_v44 = vpop.f32.mrf.mxu2 }
 0x4cf   : > { %v3410_v6 = vadd.f32 %v3409_v44, %v3241_v18 }
 0x4d0   : > { %3901 = vmatmul.bf16.gmra.mxu0 %v3697_v1  ;;  %v3242_v45 = vpop.f32.mrf.mxu1 }
 0x4d1   : > { %v3578_v22 = vpop.f32.mrf.mxu3  ;;  %v3243_v3 = vadd.f32 %v3242_v45, %v3074_v17 }
 0x4d2   : > { %v3579_v46 = vadd.f32 %v3578_v22, %v3410_v6  ;;  %v7417_v6 = vld [vmem:[#allocation13_spill] sm:$0xff] }
 0x4d4   : > { %v3660_v40 = vmax.f32 %v3579_v46, 0.0 }
 0x4d5   : > { %v3864_v21 = vpop.f32.mrf.mxu0 }
 0x4d6   : > { %v5862_v0 = vpack.c.bf16 %v3864_v21, %v3862_v34  ;;  %v3411_v10 = vpop.f32.mrf.mxu2 }
 0x4d7   : > { %v3412_v29 = vadd.f32 %v3411_v10, %v3243_v3  ;;  %v7418_v3 = vld [vmem:[#allocation15_spill] sm:$0xff] }
 0x4d8   : > { %5950 = vst [vmem:[%s7135_s11 + $0x88] sm:$0xff] %v5862_v0   ;;  %v3245_v14 = vpop.f32.mrf.mxu1  ;;  %v7419_v0 = vld [vmem:[#allocation34_spill] sm:$0xff] }
 0x4d9   : > { %v3580_v58 = vpop.f32.mrf.mxu3  ;;  %v3246_v47 = vadd.f32 %v3245_v14, %v7411_v25  ;;  %v3089_v10 = vadd.f32 %v7419_v0, %v7418_v3 }
 0x4da   : > { %v3581_v38 = vadd.f32 %v3580_v58, %v3412_v29 }
 0x4dc   : > { %v3661_v23 = vmax.f32 %v3581_v38, 0.0 }
 0x4dd   : > { %v3867_v57 = vpop.f32.mrf.mxu0 }
 0x4de   : > { %v3698_v7 = vpack.c.bf16 %v3661_v23, %v3660_v40  ;;  %v3414_v32 = vpop.f32.mrf.mxu2 }
 0x4df   : > { %v3415_v5 = vadd.f32 %v3414_v32, %v3246_v47 }
 0x4e0   : > { %3906 = vmatmul.bf16.gmra.mxu0 %v3698_v7  ;;  %v3247_v63 = vpop.f32.mrf.mxu1 }
 0x4e1   : > { %v3583_v8 = vpop.f32.mrf.mxu3  ;;  %v3248_v54 = vadd.f32 %v3247_v63, %v3079_v13 }
 0x4e2   : > { %v3584_v42 = vadd.f32 %v3583_v8, %v3415_v5 }
 0x4e4   : > { %v3662_v24 = vmax.f32 %v3584_v42, 0.0 }
 0x4e5   : > { %v3869_v4 = vpop.f32.mrf.mxu0 }
 0x4e6   : > { %v5867_v16 = vpack.c.bf16 %v3869_v4, %v3867_v57  ;;  %v3416_v26 = vpop.f32.mrf.mxu2  ;;  %v7420_v4 = vld [vmem:[#allocation17_spill] sm:$0xff] }
 0x4e7   : > { %v3417_v31 = vadd.f32 %v3416_v26, %v3248_v54  ;;  %v3094_v54 = vadd.f32 %v7420_v4, %v7042_v11  ;;  %v7421_v11 = vld [vmem:[#allocation19_spill] sm:$0xff] }
 0x4e8   : > { %5951 = vst [vmem:[%s7135_s11 + $0x90] sm:$0xff] %v5867_v16   ;;  %v3250_v56 = vpop.f32.mrf.mxu1 }
 0x4e9   : > { %v3585_v36 = vpop.f32.mrf.mxu3  ;;  %v3251_v50 = vadd.f32 %v3250_v56, %v7414_v27 }
 0x4ea   : > { %v3586_v61 = vadd.f32 %v3585_v36, %v3417_v31 }
 0x4ec   : > { %v3663_v51 = vmax.f32 %v3586_v61, 0.0 }
 0x4ed   : > { %v3872_v62 = vpop.f32.mrf.mxu0 }
 0x4ee   : > { %v3699_v19 = vpack.c.bf16 %v3663_v51, %v3662_v24  ;;  %v3419_v33 = vpop.f32.mrf.mxu2 }
 0x4ef   : > { %v3420_v53 = vadd.f32 %v3419_v33, %v3251_v50 }
 0x4f0   : > { %3911 = vmatmul.bf16.gmra.mxu0 %v3699_v19  ;;  %v3252_v12 = vpop.f32.mrf.mxu1 }
 0x4f1   : > { %v3588_v30 = vpop.f32.mrf.mxu3  ;;  %v3253_v35 = vadd.f32 %v3252_v12, %v3084_v20  ;;  %v3099_v20 = vadd.f32 %v7121_v28, %v7422_v48 }
 0x4f2   : > { %v3589_v9 = vadd.f32 %v3588_v30, %v3420_v53 }
 0x4f4   : > { %v3664_v22 = vmax.f32 %v3589_v9, 0.0 }
 0x4f5   : > { %v3874_v59 = vpop.f32.mrf.mxu0 }
 0x4f6   : > { %v5872_v55 = vpack.c.bf16 %v3874_v59, %v3872_v62  ;;  %v3421_v60 = vpop.f32.mrf.mxu2 }
 0x4f7   : > { %v3422_v15 = vadd.f32 %v3421_v60, %v3253_v35 }
 0x4f8   : > { %5952 = vst [vmem:[%s7135_s11 + $0x98] sm:$0xff] %v5872_v55   ;;  %v3255_v1 = vpop.f32.mrf.mxu1 }
 0x4f9   : > { %v3590_v34 = vpop.f32.mrf.mxu3  ;;  %v3256_v21 = vadd.f32 %v3255_v1, %v7417_v6 }
 0x4fa   : > { %v3591_v44 = vadd.f32 %v3590_v34, %v3422_v15 }
 0x4fc   : > { %v3665_v45 = vmax.f32 %v3591_v44, 0.0 }
 0x4fd   : > { %v3877_v49 = vpop.f32.mrf.mxu0 }
 0x4fe   : > { %v3700_v18 = vpack.c.bf16 %v3665_v45, %v3664_v22  ;;  %v3424_v39 = vpop.f32.mrf.mxu2 }
 0x4ff   : > { %v3425_v46 = vadd.f32 %v3424_v39, %v3256_v21 }
 0x500   : > { %3916 = vmatmul.bf16.gmra.mxu0 %v3700_v18  ;;  %v3257_v17 = vpop.f32.mrf.mxu1 }
 0x501   : > { %v3593_v2 = vpop.f32.mrf.mxu3  ;;  %v3258_v58 = vadd.f32 %v3257_v17, %v3089_v10 }
 0x502   : > { %v3594_v40 = vadd.f32 %v3593_v2, %v3425_v46 }
 0x504   : > { %v3666_v8 = vmax.f32 %v3594_v40, 0.0 }
 0x505   : > { %v3879_v29 = vpop.f32.mrf.mxu0 }
 0x506   : > { %v5877_v14 = vpack.c.bf16 %v3879_v29, %v3877_v49  ;;  %v3426_v38 = vpop.f32.mrf.mxu2 }
 0x507   : > { %v3427_v23 = vadd.f32 %v3426_v38, %v3258_v58 }
 0x508   : > { %5953 = vst [vmem:[%s7135_s11 + $0xa0] sm:$0xff] %v5877_v14   ;;  %v3260_v7 = vpop.f32.mrf.mxu1 }
 0x509   : > { %v3595_v57 = vpop.f32.mrf.mxu3  ;;  %v3261_v5 = vadd.f32 %v3260_v7, %v7031_v43 }
 0x50a   : > { %v3596_v32 = vadd.f32 %v3595_v57, %v3427_v23 }
 0x50c   : > { %v3667_v63 = vmax.f32 %v3596_v32, 0.0 }
 0x50d   : > { %v3882_v25 = vpop.f32.mrf.mxu0 }
 0x50e   : > { %v3701_v47 = vpack.c.bf16 %v3667_v63, %v3666_v8  ;;  %v3429_v37 = vpop.f32.mrf.mxu2 }
 0x50f   : > { %v3430_v16 = vadd.f32 %v3429_v37, %v3261_v5 }
 0x510   : > { %3921 = vmatmul.bf16.gmra.mxu0 %v3701_v47  ;;  %v3262_v13 = vpop.f32.mrf.mxu1 }
 0x511   : > { %v3598_v52 = vpop.f32.mrf.mxu3  ;;  %v3263_v42 = vadd.f32 %v3262_v13, %v3094_v54 }
 0x512   : > { %v3599_v56 = vadd.f32 %v3598_v52, %v3430_v16 }
 0x514   : > { %v3668_v19 = vmax.f32 %v3599_v56, 0.0 }
 0x515   : > { %v3884_v26 = vpop.f32.mrf.mxu0 }
 0x516   : > { %v5882_v31 = vpack.c.bf16 %v3884_v26, %v3882_v25  ;;  %v3431_v36 = vpop.f32.mrf.mxu2 }
 0x517   : > { %v3432_v61 = vadd.f32 %v3431_v36, %v3263_v42 }
 0x518   : > { %5954 = vst [vmem:[%s7135_s11 + $0xa8] sm:$0xff] %v5882_v31   ;;  %v3265_v51 = vpop.f32.mrf.mxu1 }
 0x519   : > { %v3600_v24 = vpop.f32.mrf.mxu3  ;;  %v3266_v50 = vadd.f32 %v3265_v51, %v7421_v11 }
 0x51a   : > { %v3601_v62 = vadd.f32 %v3600_v24, %v3432_v61 }
 0x51c   : > { %v3669_v33 = vmax.f32 %v3601_v62, 0.0 }
 0x51d   : > { %v3887_v30 = vpop.f32.mrf.mxu0 }
 0x51e   : > { %v3702_v12 = vpack.c.bf16 %v3669_v33, %v3668_v19  ;;  %v3434_v43 = vpop.f32.mrf.mxu2 }
 0x51f   : > { %v3435_v53 = vadd.f32 %v3434_v43, %v3266_v50 }
 0x520   : > { %3926 = vmatmul.bf16.gmra.mxu0 %v3702_v12  ;;  %v3267_v41 = vpop.f32.mrf.mxu1 }
 0x521   : > { %v3603_v27 = vpop.f32.mrf.mxu3  ;;  %v3268_v35 = vadd.f32 %v3267_v41, %v3099_v20 }
 0x522   : > { %v3604_v9 = vadd.f32 %v3603_v27, %v3435_v53 }
 0x524   : > { %v3670_v44 = vmax.f32 %v3604_v9, 0.0 }
 0x525   : > { %v3889_v59 = vpop.f32.mrf.mxu0 }
 0x526   : > { %v5887_v55 = vpack.c.bf16 %v3889_v59, %v3887_v30  ;;  %v3436_v60 = vpop.f32.mrf.mxu2 }
 0x527   : > { %v3437_v15 = vadd.f32 %v3436_v60, %v3268_v35 }
 0x528   : > { %5955 = vst [vmem:[%s7135_s11 + $0xb0] sm:$0xff] %v5887_v55  }
 0x529   : > { %v3605_v34 = vpop.f32.mrf.mxu3 }
 0x52a   : > { %v3606_v1 = vadd.f32 %v3605_v34, %v3437_v15 }
 0x52c   : > { %v3671_v22 = vmax.f32 %v3606_v1, 0.0 }
 0x52d   : > { %v3892_v45 = vpop.f32.mrf.mxu0 }
 0x52e   : > { %v3703_v49 = vpack.c.bf16 %v3671_v22, %v3670_v44 }
 0x530   : > { %3931 = vmatmul.bf16.gmra.mxu0 %v3703_v49 }
 0x535   : > { %v3894_v28 = vpop.f32.mrf.mxu0 }
 0x536   : > { %v5892_v18 = vpack.c.bf16 %v3894_v28, %v3892_v45 }
 0x538   : > { %5956 = vst [vmem:[%s7135_s11 + $0xb8] sm:$0xff] %v5892_v18  }
 0x53d   : > { %v3897_v39 = vpop.f32.mrf.mxu0 }
 0x545   : > { %v3899_v2 = vpop.f32.mrf.mxu0 }
 0x546   : > { %v5897_v17 = vpack.c.bf16 %v3899_v2, %v3897_v39 }
 0x548   : > { %5957 = vst [vmem:[%s7135_s11 + $0xc0] sm:$0xff] %v5897_v17  }
 0x54d   : > { %v3902_v6 = vpop.f32.mrf.mxu0 }
 0x555   : > { %v3904_v21 = vpop.f32.mrf.mxu0 }
 0x556   : > { %v5902_v3 = vpack.c.bf16 %v3904_v21, %v3902_v6 }
 0x558   : > { %5958 = vst [vmem:[%s7135_s11 + $0xc8] sm:$0xff] %v5902_v3  }
 0x55d   : > { %v3907_v0 = vpop.f32.mrf.mxu0 }
 0x565   : > { %v3909_v10 = vpop.f32.mrf.mxu0 }
 0x566   : > { %v5907_v46 = vpack.c.bf16 %v3909_v10, %v3907_v0 }
 0x568   : > { %5959 = vst [vmem:[%s7135_s11 + $0xd0] sm:$0xff] %v5907_v46  }
 0x56d   : > { %v3912_v29 = vpop.f32.mrf.mxu0 }
 0x575   : > { %v3914_v58 = vpop.f32.mrf.mxu0 }
 0x576   : > { %v5912_v14 = vpack.c.bf16 %v3914_v58, %v3912_v29 }
 0x578   : > { %5960 = vst [vmem:[%s7135_s11 + $0xd8] sm:$0xff] %v5912_v14  }
 0x57d   : > { %v3917_v38 = vpop.f32.mrf.mxu0 }
 0x585   : > { %v3919_v40 = vpop.f32.mrf.mxu0 }
 0x586   : > { %v5917_v23 = vpack.c.bf16 %v3919_v40, %v3917_v38 }
 0x588   : > { %5961 = vst [vmem:[%s7135_s11 + $0xe0] sm:$0xff] %v5917_v23  }
 0x58d   : > { %v3922_v57 = vpop.f32.mrf.mxu0 }
 0x595   : > { %v3924_v7 = vpop.f32.mrf.mxu0 }
 0x596   : > { %v5922_v32 = vpack.c.bf16 %v3924_v7, %v3922_v57 }
 0x598   : > { %5962 = vst [vmem:[%s7135_s11 + $0xe8] sm:$0xff] %v5922_v32  }
 0x59d   : > { %v3927_v8 = vpop.f32.mrf.mxu0 }
 0x5a5   : > { %v3929_v63 = vpop.f32.mrf.mxu0 }
 0x5a6   : > { %v5927_v25 = vpack.c.bf16 %v3929_v63, %v3927_v8 }
 0x5a8   : > { %5963 = vst [vmem:[%s7135_s11 + $0xf0] sm:$0xff] %v5927_v25  }
 0x5ad   : > { %v3932_v47 = vpop.f32.mrf.mxu0 }
 0x5b5   : > { %v3934_v37 = vpop.f32.mrf.mxu0 }
 0x5b6   : > { %v5932_v52 = vpack.c.bf16 %v3934_v37, %v3932_v47 }
 0x5b8   : > { %5964 = vst [vmem:[%s7135_s11 + $0xf8] sm:$0xff] %v5932_v52  }
 0x5b9 PF: > { %s14_s15 = sadd.s32 1, %s6006_s15  }
 0x5ba   : > { %p11_p4 = scmp.ge.s32.totalorder %s14_s15, 4  }
 0x5bc   :  { %13 = sbr.rel (!%p11_p4) target bundleno = 1 (0x1), region = 66 }

// kernel: gcn_encoder.5
= control target key start
LH: loop header
LB: loop body
LE: loop exit
PB: predicated region body
PF: predicated region fallthrough
CT: control target
= control target key end

     0   :  { %s5353_s12 = smov 0   ;;  %s6413_s0 = inlined_call_operand.vmem [shape: bf16[1024,1024], index: 0, kind: input, shape index: {}]   ;;  %s6414_s1 = inlined_call_operand.vmem [shape: bf16[1024,128], index: 1, kind: input, shape index: {}]   ;;  %s6415_s2 = inlined_call_operand.vmem [shape: f32[1,128], index: 2, kind: input, shape index: {}]   ;;  %s6416_s3 = inlined_call_operand.vmem [shape: f32[1024,128], index: 3, kind: output, shape index: {}]  }
   0x1 LB: > { %s3701_s13 = sadd.s32 4294967295, %s5331_s12   ;;  %p3705_p0 = scmp.ge.s32.totalorder %s5331_s12, 1  ;;  %s5331_s12 = sphi %s5353_s12, %s13_s12  }
   0x2   : > { %p139_p1 = scmp.lt.s32.totalorder %s5331_s12, 3 }
   0x4   : > { %p140_p2 = pnand %p3705_p0, %p139_p1 }
   0x6   : > { %143 = sbr.rel (%p140_p2) target bundleno = 1198 (0x4ae), region = 32 }
   0xb   : > { %v5257_v0 = vld [vmem:[%s6414_s1 + $0x38] sm:$0xff]  ;;  %v5256_v4 = vld [vmem:[%s6414_s1 + $0x30] sm:$0xff]  ;;  %v5255_v8 = vld [vmem:[%s6414_s1 + $0x28] sm:$0xff]  ;;  %s3706_s11 = sshll.u32 %s3701_s13, 6 }
   0xc   : > { %v5265_v1 = vld [vmem:[%s6414_s1 + $0x78] sm:$0xff]  ;;  %2229 = vmatpush.bf16.msra.mxu0 %v5257_v0  ;;  %v5264_v5 = vld [vmem:[%s6414_s1 + $0x70] sm:$0xff]  ;;  %v5263_v9 = vld [vmem:[%s6414_s1 + $0x68] sm:$0xff]  ;;  %p165_p3 = scmp.lt.s32.totalorder %s3706_s11, 127 }
   0xd   : > { %v5273_v2 = vld [vmem:[%s6414_s1 + $0xb8] sm:$0xff]  ;;  %2398 = vmatpush.bf16.msra.mxu1 %v5265_v1  ;;  %v5272_v6 = vld [vmem:[%s6414_s1 + $0xb0] sm:$0xff]  ;;  %v5271_v10 = vld [vmem:[%s6414_s1 + $0xa8] sm:$0xff] }
   0xe   : > { %v5281_v3 = vld [vmem:[%s6414_s1 + $0xf8] sm:$0xff]  ;;  %2567 = vmatpush.bf16.msra.mxu2 %v5273_v2  ;;  %v5280_v7 = vld [vmem:[%s6414_s1 + $0xf0] sm:$0xff]  ;;  %v5279_v11 = vld [vmem:[%s6414_s1 + $0xe8] sm:$0xff]  ;;  %s6460_s11 = smov (!%p165_p3, %s3706_s11), 127 }
   0xf   : > { %2736 = vmatpush.bf16.msra.mxu3 %v5281_v3  ;;  %v5254_v12 = vld [vmem:[%s6414_s1 + $0x20] sm:$0xff]  ;;  %v5253_v16 = vld [vmem:[%s6414_s1 + $0x18] sm:$0xff]  ;;  %v5252_v20 = vld [vmem:[%s6414_s1 + $0x10] sm:$0xff]  ;;  %s4993_s10 = sshll.u32 %s6460_s11, 5  ;;  %s3710_s30 = sshll.u32 %s6460_s11, 3 }
  0x10   : > { %2230 = vmatpush.bf16.msra.mxu0 %v5256_v4  ;;  %v5262_v13 = vld [vmem:[%s6414_s1 + $0x60] sm:$0xff]  ;;  %v5261_v17 = vld [vmem:[%s6414_s1 + $0x58] sm:$0xff]  ;;  %v5260_v21 = vld [vmem:[%s6414_s1 + $0x50] sm:$0xff]  ;;  %s5445_s20 = scalar_lea.vmem %s6413_s0, %s4993_s10  ;;  %s6097_s6 = scalar_lea.vmem %s6416_s3, %s3710_s30 }
  0x11   : > { %2399 = vmatpush.bf16.msra.mxu1 %v5264_v5  ;;  %v5270_v14 = vld [vmem:[%s6414_s1 + $0xa0] sm:$0xff]  ;;  %v5269_v18 = vld [vmem:[%s6414_s1 + $0x98] sm:$0xff]  ;;  %v5268_v22 = vld [vmem:[%s6414_s1 + $0x90] sm:$0xff] }
  0x12   : > { %2568 = vmatpush.bf16.msra.mxu2 %v5272_v6  ;;  %v5278_v15 = vld [vmem:[%s6414_s1 + $0xe0] sm:$0xff]  ;;  %v5277_v19 = vld [vmem:[%s6414_s1 + $0xd8] sm:$0xff]  ;;  %v5276_v23 = vld [vmem:[%s6414_s1 + $0xd0] sm:$0xff] }
  0x13   : > { %2737 = vmatpush.bf16.msra.mxu3 %v5280_v7  ;;  %v5251_v24 = vld [vmem:[%s6414_s1 + $0x8] sm:$0xff]  ;;  %v5250_v28 = vld [vmem:[%s6414_s1] sm:$0xff]  ;;  %v5305_v40 = vld [vmem:[%s6414_s1 + $0x1b8] sm:$0xff] }
  0x14   : > { %2231 = vmatpush.bf16.msra.mxu0 %v5255_v8  ;;  %v5259_v25 = vld [vmem:[%s6414_s1 + $0x48] sm:$0xff]  ;;  %v5258_v29 = vld [vmem:[%s6414_s1 + $0x40] sm:$0xff]  ;;  %v5289_v41 = vld [vmem:[%s6414_s1 + $0x138] sm:$0xff] }
  0x15   : > { %2400 = vmatpush.bf16.msra.mxu1 %v5263_v9  ;;  %v5267_v26 = vld [vmem:[%s6414_s1 + $0x88] sm:$0xff]  ;;  %v5266_v30 = vld [vmem:[%s6414_s1 + $0x80] sm:$0xff]  ;;  %v5313_v46 = vld [vmem:[%s6414_s1 + $0x1f8] sm:$0xff] }
  0x16   : > { %2569 = vmatpush.bf16.msra.mxu2 %v5271_v10  ;;  %v5275_v27 = vld [vmem:[%s6414_s1 + $0xc8] sm:$0xff]  ;;  %v5274_v31 = vld [vmem:[%s6414_s1 + $0xc0] sm:$0xff]  ;;  %v5297_v47 = vld [vmem:[%s6414_s1 + $0x178] sm:$0xff] }
  0x17   : > { %2738 = vmatpush.bf16.msra.mxu3 %v5279_v11  ;;  %v3713_v32 = vld [vmem:[%s5445_s20] sm:$0xf]  ;;  %v4994_v34 = vld [vmem:[%s5445_s20 + $0x4] sm:$0xf]  ;;  %v3721_v36 = vld [vmem:[%s5445_s20 + $0x8] sm:$0xf] }
  0x18   : > { %2232 = vmatpush.bf16.msra.mxu0 %v5254_v12  ;;  %v4998_v33 = vld [vmem:[%s5445_s20 + $0x1c] sm:$0xf0]  ;;  %v3715_v35 = vld [vmem:[%s5445_s20 + $0x20] sm:$0xf0]  ;;  %v4999_v37 = vld [vmem:[%s5445_s20 + $0x24] sm:$0xf0] }
  0x19   : > { %2401 = vmatpush.bf16.msra.mxu1 %v5262_v13  ;;  %v4995_v38 = vld [vmem:[%s5445_s20 + $0xc] sm:$0xf]  ;;  %v3714_v42 = vor.u32 %v4998_v33, %v3713_v32  ;;  %v3718_v43 = vor.u32 %v4994_v34, %v3715_v35  ;;  %v3722_v44 = vor.u32 %v4999_v37, %v3721_v36  ;;  %v3745_v48 = vld [vmem:[%s5445_s20 + $0x40] sm:$0xf]  ;;  %v5002_v50 = vld [vmem:[%s5445_s20 + $0x44] sm:$0xf] }
  0x1a   : > { %2570 = vmatpush.bf16.msra.mxu2 %v5270_v14  ;;  %v3723_v39 = vld [vmem:[%s5445_s20 + $0x28] sm:$0xf0]  ;;  %v5006_v49 = vld [vmem:[%s5445_s20 + $0x5c] sm:$0xf0]  ;;  %v3747_v51 = vld [vmem:[%s5445_s20 + $0x60] sm:$0xf0] }
  0x1b   : > { %2739 = vmatpush.bf16.msra.mxu3 %v5278_v15  ;;  %v3726_v45 = vor.u32 %v4995_v38, %v3723_v39  ;;  %v3753_v52 = vld [vmem:[%s5445_s20 + $0x48] sm:$0xf]  ;;  %v5003_v54 = vld [vmem:[%s5445_s20 + $0x4c] sm:$0xf]  ;;  %v3746_v56 = vor.u32 %v5006_v49, %v3745_v48  ;;  %v3750_v57 = vor.u32 %v5002_v50, %v3747_v51  ;;  %v3777_v60 = vld [vmem:[%s5445_s20 + $0x80] sm:$0xf] }
  0x1c   : > { %2233 = vmatpush.bf16.msra.mxu0 %v5253_v16  ;;  %v5007_v53 = vld [vmem:[%s5445_s20 + $0x64] sm:$0xf0]  ;;  %v3755_v55 = vld [vmem:[%s5445_s20 + $0x68] sm:$0xf0]  ;;  %v5014_v61 = vld [vmem:[%s5445_s20 + $0x9c] sm:$0xf0] }
  0x1d   : > { %2402 = vmatpush.bf16.msra.mxu1 %v5261_v17  ;;  %v3754_v58 = vor.u32 %v5007_v53, %v3753_v52  ;;  %v3758_v59 = vor.u32 %v5003_v54, %v3755_v55  ;;  %v5010_v62 = vld [vmem:[%s5445_s20 + $0x84] sm:$0xf]  ;;  %v3785_v0 = vld [vmem:[%s5445_s20 + $0x88] sm:$0xf]  ;;  %v5011_v2 = vld [vmem:[%s5445_s20 + $0x8c] sm:$0xf]  ;;  %v3778_v4 = vor.u32 %v5014_v61, %v3777_v60 }
  0x1e   : > { %2571 = vmatpush.bf16.msra.mxu2 %v5269_v18  ;;  %v3779_v63 = vld [vmem:[%s5445_s20 + $0xa0] sm:$0xf0]  ;;  %v5015_v1 = vld [vmem:[%s5445_s20 + $0xa4] sm:$0xf0]  ;;  %v3787_v3 = vld [vmem:[%s5445_s20 + $0xa8] sm:$0xf0] }
  0x1f   : > { %2740 = vmatpush.bf16.msra.mxu3 %v5277_v19  ;;  %v3782_v5 = vor.u32 %v5010_v62, %v3779_v63  ;;  %v3786_v6 = vor.u32 %v5015_v1, %v3785_v0  ;;  %v3790_v7 = vor.u32 %v5011_v2, %v3787_v3  ;;  %v5304_v8 = vld [vmem:[%s6414_s1 + $0x1b0] sm:$0xff]  ;;  %v3809_v12 = vld [vmem:[%s5445_s20 + $0xc0] sm:$0xf]  ;;  %v5018_v14 = vld [vmem:[%s5445_s20 + $0xc4] sm:$0xf] }
  0x20   : > { %2234 = vmatpush.bf16.msra.mxu0 %v5252_v20  ;;  %v5288_v9 = vld [vmem:[%s6414_s1 + $0x130] sm:$0xff]  ;;  %v5022_v13 = vld [vmem:[%s5445_s20 + $0xdc] sm:$0xf0]  ;;  %v3811_v15 = vld [vmem:[%s5445_s20 + $0xe0] sm:$0xf0] }
  0x21   : > { %2403 = vmatpush.bf16.msra.mxu1 %v5260_v21  ;;  %v5312_v10 = vld [vmem:[%s6414_s1 + $0x1f0] sm:$0xff]  ;;  %v3817_v16 = vld [vmem:[%s5445_s20 + $0xc8] sm:$0xf]  ;;  %v5019_v18 = vld [vmem:[%s5445_s20 + $0xcc] sm:$0xf]  ;;  %v3810_v20 = vor.u32 %v5022_v13, %v3809_v12  ;;  %v3814_v21 = vor.u32 %v5018_v14, %v3811_v15 }
  0x22   : > { %2572 = vmatpush.bf16.msra.mxu2 %v5268_v22  ;;  %v5296_v11 = vld [vmem:[%s6414_s1 + $0x170] sm:$0xff]  ;;  %v5023_v17 = vld [vmem:[%s5445_s20 + $0xe4] sm:$0xf0]  ;;  %v3819_v19 = vld [vmem:[%s5445_s20 + $0xe8] sm:$0xf0] }
  0x23   : > { %2741 = vmatpush.bf16.msra.mxu3 %v5276_v23  ;;  %v3818_v22 = vor.u32 %v5023_v17, %v3817_v16  ;;  %v3822_v23 = vor.u32 %v5019_v18, %v3819_v19  ;;  %v3873_v36 = vld [vmem:[%s5445_s20 + $0x140] sm:$0xf]  ;;  %v5034_v38 = vld [vmem:[%s5445_s20 + $0x144] sm:$0xf]  ;;  %v3913_v52 = vld [vmem:[%s5445_s20 + $0x188] sm:$0xf] }
  0x24   : > { %2235 = vmatpush.bf16.msra.mxu0 %v5251_v24  ;;  %v3841_v24 = vld [vmem:[%s5445_s20 + $0x100] sm:$0xf]  ;;  %v3875_v39 = vld [vmem:[%s5445_s20 + $0x160] sm:$0xf0]  ;;  %v5047_v53 = vld [vmem:[%s5445_s20 + $0x1a4] sm:$0xf0] }
  0x25   : > { %2404 = vmatpush.bf16.msra.mxu1 %v5259_v25  ;;  %v5030_v25 = vld [vmem:[%s5445_s20 + $0x11c] sm:$0xf0]  ;;  %v5042_v50 = vld [vmem:[%s5445_s20 + $0x184] sm:$0xf]  ;;  %v5043_v54 = vld [vmem:[%s5445_s20 + $0x18c] sm:$0xf] }
  0x26   : > { %2573 = vmatpush.bf16.msra.mxu2 %v5267_v26  ;;  %v5026_v26 = vld [vmem:[%s5445_s20 + $0x104] sm:$0xf]  ;;  %v3842_v32 = vor.u32 %v5030_v25, %v3841_v24  ;;  %v5038_v37 = vld [vmem:[%s5445_s20 + $0x15c] sm:$0xf0]  ;;  %v3915_v55 = vld [vmem:[%s5445_s20 + $0x1a8] sm:$0xf0] }
  0x27   : > { %2742 = vmatpush.bf16.msra.mxu3 %v5275_v27  ;;  %v3843_v27 = vld [vmem:[%s5445_s20 + $0x120] sm:$0xf0]  ;;  %v3905_v48 = vld [vmem:[%s5445_s20 + $0x180] sm:$0xf]  ;;  %v5303_v60 = vld [vmem:[%s6414_s1 + $0x1a8] sm:$0xff] }
  0x28   : > { %2236 = vmatpush.bf16.msra.mxu0 %v5250_v28  ;;  %v3849_v28 = vld [vmem:[%s5445_s20 + $0x108] sm:$0xf]  ;;  %v3846_v33 = vor.u32 %v5026_v26, %v3843_v27  ;;  %v5046_v49 = vld [vmem:[%s5445_s20 + $0x19c] sm:$0xf0]  ;;  %v3907_v51 = vld [vmem:[%s5445_s20 + $0x1a0] sm:$0xf0] }
  0x29   : > { %2405 = vmatpush.bf16.msra.mxu1 %v5258_v29  ;;  %v5031_v29 = vld [vmem:[%s5445_s20 + $0x124] sm:$0xf0]  ;;  %v3937_v0 = vld [vmem:[%s5445_s20 + $0x1c0] sm:$0xf]  ;;  %v5050_v2 = vld [vmem:[%s5445_s20 + $0x1c4] sm:$0xf] }
  0x2a   : > { %2574 = vmatpush.bf16.msra.mxu2 %v5266_v30  ;;  %v5027_v30 = vld [vmem:[%s5445_s20 + $0x10c] sm:$0xf]  ;;  %v3850_v34 = vor.u32 %v5031_v29, %v3849_v28  ;;  %v5054_v1 = vld [vmem:[%s5445_s20 + $0x1dc] sm:$0xf0]  ;;  %v3939_v3 = vld [vmem:[%s5445_s20 + $0x1e0] sm:$0xf0] }
  0x2b   : > { %2743 = vmatpush.bf16.msra.mxu3 %v5274_v31  ;;  %2237 = vmatmul.bf16.vlgmr.msra.gmra.mxu0 %v3714_v42  ;;  %v3851_v31 = vld [vmem:[%s5445_s20 + $0x128] sm:$0xf0]  ;;  %v5568_v12 = vld [vmem:[%s6415_s2] ss:$0 sm:$0xff]  ;;  %v5058_v15 = vld [vmem:[%s5445_s20 + $0x204] sm:$0xf] }
  0x2c   : > { %2905 = vmatpush.bf16.msrb.mxu0 %v5289_v41  ;;  %2406 = vmatmul.bf16.vlgmr.msra.gmra.mxu1 %v3718_v43  ;;  %v3854_v35 = vor.u32 %v5027_v30, %v3851_v31  ;;  %v5039_v41 = vld [vmem:[%s5445_s20 + $0x164] sm:$0xf0]  ;;  %v5035_v42 = vld [vmem:[%s5445_s20 + $0x14c] sm:$0xf]  ;;  %v3969_v13 = vld [vmem:[%s5445_s20 + $0x200] sm:$0xf] }
  0x2d   : > { %2575 = vmatmul.bf16.vlgmr.msra.gmra.mxu2 %v3722_v44  ;;  %3074 = vmatpush.bf16.msrb.mxu1 %v5297_v47  ;;  %v3883_v43 = vld [vmem:[%s5445_s20 + $0x168] sm:$0xf0]  ;;  %v3874_v44 = vor.u32 %v5038_v37, %v3873_v36  ;;  %v5062_v14 = vld [vmem:[%s5445_s20 + $0x21c] sm:$0xf0]  ;;  %v3971_v16 = vld [vmem:[%s5445_s20 + $0x220] sm:$0xf0] }
  0x2e   : > { %3243 = vmatpush.bf16.msrb.mxu2 %v5305_v40  ;;  %2744 = vmatmul.bf16.vlgmr.msra.gmra.mxu3 %v3726_v45  ;;  %v3881_v40 = vld [vmem:[%s5445_s20 + $0x148] sm:$0xf]  ;;  %v3878_v45 = vor.u32 %v5034_v38, %v3875_v39  ;;  %v3886_v47 = vor.u32 %v5035_v42, %v3883_v43  ;;  %v5059_v19 = vld [vmem:[%s5445_s20 + $0x20c] sm:$0xf]  ;;  %v4001_v37 = vld [vmem:[%s5445_s20 + $0x240] sm:$0xf] }
  0x2f   : > { %3412 = vmatpush.bf16.msrb.mxu3 %v5313_v46  ;;  %v3882_v46 = vor.u32 %v5039_v41, %v3881_v40  ;;  %v5287_v61 = vld [vmem:[%s6414_s1 + $0x128] sm:$0xff]  ;;  %v5070_v38 = vld [vmem:[%s5445_s20 + $0x25c] sm:$0xf0]  ;;  %v5066_v39 = vld [vmem:[%s5445_s20 + $0x244] sm:$0xf] }
  0x30   : > { %2906 = vmatpush.bf16.msrb.mxu0 %v5288_v9  ;;  %v5311_v62 = vld [vmem:[%s6414_s1 + $0x1e8] sm:$0xff]  ;;  %v3942_v9 = vor.u32 %v5050_v2, %v3939_v3  ;;  %v4003_v40 = vld [vmem:[%s5445_s20 + $0x260] sm:$0xf0]  ;;  %v5078_v2 = vld [vmem:[%s5445_s20 + $0x29c] sm:$0xf0] }
  0x31   : > { %3075 = vmatpush.bf16.msrb.mxu1 %v5296_v11  ;;  %v5295_v63 = vld [vmem:[%s6414_s1 + $0x168] sm:$0xff]  ;;  %v5074_v3 = vld [vmem:[%s5445_s20 + $0x284] sm:$0xf] }
  0x32   : > { %3244 = vmatpush.bf16.msrb.mxu2 %v5304_v8  ;;  %v3938_v8 = vor.u32 %v5054_v1, %v3937_v0  ;;  %v3977_v17 = vld [vmem:[%s5445_s20 + $0x208] sm:$0xf]  ;;  %v5067_v43 = vld [vmem:[%s5445_s20 + $0x24c] sm:$0xf]  ;;  %v4033_v1 = vld [vmem:[%s5445_s20 + $0x280] sm:$0xf] }
  0x33   : > { %3413 = vmatpush.bf16.msrb.mxu3 %v5312_v10  ;;  %v5063_v18 = vld [vmem:[%s5445_s20 + $0x224] sm:$0xf0] }
  0x34   : > { %2907 = vmatpush.bf16.msrb.mxu0 %v5287_v61  ;;  %v3978_v25 = vor.u32 %v5063_v18, %v3977_v17  ;;  %v4009_v41 = vld [vmem:[%s5445_s20 + $0x248] sm:$0xf] }
  0x35   : > { %3076 = vmatpush.bf16.msrb.mxu1 %v5295_v63  ;;  %v5071_v42 = vld [vmem:[%s5445_s20 + $0x264] sm:$0xf0] }
  0x36   : > { %3245 = vmatpush.bf16.msrb.mxu2 %v5303_v60 }
  0x37   : > { %3414 = vmatpush.bf16.msrb.mxu3 %v5311_v62 }
  0x3b   : > { %2242 = vmatmul.bf16.gmra.mxu0 %v3746_v56  ;;  %v3906_v56 = vor.u32 %v5046_v49, %v3905_v48  ;;  %v4006_v48 = vor.u32 %v5066_v39, %v4003_v40  ;;  %v4073_v39 = vld [vmem:[%s5445_s20 + $0x2c8] sm:$0xf] }
  0x3c   : > { %2411 = vmatmul.bf16.gmra.mxu1 %v3750_v57  ;;  %v3910_v57 = vor.u32 %v5042_v50, %v3907_v51  ;;  %v5087_v40 = vld [vmem:[%s5445_s20 + $0x2e4] sm:$0xf0] }
  0x3d   : > { %2580 = vmatmul.bf16.gmra.mxu2 %v3754_v58  ;;  %v3914_v58 = vor.u32 %v5047_v53, %v3913_v52  ;;  %v4010_v52 = vor.u32 %v5071_v42, %v4009_v41  ;;  %v5083_v41 = vld [vmem:[%s5445_s20 + $0x2cc] sm:$0xf] }
  0x3e   : > { %2749 = vmatmul.bf16.gmra.mxu3 %v3758_v59  ;;  %v3918_v59 = vor.u32 %v5043_v54, %v3915_v55  ;;  %v4075_v42 = vld [vmem:[%s5445_s20 + $0x2e8] sm:$0xf0] }
  0x4b   : > { %2247 = vmatmul.bf16.gmra.mxu0 %v3778_v4  ;;  %v3945_v4 = vld [vmem:[%s5445_s20 + $0x1c8] sm:$0xf] }
  0x4c   : > { %2416 = vmatmul.bf16.gmra.mxu1 %v3782_v5  ;;  %v5055_v5 = vld [vmem:[%s5445_s20 + $0x1e4] sm:$0xf0] }
  0x4d   : > { %2585 = vmatmul.bf16.gmra.mxu2 %v3786_v6  ;;  %v5051_v6 = vld [vmem:[%s5445_s20 + $0x1cc] sm:$0xf]  ;;  %v3946_v10 = vor.u32 %v5055_v5, %v3945_v4  ;;  %v4035_v4 = vld [vmem:[%s5445_s20 + $0x2a0] sm:$0xf0]  ;;  %v4041_v5 = vld [vmem:[%s5445_s20 + $0x288] sm:$0xf] }
  0x4e   : > { %2754 = vmatmul.bf16.gmra.mxu3 %v3790_v7  ;;  %v3947_v7 = vld [vmem:[%s5445_s20 + $0x1e8] sm:$0xf0] }
  0x4f   : > { %v3950_v11 = vor.u32 %v5051_v6, %v3947_v7  ;;  %v5079_v6 = vld [vmem:[%s5445_s20 + $0x2a4] sm:$0xf0]  ;;  %v5075_v7 = vld [vmem:[%s5445_s20 + $0x28c] sm:$0xf] }
  0x50   : > { %v4042_v17 = vor.u32 %v5079_v6, %v4041_v5  ;;  %v4105_v5 = vld [vmem:[%s5445_s20 + $0x308] sm:$0xf] }
  0x51   : > { %v5095_v6 = vld [vmem:[%s5445_s20 + $0x324] sm:$0xf0] }
  0x5b   : > { %2252 = vmatmul.bf16.gmra.mxu0 %v3810_v20  ;;  %v3979_v20 = vld [vmem:[%s5445_s20 + $0x228] sm:$0xf0] }
  0x5c   : > { %2421 = vmatmul.bf16.gmra.mxu1 %v3814_v21  ;;  %v3970_v21 = vor.u32 %v5062_v14, %v3969_v13  ;;  %v3982_v26 = vor.u32 %v5059_v19, %v3979_v20  ;;  %v4038_v13 = vor.u32 %v5074_v3, %v4035_v4  ;;  %v5090_v3 = vld [vmem:[%s5445_s20 + $0x304] sm:$0xf] }
  0x5d   : > { %2590 = vmatmul.bf16.gmra.mxu2 %v3818_v22  ;;  %v3974_v22 = vor.u32 %v5058_v15, %v3971_v16  ;;  %v4099_v4 = vld [vmem:[%s5445_s20 + $0x320] sm:$0xf0] }
  0x5e   : > { %2759 = vmatmul.bf16.gmra.mxu3 %v3822_v23 }
  0x6b   : > { %2257 = vmatmul.bf16.gmra.mxu0 %v3842_v32 }
  0x6c   : > { %2426 = vmatmul.bf16.gmra.mxu1 %v3846_v33 }
  0x6d   : > { %2595 = vmatmul.bf16.gmra.mxu2 %v3850_v34 }
  0x6e   : > { %2764 = vmatmul.bf16.gmra.mxu3 %v3854_v35 }
  0x7b   : > { %2262 = vmatmul.bf16.gmra.mxu0 %v3874_v44  ;;  %v4011_v44 = vld [vmem:[%s5445_s20 + $0x268] sm:$0xf0] }
  0x7c   : > { %2431 = vmatmul.bf16.gmra.mxu1 %v3878_v45  ;;  %v4014_v53 = vor.u32 %v5067_v43, %v4011_v44 }
  0x7d   : > { %2600 = vmatmul.bf16.gmra.mxu2 %v3882_v46 }
  0x7e   : > { %2769 = vmatmul.bf16.gmra.mxu3 %v3886_v47  ;;  %v4002_v47 = vor.u32 %v5070_v38, %v4001_v37  ;;  %v5082_v37 = vld [vmem:[%s5445_s20 + $0x2c4] sm:$0xf] }
  0x7f   : > { %v4067_v38 = vld [vmem:[%s5445_s20 + $0x2e0] sm:$0xf0] }
  0x8b   : > { %2267 = vmatmul.bf16.gmra.mxu0 %v3906_v56 }
  0x8c   : > { %2436 = vmatmul.bf16.gmra.mxu1 %v3910_v57 }
  0x8d   : > { %2605 = vmatmul.bf16.gmra.mxu2 %v3914_v58 }
  0x8e   : > { %2774 = vmatmul.bf16.gmra.mxu3 %v3918_v59 }
  0x9b   : > { %2272 = vmatmul.bf16.gmra.mxu0 %v3938_v8  ;;  %v4043_v8 = vld [vmem:[%s5445_s20 + $0x2a8] sm:$0xf0] }
  0x9c   : > { %2441 = vmatmul.bf16.gmra.mxu1 %v3942_v9  ;;  %v4046_v18 = vor.u32 %v5075_v7, %v4043_v8  ;;  %v5091_v7 = vld [vmem:[%s5445_s20 + $0x30c] sm:$0xf] }
  0x9d   : > { %2610 = vmatmul.bf16.gmra.mxu2 %v3946_v10  ;;  %v4107_v8 = vld [vmem:[%s5445_s20 + $0x328] sm:$0xf0] }
  0x9e   : > { %2779 = vmatmul.bf16.gmra.mxu3 %v3950_v11  ;;  %v4034_v11 = vor.u32 %v5078_v2, %v4033_v1  ;;  %v4097_v1 = vld [vmem:[%s5445_s20 + $0x300] sm:$0xf] }
  0x9f   : > { %v5094_v2 = vld [vmem:[%s5445_s20 + $0x31c] sm:$0xf0] }
  0xa8   : > { %v2238_v23 = vpop.f32.mrf.mxu0 }
  0xa9   : > { %v2407_v24 = vpop.f32.mrf.mxu1  ;;  %v2239_v27 = vadd.f32 %v5568_v12, %v2238_v23  ;;  %v5286_v23 = vld [vmem:[%s6414_s1 + $0x120] sm:$0xff] }
  0xaa   : > { %2908 = vmatpush.bf16.msrb.mxu0 %v5286_v23 }
  0xab   : > { %v2408_v28 = vadd.f32 %v2407_v24, %v2239_v27  ;;  %2277 = vmatmul.bf16.gmra.mxu0 %v3970_v21  ;;  %v5310_v24 = vld [vmem:[%s6414_s1 + $0x1e0] sm:$0xff] }
  0xac   : > { %2446 = vmatmul.bf16.gmra.mxu1 %v3974_v22  ;;  %v5302_v22 = vld [vmem:[%s6414_s1 + $0x1a0] sm:$0xff]  ;;  %3415 = vmatpush.bf16.msrb.mxu3 %v5310_v24 }
  0xad   : > { %2615 = vmatmul.bf16.gmra.mxu2 %v3978_v25 }
  0xae   : > { %2784 = vmatmul.bf16.gmra.mxu3 %v3982_v26  ;;  %3246 = vmatpush.bf16.msrb.mxu2 %v5302_v22 }
  0xb0   : > { %v2576_v29 = vpop.f32.mrf.mxu2  ;;  %v2240_v32 = vpop.f32.mrf.mxu0 }
  0xb1   : > { %v2745_v30 = vpop.f32.mrf.mxu3  ;;  %v2577_v31 = vadd.f32 %v2576_v29, %v2408_v28  ;;  %v2409_v33 = vpop.f32.mrf.mxu1  ;;  %v2241_v34 = vadd.f32 %v5568_v12, %v2240_v32  ;;  %v5294_v32 = vld [vmem:[%s6414_s1 + $0x160] sm:$0xff] }
  0xb2   : > { %3077 = vmatpush.bf16.msrb.mxu1 %v5294_v32  ;;  %v4129_v32 = vld [vmem:[%s5445_s20 + $0x340] sm:$0xf] }
  0xb3   : > { %v5580_v35 = vadd.f32 %v2745_v30, %v2577_v31  ;;  %v2410_v36 = vadd.f32 %v2409_v33, %v2241_v34  ;;  %v4065_v34 = vld [vmem:[%s5445_s20 + $0x2c0] sm:$0xf] }
  0xb8   : > { %v2578_v45 = vpop.f32.mrf.mxu2  ;;  %v2243_v50 = vpop.f32.mrf.mxu0 }
  0xb9   : > { %v2747_v46 = vpop.f32.mrf.mxu3  ;;  %v2579_v49 = vadd.f32 %v2578_v45, %v2410_v36  ;;  %v2412_v51 = vpop.f32.mrf.mxu1  ;;  %v2244_v54 = vadd.f32 %v5568_v12, %v2243_v50  ;;  %v5086_v36 = vld [vmem:[%s5445_s20 + $0x2dc] sm:$0xf0]  ;;  %v4074_v50 = vor.u32 %v5087_v40, %v4073_v39  ;;  %v5099_v39 = vld [vmem:[%s5445_s20 + $0x34c] sm:$0xf] }
  0xba   : > { %v4066_v45 = vor.u32 %v5086_v36, %v4065_v34  ;;  %v5098_v34 = vld [vmem:[%s5445_s20 + $0x344] sm:$0xf]  ;;  %v4139_v40 = vld [vmem:[%s5445_s20 + $0x368] sm:$0xf0] }
  0xbb   : > { %v5591_v55 = vadd.f32 %v2747_v46, %v2579_v49  ;;  %v2413_v56 = vadd.f32 %v2412_v51, %v2244_v54  ;;  %2282 = vmatmul.bf16.gmra.mxu0 %v4002_v47  ;;  %v4070_v46 = vor.u32 %v5082_v37, %v4067_v38  ;;  %v4078_v51 = vor.u32 %v5083_v41, %v4075_v42  ;;  %v4131_v36 = vld [vmem:[%s5445_s20 + $0x360] sm:$0xf0]  ;;  %v4137_v37 = vld [vmem:[%s5445_s20 + $0x348] sm:$0xf] }
  0xbc   : > { %2451 = vmatmul.bf16.gmra.mxu1 %v4006_v48  ;;  %v5103_v38 = vld [vmem:[%s5445_s20 + $0x364] sm:$0xf0] }
  0xbd   : > { %2620 = vmatmul.bf16.gmra.mxu2 %v4010_v52 }
  0xbe   : > { %2789 = vmatmul.bf16.gmra.mxu3 %v4014_v53 }
  0xc0   : > { %v2581_v57 = vpop.f32.mrf.mxu2  ;;  %v2245_v60 = vpop.f32.mrf.mxu0 }
  0xc1   : > { %v2750_v58 = vpop.f32.mrf.mxu3  ;;  %v2582_v59 = vadd.f32 %v2581_v57, %v2413_v56  ;;  %v2414_v61 = vpop.f32.mrf.mxu1  ;;  %v2246_v62 = vadd.f32 %v5568_v12, %v2245_v60 }
  0xc3   : > { %v5594_v63 = vadd.f32 %v2750_v58, %v2582_v59  ;;  %v2415_v0 = vadd.f32 %v2414_v61, %v2246_v62 }
  0xc8   : > { %v2583_v9 = vpop.f32.mrf.mxu2  ;;  %v2248_v15 = vpop.f32.mrf.mxu0 }
  0xc9   : > { %v2752_v10 = vpop.f32.mrf.mxu3  ;;  %v2584_v14 = vadd.f32 %v2583_v9, %v2415_v0  ;;  %v2417_v16 = vpop.f32.mrf.mxu1  ;;  %v2249_v19 = vadd.f32 %v5568_v12, %v2248_v15 }
  0xcb   : > { %v5605_v20 = vadd.f32 %v2752_v10, %v2584_v14  ;;  %v2418_v21 = vadd.f32 %v2417_v16, %v2249_v19  ;;  %2287 = vmatmul.bf16.gmra.mxu0 %v4034_v11  ;;  %v4098_v11 = vor.u32 %v5094_v2, %v4097_v1  ;;  %v4161_v1 = vld [vmem:[%s5445_s20 + $0x380] sm:$0xf] }
  0xcc   : > { %2456 = vmatmul.bf16.gmra.mxu1 %v4038_v13  ;;  %v4102_v13 = vor.u32 %v5090_v3, %v4099_v4  ;;  %v5110_v2 = vld [vmem:[%s5445_s20 + $0x39c] sm:$0xf0]  ;;  %v5106_v3 = vld [vmem:[%s5445_s20 + $0x384] sm:$0xf] }
  0xcd   : > { %2625 = vmatmul.bf16.gmra.mxu2 %v4042_v17  ;;  %v4106_v17 = vor.u32 %v5095_v6, %v4105_v5  ;;  %v4163_v4 = vld [vmem:[%s5445_s20 + $0x3a0] sm:$0xf0]  ;;  %v4169_v5 = vld [vmem:[%s5445_s20 + $0x388] sm:$0xf] }
  0xce   : > { %2794 = vmatmul.bf16.gmra.mxu3 %v4046_v18  ;;  %v4110_v18 = vor.u32 %v5091_v7, %v4107_v8  ;;  %v5111_v6 = vld [vmem:[%s5445_s20 + $0x3a4] sm:$0xf0]  ;;  %v5107_v7 = vld [vmem:[%s5445_s20 + $0x38c] sm:$0xf] }
  0xcf   : > { %v4171_v8 = vld [vmem:[%s5445_s20 + $0x3a8] sm:$0xf0] }
  0xd0   : > { %v2586_v25 = vpop.f32.mrf.mxu2  ;;  %v2250_v28 = vpop.f32.mrf.mxu0 }
  0xd1   : > { %v2755_v26 = vpop.f32.mrf.mxu3  ;;  %v2587_v27 = vadd.f32 %v2586_v25, %v2418_v21  ;;  %v2419_v29 = vpop.f32.mrf.mxu1  ;;  %v2251_v30 = vadd.f32 %v5568_v12, %v2250_v28 }
  0xd3   : > { %v5617_v31 = vadd.f32 %v2755_v26, %v2587_v27  ;;  %v2420_v33 = vadd.f32 %v2419_v29, %v2251_v30 }
  0xd8   : > { %v2588_v43 = vpop.f32.mrf.mxu2  ;;  %v2253_v48 = vpop.f32.mrf.mxu0 }
  0xd9   : > { %v2757_v44 = vpop.f32.mrf.mxu3  ;;  %v2589_v47 = vadd.f32 %v2588_v43, %v2420_v33  ;;  %v2422_v49 = vpop.f32.mrf.mxu1  ;;  %v2254_v52 = vadd.f32 %v5568_v12, %v2253_v48  ;;  %v5102_v33 = vld [vmem:[%s5445_s20 + $0x35c] sm:$0xf0]  ;;  %v4138_v48 = vor.u32 %v5103_v38, %v4137_v37  ;;  %v5293_v37 = vld [vmem:[%s6414_s1 + $0x158] sm:$0xff] }
  0xda   : > { %v4130_v43 = vor.u32 %v5102_v33, %v4129_v32  ;;  %3078 = vmatpush.bf16.msrb.mxu1 %v5293_v37 }
  0xdb   : > { %v5631_v53 = vadd.f32 %v2757_v44, %v2589_v47  ;;  %v2423_v54 = vadd.f32 %v2422_v49, %v2254_v52  ;;  %2292 = vmatmul.bf16.gmra.mxu0 %v4066_v45  ;;  %v4134_v44 = vor.u32 %v5098_v34, %v4131_v36  ;;  %v4142_v49 = vor.u32 %v5099_v39, %v4139_v40  ;;  %v4193_v39 = vld [vmem:[%s5445_s20 + $0x3c0] sm:$0xf] }
  0xdc   : > { %2461 = vmatmul.bf16.gmra.mxu1 %v4070_v46  ;;  %v5118_v40 = vld [vmem:[%s5445_s20 + $0x3dc] sm:$0xf0] }
  0xdd   : > { %2630 = vmatmul.bf16.gmra.mxu2 %v4074_v50 }
  0xde   : > { %2799 = vmatmul.bf16.gmra.mxu3 %v4078_v51 }
  0xe0   : > { %v2591_v56 = vpop.f32.mrf.mxu2  ;;  %v2255_v59 = vpop.f32.mrf.mxu0 }
  0xe1   : > { %v2760_v57 = vpop.f32.mrf.mxu3  ;;  %v2592_v58 = vadd.f32 %v2591_v56, %v2423_v54  ;;  %v2424_v60 = vpop.f32.mrf.mxu1  ;;  %v2256_v61 = vadd.f32 %v5568_v12, %v2255_v59 }
  0xe3   : > { %v5634_v62 = vadd.f32 %v2760_v57, %v2592_v58  ;;  %v2425_v0 = vadd.f32 %v2424_v60, %v2256_v61 }
  0xe8   : > { %v2593_v9 = vpop.f32.mrf.mxu2  ;;  %v2258_v15 = vpop.f32.mrf.mxu0 }
  0xe9   : > { %v2762_v10 = vpop.f32.mrf.mxu3  ;;  %v2594_v14 = vadd.f32 %v2593_v9, %v2425_v0  ;;  %v2427_v16 = vpop.f32.mrf.mxu1  ;;  %v2259_v19 = vadd.f32 %v5568_v12, %v2258_v15 }
  0xeb   : > { %v5645_v21 = vadd.f32 %v2762_v10, %v2594_v14  ;;  %v2428_v22 = vadd.f32 %v2427_v16, %v2259_v19  ;;  %2297 = vmatmul.bf16.gmra.mxu0 %v4098_v11  ;;  %v4162_v11 = vor.u32 %v5110_v2, %v4161_v1 }
  0xec   : > { %2466 = vmatmul.bf16.gmra.mxu1 %v4102_v13  ;;  %v4166_v13 = vor.u32 %v5106_v3, %v4163_v4 }
  0xed   : > { %2635 = vmatmul.bf16.gmra.mxu2 %v4106_v17  ;;  %v4170_v17 = vor.u32 %v5111_v6, %v4169_v5 }
  0xee   : > { %2804 = vmatmul.bf16.gmra.mxu3 %v4110_v18  ;;  %v4174_v18 = vor.u32 %v5107_v7, %v4171_v8 }
  0xf0   : > { %v2596_v23 = vpop.f32.mrf.mxu2  ;;  %v2260_v26 = vpop.f32.mrf.mxu0 }
  0xf1   : > { %v2765_v24 = vpop.f32.mrf.mxu3  ;;  %v2597_v25 = vadd.f32 %v2596_v23, %v2428_v22  ;;  %v2429_v27 = vpop.f32.mrf.mxu1  ;;  %v2261_v28 = vadd.f32 %v5568_v12, %v2260_v26  ;;  %v5309_v26 = vld [vmem:[%s6414_s1 + $0x1d8] sm:$0xff] }
  0xf2   : > { %3416 = vmatpush.bf16.msrb.mxu3 %v5309_v26 }
  0xf3   : > { %v5648_v29 = vadd.f32 %v2765_v24, %v2597_v25  ;;  %v2430_v30 = vadd.f32 %v2429_v27, %v2261_v28  ;;  %v5301_v24 = vld [vmem:[%s6414_s1 + $0x198] sm:$0xff] }
  0xf4   : > { %v5285_v25 = vld [vmem:[%s6414_s1 + $0x118] sm:$0xff]  ;;  %3247 = vmatpush.bf16.msrb.mxu2 %v5301_v24 }
  0xf5   : > { %2909 = vmatpush.bf16.msrb.mxu0 %v5285_v25 }
  0xf8   : > { %v2598_v41 = vpop.f32.mrf.mxu2  ;;  %v2263_v46 = vpop.f32.mrf.mxu0 }
  0xf9   : > { %v2767_v42 = vpop.f32.mrf.mxu3  ;;  %v2599_v45 = vadd.f32 %v2598_v41, %v2430_v30  ;;  %v2432_v47 = vpop.f32.mrf.mxu1  ;;  %v2264_v50 = vadd.f32 %v5568_v12, %v2263_v46  ;;  %v5114_v41 = vld [vmem:[%s5445_s20 + $0x3c4] sm:$0xf]  ;;  %v4203_v46 = vld [vmem:[%s5445_s20 + $0x3e8] sm:$0xf0] }
  0xfb   : > { %v5659_v51 = vadd.f32 %v2767_v42, %v2599_v45  ;;  %v2433_v52 = vadd.f32 %v2432_v47, %v2264_v50  ;;  %2302 = vmatmul.bf16.gmra.mxu0 %v4130_v43  ;;  %v4195_v42 = vld [vmem:[%s5445_s20 + $0x3e0] sm:$0xf0]  ;;  %v4201_v43 = vld [vmem:[%s5445_s20 + $0x3c8] sm:$0xf]  ;;  %v5115_v45 = vld [vmem:[%s5445_s20 + $0x3cc] sm:$0xf] }
  0xfc   : > { %2471 = vmatmul.bf16.gmra.mxu1 %v4134_v44  ;;  %v5119_v44 = vld [vmem:[%s5445_s20 + $0x3e4] sm:$0xf0]  ;;  %v4198_v50 = vor.u32 %v5114_v41, %v4195_v42 }
  0xfd   : > { %2640 = vmatmul.bf16.gmra.mxu2 %v4138_v48 }
  0xfe   : > { %2809 = vmatmul.bf16.gmra.mxu3 %v4142_v49  ;;  %v4194_v49 = vor.u32 %v5118_v40, %v4193_v39 }
 0x100   : > { %v2601_v54 = vpop.f32.mrf.mxu2  ;;  %v2265_v58 = vpop.f32.mrf.mxu0 }
 0x101   : > { %v2770_v56 = vpop.f32.mrf.mxu3  ;;  %v2602_v57 = vadd.f32 %v2601_v54, %v2433_v52  ;;  %v2434_v59 = vpop.f32.mrf.mxu1  ;;  %v2266_v60 = vadd.f32 %v5568_v12, %v2265_v58  ;;  %v4206_v58 = vor.u32 %v5115_v45, %v4203_v46  ;;  %v4257_v45 = vld [vmem:[%s5445_s20 + $0x440] sm:$0xf] }
 0x102   : > { %v5134_v46 = vld [vmem:[%s5445_s20 + $0x45c] sm:$0xf0] }
 0x103   : > { %v5662_v61 = vadd.f32 %v2770_v56, %v2602_v57  ;;  %v2435_v0 = vadd.f32 %v2434_v59, %v2266_v60  ;;  %v4202_v57 = vor.u32 %v5119_v44, %v4201_v43 }
 0x108   : > { %v2603_v9 = vpop.f32.mrf.mxu2  ;;  %v2268_v15 = vpop.f32.mrf.mxu0 }
 0x109   : > { %v2772_v10 = vpop.f32.mrf.mxu3  ;;  %v2604_v14 = vadd.f32 %v2603_v9, %v2435_v0  ;;  %v2437_v16 = vpop.f32.mrf.mxu1  ;;  %v2269_v19 = vadd.f32 %v5568_v12, %v2268_v15  ;;  %v4225_v9 = vld [vmem:[%s5445_s20 + $0x400] sm:$0xf]  ;;  %v5127_v15 = vld [vmem:[%s5445_s20 + $0x424] sm:$0xf0] }
 0x10b   : > { %v5673_v22 = vadd.f32 %v2772_v10, %v2604_v14  ;;  %v2438_v23 = vadd.f32 %v2437_v16, %v2269_v19  ;;  %2307 = vmatmul.bf16.gmra.mxu0 %v4162_v11  ;;  %v5126_v10 = vld [vmem:[%s5445_s20 + $0x41c] sm:$0xf0]  ;;  %v5122_v11 = vld [vmem:[%s5445_s20 + $0x404] sm:$0xf]  ;;  %v4233_v14 = vld [vmem:[%s5445_s20 + $0x408] sm:$0xf] }
 0x10c   : > { %2476 = vmatmul.bf16.gmra.mxu1 %v4166_v13  ;;  %v4227_v13 = vld [vmem:[%s5445_s20 + $0x420] sm:$0xf0]  ;;  %v5123_v16 = vld [vmem:[%s5445_s20 + $0x40c] sm:$0xf] }
 0x10d   : > { %2645 = vmatmul.bf16.gmra.mxu2 %v4170_v17  ;;  %v4235_v17 = vld [vmem:[%s5445_s20 + $0x428] sm:$0xf0]  ;;  %v4230_v24 = vor.u32 %v5122_v11, %v4227_v13 }
 0x10e   : > { %2814 = vmatmul.bf16.gmra.mxu3 %v4174_v18 }
 0x110   : > { %v2606_v27 = vpop.f32.mrf.mxu2  ;;  %v2270_v32 = vpop.f32.mrf.mxu0 }
 0x111   : > { %v2775_v28 = vpop.f32.mrf.mxu3  ;;  %v2607_v30 = vadd.f32 %v2606_v27, %v2438_v23  ;;  %v2439_v33 = vpop.f32.mrf.mxu1  ;;  %v2271_v34 = vadd.f32 %v5568_v12, %v2270_v32  ;;  %v4226_v23 = vor.u32 %v5126_v10, %v4225_v9 }
 0x113   : > { %v5685_v36 = vadd.f32 %v2775_v28, %v2607_v30  ;;  %v2440_v38 = vadd.f32 %v2439_v33, %v2271_v34  ;;  %v4234_v28 = vor.u32 %v5127_v15, %v4233_v14  ;;  %v4238_v30 = vor.u32 %v5123_v16, %v4235_v17 }
 0x118   : > { %v2608_v47 = vpop.f32.mrf.mxu2  ;;  %v2273_v54 = vpop.f32.mrf.mxu0 }
 0x119   : > { %v2777_v48 = vpop.f32.mrf.mxu3  ;;  %v2609_v52 = vadd.f32 %v2608_v47, %v2440_v38  ;;  %v2442_v56 = vpop.f32.mrf.mxu1  ;;  %v2274_v59 = vadd.f32 %v5568_v12, %v2273_v54  ;;  %v5130_v47 = vld [vmem:[%s5445_s20 + $0x444] sm:$0xf]  ;;  %v4267_v54 = vld [vmem:[%s5445_s20 + $0x468] sm:$0xf0] }
 0x11b   : > { %v5699_v60 = vadd.f32 %v2777_v48, %v2609_v52  ;;  %v2443_v0 = vadd.f32 %v2442_v56, %v2274_v59  ;;  %2312 = vmatmul.bf16.gmra.mxu0 %v4194_v49  ;;  %v4259_v48 = vld [vmem:[%s5445_s20 + $0x460] sm:$0xf0]  ;;  %v4265_v49 = vld [vmem:[%s5445_s20 + $0x448] sm:$0xf]  ;;  %v5131_v52 = vld [vmem:[%s5445_s20 + $0x44c] sm:$0xf] }
 0x11c   : > { %2481 = vmatmul.bf16.gmra.mxu1 %v4198_v50  ;;  %v5135_v50 = vld [vmem:[%s5445_s20 + $0x464] sm:$0xf0]  ;;  %v4262_v59 = vor.u32 %v5130_v47, %v4259_v48  ;;  %v5300_v47 = vld [vmem:[%s6414_s1 + $0x190] sm:$0xff] }
 0x11d   : > { %2650 = vmatmul.bf16.gmra.mxu2 %v4202_v57  ;;  %v5284_v48 = vld [vmem:[%s6414_s1 + $0x110] sm:$0xff] }
 0x11e   : > { %2819 = vmatmul.bf16.gmra.mxu3 %v4206_v58  ;;  %v4258_v58 = vor.u32 %v5134_v46, %v4257_v45  ;;  %3248 = vmatpush.bf16.msrb.mxu2 %v5300_v47  ;;  %v4355_v47 = vld [vmem:[%s5445_s20 + $0x520] sm:$0xf0] }
 0x11f   : > { %2910 = vmatpush.bf16.msrb.mxu0 %v5284_v48  ;;  %v4361_v48 = vld [vmem:[%s5445_s20 + $0x508] sm:$0xf] }
 0x120   : > { %v2611_v1 = vpop.f32.mrf.mxu2  ;;  %v2275_v4 = vpop.f32.mrf.mxu0 }
 0x121   : > { %v2780_v2 = vpop.f32.mrf.mxu3  ;;  %v2612_v3 = vadd.f32 %v2611_v1, %v2443_v0  ;;  %v2444_v5 = vpop.f32.mrf.mxu1  ;;  %v2276_v6 = vadd.f32 %v5568_v12, %v2275_v4  ;;  %v4270_v4 = vor.u32 %v5131_v52, %v4267_v54 }
 0x123   : > { %v5702_v7 = vadd.f32 %v2780_v2, %v2612_v3  ;;  %v2445_v8 = vadd.f32 %v2444_v5, %v2276_v6  ;;  %v4266_v3 = vor.u32 %v5135_v50, %v4265_v49  ;;  %v5308_v49 = vld [vmem:[%s6414_s1 + $0x1d0] sm:$0xff] }
 0x124   : > { %3417 = vmatpush.bf16.msrb.mxu3 %v5308_v49  ;;  %v5159_v49 = vld [vmem:[%s5445_s20 + $0x524] sm:$0xf0] }
 0x128   : > { %v2613_v18 = vpop.f32.mrf.mxu2  ;;  %v2278_v26 = vpop.f32.mrf.mxu0 }
 0x129   : > { %v2782_v19 = vpop.f32.mrf.mxu3  ;;  %v2614_v25 = vadd.f32 %v2613_v18, %v2445_v8  ;;  %v2447_v27 = vpop.f32.mrf.mxu1  ;;  %v2279_v32 = vadd.f32 %v5568_v12, %v2278_v26  ;;  %v4289_v18 = vld [vmem:[%s5445_s20 + $0x480] sm:$0xf]  ;;  %v5143_v26 = vld [vmem:[%s5445_s20 + $0x4a4] sm:$0xf0] }
 0x12b   : > { %v5713_v33 = vadd.f32 %v2782_v19, %v2614_v25  ;;  %v2448_v34 = vadd.f32 %v2447_v27, %v2279_v32  ;;  %2317 = vmatmul.bf16.gmra.mxu0 %v4226_v23  ;;  %v5142_v19 = vld [vmem:[%s5445_s20 + $0x49c] sm:$0xf0]  ;;  %v5138_v23 = vld [vmem:[%s5445_s20 + $0x484] sm:$0xf]  ;;  %v4297_v25 = vld [vmem:[%s5445_s20 + $0x488] sm:$0xf] }
 0x12c   : > { %2486 = vmatmul.bf16.gmra.mxu1 %v4230_v24  ;;  %v4291_v24 = vld [vmem:[%s5445_s20 + $0x4a0] sm:$0xf0]  ;;  %v5139_v27 = vld [vmem:[%s5445_s20 + $0x48c] sm:$0xf] }
 0x12d   : > { %2655 = vmatmul.bf16.gmra.mxu2 %v4234_v28  ;;  %v4299_v28 = vld [vmem:[%s5445_s20 + $0x4a8] sm:$0xf0] }
 0x12e   : > { %2824 = vmatmul.bf16.gmra.mxu3 %v4238_v30 }
 0x130   : > { %v2616_v37 = vpop.f32.mrf.mxu2  ;;  %v2280_v40 = vpop.f32.mrf.mxu0 }
 0x131   : > { %v2785_v38 = vpop.f32.mrf.mxu3  ;;  %v2617_v39 = vadd.f32 %v2616_v37, %v2448_v34  ;;  %v2449_v41 = vpop.f32.mrf.mxu1  ;;  %v2281_v42 = vadd.f32 %v5568_v12, %v2280_v40  ;;  %v4290_v34 = vor.u32 %v5142_v19, %v4289_v18  ;;  %v4294_v37 = vor.u32 %v5138_v23, %v4291_v24 }
 0x133   : > { %v5716_v43 = vadd.f32 %v2785_v38, %v2617_v39  ;;  %v2450_v44 = vadd.f32 %v2449_v41, %v2281_v42  ;;  %v4298_v41 = vor.u32 %v5143_v26, %v4297_v25  ;;  %v4302_v42 = vor.u32 %v5139_v27, %v4299_v28 }
 0x138   : > { %v2618_v56 = vpop.f32.mrf.mxu2  ;;  %v2283_v1 = vpop.f32.mrf.mxu0 }
 0x139   : > { %v2787_v57 = vpop.f32.mrf.mxu3  ;;  %v2619_v0 = vadd.f32 %v2618_v56, %v2450_v44  ;;  %v2452_v2 = vpop.f32.mrf.mxu1  ;;  %v2284_v5 = vadd.f32 %v5568_v12, %v2283_v1 }
 0x13b   : > { %v5727_v6 = vadd.f32 %v2787_v57, %v2619_v0  ;;  %v2453_v8 = vadd.f32 %v2452_v2, %v2284_v5  ;;  %2322 = vmatmul.bf16.gmra.mxu0 %v4258_v58  ;;  %v5292_v0 = vld [vmem:[%s6414_s1 + $0x150] sm:$0xff]  ;;  %v4321_v2 = vld [vmem:[%s5445_s20 + $0x4c0] sm:$0xf]  ;;  %v4323_v5 = vld [vmem:[%s5445_s20 + $0x4e0] sm:$0xf0] }
 0x13c   : > { %2491 = vmatmul.bf16.gmra.mxu1 %v4262_v59 }
 0x13d   : > { %2660 = vmatmul.bf16.gmra.mxu2 %v4266_v3  ;;  %v5150_v3 = vld [vmem:[%s5445_s20 + $0x4dc] sm:$0xf0]  ;;  %3079 = vmatpush.bf16.msrb.mxu1 %v5292_v0 }
 0x13e   : > { %2829 = vmatmul.bf16.gmra.mxu3 %v4270_v4  ;;  %v5146_v4 = vld [vmem:[%s5445_s20 + $0x4c4] sm:$0xf] }
 0x140   : > { %v2621_v9 = vpop.f32.mrf.mxu2  ;;  %v2285_v13 = vpop.f32.mrf.mxu0 }
 0x141   : > { %v2790_v10 = vpop.f32.mrf.mxu3  ;;  %v2622_v11 = vadd.f32 %v2621_v9, %v2453_v8  ;;  %v2454_v14 = vpop.f32.mrf.mxu1  ;;  %v2286_v15 = vadd.f32 %v5568_v12, %v2285_v13  ;;  %v4329_v8 = vld [vmem:[%s5445_s20 + $0x4c8] sm:$0xf] }
 0x142   : > { %v5151_v9 = vld [vmem:[%s5445_s20 + $0x4e4] sm:$0xf0] }
 0x143   : > { %v5730_v16 = vadd.f32 %v2790_v10, %v2622_v11  ;;  %v2455_v17 = vadd.f32 %v2454_v14, %v2286_v15  ;;  %v5147_v10 = vld [vmem:[%s5445_s20 + $0x4cc] sm:$0xf]  ;;  %v4322_v15 = vor.u32 %v5150_v3, %v4321_v2  ;;  %v4330_v24 = vor.u32 %v5151_v9, %v4329_v8 }
 0x144   : > { %v4331_v11 = vld [vmem:[%s5445_s20 + $0x4e8] sm:$0xf0]  ;;  %v4362_v3 = vor.u32 %v5159_v49, %v4361_v48 }
 0x145   : > { %v4334_v25 = vor.u32 %v5147_v10, %v4331_v11 }
 0x148   : > { %v2623_v30 = vpop.f32.mrf.mxu2  ;;  %v2288_v39 = vpop.f32.mrf.mxu0 }
 0x149   : > { %v2792_v32 = vpop.f32.mrf.mxu3  ;;  %v2624_v38 = vadd.f32 %v2623_v30, %v2455_v17  ;;  %v2457_v40 = vpop.f32.mrf.mxu1  ;;  %v2289_v44 = vadd.f32 %v5568_v12, %v2288_v39  ;;  %v4326_v17 = vor.u32 %v5146_v4, %v4323_v5 }
 0x14b   : > { %v5741_v45 = vadd.f32 %v2792_v32, %v2624_v38  ;;  %v2458_v46 = vadd.f32 %v2457_v40, %v2289_v44  ;;  %2327 = vmatmul.bf16.gmra.mxu0 %v4290_v34  ;;  %v5158_v44 = vld [vmem:[%s5445_s20 + $0x51c] sm:$0xf0] }
 0x14c   : > { %2496 = vmatmul.bf16.gmra.mxu1 %v4294_v37 }
 0x14d   : > { %2665 = vmatmul.bf16.gmra.mxu2 %v4298_v41 }
 0x14e   : > { %2834 = vmatmul.bf16.gmra.mxu3 %v4302_v42  ;;  %v4353_v42 = vld [vmem:[%s5445_s20 + $0x500] sm:$0xf] }
 0x150   : > { %v2626_v50 = vpop.f32.mrf.mxu2  ;;  %v2290_v56 = vpop.f32.mrf.mxu0 }
 0x151   : > { %v2795_v52 = vpop.f32.mrf.mxu3  ;;  %v2627_v54 = vadd.f32 %v2626_v50, %v2458_v46  ;;  %v2459_v57 = vpop.f32.mrf.mxu1  ;;  %v2291_v58 = vadd.f32 %v5568_v12, %v2290_v56  ;;  %v5154_v46 = vld [vmem:[%s5445_s20 + $0x504] sm:$0xf]  ;;  %v5155_v50 = vld [vmem:[%s5445_s20 + $0x50c] sm:$0xf] }
 0x153   : > { %v5753_v59 = vadd.f32 %v2795_v52, %v2627_v54  ;;  %v2460_v1 = vadd.f32 %v2459_v57, %v2291_v58  ;;  %v4363_v52 = vld [vmem:[%s5445_s20 + $0x528] sm:$0xf0]  ;;  %v4354_v57 = vor.u32 %v5158_v44, %v4353_v42  ;;  %v4358_v58 = vor.u32 %v5154_v46, %v4355_v47 }
 0x154   : > { %v4366_v4 = vor.u32 %v5155_v50, %v4363_v52 }
 0x158   : > { %v2628_v13 = vpop.f32.mrf.mxu2  ;;  %v2293_v19 = vpop.f32.mrf.mxu0 }
 0x159   : > { %v2797_v14 = vpop.f32.mrf.mxu3  ;;  %v2629_v18 = vadd.f32 %v2628_v13, %v2460_v1  ;;  %v2462_v23 = vpop.f32.mrf.mxu1  ;;  %v2294_v26 = vadd.f32 %v5568_v12, %v2293_v19 }
 0x15b   : > { %v5767_v27 = vadd.f32 %v2797_v14, %v2629_v18  ;;  %v2463_v28 = vadd.f32 %v2462_v23, %v2294_v26  ;;  %2332 = vmatmul.bf16.gmra.mxu0 %v4322_v15  ;;  %v4385_v23 = vld [vmem:[%s5445_s20 + $0x540] sm:$0xf]  ;;  %v4387_v26 = vld [vmem:[%s5445_s20 + $0x560] sm:$0xf0] }
 0x15c   : > { %2501 = vmatmul.bf16.gmra.mxu1 %v4326_v17 }
 0x15d   : > { %2670 = vmatmul.bf16.gmra.mxu2 %v4330_v24  ;;  %v5166_v24 = vld [vmem:[%s5445_s20 + $0x55c] sm:$0xf0] }
 0x15e   : > { %2839 = vmatmul.bf16.gmra.mxu3 %v4334_v25  ;;  %v5162_v25 = vld [vmem:[%s5445_s20 + $0x544] sm:$0xf] }
 0x160   : > { %v2631_v30 = vpop.f32.mrf.mxu2  ;;  %v2295_v37 = vpop.f32.mrf.mxu0 }
 0x161   : > { %v2800_v32 = vpop.f32.mrf.mxu3  ;;  %v2632_v34 = vadd.f32 %v2631_v30, %v2463_v28  ;;  %v2464_v38 = vpop.f32.mrf.mxu1  ;;  %v2296_v39 = vadd.f32 %v5568_v12, %v2295_v37  ;;  %v4393_v28 = vld [vmem:[%s5445_s20 + $0x548] sm:$0xf] }
 0x162   : > { %v5167_v30 = vld [vmem:[%s5445_s20 + $0x564] sm:$0xf0] }
 0x163   : > { %v5770_v40 = vadd.f32 %v2800_v32, %v2632_v34  ;;  %v2465_v41 = vadd.f32 %v2464_v38, %v2296_v39  ;;  %v5163_v32 = vld [vmem:[%s5445_s20 + $0x54c] sm:$0xf]  ;;  %v4386_v39 = vor.u32 %v5166_v24, %v4385_v23  ;;  %v4394_v47 = vor.u32 %v5167_v30, %v4393_v28 }
 0x164   : > { %v4395_v34 = vld [vmem:[%s5445_s20 + $0x568] sm:$0xf0] }
 0x165   : > { %v4398_v48 = vor.u32 %v5163_v32, %v4395_v34 }
 0x168   : > { %v2633_v54 = vpop.f32.mrf.mxu2  ;;  %v2298_v1 = vpop.f32.mrf.mxu0 }
 0x169   : > { %v2802_v56 = vpop.f32.mrf.mxu3  ;;  %v2634_v0 = vadd.f32 %v2633_v54, %v2465_v41  ;;  %v2467_v2 = vpop.f32.mrf.mxu1  ;;  %v2299_v5 = vadd.f32 %v5568_v12, %v2298_v1  ;;  %v4390_v41 = vor.u32 %v5162_v25, %v4387_v26 }
 0x16b   : > { %v5781_v8 = vadd.f32 %v2802_v56, %v2634_v0  ;;  %v2468_v9 = vadd.f32 %v2467_v2, %v2299_v5  ;;  %2337 = vmatmul.bf16.gmra.mxu0 %v4354_v57  ;;  %v5174_v5 = vld [vmem:[%s5445_s20 + $0x59c] sm:$0xf0] }
 0x16c   : > { %2506 = vmatmul.bf16.gmra.mxu1 %v4358_v58 }
 0x16d   : > { %2675 = vmatmul.bf16.gmra.mxu2 %v4362_v3 }
 0x16e   : > { %2844 = vmatmul.bf16.gmra.mxu3 %v4366_v4  ;;  %v4417_v4 = vld [vmem:[%s5445_s20 + $0x580] sm:$0xf] }
 0x16f   : > { %v4418_v23 = vor.u32 %v5174_v5, %v4417_v4  ;;  %v4457_v4 = vld [vmem:[%s5445_s20 + $0x5c8] sm:$0xf] }
 0x170   : > { %v2636_v10 = vpop.f32.mrf.mxu2  ;;  %v2300_v14 = vpop.f32.mrf.mxu0  ;;  %v5183_v5 = vld [vmem:[%s5445_s20 + $0x5e4] sm:$0xf0] }
 0x171   : > { %v2805_v11 = vpop.f32.mrf.mxu3  ;;  %v2637_v13 = vadd.f32 %v2636_v10, %v2468_v9  ;;  %v2469_v15 = vpop.f32.mrf.mxu1  ;;  %v2301_v17 = vadd.f32 %v5568_v12, %v2300_v14  ;;  %v5170_v9 = vld [vmem:[%s5445_s20 + $0x584] sm:$0xf]  ;;  %v5171_v14 = vld [vmem:[%s5445_s20 + $0x58c] sm:$0xf] }
 0x172   : > { %v4419_v10 = vld [vmem:[%s5445_s20 + $0x5a0] sm:$0xf0] }
 0x173   : > { %v5784_v18 = vadd.f32 %v2805_v11, %v2637_v13  ;;  %v2470_v19 = vadd.f32 %v2469_v15, %v2301_v17  ;;  %v4425_v11 = vld [vmem:[%s5445_s20 + $0x588] sm:$0xf]  ;;  %v4427_v15 = vld [vmem:[%s5445_s20 + $0x5a8] sm:$0xf0]  ;;  %v4422_v24 = vor.u32 %v5170_v9, %v4419_v10 }
 0x174   : > { %v5175_v13 = vld [vmem:[%s5445_s20 + $0x5a4] sm:$0xf0]  ;;  %v4430_v32 = vor.u32 %v5171_v14, %v4427_v15  ;;  %v5179_v9 = vld [vmem:[%s5445_s20 + $0x5cc] sm:$0xf] }
 0x175   : > { %v4426_v30 = vor.u32 %v5175_v13, %v4425_v11  ;;  %v4459_v10 = vld [vmem:[%s5445_s20 + $0x5e8] sm:$0xf0] }
 0x178   : > { %v2638_v37 = vpop.f32.mrf.mxu2  ;;  %v2303_v44 = vpop.f32.mrf.mxu0 }
 0x179   : > { %v2807_v38 = vpop.f32.mrf.mxu3  ;;  %v2639_v42 = vadd.f32 %v2638_v37, %v2470_v19  ;;  %v2472_v46 = vpop.f32.mrf.mxu1  ;;  %v2304_v49 = vadd.f32 %v5568_v12, %v2303_v44 }
 0x17b   : > { %v5795_v50 = vadd.f32 %v2807_v38, %v2639_v42  ;;  %v2473_v52 = vadd.f32 %v2472_v46, %v2304_v49  ;;  %2342 = vmatmul.bf16.gmra.mxu0 %v4386_v39  ;;  %v5299_v39 = vld [vmem:[%s6414_s1 + $0x188] sm:$0xff] }
 0x17c   : > { %2511 = vmatmul.bf16.gmra.mxu1 %v4390_v41  ;;  %v5283_v41 = vld [vmem:[%s6414_s1 + $0x108] sm:$0xff]  ;;  %3249 = vmatpush.bf16.msrb.mxu2 %v5299_v39 }
 0x17d   : > { %2680 = vmatmul.bf16.gmra.mxu2 %v4394_v47  ;;  %v5307_v42 = vld [vmem:[%s6414_s1 + $0x1c8] sm:$0xff]  ;;  %2911 = vmatpush.bf16.msrb.mxu0 %v5283_v41 }
 0x17e   : > { %2849 = vmatmul.bf16.gmra.mxu3 %v4398_v48 }
 0x17f   : > { %3418 = vmatpush.bf16.msrb.mxu3 %v5307_v42 }
 0x180   : > { %v2641_v54 = vpop.f32.mrf.mxu2  ;;  %v2305_v58 = vpop.f32.mrf.mxu0 }
 0x181   : > { %v2810_v56 = vpop.f32.mrf.mxu3  ;;  %v2642_v57 = vadd.f32 %v2641_v54, %v2473_v52  ;;  %v2474_v0 = vpop.f32.mrf.mxu1  ;;  %v2306_v1 = vadd.f32 %v5568_v12, %v2305_v58  ;;  %v4449_v58 = vld [vmem:[%s5445_s20 + $0x5c0] sm:$0xf] }
 0x183   : > { %v5798_v2 = vadd.f32 %v2810_v56, %v2642_v57  ;;  %v2475_v3 = vadd.f32 %v2474_v0, %v2306_v1  ;;  %v5291_v56 = vld [vmem:[%s6414_s1 + $0x148] sm:$0xff]  ;;  %v5182_v0 = vld [vmem:[%s5445_s20 + $0x5dc] sm:$0xf0]  ;;  %v5178_v1 = vld [vmem:[%s5445_s20 + $0x5c4] sm:$0xf] }
 0x184   : > { %3080 = vmatpush.bf16.msrb.mxu1 %v5291_v56  ;;  %v4450_v14 = vor.u32 %v5182_v0, %v4449_v58  ;;  %v4489_v56 = vld [vmem:[%s5445_s20 + $0x608] sm:$0xf]  ;;  %v5187_v58 = vld [vmem:[%s5445_s20 + $0x60c] sm:$0xf] }
 0x185   : > { %v4491_v0 = vld [vmem:[%s5445_s20 + $0x628] sm:$0xf0] }
 0x188   : > { %v2643_v17 = vpop.f32.mrf.mxu2  ;;  %v2308_v26 = vpop.f32.mrf.mxu0 }
 0x189   : > { %v2812_v19 = vpop.f32.mrf.mxu3  ;;  %v2644_v25 = vadd.f32 %v2643_v17, %v2475_v3  ;;  %v2477_v28 = vpop.f32.mrf.mxu1  ;;  %v2309_v34 = vadd.f32 %v5568_v12, %v2308_v26  ;;  %v4451_v3 = vld [vmem:[%s5445_s20 + $0x5e0] sm:$0xf0] }
 0x18b   : > { %v5809_v37 = vadd.f32 %v2812_v19, %v2644_v25  ;;  %v2478_v38 = vadd.f32 %v2477_v28, %v2309_v34  ;;  %2347 = vmatmul.bf16.gmra.mxu0 %v4418_v23  ;;  %v4458_v23 = vor.u32 %v5183_v5, %v4457_v4  ;;  %v5837_v25 = vld [vmem:[%s6415_s2] ss:$0 sm:$0xff] }
 0x18c   : > { %2516 = vmatmul.bf16.gmra.mxu1 %v4422_v24  ;;  %v4462_v24 = vor.u32 %v5179_v9, %v4459_v10 }
 0x18d   : > { %2685 = vmatmul.bf16.gmra.mxu2 %v4426_v30 }
 0x18e   : > { %2854 = vmatmul.bf16.gmra.mxu3 %v4430_v32 }
 0x190   : > { %v2646_v44 = vpop.f32.mrf.mxu2  ;;  %v2310_v48 = vpop.f32.mrf.mxu0 }
 0x191   : > { %v2815_v46 = vpop.f32.mrf.mxu3  ;;  %v2647_v47 = vadd.f32 %v2646_v44, %v2478_v38  ;;  %v2479_v49 = vpop.f32.mrf.mxu1  ;;  %v2311_v52 = vadd.f32 %v5568_v12, %v2310_v48  ;;  %v4454_v12 = vor.u32 %v5178_v1, %v4451_v3  ;;  %v5190_v48 = vld [vmem:[%s5445_s20 + $0x61c] sm:$0xf0] }
 0x193   : > { %v5821_v54 = vadd.f32 %v2815_v46, %v2647_v47  ;;  %v2480_v57 = vadd.f32 %v2479_v49, %v2311_v52  ;;  %v4481_v47 = vld [vmem:[%s5445_s20 + $0x600] sm:$0xf]  ;;  %v5186_v49 = vld [vmem:[%s5445_s20 + $0x604] sm:$0xf] }
 0x194   : > { %v4483_v52 = vld [vmem:[%s5445_s20 + $0x620] sm:$0xf0]  ;;  %v4482_v4 = vor.u32 %v5190_v48, %v4481_v47  ;;  %v4521_v47 = vld [vmem:[%s5445_s20 + $0x648] sm:$0xf] }
 0x195   : > { %v4486_v5 = vor.u32 %v5186_v49, %v4483_v52  ;;  %v5199_v48 = vld [vmem:[%s5445_s20 + $0x664] sm:$0xf0]  ;;  %v5195_v49 = vld [vmem:[%s5445_s20 + $0x64c] sm:$0xf] }
 0x196   : > { %v4523_v52 = vld [vmem:[%s5445_s20 + $0x668] sm:$0xf0] }
 0x198   : > { %v2648_v11 = vpop.f32.mrf.mxu2  ;;  %v2313_v17 = vpop.f32.mrf.mxu0 }
 0x199   : > { %v2817_v13 = vpop.f32.mrf.mxu3  ;;  %v2649_v15 = vadd.f32 %v2648_v11, %v2480_v57  ;;  %v2482_v19 = vpop.f32.mrf.mxu1  ;;  %v2314_v26 = vadd.f32 %v5837_v25, %v2313_v17  ;;  %v5191_v57 = vld [vmem:[%s5445_s20 + $0x624] sm:$0xf0] }
 0x19b   : > { %v5840_v28 = vadd.f32 %v2817_v13, %v2649_v15  ;;  %v2483_v30 = vadd.f32 %v2482_v19, %v2314_v26  ;;  %2352 = vmatmul.bf16.gmra.mxu0 %v4450_v14  ;;  %v4490_v13 = vor.u32 %v5191_v57, %v4489_v56  ;;  %v4494_v14 = vor.u32 %v5187_v58, %v4491_v0 }
 0x19c   : > { %2521 = vmatmul.bf16.gmra.mxu1 %v4454_v12 }
 0x19d   : > { %2690 = vmatmul.bf16.gmra.mxu2 %v4458_v23 }
 0x19e   : > { %2859 = vmatmul.bf16.gmra.mxu3 %v4462_v24 }
 0x1a0   : > { %v2651_v32 = vpop.f32.mrf.mxu2  ;;  %v2315_v39 = vpop.f32.mrf.mxu0 }
 0x1a1   : > { %v2820_v34 = vpop.f32.mrf.mxu3  ;;  %v2652_v38 = vadd.f32 %v2651_v32, %v2483_v30  ;;  %v2484_v41 = vpop.f32.mrf.mxu1  ;;  %v2316_v42 = vadd.f32 %v5837_v25, %v2315_v39  ;;  %v4513_v39 = vld [vmem:[%s5445_s20 + $0x640] sm:$0xf] }
 0x1a3   : > { %v5843_v44 = vadd.f32 %v2820_v34, %v2652_v38  ;;  %v2485_v46 = vadd.f32 %v2484_v41, %v2316_v42  ;;  %v5198_v41 = vld [vmem:[%s5445_s20 + $0x65c] sm:$0xf0]  ;;  %v5194_v42 = vld [vmem:[%s5445_s20 + $0x644] sm:$0xf] }
 0x1a4   : > { %v4514_v58 = vor.u32 %v5198_v41, %v4513_v39  ;;  %v5202_v39 = vld [vmem:[%s5445_s20 + $0x684] sm:$0xf] }
 0x1a5   : > { %v4547_v41 = vld [vmem:[%s5445_s20 + $0x6a0] sm:$0xf0] }
 0x1a8   : > { %v2653_v1 = vpop.f32.mrf.mxu2  ;;  %v2318_v10 = vpop.f32.mrf.mxu0 }
 0x1a9   : > { %v2822_v3 = vpop.f32.mrf.mxu3  ;;  %v2654_v9 = vadd.f32 %v2653_v1, %v2485_v46  ;;  %v2487_v11 = vpop.f32.mrf.mxu1  ;;  %v2319_v12 = vadd.f32 %v5837_v25, %v2318_v10  ;;  %v4515_v46 = vld [vmem:[%s5445_s20 + $0x660] sm:$0xf0] }
 0x1aa   : > { %v4518_v0 = vor.u32 %v5194_v42, %v4515_v46  ;;  %v4553_v42 = vld [vmem:[%s5445_s20 + $0x688] sm:$0xf] }
 0x1ab   : > { %v5854_v15 = vadd.f32 %v2822_v3, %v2654_v9  ;;  %v2488_v17 = vadd.f32 %v2487_v11, %v2319_v12  ;;  %2357 = vmatmul.bf16.gmra.mxu0 %v4482_v4  ;;  %v4526_v9 = vor.u32 %v5195_v49, %v4523_v52  ;;  %v5207_v46 = vld [vmem:[%s5445_s20 + $0x6a4] sm:$0xf0] }
 0x1ac   : > { %2526 = vmatmul.bf16.gmra.mxu1 %v4486_v5  ;;  %v4522_v5 = vor.u32 %v5199_v48, %v4521_v47  ;;  %v5203_v47 = vld [vmem:[%s5445_s20 + $0x68c] sm:$0xf] }
 0x1ad   : > { %2695 = vmatmul.bf16.gmra.mxu2 %v4490_v13  ;;  %v4555_v48 = vld [vmem:[%s5445_s20 + $0x6a8] sm:$0xf0] }
 0x1ae   : > { %2864 = vmatmul.bf16.gmra.mxu3 %v4494_v14 }
 0x1b0   : > { %v2656_v19 = vpop.f32.mrf.mxu2  ;;  %v2320_v26 = vpop.f32.mrf.mxu0 }
 0x1b1   : > { %v2825_v23 = vpop.f32.mrf.mxu3  ;;  %v2657_v24 = vadd.f32 %v2656_v19, %v2488_v17  ;;  %v2489_v30 = vpop.f32.mrf.mxu1  ;;  %v2321_v32 = vadd.f32 %v5837_v25, %v2320_v26 }
 0x1b3   : > { %v5857_v34 = vadd.f32 %v2825_v23, %v2657_v24  ;;  %v2490_v38 = vadd.f32 %v2489_v30, %v2321_v32  ;;  %v4545_v32 = vld [vmem:[%s5445_s20 + $0x680] sm:$0xf] }
 0x1b8   : > { %v2658_v56 = vpop.f32.mrf.mxu2  ;;  %v2323_v3 = vpop.f32.mrf.mxu0 }
 0x1b9   : > { %v2827_v57 = vpop.f32.mrf.mxu3  ;;  %v2659_v1 = vadd.f32 %v2658_v56, %v2490_v38  ;;  %v2492_v4 = vpop.f32.mrf.mxu1  ;;  %v2324_v10 = vadd.f32 %v5837_v25, %v2323_v3  ;;  %v5206_v38 = vld [vmem:[%s5445_s20 + $0x69c] sm:$0xf0]  ;;  %v4554_v3 = vor.u32 %v5207_v46, %v4553_v42 }
 0x1ba   : > { %v4546_v56 = vor.u32 %v5206_v38, %v4545_v32  ;;  %v4577_v42 = vld [vmem:[%s5445_s20 + $0x6c0] sm:$0xf] }
 0x1bb   : > { %v5868_v11 = vadd.f32 %v2827_v57, %v2659_v1  ;;  %v2493_v13 = vadd.f32 %v2492_v4, %v2324_v10  ;;  %2362 = vmatmul.bf16.gmra.mxu0 %v4514_v58  ;;  %v4550_v57 = vor.u32 %v5202_v39, %v4547_v41  ;;  %v4558_v4 = vor.u32 %v5203_v47, %v4555_v48  ;;  %v5290_v39 = vld [vmem:[%s6414_s1 + $0x140] sm:$0xff] }
 0x1bc   : > { %2531 = vmatmul.bf16.gmra.mxu1 %v4518_v0  ;;  %v5214_v46 = vld [vmem:[%s5445_s20 + $0x6dc] sm:$0xf0]  ;;  %v5210_v47 = vld [vmem:[%s5445_s20 + $0x6c4] sm:$0xf] }
 0x1bd   : > { %2700 = vmatmul.bf16.gmra.mxu2 %v4522_v5  ;;  %v4579_v48 = vld [vmem:[%s5445_s20 + $0x6e0] sm:$0xf0]  ;;  %3081 = vmatpush.bf16.msrb.mxu1 %v5290_v39 }
 0x1be   : > { %2869 = vmatmul.bf16.gmra.mxu3 %v4526_v9 }
 0x1c0   : > { %v2661_v14 = vpop.f32.mrf.mxu2  ;;  %v2325_v19 = vpop.f32.mrf.mxu0 }
 0x1c1   : > { %v2830_v12 = vpop.f32.mrf.mxu3  ;;  %v2662_v17 = vadd.f32 %v2661_v14, %v2493_v13  ;;  %v2494_v23 = vpop.f32.mrf.mxu1  ;;  %v2326_v24 = vadd.f32 %v5837_v25, %v2325_v19  ;;  %v5298_v13 = vld [vmem:[%s6414_s1 + $0x180] sm:$0xff] }
 0x1c2   : > { %v5282_v14 = vld [vmem:[%s6414_s1 + $0x100] sm:$0xff]  ;;  %3250 = vmatpush.bf16.msrb.mxu2 %v5298_v13 }
 0x1c3   : > { %v5871_v26 = vadd.f32 %v2830_v12, %v2662_v17  ;;  %v2495_v30 = vadd.f32 %v2494_v23, %v2326_v24  ;;  %v5306_v12 = vld [vmem:[%s6414_s1 + $0x1c0] sm:$0xff]  ;;  %2912 = vmatpush.bf16.msrb.mxu0 %v5282_v14 }
 0x1c4   : > { %3419 = vmatpush.bf16.msrb.mxu3 %v5306_v12 }
 0x1c8   : > { %v2663_v49 = vpop.f32.mrf.mxu2  ;;  %v2328_v0 = vpop.f32.mrf.mxu0 }
 0x1c9   : > { %v2832_v52 = vpop.f32.mrf.mxu3  ;;  %v2664_v58 = vadd.f32 %v2663_v49, %v2495_v30  ;;  %v2497_v1 = vpop.f32.mrf.mxu1  ;;  %v2329_v5 = vadd.f32 %v5837_v25, %v2328_v0  ;;  %v4585_v49 = vld [vmem:[%s5445_s20 + $0x6c8] sm:$0xf] }
 0x1cb   : > { %v5882_v9 = vadd.f32 %v2832_v52, %v2664_v58  ;;  %v2498_v10 = vadd.f32 %v2497_v1, %v2329_v5  ;;  %2367 = vmatmul.bf16.gmra.mxu0 %v4546_v56  ;;  %v5215_v52 = vld [vmem:[%s5445_s20 + $0x6e4] sm:$0xf0]  ;;  %v5211_v56 = vld [vmem:[%s5445_s20 + $0x6cc] sm:$0xf]  ;;  %v4578_v1 = vor.u32 %v5214_v46, %v4577_v42 }
 0x1cc   : > { %2536 = vmatmul.bf16.gmra.mxu1 %v4550_v57  ;;  %v4587_v57 = vld [vmem:[%s5445_s20 + $0x6e8] sm:$0xf0]  ;;  %v4586_v13 = vor.u32 %v5215_v52, %v4585_v49  ;;  %v5218_v49 = vld [vmem:[%s5445_s20 + $0x704] sm:$0xf] }
 0x1cd   : > { %2705 = vmatmul.bf16.gmra.mxu2 %v4554_v3  ;;  %v4582_v3 = vor.u32 %v5210_v47, %v4579_v48  ;;  %v4590_v14 = vor.u32 %v5211_v56, %v4587_v57  ;;  %v4609_v47 = vld [vmem:[%s5445_s20 + $0x700] sm:$0xf]  ;;  %v4611_v52 = vld [vmem:[%s5445_s20 + $0x720] sm:$0xf0]  ;;  %v4617_v56 = vld [vmem:[%s5445_s20 + $0x708] sm:$0xf] }
 0x1ce   : > { %2874 = vmatmul.bf16.gmra.mxu3 %v4558_v4  ;;  %v5222_v48 = vld [vmem:[%s5445_s20 + $0x71c] sm:$0xf0]  ;;  %v5223_v57 = vld [vmem:[%s5445_s20 + $0x724] sm:$0xf0] }
 0x1d0   : > { %v2666_v17 = vpop.f32.mrf.mxu2  ;;  %v2330_v24 = vpop.f32.mrf.mxu0 }
 0x1d1   : > { %v2835_v19 = vpop.f32.mrf.mxu3  ;;  %v2667_v23 = vadd.f32 %v2666_v17, %v2498_v10  ;;  %v2499_v30 = vpop.f32.mrf.mxu1  ;;  %v2331_v32 = vadd.f32 %v5837_v25, %v2330_v24 }
 0x1d3   : > { %v5894_v38 = vadd.f32 %v2835_v19, %v2667_v23  ;;  %v2500_v41 = vadd.f32 %v2499_v30, %v2331_v32 }
 0x1d8   : > { %v2668_v58 = vpop.f32.mrf.mxu2  ;;  %v2333_v5 = vpop.f32.mrf.mxu0 }
 0x1d9   : > { %v2837_v0 = vpop.f32.mrf.mxu3  ;;  %v2669_v4 = vadd.f32 %v2668_v58, %v2500_v41  ;;  %v2502_v10 = vpop.f32.mrf.mxu1  ;;  %v2334_v12 = vadd.f32 %v5837_v25, %v2333_v5  ;;  %v5219_v58 = vld [vmem:[%s5445_s20 + $0x70c] sm:$0xf]  ;;  %v4614_v5 = vor.u32 %v5218_v49, %v4611_v52 }
 0x1db   : > { %v5908_v17 = vadd.f32 %v2837_v0, %v2669_v4  ;;  %v2503_v19 = vadd.f32 %v2502_v10, %v2334_v12  ;;  %2372 = vmatmul.bf16.gmra.mxu0 %v4578_v1  ;;  %v4619_v0 = vld [vmem:[%s5445_s20 + $0x728] sm:$0xf0]  ;;  %v4610_v4 = vor.u32 %v5222_v48, %v4609_v47  ;;  %v4618_v12 = vor.u32 %v5223_v57, %v4617_v56  ;;  %v4641_v56 = vld [vmem:[%s5445_s20 + $0x740] sm:$0xf] }
 0x1dc   : > { %2541 = vmatmul.bf16.gmra.mxu1 %v4582_v3  ;;  %v5230_v57 = vld [vmem:[%s5445_s20 + $0x75c] sm:$0xf0] }
 0x1dd   : > { %2710 = vmatmul.bf16.gmra.mxu2 %v4586_v13 }
 0x1de   : > { %2879 = vmatmul.bf16.gmra.mxu3 %v4590_v14 }
 0x1e0   : > { %v2671_v23 = vpop.f32.mrf.mxu2  ;;  %v2335_v32 = vpop.f32.mrf.mxu0 }
 0x1e1   : > { %v2840_v24 = vpop.f32.mrf.mxu3  ;;  %v2672_v30 = vadd.f32 %v2671_v23, %v2503_v19  ;;  %v2504_v39 = vpop.f32.mrf.mxu1  ;;  %v2336_v41 = vadd.f32 %v5837_v25, %v2335_v32  ;;  %v4622_v19 = vor.u32 %v5219_v58, %v4619_v0  ;;  %v5226_v58 = vld [vmem:[%s5445_s20 + $0x744] sm:$0xf] }
 0x1e2   : > { %v4643_v0 = vld [vmem:[%s5445_s20 + $0x760] sm:$0xf0] }
 0x1e3   : > { %v5911_v42 = vadd.f32 %v2840_v24, %v2672_v30  ;;  %v2505_v46 = vadd.f32 %v2504_v39, %v2336_v41 }
 0x1e8   : > { %v2673_v1 = vpop.f32.mrf.mxu2  ;;  %v2338_v13 = vpop.f32.mrf.mxu0 }
 0x1e9   : > { %v2842_v3 = vpop.f32.mrf.mxu3  ;;  %v2674_v10 = vadd.f32 %v2673_v1, %v2505_v46  ;;  %v2507_v14 = vpop.f32.mrf.mxu1  ;;  %v2339_v23 = vadd.f32 %v5837_v25, %v2338_v13  ;;  %v4649_v1 = vld [vmem:[%s5445_s20 + $0x748] sm:$0xf] }
 0x1eb   : > { %v5922_v24 = vadd.f32 %v2842_v3, %v2674_v10  ;;  %v2508_v30 = vadd.f32 %v2507_v14, %v2339_v23  ;;  %2377 = vmatmul.bf16.gmra.mxu0 %v4610_v4  ;;  %v5231_v3 = vld [vmem:[%s5445_s20 + $0x764] sm:$0xf0]  ;;  %v5227_v4 = vld [vmem:[%s5445_s20 + $0x74c] sm:$0xf]  ;;  %v4642_v14 = vor.u32 %v5230_v57, %v4641_v56 }
 0x1ec   : > { %2546 = vmatmul.bf16.gmra.mxu1 %v4614_v5  ;;  %v4651_v5 = vld [vmem:[%s5445_s20 + $0x768] sm:$0xf0] }
 0x1ed   : > { %2715 = vmatmul.bf16.gmra.mxu2 %v4618_v12  ;;  %v4646_v12 = vor.u32 %v5226_v58, %v4643_v0 }
 0x1ee   : > { %2884 = vmatmul.bf16.gmra.mxu3 %v4622_v19 }
 0x1f0   : > { %v2676_v32 = vpop.f32.mrf.mxu2  ;;  %v2340_v46 = vpop.f32.mrf.mxu0 }
 0x1f1   : > { %v2845_v39 = vpop.f32.mrf.mxu3  ;;  %v2677_v41 = vadd.f32 %v2676_v32, %v2508_v30  ;;  %v2509_v47 = vpop.f32.mrf.mxu1  ;;  %v2341_v48 = vadd.f32 %v5837_v25, %v2340_v46  ;;  %v4650_v32 = vor.u32 %v5231_v3, %v4649_v1  ;;  %v4654_v46 = vor.u32 %v5227_v4, %v4651_v5  ;;  %v4673_v4 = vld [vmem:[%s5445_s20 + $0x780] sm:$0xf] }
 0x1f2   : > { %v5238_v5 = vld [vmem:[%s5445_s20 + $0x79c] sm:$0xf0] }
 0x1f3   : > { %v5925_v49 = vadd.f32 %v2845_v39, %v2677_v41  ;;  %v2510_v52 = vadd.f32 %v2509_v47, %v2341_v48 }
 0x1f5   : > { %6417 = vst [vmem:[#allocation2_spill] sm:$0xff] %v5925_v49 }
 0x1f8   : > { %v2678_v10 = vpop.f32.mrf.mxu2  ;;  %v2343_v23 = vpop.f32.mrf.mxu0 }
 0x1f9   : > { %v2847_v13 = vpop.f32.mrf.mxu3  ;;  %v2679_v19 = vadd.f32 %v2678_v10, %v2510_v52  ;;  %v2512_v30 = vpop.f32.mrf.mxu1  ;;  %v2344_v39 = vadd.f32 %v5837_v25, %v2343_v23  ;;  %v5234_v10 = vld [vmem:[%s5445_s20 + $0x784] sm:$0xf]  ;;  %v4683_v23 = vld [vmem:[%s5445_s20 + $0x7a8] sm:$0xf0] }
 0x1fb   : > { %v5936_v41 = vadd.f32 %v2847_v13, %v2679_v19  ;;  %v2513_v47 = vadd.f32 %v2512_v30, %v2344_v39  ;;  %2382 = vmatmul.bf16.gmra.mxu0 %v4642_v14  ;;  %v4675_v13 = vld [vmem:[%s5445_s20 + $0x7a0] sm:$0xf0]  ;;  %v4681_v14 = vld [vmem:[%s5445_s20 + $0x788] sm:$0xf]  ;;  %v5235_v19 = vld [vmem:[%s5445_s20 + $0x78c] sm:$0xf] }
 0x1fc   : > { %2551 = vmatmul.bf16.gmra.mxu1 %v4646_v12  ;;  %v5239_v12 = vld [vmem:[%s5445_s20 + $0x7a4] sm:$0xf0]  ;;  %v4678_v39 = vor.u32 %v5234_v10, %v4675_v13 }
 0x1fd   : > { %6418 = vst [vmem:[#allocation3_spill] sm:$0xff] %v5936_v41  ;;  %2720 = vmatmul.bf16.gmra.mxu2 %v4650_v32  ;;  %v4682_v49 = vor.u32 %v5239_v12, %v4681_v14 }
 0x1fe   : > { %2889 = vmatmul.bf16.gmra.mxu3 %v4654_v46  ;;  %v4674_v46 = vor.u32 %v5238_v5, %v4673_v4 }
 0x200   : > { %v2681_v48 = vpop.f32.mrf.mxu2  ;;  %v2345_v57 = vpop.f32.mrf.mxu0 }
 0x201   : > { %v2850_v52 = vpop.f32.mrf.mxu3  ;;  %v2682_v56 = vadd.f32 %v2681_v48, %v2513_v47  ;;  %v2514_v58 = vpop.f32.mrf.mxu1  ;;  %v2346_v0 = vadd.f32 %v5837_v25, %v2345_v57  ;;  %v4686_v57 = vor.u32 %v5235_v19, %v4683_v23  ;;  %v5246_v19 = vld [vmem:[%s5445_s20 + $0x7dc] sm:$0xf0]  ;;  %v5242_v23 = vld [vmem:[%s5445_s20 + $0x7c4] sm:$0xf] }
 0x203   : > { %v5939_v1 = vadd.f32 %v2850_v52, %v2682_v56  ;;  %v2515_v3 = vadd.f32 %v2514_v58, %v2346_v0 }
 0x205   : > { %6419 = vst [vmem:[#allocation4_spill] sm:$0xff] %v5939_v1 }
 0x208   : > { %v2683_v30 = vpop.f32.mrf.mxu2  ;;  %v2348_v48 = vpop.f32.mrf.mxu0 }
 0x209   : > { %v2852_v32 = vpop.f32.mrf.mxu3  ;;  %v2684_v47 = vadd.f32 %v2683_v30, %v2515_v3  ;;  %v2517_v41 = vpop.f32.mrf.mxu1  ;;  %v2349_v52 = vadd.f32 %v5837_v25, %v2348_v48  ;;  %v4707_v30 = vld [vmem:[%s5445_s20 + $0x7e0] sm:$0xf0] }
 0x20b   : > { %v5950_v56 = vadd.f32 %v2852_v32, %v2684_v47  ;;  %v2518_v58 = vadd.f32 %v2517_v41, %v2349_v52  ;;  %2387 = vmatmul.bf16.gmra.mxu0 %v4674_v46  ;;  %v4705_v41 = vld [vmem:[%s5445_s20 + $0x7c0] sm:$0xf]  ;;  %v4713_v32 = vld [vmem:[%s5445_s20 + $0x7c8] sm:$0xf]  ;;  %v4710_v52 = vor.u32 %v5242_v23, %v4707_v30 }
 0x20c   : > { %2556 = vmatmul.bf16.gmra.mxu1 %v4678_v39  ;;  %v5247_v46 = vld [vmem:[%s5445_s20 + $0x7e4] sm:$0xf0]  ;;  %v4715_v39 = vld [vmem:[%s5445_s20 + $0x7e8] sm:$0xf0] }
 0x20d   : > { %6420 = vst [vmem:[#allocation5_spill] sm:$0xff] %v5950_v56  ;;  %2725 = vmatmul.bf16.gmra.mxu2 %v4682_v49  ;;  %v5243_v49 = vld [vmem:[%s5445_s20 + $0x7cc] sm:$0xf]  ;;  %v4714_v1 = vor.u32 %v5247_v46, %v4713_v32 }
 0x20e   : > { %2894 = vmatmul.bf16.gmra.mxu3 %v4686_v57  ;;  %v4706_v57 = vor.u32 %v5246_v19, %v4705_v41 }
 0x210   : > { %v2686_v0 = vpop.f32.mrf.mxu2  ;;  %v2350_v5 = vpop.f32.mrf.mxu0 }
 0x211   : > { %v2855_v3 = vpop.f32.mrf.mxu3  ;;  %v2687_v4 = vadd.f32 %v2686_v0, %v2518_v58  ;;  %v2519_v10 = vpop.f32.mrf.mxu1  ;;  %v2351_v13 = vadd.f32 %v5837_v25, %v2350_v5  ;;  %v4718_v5 = vor.u32 %v5243_v49, %v4715_v39  ;;  %v5000_v49 = vld [vmem:[%s5445_s20 + $0x2c] sm:$0xf0]  ;;  %v4996_v39 = vld [vmem:[%s5445_s20 + $0x14] sm:$0xf] }
 0x213   : > { %v5953_v14 = vadd.f32 %v2855_v3, %v2687_v4  ;;  %v2520_v12 = vadd.f32 %v2519_v10, %v2351_v13 }
 0x215   : > { %6421 = vst [vmem:[#allocation6_spill] sm:$0xff] %v5953_v14 }
 0x218   : > { %v2688_v47 = vpop.f32.mrf.mxu2  ;;  %v2353_v0 = vpop.f32.mrf.mxu0 }
 0x219   : > { %v2857_v48 = vpop.f32.mrf.mxu3  ;;  %v2689_v58 = vadd.f32 %v2688_v47, %v2520_v12  ;;  %v2522_v56 = vpop.f32.mrf.mxu1  ;;  %v2354_v3 = vadd.f32 %v5837_v25, %v2353_v0  ;;  %v3731_v47 = vld [vmem:[%s5445_s20 + $0x30] sm:$0xf0] }
 0x21b   : > { %v5964_v4 = vadd.f32 %v2857_v48, %v2689_v58  ;;  %v2523_v10 = vadd.f32 %v2522_v56, %v2354_v3  ;;  %2392 = vmatmul.bf16.gmra.mxu0 %v4706_v57  ;;  %v3729_v56 = vld [vmem:[%s5445_s20 + $0x10] sm:$0xf]  ;;  %v3737_v48 = vld [vmem:[%s5445_s20 + $0x18] sm:$0xf]  ;;  %v3734_v3 = vor.u32 %v4996_v39, %v3731_v47 }
 0x21c   : > { %2561 = vmatmul.bf16.gmra.mxu1 %v4710_v52  ;;  %v5001_v57 = vld [vmem:[%s5445_s20 + $0x34] sm:$0xf0]  ;;  %v3739_v52 = vld [vmem:[%s5445_s20 + $0x38] sm:$0xf0] }
 0x21d   : > { %6422 = vst [vmem:[#allocation7_spill] sm:$0xff] %v5964_v4  ;;  %2730 = vmatmul.bf16.gmra.mxu2 %v4714_v1  ;;  %v4997_v1 = vld [vmem:[%s5445_s20 + $0x1c] sm:$0xf]  ;;  %v3738_v14 = vor.u32 %v5001_v57, %v3737_v48 }
 0x21e   : > { %2899 = vmatmul.bf16.gmra.mxu3 %v4718_v5  ;;  %v3730_v5 = vor.u32 %v5000_v49, %v3729_v56 }
 0x220   : > { %v2691_v13 = vpop.f32.mrf.mxu2  ;;  %v2355_v19 = vpop.f32.mrf.mxu0 }
 0x221   : > { %v2860_v12 = vpop.f32.mrf.mxu3  ;;  %v2692_v41 = vadd.f32 %v2691_v13, %v2523_v10  ;;  %v2524_v23 = vpop.f32.mrf.mxu1  ;;  %v2356_v30 = vadd.f32 %v5837_v25, %v2355_v19  ;;  %v3742_v19 = vor.u32 %v4997_v1, %v3739_v52  ;;  %v5008_v1 = vld [vmem:[%s5445_s20 + $0x6c] sm:$0xf0]  ;;  %v5004_v52 = vld [vmem:[%s5445_s20 + $0x54] sm:$0xf] }
 0x223   : > { %v5967_v32 = vadd.f32 %v2860_v12, %v2692_v41  ;;  %v2525_v46 = vadd.f32 %v2524_v23, %v2356_v30 }
 0x225   : > { %6423 = vst [vmem:[#allocation8_spill] sm:$0xff] %v5967_v32 }
 0x228   : > { %v2693_v58 = vpop.f32.mrf.mxu2  ;;  %v2358_v13 = vpop.f32.mrf.mxu0 }
 0x229   : > { %v2862_v0 = vpop.f32.mrf.mxu3  ;;  %v2694_v10 = vadd.f32 %v2693_v58, %v2525_v46  ;;  %v2527_v4 = vpop.f32.mrf.mxu1  ;;  %v2359_v12 = vadd.f32 %v5837_v25, %v2358_v13  ;;  %v3763_v58 = vld [vmem:[%s5445_s20 + $0x70] sm:$0xf0] }
 0x22b   : > { %v5978_v41 = vadd.f32 %v2862_v0, %v2694_v10  ;;  %v2528_v23 = vadd.f32 %v2527_v4, %v2359_v12  ;;  %2913 = vmatmul.bf16.vlgmr.msrb.gmra.mxu0 %v3730_v5  ;;  %v3761_v4 = vld [vmem:[%s5445_s20 + $0x50] sm:$0xf]  ;;  %v3769_v0 = vld [vmem:[%s5445_s20 + $0x58] sm:$0xf]  ;;  %v3766_v12 = vor.u32 %v5004_v52, %v3763_v58 }
 0x22c   : > { %3082 = vmatmul.bf16.vlgmr.msrb.gmra.mxu1 %v3734_v3  ;;  %v5009_v5 = vld [vmem:[%s5445_s20 + $0x74] sm:$0xf0]  ;;  %v3771_v3 = vld [vmem:[%s5445_s20 + $0x78] sm:$0xf0] }
 0x22d   : > { %6424 = vst [vmem:[#allocation9_spill] sm:$0xff] %v5978_v41  ;;  %3251 = vmatmul.bf16.vlgmr.msrb.gmra.mxu2 %v3738_v14  ;;  %v5005_v14 = vld [vmem:[%s5445_s20 + $0x5c] sm:$0xf]  ;;  %v3770_v32 = vor.u32 %v5009_v5, %v3769_v0 }
 0x22e   : > { %3420 = vmatmul.bf16.vlgmr.msrb.gmra.mxu3 %v3742_v19  ;;  %v3762_v19 = vor.u32 %v5008_v1, %v3761_v4 }
 0x230   : > { %v2696_v30 = vpop.f32.mrf.mxu2  ;;  %v2360_v49 = vpop.f32.mrf.mxu0 }
 0x231   : > { %v2865_v46 = vpop.f32.mrf.mxu3  ;;  %v2697_v56 = vadd.f32 %v2696_v30, %v2528_v23  ;;  %v2529_v39 = vpop.f32.mrf.mxu1  ;;  %v2361_v47 = vadd.f32 %v5837_v25, %v2360_v49  ;;  %v3774_v49 = vor.u32 %v5005_v14, %v3771_v3  ;;  %v5016_v14 = vld [vmem:[%s5445_s20 + $0xac] sm:$0xf0]  ;;  %v5012_v3 = vld [vmem:[%s5445_s20 + $0x94] sm:$0xf] }
 0x233   : > { %v5981_v48 = vadd.f32 %v2865_v46, %v2697_v56  ;;  %v2530_v57 = vadd.f32 %v2529_v39, %v2361_v47 }
 0x235   : > { %6425 = vst [vmem:[#allocation10_spill] sm:$0xff] %v5981_v48 }
 0x238   : > { %v2698_v10 = vpop.f32.mrf.mxu2  ;;  %v2363_v30 = vpop.f32.mrf.mxu0 }
 0x239   : > { %v2867_v13 = vpop.f32.mrf.mxu3  ;;  %v2699_v23 = vadd.f32 %v2698_v10, %v2530_v57  ;;  %v2532_v41 = vpop.f32.mrf.mxu1  ;;  %v2364_v46 = vadd.f32 %v5837_v25, %v2363_v30  ;;  %v3795_v10 = vld [vmem:[%s5445_s20 + $0xb0] sm:$0xf0] }
 0x23b   : > { %v5992_v56 = vadd.f32 %v2867_v13, %v2699_v23  ;;  %v2533_v39 = vadd.f32 %v2532_v41, %v2364_v46  ;;  %2918 = vmatmul.bf16.gmra.mxu0 %v3762_v19  ;;  %v3793_v41 = vld [vmem:[%s5445_s20 + $0x90] sm:$0xf]  ;;  %v3801_v13 = vld [vmem:[%s5445_s20 + $0x98] sm:$0xf]  ;;  %v3798_v46 = vor.u32 %v5012_v3, %v3795_v10 }
 0x23c   : > { %3087 = vmatmul.bf16.gmra.mxu1 %v3766_v12  ;;  %v5017_v19 = vld [vmem:[%s5445_s20 + $0xb4] sm:$0xf0]  ;;  %v3803_v12 = vld [vmem:[%s5445_s20 + $0xb8] sm:$0xf0] }
 0x23d   : > { %6426 = vst [vmem:[#allocation11_spill] sm:$0xff] %v5992_v56  ;;  %3256 = vmatmul.bf16.gmra.mxu2 %v3770_v32  ;;  %v5013_v32 = vld [vmem:[%s5445_s20 + $0x9c] sm:$0xf]  ;;  %v3802_v48 = vor.u32 %v5017_v19, %v3801_v13 }
 0x23e   : > { %3425 = vmatmul.bf16.gmra.mxu3 %v3774_v49  ;;  %v3794_v49 = vor.u32 %v5016_v14, %v3793_v41 }
 0x240   : > { %v2701_v47 = vpop.f32.mrf.mxu2  ;;  %v2365_v1 = vpop.f32.mrf.mxu0 }
 0x241   : > { %v2870_v57 = vpop.f32.mrf.mxu3  ;;  %v2702_v4 = vadd.f32 %v2701_v47, %v2533_v39  ;;  %v2534_v52 = vpop.f32.mrf.mxu1  ;;  %v2366_v58 = vadd.f32 %v5837_v25, %v2365_v1  ;;  %v3806_v1 = vor.u32 %v5013_v32, %v3803_v12  ;;  %v5024_v32 = vld [vmem:[%s5445_s20 + $0xec] sm:$0xf0]  ;;  %v5020_v12 = vld [vmem:[%s5445_s20 + $0xd4] sm:$0xf] }
 0x243   : > { %v5995_v0 = vadd.f32 %v2870_v57, %v2702_v4  ;;  %v2535_v5 = vadd.f32 %v2534_v52, %v2366_v58 }
 0x245   : > { %6427 = vst [vmem:[#allocation12_spill] sm:$0xff] %v5995_v0 }
 0x248   : > { %v2703_v23 = vpop.f32.mrf.mxu2  ;;  %v2368_v47 = vpop.f32.mrf.mxu0 }
 0x249   : > { %v2872_v30 = vpop.f32.mrf.mxu3  ;;  %v2704_v39 = vadd.f32 %v2703_v23, %v2535_v5  ;;  %v2537_v56 = vpop.f32.mrf.mxu1  ;;  %v2369_v57 = vadd.f32 %v5837_v25, %v2368_v47  ;;  %v3827_v23 = vld [vmem:[%s5445_s20 + $0xf0] sm:$0xf0] }
 0x24b   : > { %v6006_v4 = vadd.f32 %v2872_v30, %v2704_v39  ;;  %v2538_v52 = vadd.f32 %v2537_v56, %v2369_v57  ;;  %2923 = vmatmul.bf16.gmra.mxu0 %v3794_v49  ;;  %v3825_v56 = vld [vmem:[%s5445_s20 + $0xd0] sm:$0xf]  ;;  %v3833_v30 = vld [vmem:[%s5445_s20 + $0xd8] sm:$0xf]  ;;  %v3830_v57 = vor.u32 %v5020_v12, %v3827_v23 }
 0x24c   : > { %3092 = vmatmul.bf16.gmra.mxu1 %v3798_v46  ;;  %v5025_v49 = vld [vmem:[%s5445_s20 + $0xf4] sm:$0xf0]  ;;  %v3835_v46 = vld [vmem:[%s5445_s20 + $0xf8] sm:$0xf0] }
 0x24d   : > { %6428 = vst [vmem:[#allocation13_spill] sm:$0xff] %v6006_v4  ;;  %3261 = vmatmul.bf16.gmra.mxu2 %v3802_v48  ;;  %v5021_v48 = vld [vmem:[%s5445_s20 + $0xdc] sm:$0xf]  ;;  %v3834_v0 = vor.u32 %v5025_v49, %v3833_v30 }
 0x24e   : > { %3430 = vmatmul.bf16.gmra.mxu3 %v3806_v1  ;;  %v3826_v1 = vor.u32 %v5024_v32, %v3825_v56 }
 0x250   : > { %v2706_v58 = vpop.f32.mrf.mxu2  ;;  %v2370_v14 = vpop.f32.mrf.mxu0 }
 0x251   : > { %v2875_v5 = vpop.f32.mrf.mxu3  ;;  %v2707_v41 = vadd.f32 %v2706_v58, %v2538_v52  ;;  %v2539_v3 = vpop.f32.mrf.mxu1  ;;  %v2371_v10 = vadd.f32 %v5837_v25, %v2370_v14  ;;  %v3838_v14 = vor.u32 %v5021_v48, %v3835_v46  ;;  %v5032_v48 = vld [vmem:[%s5445_s20 + $0x12c] sm:$0xf0]  ;;  %v5028_v46 = vld [vmem:[%s5445_s20 + $0x114] sm:$0xf] }
 0x253   : > { %v6009_v13 = vadd.f32 %v2875_v5, %v2707_v41  ;;  %v2540_v19 = vadd.f32 %v2539_v3, %v2371_v10 }
 0x255   : > { %6429 = vst [vmem:[#allocation14_spill] sm:$0xff] %v6009_v13 }
 0x258   : > { %v2708_v39 = vpop.f32.mrf.mxu2  ;;  %v2373_v58 = vpop.f32.mrf.mxu0 }
 0x259   : > { %v2877_v47 = vpop.f32.mrf.mxu3  ;;  %v2709_v52 = vadd.f32 %v2708_v39, %v2540_v19  ;;  %v2542_v4 = vpop.f32.mrf.mxu1  ;;  %v2374_v5 = vadd.f32 %v5837_v25, %v2373_v58  ;;  %v3859_v39 = vld [vmem:[%s5445_s20 + $0x130] sm:$0xf0] }
 0x25b   : > { %v6020_v41 = vadd.f32 %v2877_v47, %v2709_v52  ;;  %v2543_v3 = vadd.f32 %v2542_v4, %v2374_v5  ;;  %2928 = vmatmul.bf16.gmra.mxu0 %v3826_v1  ;;  %v3857_v4 = vld [vmem:[%s5445_s20 + $0x110] sm:$0xf]  ;;  %v3865_v47 = vld [vmem:[%s5445_s20 + $0x118] sm:$0xf]  ;;  %v3862_v5 = vor.u32 %v5028_v46, %v3859_v39 }
 0x25c   : > { %3097 = vmatmul.bf16.gmra.mxu1 %v3830_v57  ;;  %v5033_v1 = vld [vmem:[%s5445_s20 + $0x134] sm:$0xf0]  ;;  %v3867_v57 = vld [vmem:[%s5445_s20 + $0x138] sm:$0xf0] }
 0x25d   : > { %6430 = vst [vmem:[#allocation15_spill] sm:$0xff] %v6020_v41  ;;  %3266 = vmatmul.bf16.gmra.mxu2 %v3834_v0  ;;  %v5029_v0 = vld [vmem:[%s5445_s20 + $0x11c] sm:$0xf]  ;;  %v3866_v13 = vor.u32 %v5033_v1, %v3865_v47 }
 0x25e   : > { %3435 = vmatmul.bf16.gmra.mxu3 %v3838_v14  ;;  %v3858_v14 = vor.u32 %v5032_v48, %v3857_v4 }
 0x260   : > { %v2711_v10 = vpop.f32.mrf.mxu2  ;;  %v2375_v32 = vpop.f32.mrf.mxu0 }
 0x261   : > { %v2880_v19 = vpop.f32.mrf.mxu3  ;;  %v2712_v56 = vadd.f32 %v2711_v10, %v2543_v3  ;;  %v2544_v12 = vpop.f32.mrf.mxu1  ;;  %v2376_v23 = vadd.f32 %v5837_v25, %v2375_v32  ;;  %v3870_v32 = vor.u32 %v5029_v0, %v3867_v57  ;;  %v5040_v0 = vld [vmem:[%s5445_s20 + $0x16c] sm:$0xf0]  ;;  %v5036_v57 = vld [vmem:[%s5445_s20 + $0x154] sm:$0xf] }
 0x263   : > { %v6023_v30 = vadd.f32 %v2880_v19, %v2712_v56  ;;  %v2545_v49 = vadd.f32 %v2544_v12, %v2376_v23 }
 0x265   : > { %6431 = vst [vmem:[#allocation16_spill] sm:$0xff] %v6023_v30 }
 0x268   : > { %v2713_v52 = vpop.f32.mrf.mxu2  ;;  %v2378_v10 = vpop.f32.mrf.mxu0 }
 0x269   : > { %v2882_v58 = vpop.f32.mrf.mxu3  ;;  %v2714_v3 = vadd.f32 %v2713_v52, %v2545_v49  ;;  %v2547_v41 = vpop.f32.mrf.mxu1  ;;  %v2379_v19 = vadd.f32 %v5837_v25, %v2378_v10  ;;  %v3891_v52 = vld [vmem:[%s5445_s20 + $0x170] sm:$0xf0] }
 0x26b   : > { %v6034_v56 = vadd.f32 %v2882_v58, %v2714_v3  ;;  %v2548_v12 = vadd.f32 %v2547_v41, %v2379_v19  ;;  %2933 = vmatmul.bf16.gmra.mxu0 %v3858_v14  ;;  %v3889_v41 = vld [vmem:[%s5445_s20 + $0x150] sm:$0xf]  ;;  %v3897_v58 = vld [vmem:[%s5445_s20 + $0x158] sm:$0xf]  ;;  %v3894_v19 = vor.u32 %v5036_v57, %v3891_v52 }
 0x26c   : > { %3102 = vmatmul.bf16.gmra.mxu1 %v3862_v5  ;;  %v5041_v14 = vld [vmem:[%s5445_s20 + $0x174] sm:$0xf0]  ;;  %v3899_v5 = vld [vmem:[%s5445_s20 + $0x178] sm:$0xf0] }
 0x26d   : > { %6432 = vst [vmem:[#allocation17_spill] sm:$0xff] %v6034_v56  ;;  %3271 = vmatmul.bf16.gmra.mxu2 %v3866_v13  ;;  %v5037_v13 = vld [vmem:[%s5445_s20 + $0x15c] sm:$0xf]  ;;  %v3898_v30 = vor.u32 %v5041_v14, %v3897_v58 }
 0x26e   : > { %3440 = vmatmul.bf16.gmra.mxu3 %v3870_v32  ;;  %v3890_v32 = vor.u32 %v5040_v0, %v3889_v41 }
 0x270   : > { %v2716_v23 = vpop.f32.mrf.mxu2  ;;  %v2380_v48 = vpop.f32.mrf.mxu0 }
 0x271   : > { %v2885_v49 = vpop.f32.mrf.mxu3  ;;  %v2717_v4 = vadd.f32 %v2716_v23, %v2548_v12  ;;  %v2549_v46 = vpop.f32.mrf.mxu1  ;;  %v2381_v39 = vadd.f32 %v5837_v25, %v2380_v48  ;;  %v3902_v48 = vor.u32 %v5037_v13, %v3899_v5  ;;  %v5048_v13 = vld [vmem:[%s5445_s20 + $0x1ac] sm:$0xf0]  ;;  %v5044_v5 = vld [vmem:[%s5445_s20 + $0x194] sm:$0xf] }
 0x273   : > { %v6037_v47 = vadd.f32 %v2885_v49, %v2717_v4  ;;  %v2550_v1 = vadd.f32 %v2549_v46, %v2381_v39 }
 0x275   : > { %6433 = vst [vmem:[#allocation18_spill] sm:$0xff] %v6037_v47 }
 0x278   : > { %v2718_v3 = vpop.f32.mrf.mxu2  ;;  %v2383_v23 = vpop.f32.mrf.mxu0 }
 0x279   : > { %v2887_v10 = vpop.f32.mrf.mxu3  ;;  %v2719_v12 = vadd.f32 %v2718_v3, %v2550_v1  ;;  %v2552_v56 = vpop.f32.mrf.mxu1  ;;  %v2384_v49 = vadd.f32 %v5837_v25, %v2383_v23  ;;  %v3923_v3 = vld [vmem:[%s5445_s20 + $0x1b0] sm:$0xf0] }
 0x27b   : > { %v6048_v4 = vadd.f32 %v2887_v10, %v2719_v12  ;;  %v2553_v46 = vadd.f32 %v2552_v56, %v2384_v49  ;;  %2938 = vmatmul.bf16.gmra.mxu0 %v3890_v32  ;;  %v3921_v56 = vld [vmem:[%s5445_s20 + $0x190] sm:$0xf]  ;;  %v3929_v10 = vld [vmem:[%s5445_s20 + $0x198] sm:$0xf]  ;;  %v3926_v49 = vor.u32 %v5044_v5, %v3923_v3 }
 0x27c   : > { %3107 = vmatmul.bf16.gmra.mxu1 %v3894_v19  ;;  %v5049_v32 = vld [vmem:[%s5445_s20 + $0x1b4] sm:$0xf0]  ;;  %v3931_v19 = vld [vmem:[%s5445_s20 + $0x1b8] sm:$0xf0] }
 0x27d   : > { %6434 = vst [vmem:[#allocation19_spill] sm:$0xff] %v6048_v4  ;;  %3276 = vmatmul.bf16.gmra.mxu2 %v3898_v30  ;;  %v5045_v30 = vld [vmem:[%s5445_s20 + $0x19c] sm:$0xf]  ;;  %v3930_v47 = vor.u32 %v5049_v32, %v3929_v10 }
 0x27e   : > { %3445 = vmatmul.bf16.gmra.mxu3 %v3902_v48  ;;  %v3922_v48 = vor.u32 %v5048_v13, %v3921_v56 }
 0x280   : > { %v2721_v39 = vpop.f32.mrf.mxu2  ;;  %v2385_v0 = vpop.f32.mrf.mxu0 }
 0x281   : > { %v2890_v1 = vpop.f32.mrf.mxu3  ;;  %v2722_v41 = vadd.f32 %v2721_v39, %v2553_v46  ;;  %v2554_v57 = vpop.f32.mrf.mxu1  ;;  %v2386_v52 = vadd.f32 %v5837_v25, %v2385_v0  ;;  %v3934_v0 = vor.u32 %v5045_v30, %v3931_v19  ;;  %v5056_v30 = vld [vmem:[%s5445_s20 + $0x1ec] sm:$0xf0]  ;;  %v5052_v19 = vld [vmem:[%s5445_s20 + $0x1d4] sm:$0xf] }
 0x283   : > { %v6051_v58 = vadd.f32 %v2890_v1, %v2722_v41  ;;  %v2555_v14 = vadd.f32 %v2554_v57, %v2386_v52 }
 0x285   : > { %6435 = vst [vmem:[#allocation20_spill] sm:$0xff] %v6051_v58 }
 0x288   : > { %v2723_v12 = vpop.f32.mrf.mxu2  ;;  %v2388_v39 = vpop.f32.mrf.mxu0 }
 0x289   : > { %v2892_v23 = vpop.f32.mrf.mxu3  ;;  %v2724_v46 = vadd.f32 %v2723_v12, %v2555_v14  ;;  %v2557_v4 = vpop.f32.mrf.mxu1  ;;  %v2389_v1 = vadd.f32 %v5837_v25, %v2388_v39  ;;  %v3955_v12 = vld [vmem:[%s5445_s20 + $0x1f0] sm:$0xf0] }
 0x28b   : > { %v6062_v41 = vadd.f32 %v2892_v23, %v2724_v46  ;;  %v2558_v57 = vadd.f32 %v2557_v4, %v2389_v1  ;;  %2943 = vmatmul.bf16.gmra.mxu0 %v3922_v48  ;;  %v3953_v4 = vld [vmem:[%s5445_s20 + $0x1d0] sm:$0xf]  ;;  %v3961_v23 = vld [vmem:[%s5445_s20 + $0x1d8] sm:$0xf]  ;;  %v3958_v1 = vor.u32 %v5052_v19, %v3955_v12 }
 0x28c   : > { %3112 = vmatmul.bf16.gmra.mxu1 %v3926_v49  ;;  %v5057_v48 = vld [vmem:[%s5445_s20 + $0x1f4] sm:$0xf0]  ;;  %v3963_v49 = vld [vmem:[%s5445_s20 + $0x1f8] sm:$0xf0] }
 0x28d   : > { %6436 = vst [vmem:[#allocation21_spill] sm:$0xff] %v6062_v41  ;;  %3281 = vmatmul.bf16.gmra.mxu2 %v3930_v47  ;;  %v5053_v47 = vld [vmem:[%s5445_s20 + $0x1dc] sm:$0xf]  ;;  %v3962_v58 = vor.u32 %v5057_v48, %v3961_v23 }
 0x28e   : > { %3450 = vmatmul.bf16.gmra.mxu3 %v3934_v0  ;;  %v3954_v0 = vor.u32 %v5056_v30, %v3953_v4 }
 0x290   : > { %v2726_v52 = vpop.f32.mrf.mxu2  ;;  %v2390_v13 = vpop.f32.mrf.mxu0 }
 0x291   : > { %v2895_v14 = vpop.f32.mrf.mxu3  ;;  %v2727_v56 = vadd.f32 %v2726_v52, %v2558_v57  ;;  %v2559_v5 = vpop.f32.mrf.mxu1  ;;  %v2391_v3 = vadd.f32 %v5837_v25, %v2390_v13  ;;  %v3966_v25 = vor.u32 %v5053_v47, %v3963_v49  ;;  %v3985_v47 = vld [vmem:[%s5445_s20 + $0x210] sm:$0xf]  ;;  %v5060_v49 = vld [vmem:[%s5445_s20 + $0x214] sm:$0xf] }
 0x293   : > { %v6065_v10 = vadd.f32 %v2895_v14, %v2727_v56  ;;  %v2560_v32 = vadd.f32 %v2559_v5, %v2391_v3  ;;  %v5324_v14 = vld [vmem:[%s6415_s2] ss:$0 sm:$0xff] }
 0x298   : > { %v2728_v46 = vpop.f32.mrf.mxu2  ;;  %v2393_v52 = vpop.f32.mrf.mxu0 }
 0x299   : > { %v2897_v39 = vpop.f32.mrf.mxu3  ;;  %v2729_v57 = vadd.f32 %v2728_v46, %v2560_v32  ;;  %v2562_v41 = vpop.f32.mrf.mxu1  ;;  %v2394_v56 = vadd.f32 %v5324_v14, %v2393_v52  ;;  %v3987_v46 = vld [vmem:[%s5445_s20 + $0x230] sm:$0xf0] }
 0x29b   : > { %v6078_v13 = vadd.f32 %v2897_v39, %v2729_v57  ;;  %v2563_v5 = vadd.f32 %v2562_v41, %v2394_v56  ;;  %2948 = vmatmul.bf16.gmra.mxu0 %v3954_v0  ;;  %v5064_v41 = vld [vmem:[%s5445_s20 + $0x22c] sm:$0xf0]  ;;  %v3993_v39 = vld [vmem:[%s5445_s20 + $0x218] sm:$0xf]  ;;  %v3990_v56 = vor.u32 %v5060_v49, %v3987_v46 }
 0x29c   : > { %3117 = vmatmul.bf16.gmra.mxu1 %v3958_v1  ;;  %v5065_v0 = vld [vmem:[%s5445_s20 + $0x234] sm:$0xf0]  ;;  %v5061_v1 = vld [vmem:[%s5445_s20 + $0x21c] sm:$0xf] }
 0x29d   : > { %6437 = vst [vmem:[#allocation22_spill] sm:$0xff] %v6078_v13  ;;  %3286 = vmatmul.bf16.gmra.mxu2 %v3962_v58  ;;  %v3995_v58 = vld [vmem:[%s5445_s20 + $0x238] sm:$0xf0] }
 0x29e   : > { %3455 = vmatmul.bf16.gmra.mxu3 %v3966_v25  ;;  %v3986_v25 = vor.u32 %v5064_v41, %v3985_v47 }
 0x2a0   : > { %v2731_v3 = vpop.f32.mrf.mxu2  ;;  %v2395_v30 = vpop.f32.mrf.mxu0 }
 0x2a1   : > { %v2900_v32 = vpop.f32.mrf.mxu3  ;;  %v2732_v4 = vadd.f32 %v2731_v3, %v2563_v5  ;;  %v2564_v19 = vpop.f32.mrf.mxu1  ;;  %v2396_v12 = vadd.f32 %v5324_v14, %v2395_v30  ;;  %v3994_v14 = vor.u32 %v5065_v0, %v3993_v39  ;;  %v4017_v39 = vld [vmem:[%s5445_s20 + $0x250] sm:$0xf]  ;;  %v5068_v0 = vld [vmem:[%s5445_s20 + $0x254] sm:$0xf] }
 0x2a3   : > { %v6080_v23 = vadd.f32 %v2900_v32, %v2732_v4  ;;  %v2565_v48 = vadd.f32 %v2564_v19, %v2396_v12  ;;  %v3998_v32 = vor.u32 %v5061_v1, %v3995_v58  ;;  %v4019_v1 = vld [vmem:[%s5445_s20 + $0x270] sm:$0xf0]  ;;  %v4025_v58 = vld [vmem:[%s5445_s20 + $0x258] sm:$0xf] }
 0x2a8   : > { %v2733_v57 = vpop.f32.mrf.mxu2  ;;  %v2914_v3 = vpop.f32.mrf.mxu0 }
 0x2a9   : > { %v2902_v52 = vpop.f32.mrf.mxu3  ;;  %v2734_v5 = vadd.f32 %v2733_v57, %v2565_v48  ;;  %v3083_v13 = vpop.f32.mrf.mxu1  ;;  %v2915_v30 = vadd.f32 %v2914_v3, %v5580_v35  ;;  %v5073_v57 = vld [vmem:[%s5445_s20 + $0x274] sm:$0xf0] }
 0x2ab   : > { %v6090_v4 = vadd.f32 %v2902_v52, %v2734_v5  ;;  %2953 = vmatmul.bf16.gmra.mxu0 %v3986_v25  ;;  %v3084_v19 = vadd.f32 %v3083_v13, %v2915_v30  ;;  %v5072_v13 = vld [vmem:[%s5445_s20 + $0x26c] sm:$0xf0]  ;;  %v5069_v52 = vld [vmem:[%s5445_s20 + $0x25c] sm:$0xf] }
 0x2ac   : > { %3122 = vmatmul.bf16.gmra.mxu1 %v3990_v56  ;;  %v4027_v25 = vld [vmem:[%s5445_s20 + $0x278] sm:$0xf0] }
 0x2ad   : > { %3291 = vmatmul.bf16.gmra.mxu2 %v3994_v14  ;;  %v4018_v14 = vor.u32 %v5072_v13, %v4017_v39 }
 0x2ae   : > { %3460 = vmatmul.bf16.gmra.mxu3 %v3998_v32  ;;  %v4022_v32 = vor.u32 %v5068_v0, %v4019_v1 }
 0x2b0   : > { %v3252_v12 = vpop.f32.mrf.mxu2  ;;  %v2916_v41 = vpop.f32.mrf.mxu0 }
 0x2b1   : > { %v3421_v48 = vpop.f32.mrf.mxu3  ;;  %v3253_v47 = vadd.f32 %v3252_v12, %v3084_v19  ;;  %v3085_v49 = vpop.f32.mrf.mxu1  ;;  %v2917_v46 = vadd.f32 %v2916_v41, %v5591_v55  ;;  %v4030_v55 = vor.u32 %v5069_v52, %v4027_v25  ;;  %v5076_v52 = vld [vmem:[%s5445_s20 + $0x294] sm:$0xf] }
 0x2b2   : > { %v4051_v25 = vld [vmem:[%s5445_s20 + $0x2b0] sm:$0xf0] }
 0x2b3   : > { %v3422_v35 = vadd.f32 %v3421_v48, %v3253_v47  ;;  %v3086_v56 = vadd.f32 %v3085_v49, %v2917_v46  ;;  %v4026_v48 = vor.u32 %v5073_v57, %v4025_v58  ;;  %v4049_v58 = vld [vmem:[%s5445_s20 + $0x290] sm:$0xf] }
 0x2b4   : > { %v5080_v57 = vld [vmem:[%s5445_s20 + $0x2ac] sm:$0xf0] }
 0x2b5   : > { %3581 = vst [vmem:[%s6097_s6] sm:$0xff] %v3422_v35 }
 0x2b8   : > { %v3254_v5 = vpop.f32.mrf.mxu2  ;;  %v2919_v19 = vpop.f32.mrf.mxu0 }
 0x2b9   : > { %v3423_v3 = vpop.f32.mrf.mxu3  ;;  %v3255_v30 = vadd.f32 %v3254_v5, %v3086_v56  ;;  %v3088_v12 = vpop.f32.mrf.mxu1  ;;  %v2920_v41 = vadd.f32 %v2919_v19, %v5594_v63  ;;  %v4057_v56 = vld [vmem:[%s5445_s20 + $0x298] sm:$0xf] }
 0x2ba   : > { %v5081_v5 = vld [vmem:[%s5445_s20 + $0x2b4] sm:$0xf0] }
 0x2bb   : > { %v3424_v47 = vadd.f32 %v3423_v3, %v3255_v30  ;;  %2958 = vmatmul.bf16.gmra.mxu0 %v4018_v14  ;;  %v3089_v49 = vadd.f32 %v3088_v12, %v2920_v41  ;;  %v5077_v3 = vld [vmem:[%s5445_s20 + $0x29c] sm:$0xf]  ;;  %v4050_v12 = vor.u32 %v5080_v57, %v4049_v58 }
 0x2bc   : > { %3127 = vmatmul.bf16.gmra.mxu1 %v4022_v32  ;;  %v4059_v14 = vld [vmem:[%s5445_s20 + $0x2b8] sm:$0xf0] }
 0x2bd   : > { %3582 = vst [vmem:[%s6097_s6 + $0x8] sm:$0xff] %v3424_v47  ;;  %3296 = vmatmul.bf16.gmra.mxu2 %v4026_v48  ;;  %v4054_v48 = vor.u32 %v5076_v52, %v4051_v25  ;;  %v4081_v52 = vld [vmem:[%s5445_s20 + $0x2d0] sm:$0xf] }
 0x2be   : > { %3465 = vmatmul.bf16.gmra.mxu3 %v4030_v55  ;;  %v5088_v25 = vld [vmem:[%s5445_s20 + $0x2ec] sm:$0xf0] }
 0x2c0   : > { %v3257_v35 = vpop.f32.mrf.mxu2  ;;  %v2921_v13 = vpop.f32.mrf.mxu0 }
 0x2c1   : > { %v3426_v46 = vpop.f32.mrf.mxu3  ;;  %v3258_v39 = vadd.f32 %v3257_v35, %v3089_v49  ;;  %v3090_v0 = vpop.f32.mrf.mxu1  ;;  %v2922_v63 = vadd.f32 %v2921_v13, %v5605_v20  ;;  %v4058_v49 = vor.u32 %v5081_v5, %v4057_v56  ;;  %v4062_v20 = vor.u32 %v5077_v3, %v4059_v14  ;;  %v5084_v56 = vld [vmem:[%s5445_s20 + $0x2d4] sm:$0xf]  ;;  %v4089_v3 = vld [vmem:[%s5445_s20 + $0x2d8] sm:$0xf] }
 0x2c2   : > { %v4083_v5 = vld [vmem:[%s5445_s20 + $0x2f0] sm:$0xf0]  ;;  %v5089_v14 = vld [vmem:[%s5445_s20 + $0x2f4] sm:$0xf0] }
 0x2c3   : > { %v3427_v1 = vadd.f32 %v3426_v46, %v3258_v39  ;;  %v3091_v32 = vadd.f32 %v3090_v0, %v2922_v63 }
 0x2c5   : > { %3583 = vst [vmem:[%s6097_s6 + $0x10] sm:$0xff] %v3427_v1 }
 0x2c8   : > { %v3259_v30 = vpop.f32.mrf.mxu2  ;;  %v2924_v47 = vpop.f32.mrf.mxu0 }
 0x2c9   : > { %v3428_v19 = vpop.f32.mrf.mxu3  ;;  %v3260_v55 = vadd.f32 %v3259_v30, %v3091_v32  ;;  %v3093_v41 = vpop.f32.mrf.mxu1  ;;  %v2925_v46 = vadd.f32 %v2924_v47, %v5617_v31  ;;  %v5085_v32 = vld [vmem:[%s5445_s20 + $0x2dc] sm:$0xf]  ;;  %v4086_v47 = vor.u32 %v5084_v56, %v4083_v5  ;;  %v5092_v56 = vld [vmem:[%s5445_s20 + $0x314] sm:$0xf] }
 0x2ca   : > { %v4091_v30 = vld [vmem:[%s5445_s20 + $0x2f8] sm:$0xf0]  ;;  %v4115_v5 = vld [vmem:[%s5445_s20 + $0x330] sm:$0xf0] }
 0x2cb   : > { %v3429_v35 = vadd.f32 %v3428_v19, %v3260_v55  ;;  %2963 = vmatmul.bf16.gmra.mxu0 %v4050_v12  ;;  %v3094_v39 = vadd.f32 %v3093_v41, %v2925_v46  ;;  %v4082_v55 = vor.u32 %v5088_v25, %v4081_v52  ;;  %v4113_v52 = vld [vmem:[%s5445_s20 + $0x310] sm:$0xf] }
 0x2cc   : > { %3132 = vmatmul.bf16.gmra.mxu1 %v4054_v48  ;;  %v5096_v25 = vld [vmem:[%s5445_s20 + $0x32c] sm:$0xf0] }
 0x2cd   : > { %3584 = vst [vmem:[%s6097_s6 + $0x18] sm:$0xff] %v3429_v35  ;;  %3301 = vmatmul.bf16.gmra.mxu2 %v4058_v49  ;;  %v4090_v35 = vor.u32 %v5089_v14, %v4089_v3  ;;  %v4121_v3 = vld [vmem:[%s5445_s20 + $0x318] sm:$0xf] }
 0x2ce   : > { %3470 = vmatmul.bf16.gmra.mxu3 %v4062_v20  ;;  %v5097_v14 = vld [vmem:[%s5445_s20 + $0x334] sm:$0xf0] }
 0x2d0   : > { %v3262_v13 = vpop.f32.mrf.mxu2  ;;  %v2926_v63 = vpop.f32.mrf.mxu0 }
 0x2d1   : > { %v3431_v0 = vpop.f32.mrf.mxu3  ;;  %v3263_v1 = vadd.f32 %v3262_v13, %v3094_v39  ;;  %v3095_v58 = vpop.f32.mrf.mxu1  ;;  %v2927_v31 = vadd.f32 %v2926_v63, %v5631_v53  ;;  %v4094_v53 = vor.u32 %v5085_v32, %v4091_v30  ;;  %v5093_v32 = vld [vmem:[%s5445_s20 + $0x31c] sm:$0xf] }
 0x2d2   : > { %v4123_v30 = vld [vmem:[%s5445_s20 + $0x338] sm:$0xf0] }
 0x2d3   : > { %v3432_v57 = vadd.f32 %v3431_v0, %v3263_v1  ;;  %v3096_v19 = vadd.f32 %v3095_v58, %v2927_v31 }
 0x2d5   : > { %3585 = vst [vmem:[%s6097_s6 + $0x20] sm:$0xff] %v3432_v57 }
 0x2d8   : > { %v3264_v12 = vpop.f32.mrf.mxu2  ;;  %v2929_v49 = vpop.f32.mrf.mxu0 }
 0x2d9   : > { %v3433_v48 = vpop.f32.mrf.mxu3  ;;  %v3265_v41 = vadd.f32 %v3264_v12, %v3096_v19  ;;  %v3098_v20 = vpop.f32.mrf.mxu1  ;;  %v2930_v39 = vadd.f32 %v2929_v49, %v5634_v62 }
 0x2db   : > { %v3434_v46 = vadd.f32 %v3433_v48, %v3265_v41  ;;  %2968 = vmatmul.bf16.gmra.mxu0 %v4082_v55  ;;  %v3099_v13 = vadd.f32 %v3098_v20, %v2930_v39  ;;  %v4114_v55 = vor.u32 %v5096_v25, %v4113_v52  ;;  %v5100_v52 = vld [vmem:[%s5445_s20 + $0x354] sm:$0xf] }
 0x2dc   : > { %3137 = vmatmul.bf16.gmra.mxu1 %v4086_v47  ;;  %v4118_v47 = vor.u32 %v5092_v56, %v4115_v5  ;;  %v4147_v25 = vld [vmem:[%s5445_s20 + $0x370] sm:$0xf0]  ;;  %v4153_v56 = vld [vmem:[%s5445_s20 + $0x358] sm:$0xf] }
 0x2dd   : > { %3586 = vst [vmem:[%s6097_s6 + $0x28] sm:$0xff] %v3434_v46  ;;  %3306 = vmatmul.bf16.gmra.mxu2 %v4090_v35  ;;  %v4122_v35 = vor.u32 %v5097_v14, %v4121_v3  ;;  %v5105_v5 = vld [vmem:[%s5445_s20 + $0x374] sm:$0xf0]  ;;  %v5101_v3 = vld [vmem:[%s5445_s20 + $0x35c] sm:$0xf] }
 0x2de   : > { %3475 = vmatmul.bf16.gmra.mxu3 %v4094_v53  ;;  %v4155_v14 = vld [vmem:[%s5445_s20 + $0x378] sm:$0xf0] }
 0x2e0   : > { %v3267_v0 = vpop.f32.mrf.mxu2  ;;  %v2931_v58 = vpop.f32.mrf.mxu0 }
 0x2e1   : > { %v3436_v1 = vpop.f32.mrf.mxu3  ;;  %v3268_v63 = vadd.f32 %v3267_v0, %v3099_v13  ;;  %v3100_v57 = vpop.f32.mrf.mxu1  ;;  %v2932_v62 = vadd.f32 %v2931_v58, %v5645_v21  ;;  %v4126_v21 = vor.u32 %v5093_v32, %v4123_v30 }
 0x2e3   : > { %v3437_v31 = vadd.f32 %v3436_v1, %v3268_v63  ;;  %v3101_v19 = vadd.f32 %v3100_v57, %v2932_v62  ;;  %v5104_v62 = vld [vmem:[%s5445_s20 + $0x36c] sm:$0xf0] }
 0x2e5   : > { %3587 = vst [vmem:[%s6097_s6 + $0x30] sm:$0xff] %v3437_v31  ;;  %v4145_v31 = vld [vmem:[%s5445_s20 + $0x350] sm:$0xf] }
 0x2e8   : > { %v3269_v12 = vpop.f32.mrf.mxu2  ;;  %v2934_v49 = vpop.f32.mrf.mxu0 }
 0x2e9   : > { %v3438_v48 = vpop.f32.mrf.mxu3  ;;  %v3270_v41 = vadd.f32 %v3269_v12, %v3101_v19  ;;  %v3103_v20 = vpop.f32.mrf.mxu1  ;;  %v2935_v46 = vadd.f32 %v2934_v49, %v5648_v29  ;;  %v4146_v12 = vor.u32 %v5104_v62, %v4145_v31  ;;  %v4154_v49 = vor.u32 %v5105_v5, %v4153_v56  ;;  %v4185_v31 = vld [vmem:[%s5445_s20 + $0x398] sm:$0xf] }
 0x2ea   : > { %v5113_v62 = vld [vmem:[%s5445_s20 + $0x3b4] sm:$0xf0] }
 0x2eb   : > { %v3439_v53 = vadd.f32 %v3438_v48, %v3270_v41  ;;  %2973 = vmatmul.bf16.gmra.mxu0 %v4114_v55  ;;  %v3104_v39 = vadd.f32 %v3103_v20, %v2935_v46  ;;  %v4150_v48 = vor.u32 %v5100_v52, %v4147_v25  ;;  %v5109_v52 = vld [vmem:[%s5445_s20 + $0x39c] sm:$0xf] }
 0x2ec   : > { %3142 = vmatmul.bf16.gmra.mxu1 %v4118_v47  ;;  %v4187_v25 = vld [vmem:[%s5445_s20 + $0x3b8] sm:$0xf0] }
 0x2ed   : > { %3588 = vst [vmem:[%s6097_s6 + $0x38] sm:$0xff] %v3439_v53  ;;  %3311 = vmatmul.bf16.gmra.mxu2 %v4122_v35 }
 0x2ee   : > { %3480 = vmatmul.bf16.gmra.mxu3 %v4126_v21 }
 0x2f0   : > { %v3272_v13 = vpop.f32.mrf.mxu2  ;;  %v2936_v63 = vpop.f32.mrf.mxu0 }
 0x2f1   : > { %v3441_v0 = vpop.f32.mrf.mxu3  ;;  %v3273_v1 = vadd.f32 %v3272_v13, %v3104_v39  ;;  %v3105_v58 = vpop.f32.mrf.mxu1  ;;  %v2937_v29 = vadd.f32 %v2936_v63, %v5659_v51  ;;  %v4158_v51 = vor.u32 %v5101_v3, %v4155_v14  ;;  %v4177_v63 = vld [vmem:[%s5445_s20 + $0x390] sm:$0xf] }
 0x2f3   : > { %v3442_v57 = vadd.f32 %v3441_v0, %v3273_v1  ;;  %v3106_v32 = vadd.f32 %v3105_v58, %v2937_v29  ;;  %v5112_v58 = vld [vmem:[%s5445_s20 + $0x3ac] sm:$0xf0]  ;;  %v4179_v29 = vld [vmem:[%s5445_s20 + $0x3b0] sm:$0xf0] }
 0x2f4   : > { %v4178_v14 = vor.u32 %v5112_v58, %v4177_v63  ;;  %v5117_v63 = vld [vmem:[%s5445_s20 + $0x3dc] sm:$0xf] }
 0x2f5   : > { %3589 = vst [vmem:[%s6097_s6 + $0x40] sm:$0xff] %v3442_v57  ;;  %v5108_v57 = vld [vmem:[%s5445_s20 + $0x394] sm:$0xf]  ;;  %v4219_v58 = vld [vmem:[%s5445_s20 + $0x3f8] sm:$0xf0] }
 0x2f8   : > { %v3274_v30 = vpop.f32.mrf.mxu2  ;;  %v2939_v47 = vpop.f32.mrf.mxu0 }
 0x2f9   : > { %v3443_v19 = vpop.f32.mrf.mxu3  ;;  %v3275_v55 = vadd.f32 %v3274_v30, %v3106_v32  ;;  %v3108_v41 = vpop.f32.mrf.mxu1  ;;  %v2940_v35 = vadd.f32 %v2939_v47, %v5662_v61  ;;  %v4182_v32 = vor.u32 %v5108_v57, %v4179_v29 }
 0x2fb   : > { %v3444_v20 = vadd.f32 %v3443_v19, %v3275_v55  ;;  %2978 = vmatmul.bf16.gmra.mxu0 %v4146_v12  ;;  %v3109_v21 = vadd.f32 %v3108_v41, %v2940_v35 }
 0x2fc   : > { %3147 = vmatmul.bf16.gmra.mxu1 %v4150_v48  ;;  %v4186_v48 = vor.u32 %v5113_v62, %v4185_v31 }
 0x2fd   : > { %3590 = vst [vmem:[%s6097_s6 + $0x48] sm:$0xff] %v3444_v20  ;;  %3316 = vmatmul.bf16.gmra.mxu2 %v4154_v49 }
 0x2fe   : > { %3485 = vmatmul.bf16.gmra.mxu3 %v4158_v51 }
 0x300   : > { %v3277_v53 = vpop.f32.mrf.mxu2  ;;  %v2941_v13 = vpop.f32.mrf.mxu0 }
 0x301   : > { %v3446_v46 = vpop.f32.mrf.mxu3  ;;  %v3278_v39 = vadd.f32 %v3277_v53, %v3109_v21  ;;  %v3110_v0 = vpop.f32.mrf.mxu1  ;;  %v2942_v61 = vadd.f32 %v2941_v13, %v5673_v22  ;;  %v4190_v22 = vor.u32 %v5109_v52, %v4187_v25  ;;  %v5116_v13 = vld [vmem:[%s5445_s20 + $0x3d4] sm:$0xf] }
 0x303   : > { %v3447_v1 = vadd.f32 %v3446_v46, %v3278_v39  ;;  %v3111_v56 = vadd.f32 %v3110_v0, %v2942_v61  ;;  %v4209_v46 = vld [vmem:[%s5445_s20 + $0x3d0] sm:$0xf]  ;;  %v4211_v0 = vld [vmem:[%s5445_s20 + $0x3f0] sm:$0xf0]  ;;  %v5121_v61 = vld [vmem:[%s5445_s20 + $0x3f4] sm:$0xf0] }
 0x304   : > { %v5120_v39 = vld [vmem:[%s5445_s20 + $0x3ec] sm:$0xf0]  ;;  %v4214_v52 = vor.u32 %v5116_v13, %v4211_v0 }
 0x305   : > { %3591 = vst [vmem:[%s6097_s6 + $0x50] sm:$0xff] %v3447_v1  ;;  %v4217_v1 = vld [vmem:[%s5445_s20 + $0x3d8] sm:$0xf]  ;;  %v4210_v62 = vor.u32 %v5120_v39, %v4209_v46 }
 0x308   : > { %v3279_v5 = vpop.f32.mrf.mxu2  ;;  %v2944_v19 = vpop.f32.mrf.mxu0 }
 0x309   : > { %v3448_v3 = vpop.f32.mrf.mxu3  ;;  %v3280_v30 = vadd.f32 %v3279_v5, %v3111_v56  ;;  %v3113_v12 = vpop.f32.mrf.mxu1  ;;  %v2945_v47 = vadd.f32 %v2944_v19, %v5685_v36 }
 0x30b   : > { %v3449_v55 = vadd.f32 %v3448_v3, %v3280_v30  ;;  %2983 = vmatmul.bf16.gmra.mxu0 %v4178_v14  ;;  %v3114_v41 = vadd.f32 %v3113_v12, %v2945_v47  ;;  %v4218_v3 = vor.u32 %v5121_v61, %v4217_v1 }
 0x30c   : > { %3152 = vmatmul.bf16.gmra.mxu1 %v4182_v32 }
 0x30d   : > { %3592 = vst [vmem:[%s6097_s6 + $0x58] sm:$0xff] %v3449_v55  ;;  %3321 = vmatmul.bf16.gmra.mxu2 %v4186_v48 }
 0x30e   : > { %3490 = vmatmul.bf16.gmra.mxu3 %v4190_v22 }
 0x310   : > { %v3282_v49 = vpop.f32.mrf.mxu2  ;;  %v2946_v35 = vpop.f32.mrf.mxu0 }
 0x311   : > { %v3451_v51 = vpop.f32.mrf.mxu3  ;;  %v3283_v20 = vadd.f32 %v3282_v49, %v3114_v41  ;;  %v3115_v21 = vpop.f32.mrf.mxu1  ;;  %v2947_v36 = vadd.f32 %v2946_v35, %v5699_v60  ;;  %v4222_v60 = vor.u32 %v5117_v63, %v4219_v58  ;;  %v4241_v41 = vld [vmem:[%s5445_s20 + $0x410] sm:$0xf]  ;;  %v4249_v35 = vld [vmem:[%s5445_s20 + $0x418] sm:$0xf] }
 0x312   : > { %v5128_v49 = vld [vmem:[%s5445_s20 + $0x42c] sm:$0xf0] }
 0x313   : > { %v3452_v53 = vadd.f32 %v3451_v51, %v3283_v20  ;;  %v3116_v57 = vadd.f32 %v3115_v21, %v2947_v36  ;;  %v5124_v51 = vld [vmem:[%s5445_s20 + $0x414] sm:$0xf]  ;;  %v5129_v21 = vld [vmem:[%s5445_s20 + $0x434] sm:$0xf0]  ;;  %v4251_v36 = vld [vmem:[%s5445_s20 + $0x438] sm:$0xf0]  ;;  %v4242_v0 = vor.u32 %v5128_v49, %v4241_v41 }
 0x314   : > { %v4243_v20 = vld [vmem:[%s5445_s20 + $0x430] sm:$0xf0] }
 0x315   : > { %3593 = vst [vmem:[%s6097_s6 + $0x60] sm:$0xff] %v3452_v53  ;;  %v5125_v53 = vld [vmem:[%s5445_s20 + $0x41c] sm:$0xf]  ;;  %v4246_v1 = vor.u32 %v5124_v51, %v4243_v20 }
 0x318   : > { %v3284_v29 = vpop.f32.mrf.mxu2  ;;  %v2949_v56 = vpop.f32.mrf.mxu0 }
 0x319   : > { %v3453_v31 = vpop.f32.mrf.mxu3  ;;  %v3285_v25 = vadd.f32 %v3284_v29, %v3116_v57  ;;  %v3118_v5 = vpop.f32.mrf.mxu1  ;;  %v2950_v32 = vadd.f32 %v2949_v56, %v5702_v7  ;;  %v4250_v57 = vor.u32 %v5129_v21, %v4249_v35 }
 0x31b   : > { %v3454_v14 = vadd.f32 %v3453_v31, %v3285_v25  ;;  %2988 = vmatmul.bf16.gmra.mxu0 %v4210_v62  ;;  %v3119_v30 = vadd.f32 %v3118_v5, %v2950_v32  ;;  %v5136_v32 = vld [vmem:[%s5445_s20 + $0x46c] sm:$0xf0] }
 0x31c   : > { %3157 = vmatmul.bf16.gmra.mxu1 %v4214_v52 }
 0x31d   : > { %3594 = vst [vmem:[%s6097_s6 + $0x68] sm:$0xff] %v3454_v14  ;;  %3326 = vmatmul.bf16.gmra.mxu2 %v4218_v3  ;;  %v4273_v14 = vld [vmem:[%s5445_s20 + $0x450] sm:$0xf] }
 0x31e   : > { %3495 = vmatmul.bf16.gmra.mxu3 %v4222_v60  ;;  %v4274_v49 = vor.u32 %v5136_v32, %v4273_v14 }
 0x320   : > { %v3287_v19 = vpop.f32.mrf.mxu2  ;;  %v2951_v22 = vpop.f32.mrf.mxu0 }
 0x321   : > { %v3456_v12 = vpop.f32.mrf.mxu3  ;;  %v3288_v48 = vadd.f32 %v3287_v19, %v3119_v30  ;;  %v3120_v55 = vpop.f32.mrf.mxu1  ;;  %v2952_v7 = vadd.f32 %v2951_v22, %v5713_v33  ;;  %v4254_v33 = vor.u32 %v5125_v53, %v4251_v36  ;;  %v5132_v30 = vld [vmem:[%s5445_s20 + $0x454] sm:$0xf]  ;;  %v5133_v22 = vld [vmem:[%s5445_s20 + $0x45c] sm:$0xf] }
 0x322   : > { %v4275_v19 = vld [vmem:[%s5445_s20 + $0x470] sm:$0xf0] }
 0x323   : > { %v3457_v47 = vadd.f32 %v3456_v12, %v3288_v48  ;;  %v3121_v46 = vadd.f32 %v3120_v55, %v2952_v7  ;;  %v4281_v12 = vld [vmem:[%s5445_s20 + $0x458] sm:$0xf]  ;;  %v4283_v55 = vld [vmem:[%s5445_s20 + $0x478] sm:$0xf0]  ;;  %v4278_v51 = vor.u32 %v5132_v30, %v4275_v19 }
 0x324   : > { %v5137_v48 = vld [vmem:[%s5445_s20 + $0x474] sm:$0xf0] }
 0x325   : > { %3595 = vst [vmem:[%s6097_s6 + $0x70] sm:$0xff] %v3457_v47  ;;  %v4282_v53 = vor.u32 %v5137_v48, %v4281_v12 }
 0x328   : > { %v3289_v39 = vpop.f32.mrf.mxu2  ;;  %v2954_v63 = vpop.f32.mrf.mxu0 }
 0x329   : > { %v3458_v13 = vpop.f32.mrf.mxu3  ;;  %v3290_v61 = vadd.f32 %v3289_v39, %v3121_v46  ;;  %v3123_v58 = vpop.f32.mrf.mxu1  ;;  %v2955_v31 = vadd.f32 %v2954_v63, %v5716_v43 }
 0x32b   : > { %v3459_v29 = vadd.f32 %v3458_v13, %v3290_v61  ;;  %2993 = vmatmul.bf16.gmra.mxu0 %v4242_v0  ;;  %v3124_v62 = vadd.f32 %v3123_v58, %v2955_v31  ;;  %v4307_v31 = vld [vmem:[%s5445_s20 + $0x4b0] sm:$0xf0] }
 0x32c   : > { %3162 = vmatmul.bf16.gmra.mxu1 %v4246_v1 }
 0x32d   : > { %3596 = vst [vmem:[%s6097_s6 + $0x78] sm:$0xff] %v3459_v29  ;;  %3331 = vmatmul.bf16.gmra.mxu2 %v4250_v57  ;;  %v4305_v57 = vld [vmem:[%s5445_s20 + $0x490] sm:$0xf]  ;;  %v5140_v29 = vld [vmem:[%s5445_s20 + $0x494] sm:$0xf] }
 0x32e   : > { %3500 = vmatmul.bf16.gmra.mxu3 %v4254_v33  ;;  %v5144_v33 = vld [vmem:[%s5445_s20 + $0x4ac] sm:$0xf0]  ;;  %v4310_v14 = vor.u32 %v5140_v29, %v4307_v31 }
 0x330   : > { %v3292_v52 = vpop.f32.mrf.mxu2  ;;  %v2956_v5 = vpop.f32.mrf.mxu0 }
 0x331   : > { %v3461_v25 = vpop.f32.mrf.mxu3  ;;  %v3293_v56 = vadd.f32 %v3292_v52, %v3124_v62  ;;  %v3125_v3 = vpop.f32.mrf.mxu1  ;;  %v2957_v43 = vadd.f32 %v2956_v5, %v5727_v6  ;;  %v4286_v6 = vor.u32 %v5133_v22, %v4283_v55  ;;  %v4313_v62 = vld [vmem:[%s5445_s20 + $0x498] sm:$0xf] }
 0x332   : > { %v5145_v52 = vld [vmem:[%s5445_s20 + $0x4b4] sm:$0xf0] }
 0x333   : > { %v3462_v60 = vadd.f32 %v3461_v25, %v3293_v56  ;;  %v3126_v47 = vadd.f32 %v3125_v3, %v2957_v43  ;;  %v5141_v25 = vld [vmem:[%s5445_s20 + $0x49c] sm:$0xf]  ;;  %v4306_v43 = vor.u32 %v5144_v33, %v4305_v57  ;;  %v4314_v12 = vor.u32 %v5145_v52, %v4313_v62 }
 0x334   : > { %v4315_v56 = vld [vmem:[%s5445_s20 + $0x4b8] sm:$0xf0] }
 0x335   : > { %3597 = vst [vmem:[%s6097_s6 + $0x80] sm:$0xff] %v3462_v60 }
 0x338   : > { %v3294_v7 = vpop.f32.mrf.mxu2  ;;  %v2959_v35 = vpop.f32.mrf.mxu0 }
 0x339   : > { %v3463_v41 = vpop.f32.mrf.mxu3  ;;  %v3295_v20 = vadd.f32 %v3294_v7, %v3126_v47  ;;  %v3128_v21 = vpop.f32.mrf.mxu1  ;;  %v2960_v46 = vadd.f32 %v2959_v35, %v5730_v16  ;;  %v4337_v35 = vld [vmem:[%s5445_s20 + $0x4d0] sm:$0xf] }
 0x33b   : > { %v3464_v36 = vadd.f32 %v3463_v41, %v3295_v20  ;;  %2998 = vmatmul.bf16.gmra.mxu0 %v4274_v49  ;;  %v3129_v39 = vadd.f32 %v3128_v21, %v2960_v46  ;;  %v5152_v21 = vld [vmem:[%s5445_s20 + $0x4ec] sm:$0xf0]  ;;  %v5153_v46 = vld [vmem:[%s5445_s20 + $0x4f4] sm:$0xf0] }
 0x33c   : > { %3167 = vmatmul.bf16.gmra.mxu1 %v4278_v51 }
 0x33d   : > { %3598 = vst [vmem:[%s6097_s6 + $0x88] sm:$0xff] %v3464_v36  ;;  %3336 = vmatmul.bf16.gmra.mxu2 %v4282_v53  ;;  %v5148_v53 = vld [vmem:[%s5445_s20 + $0x4d4] sm:$0xf]  ;;  %v4345_v36 = vld [vmem:[%s5445_s20 + $0x4d8] sm:$0xf] }
 0x33e   : > { %3505 = vmatmul.bf16.gmra.mxu3 %v4286_v6  ;;  %v4339_v6 = vld [vmem:[%s5445_s20 + $0x4f0] sm:$0xf0]  ;;  %v4346_v29 = vor.u32 %v5153_v46, %v4345_v36 }
 0x340   : > { %v3297_v13 = vpop.f32.mrf.mxu2  ;;  %v2961_v61 = vpop.f32.mrf.mxu0 }
 0x341   : > { %v3466_v0 = vpop.f32.mrf.mxu3  ;;  %v3298_v1 = vadd.f32 %v3297_v13, %v3129_v39  ;;  %v3130_v63 = vpop.f32.mrf.mxu1  ;;  %v2962_v16 = vadd.f32 %v2961_v61, %v5741_v45  ;;  %v4318_v45 = vor.u32 %v5141_v25, %v4315_v56  ;;  %v5149_v39 = vld [vmem:[%s5445_s20 + $0x4dc] sm:$0xf] }
 0x342   : > { %v4347_v13 = vld [vmem:[%s5445_s20 + $0x4f8] sm:$0xf0] }
 0x343   : > { %v3467_v58 = vadd.f32 %v3466_v0, %v3298_v1  ;;  %v3131_v5 = vadd.f32 %v3130_v63, %v2962_v16  ;;  %v4338_v63 = vor.u32 %v5152_v21, %v4337_v35 }
 0x345   : > { %3599 = vst [vmem:[%s6097_s6 + $0x90] sm:$0xff] %v3467_v58  ;;  %v4342_v58 = vor.u32 %v5148_v53, %v4339_v6 }
 0x348   : > { %v3299_v3 = vpop.f32.mrf.mxu2  ;;  %v2964_v30 = vpop.f32.mrf.mxu0 }
 0x349   : > { %v3468_v60 = vpop.f32.mrf.mxu3  ;;  %v3300_v32 = vadd.f32 %v3299_v3, %v3131_v5  ;;  %v3133_v19 = vpop.f32.mrf.mxu1  ;;  %v2965_v22 = vadd.f32 %v2964_v30, %v5753_v59  ;;  %v5156_v30 = vld [vmem:[%s5445_s20 + $0x514] sm:$0xf] }
 0x34b   : > { %v3469_v48 = vadd.f32 %v3468_v60, %v3300_v32  ;;  %3003 = vmatmul.bf16.gmra.mxu0 %v4306_v43  ;;  %v3134_v55 = vadd.f32 %v3133_v19, %v2965_v22  ;;  %v5160_v32 = vld [vmem:[%s5445_s20 + $0x52c] sm:$0xf0]  ;;  %v4371_v19 = vld [vmem:[%s5445_s20 + $0x530] sm:$0xf0]  ;;  %v4379_v22 = vld [vmem:[%s5445_s20 + $0x538] sm:$0xf0] }
 0x34c   : > { %3172 = vmatmul.bf16.gmra.mxu1 %v4310_v14  ;;  %v4369_v14 = vld [vmem:[%s5445_s20 + $0x510] sm:$0xf] }
 0x34d   : > { %3600 = vst [vmem:[%s6097_s6 + $0x98] sm:$0xff] %v3469_v48  ;;  %3341 = vmatmul.bf16.gmra.mxu2 %v4314_v12  ;;  %v4377_v12 = vld [vmem:[%s5445_s20 + $0x518] sm:$0xf]  ;;  %v5157_v48 = vld [vmem:[%s5445_s20 + $0x51c] sm:$0xf] }
 0x34e   : > { %3510 = vmatmul.bf16.gmra.mxu3 %v4318_v45  ;;  %v5161_v45 = vld [vmem:[%s5445_s20 + $0x534] sm:$0xf0] }
 0x34f   : > { %v4378_v35 = vor.u32 %v5161_v45, %v4377_v12 }
 0x350   : > { %v3302_v47 = vpop.f32.mrf.mxu2  ;;  %v2966_v49 = vpop.f32.mrf.mxu0 }
 0x351   : > { %v3471_v7 = vpop.f32.mrf.mxu3  ;;  %v3303_v41 = vadd.f32 %v3302_v47, %v3134_v55  ;;  %v3135_v51 = vpop.f32.mrf.mxu1  ;;  %v2967_v59 = vadd.f32 %v2966_v49, %v5767_v27  ;;  %v4350_v27 = vor.u32 %v5149_v39, %v4347_v13  ;;  %v4374_v49 = vor.u32 %v5156_v30, %v4371_v19 }
 0x353   : > { %v3472_v20 = vadd.f32 %v3471_v7, %v3303_v41  ;;  %v3136_v0 = vadd.f32 %v3135_v51, %v2967_v59  ;;  %v4370_v41 = vor.u32 %v5160_v32, %v4369_v14 }
 0x355   : > { %3601 = vst [vmem:[%s6097_s6 + $0xa0] sm:$0xff] %v3472_v20 }
 0x358   : > { %v3304_v1 = vpop.f32.mrf.mxu2  ;;  %v2969_v57 = vpop.f32.mrf.mxu0 }
 0x359   : > { %v3473_v61 = vpop.f32.mrf.mxu3  ;;  %v3305_v16 = vadd.f32 %v3304_v1, %v3136_v0  ;;  %v3138_v33 = vpop.f32.mrf.mxu1  ;;  %v2970_v62 = vadd.f32 %v2969_v57, %v5770_v40  ;;  %v4409_v57 = vld [vmem:[%s5445_s20 + $0x558] sm:$0xf] }
 0x35b   : > { %v3474_v31 = vadd.f32 %v3473_v61, %v3305_v16  ;;  %3008 = vmatmul.bf16.gmra.mxu0 %v4338_v63  ;;  %v3139_v52 = vadd.f32 %v3138_v33, %v2970_v62  ;;  %v4401_v61 = vld [vmem:[%s5445_s20 + $0x550] sm:$0xf]  ;;  %v4403_v16 = vld [vmem:[%s5445_s20 + $0x570] sm:$0xf0]  ;;  %v5169_v33 = vld [vmem:[%s5445_s20 + $0x574] sm:$0xf0] }
 0x35c   : > { %3177 = vmatmul.bf16.gmra.mxu1 %v4342_v58  ;;  %v5168_v63 = vld [vmem:[%s5445_s20 + $0x56c] sm:$0xf0]  ;;  %v5164_v58 = vld [vmem:[%s5445_s20 + $0x554] sm:$0xf] }
 0x35d   : > { %3602 = vst [vmem:[%s6097_s6 + $0xa8] sm:$0xff] %v3474_v31  ;;  %3346 = vmatmul.bf16.gmra.mxu2 %v4346_v29  ;;  %v5165_v29 = vld [vmem:[%s5445_s20 + $0x55c] sm:$0xf] }
 0x35e   : > { %3515 = vmatmul.bf16.gmra.mxu3 %v4350_v27  ;;  %v4411_v27 = vld [vmem:[%s5445_s20 + $0x578] sm:$0xf0] }
 0x360   : > { %v3307_v25 = vpop.f32.mrf.mxu2  ;;  %v2971_v3 = vpop.f32.mrf.mxu0 }
 0x361   : > { %v3476_v56 = vpop.f32.mrf.mxu3  ;;  %v3308_v5 = vadd.f32 %v3307_v25, %v3139_v52  ;;  %v3140_v60 = vpop.f32.mrf.mxu1  ;;  %v2972_v40 = vadd.f32 %v2971_v3, %v5781_v8  ;;  %v4382_v8 = vor.u32 %v5157_v48, %v4379_v22  ;;  %v4402_v25 = vor.u32 %v5168_v63, %v4401_v61 }
 0x363   : > { %v3477_v43 = vadd.f32 %v3476_v56, %v3308_v5  ;;  %v3141_v55 = vadd.f32 %v3140_v60, %v2972_v40  ;;  %v4406_v56 = vor.u32 %v5164_v58, %v4403_v16 }
 0x365   : > { %3603 = vst [vmem:[%s6097_s6 + $0xb0] sm:$0xff] %v3477_v43  ;;  %v4410_v43 = vor.u32 %v5169_v33, %v4409_v57 }
 0x368   : > { %v3309_v47 = vpop.f32.mrf.mxu2  ;;  %v2974_v20 = vpop.f32.mrf.mxu0 }
 0x369   : > { %v3478_v7 = vpop.f32.mrf.mxu3  ;;  %v3310_v51 = vadd.f32 %v3309_v47, %v3141_v55  ;;  %v3143_v59 = vpop.f32.mrf.mxu1  ;;  %v2975_v53 = vadd.f32 %v2974_v20, %v5784_v18  ;;  %v4433_v55 = vld [vmem:[%s5445_s20 + $0x590] sm:$0xf]  ;;  %v5173_v20 = vld [vmem:[%s5445_s20 + $0x59c] sm:$0xf] }
 0x36a   : > { %v5176_v47 = vld [vmem:[%s5445_s20 + $0x5ac] sm:$0xf0] }
 0x36b   : > { %v3479_v21 = vadd.f32 %v3478_v7, %v3310_v51  ;;  %3013 = vmatmul.bf16.gmra.mxu0 %v4370_v41  ;;  %v3144_v6 = vadd.f32 %v3143_v59, %v2975_v53  ;;  %v5172_v7 = vld [vmem:[%s5445_s20 + $0x594] sm:$0xf]  ;;  %v5177_v51 = vld [vmem:[%s5445_s20 + $0x5b4] sm:$0xf0]  ;;  %v4443_v59 = vld [vmem:[%s5445_s20 + $0x5b8] sm:$0xf0]  ;;  %v4434_v53 = vor.u32 %v5176_v47, %v4433_v55 }
 0x36c   : > { %3182 = vmatmul.bf16.gmra.mxu1 %v4374_v49  ;;  %v4435_v41 = vld [vmem:[%s5445_s20 + $0x5b0] sm:$0xf0]  ;;  %v4441_v49 = vld [vmem:[%s5445_s20 + $0x598] sm:$0xf] }
 0x36d   : > { %3604 = vst [vmem:[%s6097_s6 + $0xb8] sm:$0xff] %v3479_v21  ;;  %3351 = vmatmul.bf16.gmra.mxu2 %v4378_v35 }
 0x36e   : > { %3520 = vmatmul.bf16.gmra.mxu3 %v4382_v8 }
 0x370   : > { %v3312_v36 = vpop.f32.mrf.mxu2  ;;  %v2976_v13 = vpop.f32.mrf.mxu0 }
 0x371   : > { %v3481_v46 = vpop.f32.mrf.mxu3  ;;  %v3313_v39 = vadd.f32 %v3312_v36, %v3144_v6  ;;  %v3145_v0 = vpop.f32.mrf.mxu1  ;;  %v2977_v18 = vadd.f32 %v2976_v13, %v5795_v50  ;;  %v4414_v50 = vor.u32 %v5165_v29, %v4411_v27  ;;  %v4438_v6 = vor.u32 %v5172_v7, %v4435_v41  ;;  %v4465_v29 = vld [vmem:[%s5445_s20 + $0x5d0] sm:$0xf] }
 0x372   : > { %v4442_v13 = vor.u32 %v5177_v51, %v4441_v49  ;;  %v5184_v27 = vld [vmem:[%s5445_s20 + $0x5ec] sm:$0xf0] }
 0x373   : > { %v3482_v1 = vadd.f32 %v3481_v46, %v3313_v39  ;;  %v3146_v31 = vadd.f32 %v3145_v0, %v2977_v18  ;;  %v4497_v49 = vld [vmem:[%s5445_s20 + $0x610] sm:$0xf] }
 0x374   : > { %v5192_v51 = vld [vmem:[%s5445_s20 + $0x62c] sm:$0xf0] }
 0x375   : > { %3605 = vst [vmem:[%s6097_s6 + $0xc0] sm:$0xff] %v3482_v1 }
 0x378   : > { %v3314_v62 = vpop.f32.mrf.mxu2  ;;  %v2979_v3 = vpop.f32.mrf.mxu0 }
 0x379   : > { %v3483_v52 = vpop.f32.mrf.mxu3  ;;  %v3315_v5 = vadd.f32 %v3314_v62, %v3146_v31  ;;  %v3148_v60 = vpop.f32.mrf.mxu1  ;;  %v2980_v14 = vadd.f32 %v2979_v3, %v5798_v2  ;;  %v5180_v31 = vld [vmem:[%s5445_s20 + $0x5d4] sm:$0xf] }
 0x37a   : > { %v4467_v62 = vld [vmem:[%s5445_s20 + $0x5f0] sm:$0xf0] }
 0x37b   : > { %v3484_v40 = vadd.f32 %v3483_v52, %v3315_v5  ;;  %3018 = vmatmul.bf16.gmra.mxu0 %v4402_v25  ;;  %v3149_v32 = vadd.f32 %v3148_v60, %v2980_v14  ;;  %v4473_v52 = vld [vmem:[%s5445_s20 + $0x5d8] sm:$0xf]  ;;  %v4475_v5 = vld [vmem:[%s5445_s20 + $0x5f8] sm:$0xf0] }
 0x37c   : > { %3187 = vmatmul.bf16.gmra.mxu1 %v4406_v56  ;;  %v5185_v25 = vld [vmem:[%s5445_s20 + $0x5f4] sm:$0xf0]  ;;  %v5181_v56 = vld [vmem:[%s5445_s20 + $0x5dc] sm:$0xf] }
 0x37d   : > { %3606 = vst [vmem:[%s6097_s6 + $0xc8] sm:$0xff] %v3484_v40  ;;  %3356 = vmatmul.bf16.gmra.mxu2 %v4410_v43  ;;  %v4470_v40 = vor.u32 %v5180_v31, %v4467_v62  ;;  %v4529_v31 = vld [vmem:[%s5445_s20 + $0x650] sm:$0xf] }
 0x37e   : > { %3525 = vmatmul.bf16.gmra.mxu3 %v4414_v50  ;;  %v4466_v50 = vor.u32 %v5184_v27, %v4465_v29  ;;  %v5200_v62 = vld [vmem:[%s5445_s20 + $0x66c] sm:$0xf0] }
 0x380   : > { %v3317_v30 = vpop.f32.mrf.mxu2  ;;  %v2981_v45 = vpop.f32.mrf.mxu0 }
 0x381   : > { %v3486_v19 = vpop.f32.mrf.mxu3  ;;  %v3318_v12 = vadd.f32 %v3317_v30, %v3149_v32  ;;  %v3150_v48 = vpop.f32.mrf.mxu1  ;;  %v2982_v2 = vadd.f32 %v2981_v45, %v5809_v37  ;;  %v4446_v37 = vor.u32 %v5173_v20, %v4443_v59  ;;  %v5188_v20 = vld [vmem:[%s5445_s20 + $0x614] sm:$0xf] }
 0x382   : > { %v4499_v59 = vld [vmem:[%s5445_s20 + $0x630] sm:$0xf0] }
 0x383   : > { %v3487_v22 = vadd.f32 %v3486_v19, %v3318_v12  ;;  %v3151_v35 = vadd.f32 %v3150_v48, %v2982_v2  ;;  %v4474_v19 = vor.u32 %v5185_v25, %v4473_v52  ;;  %v5196_v52 = vld [vmem:[%s5445_s20 + $0x654] sm:$0xf] }
 0x384   : > { %v4531_v25 = vld [vmem:[%s5445_s20 + $0x670] sm:$0xf0] }
 0x385   : > { %3607 = vst [vmem:[%s6097_s6 + $0xd0] sm:$0xff] %v3487_v22 }
 0x388   : > { %v3319_v8 = vpop.f32.mrf.mxu2  ;;  %v2984_v46 = vpop.f32.mrf.mxu0 }
 0x389   : > { %v3488_v21 = vpop.f32.mrf.mxu3  ;;  %v3320_v36 = vadd.f32 %v3319_v8, %v3151_v35  ;;  %v3153_v39 = vpop.f32.mrf.mxu1  ;;  %v2985_v1 = vadd.f32 %v2984_v46, %v5821_v54  ;;  %v4505_v35 = vld [vmem:[%s5445_s20 + $0x618] sm:$0xf] }
 0x38a   : > { %v5193_v8 = vld [vmem:[%s5445_s20 + $0x634] sm:$0xf0] }
 0x38b   : > { %v3489_v0 = vadd.f32 %v3488_v21, %v3320_v36  ;;  %3023 = vmatmul.bf16.gmra.mxu0 %v4434_v53  ;;  %v3154_v18 = vadd.f32 %v3153_v39, %v2985_v1  ;;  %v5189_v21 = vld [vmem:[%s5445_s20 + $0x61c] sm:$0xf]  ;;  %v4498_v39 = vor.u32 %v5192_v51, %v4497_v49  ;;  %v4561_v49 = vld [vmem:[%s5445_s20 + $0x690] sm:$0xf] }
 0x38c   : > { %3192 = vmatmul.bf16.gmra.mxu1 %v4438_v6  ;;  %v4507_v53 = vld [vmem:[%s5445_s20 + $0x638] sm:$0xf0]  ;;  %v5208_v51 = vld [vmem:[%s5445_s20 + $0x6ac] sm:$0xf0] }
 0x38d   : > { %3608 = vst [vmem:[%s6097_s6 + $0xd8] sm:$0xff] %v3489_v0  ;;  %3361 = vmatmul.bf16.gmra.mxu2 %v4442_v13  ;;  %v4502_v13 = vor.u32 %v5188_v20, %v4499_v59  ;;  %v5204_v20 = vld [vmem:[%s5445_s20 + $0x694] sm:$0xf] }
 0x38e   : > { %3530 = vmatmul.bf16.gmra.mxu3 %v4446_v37  ;;  %v4563_v59 = vld [vmem:[%s5445_s20 + $0x6b0] sm:$0xf0] }
 0x390   : > { %v3322_v61 = vpop.f32.mrf.mxu2  ;;  %v2986_v16 = vpop.f32.mrf.mxu0 }
 0x391   : > { %v3491_v63 = vpop.f32.mrf.mxu3  ;;  %v3323_v58 = vadd.f32 %v3322_v61, %v3154_v18  ;;  %v3155_v57 = vpop.f32.mrf.mxu1  ;;  %v2987_v54 = vadd.f32 %v2986_v16, %v5840_v28  ;;  %v4478_v28 = vor.u32 %v5181_v56, %v4475_v5  ;;  %v4506_v18 = vor.u32 %v5193_v8, %v4505_v35  ;;  %v4537_v56 = vld [vmem:[%s5445_s20 + $0x658] sm:$0xf] }
 0x392   : > { %v5201_v5 = vld [vmem:[%s5445_s20 + $0x674] sm:$0xf0] }
 0x393   : > { %v3492_v33 = vadd.f32 %v3491_v63, %v3323_v58  ;;  %v3156_v3 = vadd.f32 %v3155_v57, %v2987_v54  ;;  %v4569_v35 = vld [vmem:[%s5445_s20 + $0x698] sm:$0xf] }
 0x394   : > { %v5209_v8 = vld [vmem:[%s5445_s20 + $0x6b4] sm:$0xf0] }
 0x395   : > { %3609 = vst [vmem:[%s6097_s6 + $0xe0] sm:$0xff] %v3492_v33 }
 0x398   : > { %v3324_v60 = vpop.f32.mrf.mxu2  ;;  %v2989_v32 = vpop.f32.mrf.mxu0 }
 0x399   : > { %v3493_v43 = vpop.f32.mrf.mxu3  ;;  %v3325_v14 = vadd.f32 %v3324_v60, %v3156_v3  ;;  %v3158_v30 = vpop.f32.mrf.mxu1  ;;  %v2990_v45 = vadd.f32 %v2989_v32, %v5843_v44  ;;  %v5197_v3 = vld [vmem:[%s5445_s20 + $0x65c] sm:$0xf]  ;;  %v4534_v32 = vor.u32 %v5196_v52, %v4531_v25  ;;  %v4601_v52 = vld [vmem:[%s5445_s20 + $0x6d8] sm:$0xf] }
 0x39a   : > { %v4539_v60 = vld [vmem:[%s5445_s20 + $0x678] sm:$0xf0]  ;;  %v5217_v25 = vld [vmem:[%s5445_s20 + $0x6f4] sm:$0xf0] }
 0x39b   : > { %v3494_v12 = vadd.f32 %v3493_v43, %v3325_v14  ;;  %3028 = vmatmul.bf16.gmra.mxu0 %v4466_v50  ;;  %v3159_v48 = vadd.f32 %v3158_v30, %v2990_v45  ;;  %v4530_v14 = vor.u32 %v5200_v62, %v4529_v31  ;;  %v5212_v31 = vld [vmem:[%s5445_s20 + $0x6d4] sm:$0xf] }
 0x39c   : > { %3197 = vmatmul.bf16.gmra.mxu1 %v4470_v40  ;;  %v4595_v62 = vld [vmem:[%s5445_s20 + $0x6f0] sm:$0xf0] }
 0x39d   : > { %3610 = vst [vmem:[%s6097_s6 + $0xe8] sm:$0xff] %v3494_v12  ;;  %3366 = vmatmul.bf16.gmra.mxu2 %v4474_v19  ;;  %v4538_v12 = vor.u32 %v5201_v5, %v4537_v56  ;;  %v5213_v56 = vld [vmem:[%s5445_s20 + $0x6dc] sm:$0xf] }
 0x39e   : > { %3535 = vmatmul.bf16.gmra.mxu3 %v4478_v28  ;;  %v4603_v5 = vld [vmem:[%s5445_s20 + $0x6f8] sm:$0xf0] }
 0x3a0   : > { %v3327_v22 = vpop.f32.mrf.mxu2  ;;  %v2991_v47 = vpop.f32.mrf.mxu0 }
 0x3a1   : > { %v3496_v2 = vpop.f32.mrf.mxu3  ;;  %v3328_v55 = vadd.f32 %v3327_v22, %v3159_v48  ;;  %v3160_v7 = vpop.f32.mrf.mxu1  ;;  %v2992_v44 = vadd.f32 %v2991_v47, %v5854_v15  ;;  %v4510_v15 = vor.u32 %v5189_v21, %v4507_v53  ;;  %v5205_v21 = vld [vmem:[%s5445_s20 + $0x69c] sm:$0xf] }
 0x3a2   : > { %v4571_v53 = vld [vmem:[%s5445_s20 + $0x6b8] sm:$0xf0] }
 0x3a3   : > { %v3497_v41 = vadd.f32 %v3496_v2, %v3328_v55  ;;  %v3161_v6 = vadd.f32 %v3160_v7, %v2992_v44 }
 0x3a5   : > { %3611 = vst [vmem:[%s6097_s6 + $0xf0] sm:$0xff] %v3497_v41 }
 0x3a8   : > { %v3329_v36 = vpop.f32.mrf.mxu2  ;;  %v2994_v0 = vpop.f32.mrf.mxu0 }
 0x3a9   : > { %v3498_v46 = vpop.f32.mrf.mxu3  ;;  %v3330_v37 = vadd.f32 %v3329_v36, %v3161_v6  ;;  %v3163_v1 = vpop.f32.mrf.mxu1  ;;  %v2995_v63 = vadd.f32 %v2994_v0, %v5857_v34 }
 0x3ab   : > { %v3499_v61 = vadd.f32 %v3498_v46, %v3330_v37  ;;  %3033 = vmatmul.bf16.gmra.mxu0 %v4498_v39  ;;  %v3164_v58 = vadd.f32 %v3163_v1, %v2995_v63  ;;  %v4562_v39 = vor.u32 %v5208_v51, %v4561_v49  ;;  %v4633_v49 = vld [vmem:[%s5445_s20 + $0x718] sm:$0xf] }
 0x3ac   : > { %3202 = vmatmul.bf16.gmra.mxu1 %v4502_v13  ;;  %v4566_v13 = vor.u32 %v5204_v20, %v4563_v59  ;;  %v5225_v51 = vld [vmem:[%s5445_s20 + $0x734] sm:$0xf0]  ;;  %v5221_v20 = vld [vmem:[%s5445_s20 + $0x71c] sm:$0xf] }
 0x3ad   : > { %3612 = vst [vmem:[%s6097_s6 + $0xf8] sm:$0xff] %v3499_v61  ;;  %3371 = vmatmul.bf16.gmra.mxu2 %v4506_v18  ;;  %v4570_v18 = vor.u32 %v5209_v8, %v4569_v35  ;;  %v4635_v59 = vld [vmem:[%s5445_s20 + $0x738] sm:$0xf0] }
 0x3ae   : > { %3540 = vmatmul.bf16.gmra.mxu3 %v4510_v15 }
 0x3b0   : > { %v3332_v16 = vpop.f32.mrf.mxu2  ;;  %v2996_v54 = vpop.f32.mrf.mxu0 }
 0x3b1   : > { %v3501_v57 = vpop.f32.mrf.mxu3  ;;  %v3333_v33 = vadd.f32 %v3332_v16, %v3164_v58  ;;  %v3165_v29 = vpop.f32.mrf.mxu1  ;;  %v2997_v34 = vadd.f32 %v2996_v54, %v5868_v11  ;;  %v4542_v11 = vor.u32 %v5197_v3, %v4539_v60 }
 0x3b3   : > { %v3502_v27 = vadd.f32 %v3501_v57, %v3333_v33  ;;  %v3166_v43 = vadd.f32 %v3165_v29, %v2997_v34  ;;  %v5216_v34 = vld [vmem:[%s5445_s20 + $0x6ec] sm:$0xf0] }
 0x3b5   : > { %3613 = vst [vmem:[%s6097_s6 + $0x100] sm:$0xff] %v3502_v27  ;;  %v4593_v27 = vld [vmem:[%s5445_s20 + $0x6d0] sm:$0xf] }
 0x3b8   : > { %v3334_v50 = vpop.f32.mrf.mxu2  ;;  %v2999_v19 = vpop.f32.mrf.mxu0 }
 0x3b9   : > { %v3503_v40 = vpop.f32.mrf.mxu3  ;;  %v3335_v30 = vadd.f32 %v3334_v50, %v3166_v43  ;;  %v3168_v28 = vpop.f32.mrf.mxu1  ;;  %v3000_v48 = vadd.f32 %v2999_v19, %v5871_v26  ;;  %v4594_v50 = vor.u32 %v5216_v34, %v4593_v27  ;;  %v4602_v19 = vor.u32 %v5217_v25, %v4601_v52  ;;  %v4659_v27 = vld [vmem:[%s5445_s20 + $0x770] sm:$0xf0]  ;;  %v4665_v34 = vld [vmem:[%s5445_s20 + $0x758] sm:$0xf]  ;;  %v4667_v52 = vld [vmem:[%s5445_s20 + $0x778] sm:$0xf0] }
 0x3bb   : > { %v3504_v45 = vadd.f32 %v3503_v40, %v3335_v30  ;;  %3038 = vmatmul.bf16.gmra.mxu0 %v4530_v14  ;;  %v3169_v22 = vadd.f32 %v3168_v28, %v3000_v48  ;;  %v4598_v40 = vor.u32 %v5212_v31, %v4595_v62  ;;  %v5233_v31 = vld [vmem:[%s5445_s20 + $0x774] sm:$0xf0]  ;;  %v5229_v62 = vld [vmem:[%s5445_s20 + $0x75c] sm:$0xf] }
 0x3bc   : > { %3207 = vmatmul.bf16.gmra.mxu1 %v4534_v32 }
 0x3bd   : > { %3614 = vst [vmem:[%s6097_s6 + $0x108] sm:$0xff] %v3504_v45  ;;  %3376 = vmatmul.bf16.gmra.mxu2 %v4538_v12 }
 0x3be   : > { %3545 = vmatmul.bf16.gmra.mxu3 %v4542_v11 }
 0x3c0   : > { %v3337_v2 = vpop.f32.mrf.mxu2  ;;  %v3001_v7 = vpop.f32.mrf.mxu0 }
 0x3c1   : > { %v3506_v55 = vpop.f32.mrf.mxu3  ;;  %v3338_v47 = vadd.f32 %v3337_v2, %v3169_v22  ;;  %v3170_v41 = vpop.f32.mrf.mxu1  ;;  %v3002_v26 = vadd.f32 %v3001_v7, %v5882_v9  ;;  %v4574_v9 = vor.u32 %v5205_v21, %v4571_v53  ;;  %v4625_v7 = vld [vmem:[%s5445_s20 + $0x710] sm:$0xf] }
 0x3c3   : > { %v3507_v44 = vadd.f32 %v3506_v55, %v3338_v47  ;;  %v3171_v6 = vadd.f32 %v3170_v41, %v3002_v26  ;;  %v5224_v41 = vld [vmem:[%s5445_s20 + $0x72c] sm:$0xf0]  ;;  %v4627_v26 = vld [vmem:[%s5445_s20 + $0x730] sm:$0xf0] }
 0x3c4   : > { %v4626_v53 = vor.u32 %v5224_v41, %v4625_v7  ;;  %v5240_v7 = vld [vmem:[%s5445_s20 + $0x7ac] sm:$0xf0]  ;;  %v5236_v41 = vld [vmem:[%s5445_s20 + $0x794] sm:$0xf] }
 0x3c5   : > { %3615 = vst [vmem:[%s6097_s6 + $0x110] sm:$0xff] %v3507_v44  ;;  %v5220_v44 = vld [vmem:[%s5445_s20 + $0x714] sm:$0xf] }
 0x3c8   : > { %v3339_v36 = vpop.f32.mrf.mxu2  ;;  %v3004_v0 = vpop.f32.mrf.mxu0 }
 0x3c9   : > { %v3508_v46 = vpop.f32.mrf.mxu3  ;;  %v3340_v37 = vadd.f32 %v3339_v36, %v3171_v6  ;;  %v3173_v1 = vpop.f32.mrf.mxu1  ;;  %v3005_v61 = vadd.f32 %v3004_v0, %v5894_v38  ;;  %v4630_v6 = vor.u32 %v5220_v44, %v4627_v26  ;;  %v6438_v0 = vld [vmem:[#allocation2_spill] sm:$0xff]  ;;  %v4691_v44 = vld [vmem:[%s5445_s20 + $0x7b0] sm:$0xf0]  ;;  %v4697_v26 = vld [vmem:[%s5445_s20 + $0x798] sm:$0xf] }
 0x3cb   : > { %v3509_v15 = vadd.f32 %v3508_v46, %v3340_v37  ;;  %3043 = vmatmul.bf16.gmra.mxu0 %v4562_v39  ;;  %v3174_v63 = vadd.f32 %v3173_v1, %v3005_v61 }
 0x3cc   : > { %3212 = vmatmul.bf16.gmra.mxu1 %v4566_v13  ;;  %v4634_v13 = vor.u32 %v5225_v51, %v4633_v49  ;;  %v5241_v49 = vld [vmem:[%s5445_s20 + $0x7b4] sm:$0xf0]  ;;  %v5237_v51 = vld [vmem:[%s5445_s20 + $0x79c] sm:$0xf] }
 0x3cd   : > { %3616 = vst [vmem:[%s6097_s6 + $0x118] sm:$0xff] %v3509_v15  ;;  %3381 = vmatmul.bf16.gmra.mxu2 %v4570_v18 }
 0x3ce   : > { %3550 = vmatmul.bf16.gmra.mxu3 %v4574_v9 }
 0x3d0   : > { %v3342_v58 = vpop.f32.mrf.mxu2  ;;  %v3006_v33 = vpop.f32.mrf.mxu0 }
 0x3d1   : > { %v3511_v16 = vpop.f32.mrf.mxu3  ;;  %v3343_v57 = vadd.f32 %v3342_v58, %v3174_v63  ;;  %v3175_v54 = vpop.f32.mrf.mxu1  ;;  %v3007_v38 = vadd.f32 %v3006_v33, %v5908_v17  ;;  %v4606_v17 = vor.u32 %v5213_v56, %v4603_v5 }
 0x3d3   : > { %v3512_v29 = vadd.f32 %v3511_v16, %v3343_v57  ;;  %v3176_v3 = vadd.f32 %v3175_v54, %v3007_v38  ;;  %v6439_v57 = vld [vmem:[#allocation3_spill] sm:$0xff]  ;;  %v4657_v54 = vld [vmem:[%s5445_s20 + $0x750] sm:$0xf]  ;;  %v5228_v38 = vld [vmem:[%s5445_s20 + $0x754] sm:$0xf] }
 0x3d5   : > { %3617 = vst [vmem:[%s6097_s6 + $0x120] sm:$0xff] %v3512_v29  ;;  %v5232_v29 = vld [vmem:[%s5445_s20 + $0x76c] sm:$0xf0] }
 0x3d8   : > { %v3344_v60 = vpop.f32.mrf.mxu2  ;;  %v3009_v32 = vpop.f32.mrf.mxu0 }
 0x3d9   : > { %v3513_v43 = vpop.f32.mrf.mxu3  ;;  %v3345_v14 = vadd.f32 %v3344_v60, %v3176_v3  ;;  %v3178_v30 = vpop.f32.mrf.mxu1  ;;  %v3010_v12 = vadd.f32 %v3009_v32, %v5911_v42  ;;  %v4658_v3 = vor.u32 %v5232_v29, %v4657_v54  ;;  %v4662_v60 = vor.u32 %v5228_v38, %v4659_v27  ;;  %v5248_v54 = vld [vmem:[%s5445_s20 + $0x7ec] sm:$0xf0]  ;;  %v5244_v29 = vld [vmem:[%s5445_s20 + $0x7d4] sm:$0xf]  ;;  %v4729_v27 = vld [vmem:[%s5445_s20 + $0x7d8] sm:$0xf] }
 0x3da   : > { %v4670_v32 = vor.u32 %v5229_v62, %v4667_v52  ;;  %v4723_v38 = vld [vmem:[%s5445_s20 + $0x7f0] sm:$0xf0]  ;;  %v4731_v62 = vld [vmem:[%s5445_s20 + $0x7f8] sm:$0xf0] }
 0x3db   : > { %v3514_v28 = vadd.f32 %v3513_v43, %v3345_v14  ;;  %3048 = vmatmul.bf16.gmra.mxu0 %v4594_v50  ;;  %v3179_v11 = vadd.f32 %v3178_v30, %v3010_v12  ;;  %v4666_v14 = vor.u32 %v5233_v31, %v4665_v34  ;;  %v5249_v34 = vld [vmem:[%s5445_s20 + $0x7f4] sm:$0xf0]  ;;  %v5245_v31 = vld [vmem:[%s5445_s20 + $0x7dc] sm:$0xf] }
 0x3dc   : > { %3217 = vmatmul.bf16.gmra.mxu1 %v4598_v40 }
 0x3dd   : > { %3618 = vst [vmem:[%s6097_s6 + $0x128] sm:$0xff] %v3514_v28  ;;  %3386 = vmatmul.bf16.gmra.mxu2 %v4602_v19  ;;  %v6440_v19 = vld [vmem:[#allocation4_spill] sm:$0xff] }
 0x3de   : > { %3555 = vmatmul.bf16.gmra.mxu3 %v4606_v17 }
 0x3e0   : > { %v3347_v45 = vpop.f32.mrf.mxu2  ;;  %v3011_v2 = vpop.f32.mrf.mxu0 }
 0x3e1   : > { %v3516_v48 = vpop.f32.mrf.mxu3  ;;  %v3348_v22 = vadd.f32 %v3347_v45, %v3179_v11  ;;  %v3180_v55 = vpop.f32.mrf.mxu1  ;;  %v3012_v42 = vadd.f32 %v3011_v2, %v5922_v24  ;;  %v4638_v24 = vor.u32 %v5221_v20, %v4635_v59  ;;  %v4699_v20 = vld [vmem:[%s5445_s20 + $0x7b8] sm:$0xf0] }
 0x3e3   : > { %v3517_v47 = vadd.f32 %v3516_v48, %v3348_v22  ;;  %v3181_v35 = vadd.f32 %v3180_v55, %v3012_v42  ;;  %v6441_v55 = vld [vmem:[#allocation5_spill] sm:$0xff]  ;;  %v4689_v42 = vld [vmem:[%s5445_s20 + $0x790] sm:$0xf] }
 0x3e5   : > { %3619 = vst [vmem:[%s6097_s6 + $0x130] sm:$0xff] %v3517_v47 }
 0x3e8   : > { %v3349_v8 = vpop.f32.mrf.mxu2  ;;  %v3014_v46 = vpop.f32.mrf.mxu0 }
 0x3e9   : > { %v3518_v21 = vpop.f32.mrf.mxu3  ;;  %v3350_v36 = vadd.f32 %v3349_v8, %v3181_v35  ;;  %v3183_v39 = vpop.f32.mrf.mxu1  ;;  %v3015_v1 = vadd.f32 %v3014_v46, %v6438_v0 }
 0x3eb   : > { %v3519_v37 = vadd.f32 %v3518_v21, %v3350_v36  ;;  %3053 = vmatmul.bf16.gmra.mxu0 %v4626_v53  ;;  %v3184_v18 = vadd.f32 %v3183_v39, %v3015_v1  ;;  %v4690_v21 = vor.u32 %v5240_v7, %v4689_v42  ;;  %v4694_v53 = vor.u32 %v5236_v41, %v4691_v44 }
 0x3ec   : > { %3222 = vmatmul.bf16.gmra.mxu1 %v4630_v6  ;;  %v4698_v39 = vor.u32 %v5241_v49, %v4697_v26 }
 0x3ed   : > { %3620 = vst [vmem:[%s6097_s6 + $0x138] sm:$0xff] %v3519_v37  ;;  %3391 = vmatmul.bf16.gmra.mxu2 %v4634_v13  ;;  %v4702_v13 = vor.u32 %v5237_v51, %v4699_v20  ;;  %v6442_v37 = vld [vmem:[#allocation6_spill] sm:$0xff] }
 0x3ee   : > { %3560 = vmatmul.bf16.gmra.mxu3 %v4638_v24  ;;  %v6446_v51 = vld [vmem:[#allocation10_spill] sm:$0xff] }
 0x3f0   : > { %v3352_v9 = vpop.f32.mrf.mxu2  ;;  %v3016_v63 = vpop.f32.mrf.mxu0 }
 0x3f1   : > { %v3521_v15 = vpop.f32.mrf.mxu3  ;;  %v3353_v61 = vadd.f32 %v3352_v9, %v3184_v18  ;;  %v3185_v58 = vpop.f32.mrf.mxu1  ;;  %v3017_v33 = vadd.f32 %v3016_v63, %v6439_v57 }
 0x3f3   : > { %v3522_v16 = vadd.f32 %v3521_v15, %v3353_v61  ;;  %v3186_v25 = vadd.f32 %v3185_v58, %v3017_v33  ;;  %v4721_v33 = vld [vmem:[%s5445_s20 + $0x7d0] sm:$0xf] }
 0x3f5   : > { %3621 = vst [vmem:[%s6097_s6 + $0x140] sm:$0xff] %v3522_v16  ;;  %v6443_v16 = vld [vmem:[#allocation7_spill] sm:$0xff] }
 0x3f8   : > { %v3354_v56 = vpop.f32.mrf.mxu2  ;;  %v3019_v50 = vpop.f32.mrf.mxu0 }
 0x3f9   : > { %v3523_v5 = vpop.f32.mrf.mxu3  ;;  %v3355_v43 = vadd.f32 %v3354_v56, %v3186_v25  ;;  %v3188_v40 = vpop.f32.mrf.mxu1  ;;  %v3020_v17 = vadd.f32 %v3019_v50, %v6440_v19 }
 0x3fb   : > { %v3524_v30 = vadd.f32 %v3523_v5, %v3355_v43  ;;  %3058 = vmatmul.bf16.gmra.mxu0 %v4658_v3  ;;  %v3189_v28 = vadd.f32 %v3188_v40, %v3020_v17  ;;  %v4722_v5 = vor.u32 %v5248_v54, %v4721_v33  ;;  %v4726_v3 = vor.u32 %v5244_v29, %v4723_v38  ;;  %v6449_v38 = vld [vmem:[#allocation13_spill] sm:$0xff] }
 0x3fc   : > { %3227 = vmatmul.bf16.gmra.mxu1 %v4662_v60  ;;  %v4730_v40 = vor.u32 %v5249_v34, %v4729_v27 }
 0x3fd   : > { %3622 = vst [vmem:[%s6097_s6 + $0x148] sm:$0xff] %v3524_v30  ;;  %3396 = vmatmul.bf16.gmra.mxu2 %v4666_v14  ;;  %v4734_v14 = vor.u32 %v5245_v31, %v4731_v62  ;;  %v6444_v30 = vld [vmem:[#allocation8_spill] sm:$0xff] }
 0x3fe   : > { %3565 = vmatmul.bf16.gmra.mxu3 %v4670_v32 }
 0x400   : > { %v3357_v12 = vpop.f32.mrf.mxu2  ;;  %v3021_v48 = vpop.f32.mrf.mxu0 }
 0x401   : > { %v3526_v11 = vpop.f32.mrf.mxu3  ;;  %v3358_v45 = vadd.f32 %v3357_v12, %v3189_v28  ;;  %v3190_v22 = vpop.f32.mrf.mxu1  ;;  %v3022_v47 = vadd.f32 %v3021_v48, %v6441_v55 }
 0x403   : > { %v3527_v2 = vadd.f32 %v3526_v11, %v3358_v45  ;;  %v3191_v59 = vadd.f32 %v3190_v22, %v3022_v47 }
 0x405   : > { %3623 = vst [vmem:[%s6097_s6 + $0x150] sm:$0xff] %v3527_v2  ;;  %v6445_v2 = vld [vmem:[#allocation9_spill] sm:$0xff] }
 0x408   : > { %v3359_v35 = vpop.f32.mrf.mxu2  ;;  %v3024_v36 = vpop.f32.mrf.mxu0 }
 0x409   : > { %v3528_v8 = vpop.f32.mrf.mxu3  ;;  %v3360_v6 = vadd.f32 %v3359_v35, %v3191_v59  ;;  %v3193_v46 = vpop.f32.mrf.mxu1  ;;  %v3025_v0 = vadd.f32 %v3024_v36, %v6442_v37 }
 0x40b   : > { %v3529_v24 = vadd.f32 %v3528_v8, %v3360_v6  ;;  %3063 = vmatmul.bf16.gmra.mxu0 %v4690_v21  ;;  %v3194_v1 = vadd.f32 %v3193_v46, %v3025_v0  ;;  %v6447_v46 = vld [vmem:[#allocation11_spill] sm:$0xff] }
 0x40c   : > { %3232 = vmatmul.bf16.gmra.mxu1 %v4694_v53 }
 0x40d   : > { %3624 = vst [vmem:[%s6097_s6 + $0x158] sm:$0xff] %v3529_v24  ;;  %3401 = vmatmul.bf16.gmra.mxu2 %v4698_v39 }
 0x40e   : > { %3570 = vmatmul.bf16.gmra.mxu3 %v4702_v13 }
 0x410   : > { %v3362_v18 = vpop.f32.mrf.mxu2  ;;  %v3026_v61 = vpop.f32.mrf.mxu0 }
 0x411   : > { %v3531_v9 = vpop.f32.mrf.mxu3  ;;  %v3363_v15 = vadd.f32 %v3362_v18, %v3194_v1  ;;  %v3195_v63 = vpop.f32.mrf.mxu1  ;;  %v3027_v57 = vadd.f32 %v3026_v61, %v6443_v16 }
 0x413   : > { %v3532_v58 = vadd.f32 %v3531_v9, %v3363_v15  ;;  %v3196_v52 = vadd.f32 %v3195_v63, %v3027_v57  ;;  %v6448_v15 = vld [vmem:[#allocation12_spill] sm:$0xff] }
 0x415   : > { %3625 = vst [vmem:[%s6097_s6 + $0x160] sm:$0xff] %v3532_v58 }
 0x418   : > { %v3364_v25 = vpop.f32.mrf.mxu2  ;;  %v3029_v43 = vpop.f32.mrf.mxu0 }
 0x419   : > { %v3533_v56 = vpop.f32.mrf.mxu3  ;;  %v3365_v60 = vadd.f32 %v3364_v25, %v3196_v52  ;;  %v3198_v50 = vpop.f32.mrf.mxu1  ;;  %v3030_v19 = vadd.f32 %v3029_v43, %v6444_v30 }
 0x41b   : > { %v3534_v32 = vadd.f32 %v3533_v56, %v3365_v60  ;;  %3068 = vmatmul.bf16.gmra.mxu0 %v4722_v5  ;;  %v3199_v17 = vadd.f32 %v3198_v50, %v3030_v19 }
 0x41c   : > { %3237 = vmatmul.bf16.gmra.mxu1 %v4726_v3  ;;  %v6450_v3 = vld [vmem:[#allocation14_spill] sm:$0xff] }
 0x41d   : > { %3626 = vst [vmem:[%s6097_s6 + $0x168] sm:$0xff] %v3534_v32  ;;  %3406 = vmatmul.bf16.gmra.mxu2 %v4730_v40 }
 0x41e   : > { %3575 = vmatmul.bf16.gmra.mxu3 %v4734_v14 }
 0x420   : > { %v3367_v28 = vpop.f32.mrf.mxu2  ;;  %v3031_v45 = vpop.f32.mrf.mxu0 }
 0x421   : > { %v3536_v12 = vpop.f32.mrf.mxu3  ;;  %v3368_v11 = vadd.f32 %v3367_v28, %v3199_v17  ;;  %v3200_v48 = vpop.f32.mrf.mxu1  ;;  %v3032_v55 = vadd.f32 %v3031_v45, %v6445_v2  ;;  %v6451_v17 = vld [vmem:[#allocation15_spill] sm:$0xff] }
 0x423   : > { %v3537_v22 = vadd.f32 %v3536_v12, %v3368_v11  ;;  %v3201_v47 = vadd.f32 %v3200_v48, %v3032_v55 }
 0x425   : > { %3627 = vst [vmem:[%s6097_s6 + $0x170] sm:$0xff] %v3537_v22 }
 0x428   : > { %v3369_v42 = vpop.f32.mrf.mxu2  ;;  %v3034_v44 = vpop.f32.mrf.mxu0 }
 0x429   : > { %v3538_v7 = vpop.f32.mrf.mxu3  ;;  %v3370_v41 = vadd.f32 %v3369_v42, %v3201_v47  ;;  %v3203_v26 = vpop.f32.mrf.mxu1  ;;  %v3035_v20 = vadd.f32 %v3034_v44, %v6446_v51  ;;  %v6452_v47 = vld [vmem:[#allocation16_spill] sm:$0xff] }
 0x42b   : > { %v3539_v49 = vadd.f32 %v3538_v7, %v3370_v41  ;;  %v3204_v59 = vadd.f32 %v3203_v26, %v3035_v20 }
 0x42d   : > { %3628 = vst [vmem:[%s6097_s6 + $0x178] sm:$0xff] %v3539_v49 }
 0x430   : > { %v3372_v35 = vpop.f32.mrf.mxu2  ;;  %v3036_v53 = vpop.f32.mrf.mxu0 }
 0x431   : > { %v3541_v8 = vpop.f32.mrf.mxu3  ;;  %v3373_v21 = vadd.f32 %v3372_v35, %v3204_v59  ;;  %v3205_v6 = vpop.f32.mrf.mxu1  ;;  %v3037_v39 = vadd.f32 %v3036_v53, %v6447_v46  ;;  %v6453_v59 = vld [vmem:[#allocation17_spill] sm:$0xff] }
 0x433   : > { %v3542_v36 = vadd.f32 %v3541_v8, %v3373_v21  ;;  %v3206_v13 = vadd.f32 %v3205_v6, %v3037_v39 }
 0x435   : > { %3629 = vst [vmem:[%s6097_s6 + $0x180] sm:$0xff] %v3542_v36 }
 0x438   : > { %v3374_v24 = vpop.f32.mrf.mxu2  ;;  %v3039_v1 = vpop.f32.mrf.mxu0 }
 0x439   : > { %v3543_v37 = vpop.f32.mrf.mxu3  ;;  %v3375_v0 = vadd.f32 %v3374_v24, %v3206_v13  ;;  %v3208_v18 = vpop.f32.mrf.mxu1  ;;  %v3040_v61 = vadd.f32 %v3039_v1, %v6448_v15  ;;  %v6454_v13 = vld [vmem:[#allocation18_spill] sm:$0xff] }
 0x43b   : > { %v3544_v9 = vadd.f32 %v3543_v37, %v3375_v0  ;;  %v3209_v63 = vadd.f32 %v3208_v18, %v3040_v61 }
 0x43d   : > { %3630 = vst [vmem:[%s6097_s6 + $0x188] sm:$0xff] %v3544_v9 }
 0x440   : > { %v3377_v58 = vpop.f32.mrf.mxu2  ;;  %v3041_v33 = vpop.f32.mrf.mxu0 }
 0x441   : > { %v3546_v16 = vpop.f32.mrf.mxu3  ;;  %v3378_v57 = vadd.f32 %v3377_v58, %v3209_v63  ;;  %v3210_v54 = vpop.f32.mrf.mxu1  ;;  %v3042_v27 = vadd.f32 %v3041_v33, %v6449_v38  ;;  %v6455_v63 = vld [vmem:[#allocation19_spill] sm:$0xff] }
 0x443   : > { %v3547_v29 = vadd.f32 %v3546_v16, %v3378_v57  ;;  %v3211_v34 = vadd.f32 %v3210_v54, %v3042_v27 }
 0x445   : > { %3631 = vst [vmem:[%s6097_s6 + $0x190] sm:$0xff] %v3547_v29 }
 0x448   : > { %v3379_v31 = vpop.f32.mrf.mxu2  ;;  %v3044_v25 = vpop.f32.mrf.mxu0 }
 0x449   : > { %v3548_v62 = vpop.f32.mrf.mxu3  ;;  %v3380_v52 = vadd.f32 %v3379_v31, %v3211_v34  ;;  %v3213_v56 = vpop.f32.mrf.mxu1  ;;  %v3045_v60 = vadd.f32 %v3044_v25, %v6450_v3  ;;  %v6456_v34 = vld [vmem:[#allocation20_spill] sm:$0xff] }
 0x44b   : > { %v3549_v5 = vadd.f32 %v3548_v62, %v3380_v52  ;;  %v3214_v43 = vadd.f32 %v3213_v56, %v3045_v60 }
 0x44d   : > { %3632 = vst [vmem:[%s6097_s6 + $0x198] sm:$0xff] %v3549_v5 }
 0x450   : > { %v3382_v50 = vpop.f32.mrf.mxu2  ;;  %v3046_v32 = vpop.f32.mrf.mxu0 }
 0x451   : > { %v3551_v40 = vpop.f32.mrf.mxu3  ;;  %v3383_v14 = vadd.f32 %v3382_v50, %v3214_v43  ;;  %v3215_v30 = vpop.f32.mrf.mxu1  ;;  %v3047_v28 = vadd.f32 %v3046_v32, %v6451_v17  ;;  %v6457_v43 = vld [vmem:[#allocation21_spill] sm:$0xff] }
 0x453   : > { %v3552_v19 = vadd.f32 %v3551_v40, %v3383_v14  ;;  %v3216_v12 = vadd.f32 %v3215_v30, %v3047_v28 }
 0x455   : > { %3633 = vst [vmem:[%s6097_s6 + $0x1a0] sm:$0xff] %v3552_v19 }
 0x458   : > { %v3384_v11 = vpop.f32.mrf.mxu2  ;;  %v3049_v22 = vpop.f32.mrf.mxu0 }
 0x459   : > { %v3553_v45 = vpop.f32.mrf.mxu3  ;;  %v3385_v48 = vadd.f32 %v3384_v11, %v3216_v12  ;;  %v3218_v2 = vpop.f32.mrf.mxu1  ;;  %v3050_v42 = vadd.f32 %v3049_v22, %v6452_v47 }
 0x45b   : > { %v3554_v55 = vadd.f32 %v3553_v45, %v3385_v48  ;;  %v3219_v7 = vadd.f32 %v3218_v2, %v3050_v42  ;;  %v6458_v42 = vld [vmem:[#allocation22_spill] sm:$0xff] }
 0x45d   : > { %3634 = vst [vmem:[%s6097_s6 + $0x1a8] sm:$0xff] %v3554_v55 }
 0x460   : > { %v3387_v41 = vpop.f32.mrf.mxu2  ;;  %v3051_v49 = vpop.f32.mrf.mxu0 }
 0x461   : > { %v3556_v44 = vpop.f32.mrf.mxu3  ;;  %v3388_v26 = vadd.f32 %v3387_v41, %v3219_v7  ;;  %v3220_v51 = vpop.f32.mrf.mxu1  ;;  %v3052_v35 = vadd.f32 %v3051_v49, %v6453_v59 }
 0x463   : > { %v3557_v20 = vadd.f32 %v3556_v44, %v3388_v26  ;;  %v3221_v8 = vadd.f32 %v3220_v51, %v3052_v35 }
 0x465   : > { %3635 = vst [vmem:[%s6097_s6 + $0x1b0] sm:$0xff] %v3557_v20 }
 0x468   : > { %v3389_v21 = vpop.f32.mrf.mxu2  ;;  %v3054_v36 = vpop.f32.mrf.mxu0 }
 0x469   : > { %v3558_v53 = vpop.f32.mrf.mxu3  ;;  %v3390_v6 = vadd.f32 %v3389_v21, %v3221_v8  ;;  %v3223_v46 = vpop.f32.mrf.mxu1  ;;  %v3055_v24 = vadd.f32 %v3054_v36, %v6454_v13 }
 0x46b   : > { %v3559_v39 = vadd.f32 %v3558_v53, %v3390_v6  ;;  %v3224_v37 = vadd.f32 %v3223_v46, %v3055_v24 }
 0x46d   : > { %3636 = vst [vmem:[%s6097_s6 + $0x1b8] sm:$0xff] %v3559_v39 }
 0x470   : > { %v3392_v0 = vpop.f32.mrf.mxu2  ;;  %v3056_v9 = vpop.f32.mrf.mxu0 }
 0x471   : > { %v3561_v1 = vpop.f32.mrf.mxu3  ;;  %v3393_v18 = vadd.f32 %v3392_v0, %v3224_v37  ;;  %v3225_v15 = vpop.f32.mrf.mxu1  ;;  %v3057_v58 = vadd.f32 %v3056_v9, %v6455_v63 }
 0x473   : > { %v3562_v61 = vadd.f32 %v3561_v1, %v3393_v18  ;;  %v3226_v16 = vadd.f32 %v3225_v15, %v3057_v58 }
 0x475   : > { %3637 = vst [vmem:[%s6097_s6 + $0x1c0] sm:$0xff] %v3562_v61 }
 0x478   : > { %v3394_v57 = vpop.f32.mrf.mxu2  ;;  %v3059_v29 = vpop.f32.mrf.mxu0 }
 0x479   : > { %v3563_v33 = vpop.f32.mrf.mxu3  ;;  %v3395_v54 = vadd.f32 %v3394_v57, %v3226_v16  ;;  %v3228_v38 = vpop.f32.mrf.mxu1  ;;  %v3060_v31 = vadd.f32 %v3059_v29, %v6456_v34 }
 0x47b   : > { %v3564_v27 = vadd.f32 %v3563_v33, %v3395_v54  ;;  %v3229_v62 = vadd.f32 %v3228_v38, %v3060_v31 }
 0x47d   : > { %3638 = vst [vmem:[%s6097_s6 + $0x1c8] sm:$0xff] %v3564_v27 }
 0x480   : > { %v3397_v52 = vpop.f32.mrf.mxu2  ;;  %v3061_v5 = vpop.f32.mrf.mxu0 }
 0x481   : > { %v3566_v25 = vpop.f32.mrf.mxu3  ;;  %v3398_v56 = vadd.f32 %v3397_v52, %v3229_v62  ;;  %v3230_v3 = vpop.f32.mrf.mxu1  ;;  %v3062_v50 = vadd.f32 %v3061_v5, %v6457_v43 }
 0x483   : > { %v3567_v60 = vadd.f32 %v3566_v25, %v3398_v56  ;;  %v3231_v40 = vadd.f32 %v3230_v3, %v3062_v50 }
 0x485   : > { %3639 = vst [vmem:[%s6097_s6 + $0x1d0] sm:$0xff] %v3567_v60 }
 0x488   : > { %v3399_v14 = vpop.f32.mrf.mxu2  ;;  %v3064_v19 = vpop.f32.mrf.mxu0 }
 0x489   : > { %v3568_v32 = vpop.f32.mrf.mxu3  ;;  %v3400_v30 = vadd.f32 %v3399_v14, %v3231_v40  ;;  %v3233_v17 = vpop.f32.mrf.mxu1  ;;  %v3065_v12 = vadd.f32 %v3064_v19, %v6065_v10 }
 0x48b   : > { %v3569_v28 = vadd.f32 %v3568_v32, %v3400_v30  ;;  %v3234_v11 = vadd.f32 %v3233_v17, %v3065_v12 }
 0x48d   : > { %3640 = vst [vmem:[%s6097_s6 + $0x1d8] sm:$0xff] %v3569_v28 }
 0x490   : > { %v3402_v45 = vpop.f32.mrf.mxu2  ;;  %v3066_v2 = vpop.f32.mrf.mxu0 }
 0x491   : > { %v3571_v48 = vpop.f32.mrf.mxu3  ;;  %v3403_v22 = vadd.f32 %v3402_v45, %v3234_v11  ;;  %v3235_v55 = vpop.f32.mrf.mxu1  ;;  %v3067_v7 = vadd.f32 %v3066_v2, %v6458_v42 }
 0x493   : > { %v3572_v47 = vadd.f32 %v3571_v48, %v3403_v22  ;;  %v3236_v41 = vadd.f32 %v3235_v55, %v3067_v7 }
 0x495   : > { %3641 = vst [vmem:[%s6097_s6 + $0x1e0] sm:$0xff] %v3572_v47 }
 0x498   : > { %v3404_v44 = vpop.f32.mrf.mxu2  ;;  %v3069_v51 = vpop.f32.mrf.mxu0 }
 0x499   : > { %v3573_v26 = vpop.f32.mrf.mxu3  ;;  %v3405_v49 = vadd.f32 %v3404_v44, %v3236_v41  ;;  %v3070_v10 = vadd.f32 %v3069_v51, %v6080_v23  ;;  %v3238_v59 = vpop.f32.mrf.mxu1 }
 0x49b   : > { %v3574_v20 = vadd.f32 %v3573_v26, %v3405_v49  ;;  %v3239_v35 = vadd.f32 %v3238_v59, %v3070_v10 }
 0x49d   : > { %3642 = vst [vmem:[%s6097_s6 + $0x1e8] sm:$0xff] %v3574_v20 }
 0x4a0   : > { %v3407_v8 = vpop.f32.mrf.mxu2  ;;  %v3071_v6 = vpop.f32.mrf.mxu0 }
 0x4a1   : > { %v3576_v21 = vpop.f32.mrf.mxu3  ;;  %v3408_v53 = vadd.f32 %v3407_v8, %v3239_v35  ;;  %v3072_v46 = vadd.f32 %v3071_v6, %v6090_v4  ;;  %v3240_v39 = vpop.f32.mrf.mxu1 }
 0x4a3   : > { %v3577_v36 = vadd.f32 %v3576_v21, %v3408_v53  ;;  %v3241_v13 = vadd.f32 %v3240_v39, %v3072_v46 }
 0x4a5   : > { %3643 = vst [vmem:[%s6097_s6 + $0x1f0] sm:$0xff] %v3577_v36 }
 0x4a8   : > { %v3409_v24 = vpop.f32.mrf.mxu2 }
 0x4a9   : > { %v3410_v37 = vadd.f32 %v3409_v24, %v3241_v13  ;;  %v3578_v0 = vpop.f32.mrf.mxu3 }
 0x4ab   : > { %v3579_v1 = vadd.f32 %v3578_v0, %v3410_v37 }
 0x4ad   : > { %3644 = vst [vmem:[%s6097_s6 + $0x1f8] sm:$0xff] %v3579_v1 }
 0x4ae PF: > { %s13_s12 = sadd.s32 1, %s5331_s12  }
 0x4af   : > { %p10_p4 = scmp.ge.s32.totalorder %s13_s12, 4  }
 0x4b1   :  { %12 = sbr.rel (!%p10_p4) target bundleno = 1 (0x1), region = 62 }

</bundles_post_ra>
